<compile_context>
chip_gen: v7x
topology: tpu7x:2x2x1
jax: 0.10.0
libtpu: 0.0.40
codegen_flags: <defaults>
</compile_context>

<pallas_src>
import jax
import jax.numpy as jnp
from jax import lax
from jax.experimental import pallas as pl
from jax.experimental.pallas import tpu as pltpu

# Module hyper-parameters (ECRTM defaults), baked in as static constants.
WEIGHT_LOSS_ECR = 250.0
SINKHORN_ALPHA = 20.0
OT_MAX_ITER = 5000
STOP_THR = 0.005
EPSILON = 1e-16

CHECK_EVERY = 50                                        # reference checks cpt % 50 == 1
N_CHUNKS = (OT_MAX_ITER - 1) // CHECK_EVERY             # 99 full chunks after cpt = 1
TAIL_ITERS = OT_MAX_ITER - 1 - N_CHUNKS * CHECK_EVERY   # 49 capped, check-free iterations
assert 1 + CHECK_EVERY * N_CHUNKS + TAIL_ITERS == OT_MAX_ITER


def _recip(x):
    # EUP approximate reciprocal (separate VLIW slot) + one Newton step on the
    # VPU so the Sinkhorn fixed point / stopping criterion keep ~f32 accuracy.
    r = pl.reciprocal(x, approx=True)
    return r * (2.0 - x * r)


def _ecr_kernel(m_ref, out_ref):
    # Whole cost matrix lives in one VMEM tile (demo regime).
    M = m_ref[...].astype(jnp.float32)
    n_rows, n_cols = M.shape                      # static
    inv_r = jnp.float32(1.0 / n_rows)             # uniform row marginal a == 1/R
    inv_c = jnp.float32(1.0 / n_cols)             # uniform col marginal b == 1/C

    # K is the only array that must stay resident across the 5000-iteration
    # loop.  f32 to match the torch reference exactly at this shape; no f32
    # K^T copy and no K*M buffer are kept live across the loop.
    # TODO(synk): for 128 < C <= 256 the MXU weight-stationary path
    # (pltpu.matmul_push_rhs / matmul_acc_lhs / matmul_pop) is the faster
    # alternative to the VPU/XLU mat-vecs below.
    K = jnp.exp(-M * SINKHORN_ALPHA)              # (R, C) f32, loop-invariant

    u0 = jnp.full((n_rows, 1), inv_r, jnp.float32)        # u = ones_like(a) / R

    def sinkhorn_step(carry):
        # carry = (u, v, ktu) with ktu == K^T u from the previous step
        # (carried, so the convergence check reuses it for free).
        # Mat-vecs are VPU broadcast-multiplies + XLU reductions: K stays
        # weight-stationary with zero per-iteration push.
        u, _, ktu = carry
        v_new = inv_c * _recip(ktu + EPSILON)                     # (1, C)
        kv = jnp.sum(K * v_new, axis=1, keepdims=True)            # (R, 1) lane-reduce
        u_new = inv_r * _recip(kv + EPSILON)                      # (R, 1)
        ktu_new = jnp.sum(u_new * K, axis=0, keepdims=True)       # (1, C) sublane-reduce
        return u_new, v_new, ktu_new

    def residual(v, ktu):
        # torch: norm(sum(|v*(K^T u) - b|, dim=0), p=inf) on (C,1) columns
        #      == plain sum over entries of |v*ktu - 1/C|.
        return jnp.sum(jnp.abs(v * ktu - inv_c))

    # Iteration cpt = 1 and its error check (reference: cpt % 50 == 1).
    ktu0 = jnp.sum(u0 * K, axis=0, keepdims=True)
    v_dummy = jnp.full((1, n_cols), inv_c, jnp.float32)
    u, v, ktu = sinkhorn_step((u0, v_dummy, ktu0))
    err = residual(v, ktu)

    # Chunks of 50 iterations, fully unrolled at trace time (straight-line
    # body for the LLO scheduler); cross-lane error reduction once per chunk,
    # i.e. at cpt = 51, 101, ..., 1 + 50 * N_CHUNKS = 4951.
    def outer_cond(state):
        return jnp.logical_and(state[3] > STOP_THR, state[4] < N_CHUNKS)

    def outer_body(state):
        u, v, ktu, _, chunk = state
        c = (u, v, ktu)
        for _ in range(CHECK_EVERY):              # trace-time unroll
            c = sinkhorn_step(c)
        u, v, ktu = c
        return u, v, ktu, residual(v, ktu), chunk + 1

    u, v, ktu, err, _ = lax.while_loop(
        outer_cond, outer_body, (u, v, ktu, err, jnp.int32(0))
    )

    # Honour the OT_MAX_ITER cap exactly: if still unconverged after the last
    # check (cpt = 4951), run the remaining 49 updates with no further checks.
    if TAIL_ITERS > 0:
        n_tail = jnp.where(err > STOP_THR, jnp.int32(TAIL_ITERS), jnp.int32(0))
        u, v, ktu = lax.fori_loop(0, n_tail, lambda _, c: sinkhorn_step(c),
                                  (u, v, ktu))

    # transp = u * (K * v^T);  loss = sum(transp * M) * weight
    #        = sum_{ij} u_i K_ij v_j M_ij  — pure elementwise + one reduce;
    # no extra full-size buffer is kept live across the loop.
    # TODO(synk): at production vocab (~50k cols) keep M in HBM
    # (memory_space=pl.ANY), build bf16 K from column-chunk DMAs once, and run
    # this epilogue over the same column chunks so only K stays VMEM-resident
    # on v7x (64 MiB).
    loss = jnp.sum((u * K) * (v * M)) * WEIGHT_LOSS_ECR
    out_ref[0, 0] = loss


def _vmem_budget_bytes():
    # Per-chip physical VMEM (128 MiB v5e/v6e, 64 MiB v7x) minus headroom for
    # Mosaic-internal scratch; conservative fallback if the query is missing.
    try:
        cap = int(pltpu.get_tpu_info().vmem_capacity_bytes)
    except Exception:
        cap = 64 * 1024 * 1024
    return cap - 8 * 1024 * 1024


@jax.jit
def ecr_loss(M):
    n_rows, n_cols = M.shape
    # Peak residency: pipelined M input block (~2 buffers) + resident f32 K
    # + fused epilogue transient + small u/v/ktu vectors.
    est_bytes = (3 * n_rows * n_cols * 4
                 + 16 * (n_rows + n_cols) * 4
                 + 512 * 1024)
    vmem_limit = int(min(_vmem_budget_bytes(),
                         max(32 * 1024 * 1024, 2 * est_bytes)))
    # TODO(synk): if a training step evaluates several cost matrices, stack
    # them on a leading "parallel" grid axis (and batch the u/v rows) so
    # v7x's second TensorCore is not idle.
    out = pl.pallas_call(
        _ecr_kernel,
        out_shape=jax.ShapeDtypeStruct((1, 1), jnp.float32),
        in_specs=[pl.BlockSpec((n_rows, n_cols), lambda: (0, 0))],
        out_specs=pl.BlockSpec(memory_space=pltpu.SMEM),
        compiler_params=pltpu.CompilerParams(vmem_limit_bytes=vmem_limit),
    )(M)
    return out[0, 0]


if __name__ == "__main__":
    key = jax.random.PRNGKey(0)
    k1, k2 = jax.random.split(key)

    # Synthetic cost matrix: pairwise (1 - cosine similarity) distances between
    # 32 "topic" embeddings and 128 "word" embeddings, dim 16. Range ~[0, 2].
    n_topics, vocab, dim = 32, 128, 16
    topic_emb = jax.random.normal(k1, (n_topics, dim), dtype=jnp.float32)
    word_emb = jax.random.normal(k2, (vocab, dim), dtype=jnp.float32)
    topic_emb = topic_emb / jnp.linalg.norm(topic_emb, axis=1, keepdims=True)
    word_emb = word_emb / jnp.linalg.norm(word_emb, axis=1, keepdims=True)
    M = 1.0 - topic_emb @ word_emb.T        # (32, 128) cost matrix

    loss = ecr_loss(M)
    jax.block_until_ready(loss)
    assert jnp.isfinite(loss)
    print("KERNEL_OK")
</pallas_src>

<mosaic_0001>
module attributes {stable_mosaic.version = 11 : i64} {
  func.func @_ecr_kernel(%arg0: memref<32x128xf32, #tpu.memory_space<vmem>>, %arg1: memref<1x1xf32, #tpu.memory_space<smem>>) attributes {dimension_semantics = [], scalar_prefetch = 0 : i64, scratch_operands = 0 : i64, tpu.core_type = #tpu.core_type<tc>} {
    %c0 = arith.constant 0 : index
    %c0_0 = arith.constant 0 : index
    %0 = vector.load %arg0[%c0, %c0_0] : memref<32x128xf32, #tpu.memory_space<vmem>>, vector<32x128xf32>
    %cst = arith.constant 0.000000e+00 : f32
    %1 = vector.broadcast %cst : f32 to vector<32x128xf32>
    %2 = arith.subf %1, %0 : vector<32x128xf32>
    %cst_1 = arith.constant 2.000000e+01 : f32
    %3 = vector.broadcast %cst_1 : f32 to vector<32x128xf32>
    %4 = arith.mulf %2, %3 : vector<32x128xf32>
    %5 = math.exp %4 : vector<32x128xf32>
    %cst_2 = arith.constant 3.125000e-02 : f32
    %6 = vector.broadcast %cst_2 : f32 to vector<32x1xf32>
    %7 = vector.broadcast %6 : vector<32x1xf32> to vector<32x128xf32>
    %8 = arith.mulf %7, %5 : vector<32x128xf32>
    %cst_3 = arith.constant dense<0.000000e+00> : vector<128xf32>
    %9 = vector.multi_reduction <add>, %8, %cst_3 [0] : vector<32x128xf32> to vector<128xf32>
    %10 = vector.shape_cast %9 : vector<128xf32> to vector<1x128xf32>
    %cst_4 = arith.constant 1.000000e-16 : f32
    %11 = vector.broadcast %cst_4 : f32 to vector<1x128xf32>
    %12 = arith.addf %10, %11 : vector<1x128xf32>
    %13 = tpu.reciprocal %12 {approx = true} : vector<1x128xf32> -> vector<1x128xf32>
    %14 = arith.mulf %12, %13 : vector<1x128xf32>
    %cst_5 = arith.constant 2.000000e+00 : f32
    %15 = vector.broadcast %cst_5 : f32 to vector<1x128xf32>
    %16 = arith.subf %15, %14 : vector<1x128xf32>
    %17 = arith.mulf %13, %16 : vector<1x128xf32>
    %cst_6 = arith.constant 7.812500e-03 : f32
    %18 = vector.broadcast %cst_6 : f32 to vector<1x128xf32>
    %19 = arith.mulf %18, %17 : vector<1x128xf32>
    %20 = vector.broadcast %19 : vector<1x128xf32> to vector<32x128xf32>
    %21 = arith.mulf %5, %20 : vector<32x128xf32>
    %cst_7 = arith.constant dense<0.000000e+00> : vector<32xf32>
    %22 = vector.multi_reduction <add>, %21, %cst_7 [1] : vector<32x128xf32> to vector<32xf32>
    %23 = vector.shape_cast %22 : vector<32xf32> to vector<32x1xf32>
    %cst_8 = arith.constant 1.000000e-16 : f32
    %24 = vector.broadcast %cst_8 : f32 to vector<32x1xf32>
    %25 = arith.addf %23, %24 : vector<32x1xf32>
    %26 = tpu.reciprocal %25 {approx = true} : vector<32x1xf32> -> vector<32x1xf32>
    %27 = arith.mulf %25, %26 : vector<32x1xf32>
    %cst_9 = arith.constant 2.000000e+00 : f32
    %28 = vector.broadcast %cst_9 : f32 to vector<32x1xf32>
    %29 = arith.subf %28, %27 : vector<32x1xf32>
    %30 = arith.mulf %26, %29 : vector<32x1xf32>
    %cst_10 = arith.constant 3.125000e-02 : f32
    %31 = vector.broadcast %cst_10 : f32 to vector<32x1xf32>
    %32 = arith.mulf %31, %30 : vector<32x1xf32>
    %33 = vector.broadcast %32 : vector<32x1xf32> to vector<32x128xf32>
    %34 = arith.mulf %33, %5 : vector<32x128xf32>
    %cst_11 = arith.constant dense<0.000000e+00> : vector<128xf32>
    %35 = vector.multi_reduction <add>, %34, %cst_11 [0] : vector<32x128xf32> to vector<128xf32>
    %36 = vector.shape_cast %35 : vector<128xf32> to vector<1x128xf32>
    %37 = arith.mulf %19, %36 : vector<1x128xf32>
    %cst_12 = arith.constant 7.812500e-03 : f32
    %38 = vector.broadcast %cst_12 : f32 to vector<1x128xf32>
    %39 = arith.subf %37, %38 : vector<1x128xf32>
    %40 = math.absf %39 : vector<1x128xf32>
    %41 = vector.shape_cast %40 : vector<1x128xf32> to vector<1x1x128xf32>
    %cst_13 = arith.constant dense<0.000000e+00> : vector<1xf32>
    %42 = vector.multi_reduction <add>, %41, %cst_13 [1, 2] : vector<1x1x128xf32> to vector<1xf32>
    %43 = vector.shape_cast %42 : vector<1xf32> to vector<1x1x1xf32>
    %44 = vector.extract %43[0, 0, 0] : f32 from vector<1x1x1xf32>
    %cst_14 = arith.constant 7.812500e-03 : f32
    %cst_15 = arith.constant 3.125000e-02 : f32
    %c0_i32 = arith.constant 0 : i32
    %45:5 = scf.while (%arg2 = %32, %arg3 = %19, %arg4 = %36, %arg5 = %44, %arg6 = %c0_i32) : (vector<32x1xf32>, vector<1x128xf32>, vector<1x128xf32>, f32, i32) -> (vector<32x1xf32>, vector<1x128xf32>, vector<1x128xf32>, f32, i32) {
      %cst_25 = arith.constant 5.000000e-03 : f32
      %62 = arith.cmpf ogt, %arg5, %cst_25 : f32
      %c99_i32 = arith.constant 99 : i32
      %63 = arith.cmpi slt, %arg6, %c99_i32 : i32
      %64 = arith.andi %62, %63 : i1
      scf.condition(%64) %arg2, %arg3, %arg4, %arg5, %arg6 : vector<32x1xf32>, vector<1x128xf32>, vector<1x128xf32>, f32, i32
    } do {
    ^bb0(%arg2: vector<32x1xf32>, %arg3: vector<1x128xf32>, %arg4: vector<1x128xf32>, %arg5: f32, %arg6: i32):
      %cst_25 = arith.constant 1.000000e-16 : f32
      %62 = vector.broadcast %cst_25 : f32 to vector<1x128xf32>
      %63 = arith.addf %arg4, %62 : vector<1x128xf32>
      %64 = tpu.reciprocal %63 {approx = true} : vector<1x128xf32> -> vector<1x128xf32>
      %65 = arith.mulf %63, %64 : vector<1x128xf32>
      %cst_26 = arith.constant 2.000000e+00 : f32
      %66 = vector.broadcast %cst_26 : f32 to vector<1x128xf32>
      %67 = arith.subf %66, %65 : vector<1x128xf32>
      %68 = arith.mulf %64, %67 : vector<1x128xf32>
      %69 = vector.broadcast %cst_14 : f32 to vector<1x128xf32>
      %70 = arith.mulf %69, %68 : vector<1x128xf32>
      %71 = vector.broadcast %70 : vector<1x128xf32> to vector<32x128xf32>
      %72 = arith.mulf %5, %71 : vector<32x128xf32>
      %cst_27 = arith.constant dense<0.000000e+00> : vector<32xf32>
      %73 = vector.multi_reduction <add>, %72, %cst_27 [1] : vector<32x128xf32> to vector<32xf32>
      %74 = vector.shape_cast %73 : vector<32xf32> to vector<32x1xf32>
      %cst_28 = arith.constant 1.000000e-16 : f32
      %75 = vector.broadcast %cst_28 : f32 to vector<32x1xf32>
      %76 = arith.addf %74, %75 : vector<32x1xf32>
      %77 = tpu.reciprocal %76 {approx = true} : vector<32x1xf32> -> vector<32x1xf32>
      %78 = arith.mulf %76, %77 : vector<32x1xf32>
      %cst_29 = arith.constant 2.000000e+00 : f32
      %79 = vector.broadcast %cst_29 : f32 to vector<32x1xf32>
      %80 = arith.subf %79, %78 : vector<32x1xf32>
      %81 = arith.mulf %77, %80 : vector<32x1xf32>
      %82 = vector.broadcast %cst_15 : f32 to vector<32x1xf32>
      %83 = arith.mulf %82, %81 : vector<32x1xf32>
      %84 = vector.broadcast %83 : vector<32x1xf32> to vector<32x128xf32>
      %85 = arith.mulf %84, %5 : vector<32x128xf32>
      %cst_30 = arith.constant dense<0.000000e+00> : vector<128xf32>
      %86 = vector.multi_reduction <add>, %85, %cst_30 [0] : vector<32x128xf32> to vector<128xf32>
      %87 = vector.shape_cast %86 : vector<128xf32> to vector<1x128xf32>
      %cst_31 = arith.constant 1.000000e-16 : f32
      %88 = vector.broadcast %cst_31 : f32 to vector<1x128xf32>
      %89 = arith.addf %87, %88 : vector<1x128xf32>
      %90 = tpu.reciprocal %89 {approx = true} : vector<1x128xf32> -> vector<1x128xf32>
      %91 = arith.mulf %89, %90 : vector<1x128xf32>
      %cst_32 = arith.constant 2.000000e+00 : f32
      %92 = vector.broadcast %cst_32 : f32 to vector<1x128xf32>
      %93 = arith.subf %92, %91 : vector<1x128xf32>
      %94 = arith.mulf %90, %93 : vector<1x128xf32>
      %95 = vector.broadcast %cst_14 : f32 to vector<1x128xf32>
      %96 = arith.mulf %95, %94 : vector<1x128xf32>
      %97 = vector.broadcast %96 : vector<1x128xf32> to vector<32x128xf32>
      %98 = arith.mulf %5, %97 : vector<32x128xf32>
      %cst_33 = arith.constant dense<0.000000e+00> : vector<32xf32>
      %99 = vector.multi_reduction <add>, %98, %cst_33 [1] : vector<32x128xf32> to vector<32xf32>
      %100 = vector.shape_cast %99 : vector<32xf32> to vector<32x1xf32>
      %cst_34 = arith.constant 1.000000e-16 : f32
      %101 = vector.broadcast %cst_34 : f32 to vector<32x1xf32>
      %102 = arith.addf %100, %101 : vector<32x1xf32>
      %103 = tpu.reciprocal %102 {approx = true} : vector<32x1xf32> -> vector<32x1xf32>
      %104 = arith.mulf %102, %103 : vector<32x1xf32>
      %cst_35 = arith.constant 2.000000e+00 : f32
      %105 = vector.broadcast %cst_35 : f32 to vector<32x1xf32>
      %106 = arith.subf %105, %104 : vector<32x1xf32>
      %107 = arith.mulf %103, %106 : vector<32x1xf32>
      %108 = vector.broadcast %cst_15 : f32 to vector<32x1xf32>
      %109 = arith.mulf %108, %107 : vector<32x1xf32>
      %110 = vector.broadcast %109 : vector<32x1xf32> to vector<32x128xf32>
      %111 = arith.mulf %110, %5 : vector<32x128xf32>
      %cst_36 = arith.constant dense<0.000000e+00> : vector<128xf32>
      %112 = vector.multi_reduction <add>, %111, %cst_36 [0] : vector<32x128xf32> to vector<128xf32>
      %113 = vector.shape_cast %112 : vector<128xf32> to vector<1x128xf32>
      %cst_37 = arith.constant 1.000000e-16 : f32
      %114 = vector.broadcast %cst_37 : f32 to vector<1x128xf32>
      %115 = arith.addf %113, %114 : vector<1x128xf32>
      %116 = tpu.reciprocal %115 {approx = true} : vector<1x128xf32> -> vector<1x128xf32>
      %117 = arith.mulf %115, %116 : vector<1x128xf32>
      %cst_38 = arith.constant 2.000000e+00 : f32
      %118 = vector.broadcast %cst_38 : f32 to vector<1x128xf32>
      %119 = arith.subf %118, %117 : vector<1x128xf32>
      %120 = arith.mulf %116, %119 : vector<1x128xf32>
      %121 = vector.broadcast %cst_14 : f32 to vector<1x128xf32>
      %122 = arith.mulf %121, %120 : vector<1x128xf32>
      %123 = vector.broadcast %122 : vector<1x128xf32> to vector<32x128xf32>
      %124 = arith.mulf %5, %123 : vector<32x128xf32>
      %cst_39 = arith.constant dense<0.000000e+00> : vector<32xf32>
      %125 = vector.multi_reduction <add>, %124, %cst_39 [1] : vector<32x128xf32> to vector<32xf32>
      %126 = vector.shape_cast %125 : vector<32xf32> to vector<32x1xf32>
      %cst_40 = arith.constant 1.000000e-16 : f32
      %127 = vector.broadcast %cst_40 : f32 to vector<32x1xf32>
      %128 = arith.addf %126, %127 : vector<32x1xf32>
      %129 = tpu.reciprocal %128 {approx = true} : vector<32x1xf32> -> vector<32x1xf32>
      %130 = arith.mulf %128, %129 : vector<32x1xf32>
      %cst_41 = arith.constant 2.000000e+00 : f32
      %131 = vector.broadcast %cst_41 : f32 to vector<32x1xf32>
      %132 = arith.subf %131, %130 : vector<32x1xf32>
      %133 = arith.mulf %129, %132 : vector<32x1xf32>
      %134 = vector.broadcast %cst_15 : f32 to vector<32x1xf32>
      %135 = arith.mulf %134, %133 : vector<32x1xf32>
      %136 = vector.broadcast %135 : vector<32x1xf32> to vector<32x128xf32>
      %137 = arith.mulf %136, %5 : vector<32x128xf32>
      %cst_42 = arith.constant dense<0.000000e+00> : vector<128xf32>
      %138 = vector.multi_reduction <add>, %137, %cst_42 [0] : vector<32x128xf32> to vector<128xf32>
      %139 = vector.shape_cast %138 : vector<128xf32> to vector<1x128xf32>
      %cst_43 = arith.constant 1.000000e-16 : f32
      %140 = vector.broadcast %cst_43 : f32 to vector<1x128xf32>
      %141 = arith.addf %139, %140 : vector<1x128xf32>
      %142 = tpu.reciprocal %141 {approx = true} : vector<1x128xf32> -> vector<1x128xf32>
      %143 = arith.mulf %141, %142 : vector<1x128xf32>
      %cst_44 = arith.constant 2.000000e+00 : f32
      %144 = vector.broadcast %cst_44 : f32 to vector<1x128xf32>
      %145 = arith.subf %144, %143 : vector<1x128xf32>
      %146 = arith.mulf %142, %145 : vector<1x128xf32>
      %147 = vector.broadcast %cst_14 : f32 to vector<1x128xf32>
      %148 = arith.mulf %147, %146 : vector<1x128xf32>
      %149 = vector.broadcast %148 : vector<1x128xf32> to vector<32x128xf32>
      %150 = arith.mulf %5, %149 : vector<32x128xf32>
      %cst_45 = arith.constant dense<0.000000e+00> : vector<32xf32>
      %151 = vector.multi_reduction <add>, %150, %cst_45 [1] : vector<32x128xf32> to vector<32xf32>
      %152 = vector.shape_cast %151 : vector<32xf32> to vector<32x1xf32>
      %cst_46 = arith.constant 1.000000e-16 : f32
      %153 = vector.broadcast %cst_46 : f32 to vector<32x1xf32>
      %154 = arith.addf %152, %153 : vector<32x1xf32>
      %155 = tpu.reciprocal %154 {approx = true} : vector<32x1xf32> -> vector<32x1xf32>
      %156 = arith.mulf %154, %155 : vector<32x1xf32>
      %cst_47 = arith.constant 2.000000e+00 : f32
      %157 = vector.broadcast %cst_47 : f32 to vector<32x1xf32>
      %158 = arith.subf %157, %156 : vector<32x1xf32>
      %159 = arith.mulf %155, %158 : vector<32x1xf32>
      %160 = vector.broadcast %cst_15 : f32 to vector<32x1xf32>
      %161 = arith.mulf %160, %159 : vector<32x1xf32>
      %162 = vector.broadcast %161 : vector<32x1xf32> to vector<32x128xf32>
      %163 = arith.mulf %162, %5 : vector<32x128xf32>
      %cst_48 = arith.constant dense<0.000000e+00> : vector<128xf32>
      %164 = vector.multi_reduction <add>, %163, %cst_48 [0] : vector<32x128xf32> to vector<128xf32>
      %165 = vector.shape_cast %164 : vector<128xf32> to vector<1x128xf32>
      %cst_49 = arith.constant 1.000000e-16 : f32
      %166 = vector.broadcast %cst_49 : f32 to vector<1x128xf32>
      %167 = arith.addf %165, %166 : vector<1x128xf32>
      %168 = tpu.reciprocal %167 {approx = true} : vector<1x128xf32> -> vector<1x128xf32>
      %169 = arith.mulf %167, %168 : vector<1x128xf32>
      %cst_50 = arith.constant 2.000000e+00 : f32
      %170 = vector.broadcast %cst_50 : f32 to vector<1x128xf32>
      %171 = arith.subf %170, %169 : vector<1x128xf32>
      %172 = arith.mulf %168, %171 : vector<1x128xf32>
      %173 = vector.broadcast %cst_14 : f32 to vector<1x128xf32>
      %174 = arith.mulf %173, %172 : vector<1x128xf32>
      %175 = vector.broadcast %174 : vector<1x128xf32> to vector<32x128xf32>
      %176 = arith.mulf %5, %175 : vector<32x128xf32>
      %cst_51 = arith.constant dense<0.000000e+00> : vector<32xf32>
      %177 = vector.multi_reduction <add>, %176, %cst_51 [1] : vector<32x128xf32> to vector<32xf32>
      %178 = vector.shape_cast %177 : vector<32xf32> to vector<32x1xf32>
      %cst_52 = arith.constant 1.000000e-16 : f32
      %179 = vector.broadcast %cst_52 : f32 to vector<32x1xf32>
      %180 = arith.addf %178, %179 : vector<32x1xf32>
      %181 = tpu.reciprocal %180 {approx = true} : vector<32x1xf32> -> vector<32x1xf32>
      %182 = arith.mulf %180, %181 : vector<32x1xf32>
      %cst_53 = arith.constant 2.000000e+00 : f32
      %183 = vector.broadcast %cst_53 : f32 to vector<32x1xf32>
      %184 = arith.subf %183, %182 : vector<32x1xf32>
      %185 = arith.mulf %181, %184 : vector<32x1xf32>
      %186 = vector.broadcast %cst_15 : f32 to vector<32x1xf32>
      %187 = arith.mulf %186, %185 : vector<32x1xf32>
      %188 = vector.broadcast %187 : vector<32x1xf32> to vector<32x128xf32>
      %189 = arith.mulf %188, %5 : vector<32x128xf32>
      %cst_54 = arith.constant dense<0.000000e+00> : vector<128xf32>
      %190 = vector.multi_reduction <add>, %189, %cst_54 [0] : vector<32x128xf32> to vector<128xf32>
      %191 = vector.shape_cast %190 : vector<128xf32> to vector<1x128xf32>
      %cst_55 = arith.constant 1.000000e-16 : f32
      %192 = vector.broadcast %cst_55 : f32 to vector<1x128xf32>
      %193 = arith.addf %191, %192 : vector<1x128xf32>
      %194 = tpu.reciprocal %193 {approx = true} : vector<1x128xf32> -> vector<1x128xf32>
      %195 = arith.mulf %193, %194 : vector<1x128xf32>
      %cst_56 = arith.constant 2.000000e+00 : f32
      %196 = vector.broadcast %cst_56 : f32 to vector<1x128xf32>
      %197 = arith.subf %196, %195 : vector<1x128xf32>
      %198 = arith.mulf %194, %197 : vector<1x128xf32>
      %199 = vector.broadcast %cst_14 : f32 to vector<1x128xf32>
      %200 = arith.mulf %199, %198 : vector<1x128xf32>
      %201 = vector.broadcast %200 : vector<1x128xf32> to vector<32x128xf32>
      %202 = arith.mulf %5, %201 : vector<32x128xf32>
      %cst_57 = arith.constant dense<0.000000e+00> : vector<32xf32>
      %203 = vector.multi_reduction <add>, %202, %cst_57 [1] : vector<32x128xf32> to vector<32xf32>
      %204 = vector.shape_cast %203 : vector<32xf32> to vector<32x1xf32>
      %cst_58 = arith.constant 1.000000e-16 : f32
      %205 = vector.broadcast %cst_58 : f32 to vector<32x1xf32>
      %206 = arith.addf %204, %205 : vector<32x1xf32>
      %207 = tpu.reciprocal %206 {approx = true} : vector<32x1xf32> -> vector<32x1xf32>
      %208 = arith.mulf %206, %207 : vector<32x1xf32>
      %cst_59 = arith.constant 2.000000e+00 : f32
      %209 = vector.broadcast %cst_59 : f32 to vector<32x1xf32>
      %210 = arith.subf %209, %208 : vector<32x1xf32>
      %211 = arith.mulf %207, %210 : vector<32x1xf32>
      %212 = vector.broadcast %cst_15 : f32 to vector<32x1xf32>
      %213 = arith.mulf %212, %211 : vector<32x1xf32>
      %214 = vector.broadcast %213 : vector<32x1xf32> to vector<32x128xf32>
      %215 = arith.mulf %214, %5 : vector<32x128xf32>
      %cst_60 = arith.constant dense<0.000000e+00> : vector<128xf32>
      %216 = vector.multi_reduction <add>, %215, %cst_60 [0] : vector<32x128xf32> to vector<128xf32>
      %217 = vector.shape_cast %216 : vector<128xf32> to vector<1x128xf32>
      %cst_61 = arith.constant 1.000000e-16 : f32
      %218 = vector.broadcast %cst_61 : f32 to vector<1x128xf32>
      %219 = arith.addf %217, %218 : vector<1x128xf32>
      %220 = tpu.reciprocal %219 {approx = true} : vector<1x128xf32> -> vector<1x128xf32>
      %221 = arith.mulf %219, %220 : vector<1x128xf32>
      %cst_62 = arith.constant 2.000000e+00 : f32
      %222 = vector.broadcast %cst_62 : f32 to vector<1x128xf32>
      %223 = arith.subf %222, %221 : vector<1x128xf32>
      %224 = arith.mulf %220, %223 : vector<1x128xf32>
      %225 = vector.broadcast %cst_14 : f32 to vector<1x128xf32>
      %226 = arith.mulf %225, %224 : vector<1x128xf32>
      %227 = vector.broadcast %226 : vector<1x128xf32> to vector<32x128xf32>
      %228 = arith.mulf %5, %227 : vector<32x128xf32>
      %cst_63 = arith.constant dense<0.000000e+00> : vector<32xf32>
      %229 = vector.multi_reduction <add>, %228, %cst_63 [1] : vector<32x128xf32> to vector<32xf32>
      %230 = vector.shape_cast %229 : vector<32xf32> to vector<32x1xf32>
      %cst_64 = arith.constant 1.000000e-16 : f32
      %231 = vector.broadcast %cst_64 : f32 to vector<32x1xf32>
      %232 = arith.addf %230, %231 : vector<32x1xf32>
      %233 = tpu.reciprocal %232 {approx = true} : vector<32x1xf32> -> vector<32x1xf32>
      %234 = arith.mulf %232, %233 : vector<32x1xf32>
      %cst_65 = arith.constant 2.000000e+00 : f32
      %235 = vector.broadcast %cst_65 : f32 to vector<32x1xf32>
      %236 = arith.subf %235, %234 : vector<32x1xf32>
      %237 = arith.mulf %233, %236 : vector<32x1xf32>
      %238 = vector.broadcast %cst_15 : f32 to vector<32x1xf32>
      %239 = arith.mulf %238, %237 : vector<32x1xf32>
      %240 = vector.broadcast %239 : vector<32x1xf32> to vector<32x128xf32>
      %241 = arith.mulf %240, %5 : vector<32x128xf32>
      %cst_66 = arith.constant dense<0.000000e+00> : vector<128xf32>
      %242 = vector.multi_reduction <add>, %241, %cst_66 [0] : vector<32x128xf32> to vector<128xf32>
      %243 = vector.shape_cast %242 : vector<128xf32> to vector<1x128xf32>
      %cst_67 = arith.constant 1.000000e-16 : f32
      %244 = vector.broadcast %cst_67 : f32 to vector<1x128xf32>
      %245 = arith.addf %243, %244 : vector<1x128xf32>
      %246 = tpu.reciprocal %245 {approx = true} : vector<1x128xf32> -> vector<1x128xf32>
      %247 = arith.mulf %245, %246 : vector<1x128xf32>
      %cst_68 = arith.constant 2.000000e+00 : f32
      %248 = vector.broadcast %cst_68 : f32 to vector<1x128xf32>
      %249 = arith.subf %248, %247 : vector<1x128xf32>
      %250 = arith.mulf %246, %249 : vector<1x128xf32>
      %251 = vector.broadcast %cst_14 : f32 to vector<1x128xf32>
      %252 = arith.mulf %251, %250 : vector<1x128xf32>
      %253 = vector.broadcast %252 : vector<1x128xf32> to vector<32x128xf32>
      %254 = arith.mulf %5, %253 : vector<32x128xf32>
      %cst_69 = arith.constant dense<0.000000e+00> : vector<32xf32>
      %255 = vector.multi_reduction <add>, %254, %cst_69 [1] : vector<32x128xf32> to vector<32xf32>
      %256 = vector.shape_cast %255 : vector<32xf32> to vector<32x1xf32>
      %cst_70 = arith.constant 1.000000e-16 : f32
      %257 = vector.broadcast %cst_70 : f32 to vector<32x1xf32>
      %258 = arith.addf %256, %257 : vector<32x1xf32>
      %259 = tpu.reciprocal %258 {approx = true} : vector<32x1xf32> -> vector<32x1xf32>
      %260 = arith.mulf %258, %259 : vector<32x1xf32>
      %cst_71 = arith.constant 2.000000e+00 : f32
      %261 = vector.broadcast %cst_71 : f32 to vector<32x1xf32>
      %262 = arith.subf %261, %260 : vector<32x1xf32>
      %263 = arith.mulf %259, %262 : vector<32x1xf32>
      %264 = vector.broadcast %cst_15 : f32 to vector<32x1xf32>
      %265 = arith.mulf %264, %263 : vector<32x1xf32>
      %266 = vector.broadcast %265 : vector<32x1xf32> to vector<32x128xf32>
      %267 = arith.mulf %266, %5 : vector<32x128xf32>
      %cst_72 = arith.constant dense<0.000000e+00> : vector<128xf32>
      %268 = vector.multi_reduction <add>, %267, %cst_72 [0] : vector<32x128xf32> to vector<128xf32>
      %269 = vector.shape_cast %268 : vector<128xf32> to vector<1x128xf32>
      %cst_73 = arith.constant 1.000000e-16 : f32
      %270 = vector.broadcast %cst_73 : f32 to vector<1x128xf32>
      %271 = arith.addf %269, %270 : vector<1x128xf32>
      %272 = tpu.reciprocal %271 {approx = true} : vector<1x128xf32> -> vector<1x128xf32>
      %273 = arith.mulf %271, %272 : vector<1x128xf32>
      %cst_74 = arith.constant 2.000000e+00 : f32
      %274 = vector.broadcast %cst_74 : f32 to vector<1x128xf32>
      %275 = arith.subf %274, %273 : vector<1x128xf32>
      %276 = arith.mulf %272, %275 : vector<1x128xf32>
      %277 = vector.broadcast %cst_14 : f32 to vector<1x128xf32>
      %278 = arith.mulf %277, %276 : vector<1x128xf32>
      %279 = vector.broadcast %278 : vector<1x128xf32> to vector<32x128xf32>
      %280 = arith.mulf %5, %279 : vector<32x128xf32>
      %cst_75 = arith.constant dense<0.000000e+00> : vector<32xf32>
      %281 = vector.multi_reduction <add>, %280, %cst_75 [1] : vector<32x128xf32> to vector<32xf32>
      %282 = vector.shape_cast %281 : vector<32xf32> to vector<32x1xf32>
      %cst_76 = arith.constant 1.000000e-16 : f32
      %283 = vector.broadcast %cst_76 : f32 to vector<32x1xf32>
      %284 = arith.addf %282, %283 : vector<32x1xf32>
      %285 = tpu.reciprocal %284 {approx = true} : vector<32x1xf32> -> vector<32x1xf32>
      %286 = arith.mulf %284, %285 : vector<32x1xf32>
      %cst_77 = arith.constant 2.000000e+00 : f32
      %287 = vector.broadcast %cst_77 : f32 to vector<32x1xf32>
      %288 = arith.subf %287, %286 : vector<32x1xf32>
      %289 = arith.mulf %285, %288 : vector<32x1xf32>
      %290 = vector.broadcast %cst_15 : f32 to vector<32x1xf32>
      %291 = arith.mulf %290, %289 : vector<32x1xf32>
      %292 = vector.broadcast %291 : vector<32x1xf32> to vector<32x128xf32>
      %293 = arith.mulf %292, %5 : vector<32x128xf32>
      %cst_78 = arith.constant dense<0.000000e+00> : vector<128xf32>
      %294 = vector.multi_reduction <add>, %293, %cst_78 [0] : vector<32x128xf32> to vector<128xf32>
      %295 = vector.shape_cast %294 : vector<128xf32> to vector<1x128xf32>
      %cst_79 = arith.constant 1.000000e-16 : f32
      %296 = vector.broadcast %cst_79 : f32 to vector<1x128xf32>
      %297 = arith.addf %295, %296 : vector<1x128xf32>
      %298 = tpu.reciprocal %297 {approx = true} : vector<1x128xf32> -> vector<1x128xf32>
      %299 = arith.mulf %297, %298 : vector<1x128xf32>
      %cst_80 = arith.constant 2.000000e+00 : f32
      %300 = vector.broadcast %cst_80 : f32 to vector<1x128xf32>
      %301 = arith.subf %300, %299 : vector<1x128xf32>
      %302 = arith.mulf %298, %301 : vector<1x128xf32>
      %303 = vector.broadcast %cst_14 : f32 to vector<1x128xf32>
      %304 = arith.mulf %303, %302 : vector<1x128xf32>
      %305 = vector.broadcast %304 : vector<1x128xf32> to vector<32x128xf32>
      %306 = arith.mulf %5, %305 : vector<32x128xf32>
      %cst_81 = arith.constant dense<0.000000e+00> : vector<32xf32>
      %307 = vector.multi_reduction <add>, %306, %cst_81 [1] : vector<32x128xf32> to vector<32xf32>
      %308 = vector.shape_cast %307 : vector<32xf32> to vector<32x1xf32>
      %cst_82 = arith.constant 1.000000e-16 : f32
      %309 = vector.broadcast %cst_82 : f32 to vector<32x1xf32>
      %310 = arith.addf %308, %309 : vector<32x1xf32>
      %311 = tpu.reciprocal %310 {approx = true} : vector<32x1xf32> -> vector<32x1xf32>
      %312 = arith.mulf %310, %311 : vector<32x1xf32>
      %cst_83 = arith.constant 2.000000e+00 : f32
      %313 = vector.broadcast %cst_83 : f32 to vector<32x1xf32>
      %314 = arith.subf %313, %312 : vector<32x1xf32>
      %315 = arith.mulf %311, %314 : vector<32x1xf32>
      %316 = vector.broadcast %cst_15 : f32 to vector<32x1xf32>
      %317 = arith.mulf %316, %315 : vector<32x1xf32>
      %318 = vector.broadcast %317 : vector<32x1xf32> to vector<32x128xf32>
      %319 = arith.mulf %318, %5 : vector<32x128xf32>
      %cst_84 = arith.constant dense<0.000000e+00> : vector<128xf32>
      %320 = vector.multi_reduction <add>, %319, %cst_84 [0] : vector<32x128xf32> to vector<128xf32>
      %321 = vector.shape_cast %320 : vector<128xf32> to vector<1x128xf32>
      %cst_85 = arith.constant 1.000000e-16 : f32
      %322 = vector.broadcast %cst_85 : f32 to vector<1x128xf32>
      %323 = arith.addf %321, %322 : vector<1x128xf32>
      %324 = tpu.reciprocal %323 {approx = true} : vector<1x128xf32> -> vector<1x128xf32>
      %325 = arith.mulf %323, %324 : vector<1x128xf32>
      %cst_86 = arith.constant 2.000000e+00 : f32
      %326 = vector.broadcast %cst_86 : f32 to vector<1x128xf32>
      %327 = arith.subf %326, %325 : vector<1x128xf32>
      %328 = arith.mulf %324, %327 : vector<1x128xf32>
      %329 = vector.broadcast %cst_14 : f32 to vector<1x128xf32>
      %330 = arith.mulf %329, %328 : vector<1x128xf32>
      %331 = vector.broadcast %330 : vector<1x128xf32> to vector<32x128xf32>
      %332 = arith.mulf %5, %331 : vector<32x128xf32>
      %cst_87 = arith.constant dense<0.000000e+00> : vector<32xf32>
      %333 = vector.multi_reduction <add>, %332, %cst_87 [1] : vector<32x128xf32> to vector<32xf32>
      %334 = vector.shape_cast %333 : vector<32xf32> to vector<32x1xf32>
      %cst_88 = arith.constant 1.000000e-16 : f32
      %335 = vector.broadcast %cst_88 : f32 to vector<32x1xf32>
      %336 = arith.addf %334, %335 : vector<32x1xf32>
      %337 = tpu.reciprocal %336 {approx = true} : vector<32x1xf32> -> vector<32x1xf32>
      %338 = arith.mulf %336, %337 : vector<32x1xf32>
      %cst_89 = arith.constant 2.000000e+00 : f32
      %339 = vector.broadcast %cst_89 : f32 to vector<32x1xf32>
      %340 = arith.subf %339, %338 : vector<32x1xf32>
      %341 = arith.mulf %337, %340 : vector<32x1xf32>
      %342 = vector.broadcast %cst_15 : f32 to vector<32x1xf32>
      %343 = arith.mulf %342, %341 : vector<32x1xf32>
      %344 = vector.broadcast %343 : vector<32x1xf32> to vector<32x128xf32>
      %345 = arith.mulf %344, %5 : vector<32x128xf32>
      %cst_90 = arith.constant dense<0.000000e+00> : vector<128xf32>
      %346 = vector.multi_reduction <add>, %345, %cst_90 [0] : vector<32x128xf32> to vector<128xf32>
      %347 = vector.shape_cast %346 : vector<128xf32> to vector<1x128xf32>
      %cst_91 = arith.constant 1.000000e-16 : f32
      %348 = vector.broadcast %cst_91 : f32 to vector<1x128xf32>
      %349 = arith.addf %347, %348 : vector<1x128xf32>
      %350 = tpu.reciprocal %349 {approx = true} : vector<1x128xf32> -> vector<1x128xf32>
      %351 = arith.mulf %349, %350 : vector<1x128xf32>
      %cst_92 = arith.constant 2.000000e+00 : f32
      %352 = vector.broadcast %cst_92 : f32 to vector<1x128xf32>
      %353 = arith.subf %352, %351 : vector<1x128xf32>
      %354 = arith.mulf %350, %353 : vector<1x128xf32>
      %355 = vector.broadcast %cst_14 : f32 to vector<1x128xf32>
      %356 = arith.mulf %355, %354 : vector<1x128xf32>
      %357 = vector.broadcast %356 : vector<1x128xf32> to vector<32x128xf32>
      %358 = arith.mulf %5, %357 : vector<32x128xf32>
      %cst_93 = arith.constant dense<0.000000e+00> : vector<32xf32>
      %359 = vector.multi_reduction <add>, %358, %cst_93 [1] : vector<32x128xf32> to vector<32xf32>
      %360 = vector.shape_cast %359 : vector<32xf32> to vector<32x1xf32>
      %cst_94 = arith.constant 1.000000e-16 : f32
      %361 = vector.broadcast %cst_94 : f32 to vector<32x1xf32>
      %362 = arith.addf %360, %361 : vector<32x1xf32>
      %363 = tpu.reciprocal %362 {approx = true} : vector<32x1xf32> -> vector<32x1xf32>
      %364 = arith.mulf %362, %363 : vector<32x1xf32>
      %cst_95 = arith.constant 2.000000e+00 : f32
      %365 = vector.broadcast %cst_95 : f32 to vector<32x1xf32>
      %366 = arith.subf %365, %364 : vector<32x1xf32>
      %367 = arith.mulf %363, %366 : vector<32x1xf32>
      %368 = vector.broadcast %cst_15 : f32 to vector<32x1xf32>
      %369 = arith.mulf %368, %367 : vector<32x1xf32>
      %370 = vector.broadcast %369 : vector<32x1xf32> to vector<32x128xf32>
      %371 = arith.mulf %370, %5 : vector<32x128xf32>
      %cst_96 = arith.constant dense<0.000000e+00> : vector<128xf32>
      %372 = vector.multi_reduction <add>, %371, %cst_96 [0] : vector<32x128xf32> to vector<128xf32>
      %373 = vector.shape_cast %372 : vector<128xf32> to vector<1x128xf32>
      %cst_97 = arith.constant 1.000000e-16 : f32
      %374 = vector.broadcast %cst_97 : f32 to vector<1x128xf32>
      %375 = arith.addf %373, %374 : vector<1x128xf32>
      %376 = tpu.reciprocal %375 {approx = true} : vector<1x128xf32> -> vector<1x128xf32>
      %377 = arith.mulf %375, %376 : vector<1x128xf32>
      %cst_98 = arith.constant 2.000000e+00 : f32
      %378 = vector.broadcast %cst_98 : f32 to vector<1x128xf32>
      %379 = arith.subf %378, %377 : vector<1x128xf32>
      %380 = arith.mulf %376, %379 : vector<1x128xf32>
      %381 = vector.broadcast %cst_14 : f32 to vector<1x128xf32>
      %382 = arith.mulf %381, %380 : vector<1x128xf32>
      %383 = vector.broadcast %382 : vector<1x128xf32> to vector<32x128xf32>
      %384 = arith.mulf %5, %383 : vector<32x128xf32>
      %cst_99 = arith.constant dense<0.000000e+00> : vector<32xf32>
      %385 = vector.multi_reduction <add>, %384, %cst_99 [1] : vector<32x128xf32> to vector<32xf32>
      %386 = vector.shape_cast %385 : vector<32xf32> to vector<32x1xf32>
      %cst_100 = arith.constant 1.000000e-16 : f32
      %387 = vector.broadcast %cst_100 : f32 to vector<32x1xf32>
      %388 = arith.addf %386, %387 : vector<32x1xf32>
      %389 = tpu.reciprocal %388 {approx = true} : vector<32x1xf32> -> vector<32x1xf32>
      %390 = arith.mulf %388, %389 : vector<32x1xf32>
      %cst_101 = arith.constant 2.000000e+00 : f32
      %391 = vector.broadcast %cst_101 : f32 to vector<32x1xf32>
      %392 = arith.subf %391, %390 : vector<32x1xf32>
      %393 = arith.mulf %389, %392 : vector<32x1xf32>
      %394 = vector.broadcast %cst_15 : f32 to vector<32x1xf32>
      %395 = arith.mulf %394, %393 : vector<32x1xf32>
      %396 = vector.broadcast %395 : vector<32x1xf32> to vector<32x128xf32>
      %397 = arith.mulf %396, %5 : vector<32x128xf32>
      %cst_102 = arith.constant dense<0.000000e+00> : vector<128xf32>
      %398 = vector.multi_reduction <add>, %397, %cst_102 [0] : vector<32x128xf32> to vector<128xf32>
      %399 = vector.shape_cast %398 : vector<128xf32> to vector<1x128xf32>
      %cst_103 = arith.constant 1.000000e-16 : f32
      %400 = vector.broadcast %cst_103 : f32 to vector<1x128xf32>
      %401 = arith.addf %399, %400 : vector<1x128xf32>
      %402 = tpu.reciprocal %401 {approx = true} : vector<1x128xf32> -> vector<1x128xf32>
      %403 = arith.mulf %401, %402 : vector<1x128xf32>
      %cst_104 = arith.constant 2.000000e+00 : f32
      %404 = vector.broadcast %cst_104 : f32 to vector<1x128xf32>
      %405 = arith.subf %404, %403 : vector<1x128xf32>
      %406 = arith.mulf %402, %405 : vector<1x128xf32>
      %407 = vector.broadcast %cst_14 : f32 to vector<1x128xf32>
      %408 = arith.mulf %407, %406 : vector<1x128xf32>
      %409 = vector.broadcast %408 : vector<1x128xf32> to vector<32x128xf32>
      %410 = arith.mulf %5, %409 : vector<32x128xf32>
      %cst_105 = arith.constant dense<0.000000e+00> : vector<32xf32>
      %411 = vector.multi_reduction <add>, %410, %cst_105 [1] : vector<32x128xf32> to vector<32xf32>
      %412 = vector.shape_cast %411 : vector<32xf32> to vector<32x1xf32>
      %cst_106 = arith.constant 1.000000e-16 : f32
      %413 = vector.broadcast %cst_106 : f32 to vector<32x1xf32>
      %414 = arith.addf %412, %413 : vector<32x1xf32>
      %415 = tpu.reciprocal %414 {approx = true} : vector<32x1xf32> -> vector<32x1xf32>
      %416 = arith.mulf %414, %415 : vector<32x1xf32>
      %cst_107 = arith.constant 2.000000e+00 : f32
      %417 = vector.broadcast %cst_107 : f32 to vector<32x1xf32>
      %418 = arith.subf %417, %416 : vector<32x1xf32>
      %419 = arith.mulf %415, %418 : vector<32x1xf32>
      %420 = vector.broadcast %cst_15 : f32 to vector<32x1xf32>
      %421 = arith.mulf %420, %419 : vector<32x1xf32>
      %422 = vector.broadcast %421 : vector<32x1xf32> to vector<32x128xf32>
      %423 = arith.mulf %422, %5 : vector<32x128xf32>
      %cst_108 = arith.constant dense<0.000000e+00> : vector<128xf32>
      %424 = vector.multi_reduction <add>, %423, %cst_108 [0] : vector<32x128xf32> to vector<128xf32>
      %425 = vector.shape_cast %424 : vector<128xf32> to vector<1x128xf32>
      %cst_109 = arith.constant 1.000000e-16 : f32
      %426 = vector.broadcast %cst_109 : f32 to vector<1x128xf32>
      %427 = arith.addf %425, %426 : vector<1x128xf32>
      %428 = tpu.reciprocal %427 {approx = true} : vector<1x128xf32> -> vector<1x128xf32>
      %429 = arith.mulf %427, %428 : vector<1x128xf32>
      %cst_110 = arith.constant 2.000000e+00 : f32
      %430 = vector.broadcast %cst_110 : f32 to vector<1x128xf32>
      %431 = arith.subf %430, %429 : vector<1x128xf32>
      %432 = arith.mulf %428, %431 : vector<1x128xf32>
      %433 = vector.broadcast %cst_14 : f32 to vector<1x128xf32>
      %434 = arith.mulf %433, %432 : vector<1x128xf32>
      %435 = vector.broadcast %434 : vector<1x128xf32> to vector<32x128xf32>
      %436 = arith.mulf %5, %435 : vector<32x128xf32>
      %cst_111 = arith.constant dense<0.000000e+00> : vector<32xf32>
      %437 = vector.multi_reduction <add>, %436, %cst_111 [1] : vector<32x128xf32> to vector<32xf32>
      %438 = vector.shape_cast %437 : vector<32xf32> to vector<32x1xf32>
      %cst_112 = arith.constant 1.000000e-16 : f32
      %439 = vector.broadcast %cst_112 : f32 to vector<32x1xf32>
      %440 = arith.addf %438, %439 : vector<32x1xf32>
      %441 = tpu.reciprocal %440 {approx = true} : vector<32x1xf32> -> vector<32x1xf32>
      %442 = arith.mulf %440, %441 : vector<32x1xf32>
      %cst_113 = arith.constant 2.000000e+00 : f32
      %443 = vector.broadcast %cst_113 : f32 to vector<32x1xf32>
      %444 = arith.subf %443, %442 : vector<32x1xf32>
      %445 = arith.mulf %441, %444 : vector<32x1xf32>
      %446 = vector.broadcast %cst_15 : f32 to vector<32x1xf32>
      %447 = arith.mulf %446, %445 : vector<32x1xf32>
      %448 = vector.broadcast %447 : vector<32x1xf32> to vector<32x128xf32>
      %449 = arith.mulf %448, %5 : vector<32x128xf32>
      %cst_114 = arith.constant dense<0.000000e+00> : vector<128xf32>
      %450 = vector.multi_reduction <add>, %449, %cst_114 [0] : vector<32x128xf32> to vector<128xf32>
      %451 = vector.shape_cast %450 : vector<128xf32> to vector<1x128xf32>
      %cst_115 = arith.constant 1.000000e-16 : f32
      %452 = vector.broadcast %cst_115 : f32 to vector<1x128xf32>
      %453 = arith.addf %451, %452 : vector<1x128xf32>
      %454 = tpu.reciprocal %453 {approx = true} : vector<1x128xf32> -> vector<1x128xf32>
      %455 = arith.mulf %453, %454 : vector<1x128xf32>
      %cst_116 = arith.constant 2.000000e+00 : f32
      %456 = vector.broadcast %cst_116 : f32 to vector<1x128xf32>
      %457 = arith.subf %456, %455 : vector<1x128xf32>
      %458 = arith.mulf %454, %457 : vector<1x128xf32>
      %459 = vector.broadcast %cst_14 : f32 to vector<1x128xf32>
      %460 = arith.mulf %459, %458 : vector<1x128xf32>
      %461 = vector.broadcast %460 : vector<1x128xf32> to vector<32x128xf32>
      %462 = arith.mulf %5, %461 : vector<32x128xf32>
      %cst_117 = arith.constant dense<0.000000e+00> : vector<32xf32>
      %463 = vector.multi_reduction <add>, %462, %cst_117 [1] : vector<32x128xf32> to vector<32xf32>
      %464 = vector.shape_cast %463 : vector<32xf32> to vector<32x1xf32>
      %cst_118 = arith.constant 1.000000e-16 : f32
      %465 = vector.broadcast %cst_118 : f32 to vector<32x1xf32>
      %466 = arith.addf %464, %465 : vector<32x1xf32>
      %467 = tpu.reciprocal %466 {approx = true} : vector<32x1xf32> -> vector<32x1xf32>
      %468 = arith.mulf %466, %467 : vector<32x1xf32>
      %cst_119 = arith.constant 2.000000e+00 : f32
      %469 = vector.broadcast %cst_119 : f32 to vector<32x1xf32>
      %470 = arith.subf %469, %468 : vector<32x1xf32>
      %471 = arith.mulf %467, %470 : vector<32x1xf32>
      %472 = vector.broadcast %cst_15 : f32 to vector<32x1xf32>
      %473 = arith.mulf %472, %471 : vector<32x1xf32>
      %474 = vector.broadcast %473 : vector<32x1xf32> to vector<32x128xf32>
      %475 = arith.mulf %474, %5 : vector<32x128xf32>
      %cst_120 = arith.constant dense<0.000000e+00> : vector<128xf32>
      %476 = vector.multi_reduction <add>, %475, %cst_120 [0] : vector<32x128xf32> to vector<128xf32>
      %477 = vector.shape_cast %476 : vector<128xf32> to vector<1x128xf32>
      %cst_121 = arith.constant 1.000000e-16 : f32
      %478 = vector.broadcast %cst_121 : f32 to vector<1x128xf32>
      %479 = arith.addf %477, %478 : vector<1x128xf32>
      %480 = tpu.reciprocal %479 {approx = true} : vector<1x128xf32> -> vector<1x128xf32>
      %481 = arith.mulf %479, %480 : vector<1x128xf32>
      %cst_122 = arith.constant 2.000000e+00 : f32
      %482 = vector.broadcast %cst_122 : f32 to vector<1x128xf32>
      %483 = arith.subf %482, %481 : vector<1x128xf32>
      %484 = arith.mulf %480, %483 : vector<1x128xf32>
      %485 = vector.broadcast %cst_14 : f32 to vector<1x128xf32>
      %486 = arith.mulf %485, %484 : vector<1x128xf32>
      %487 = vector.broadcast %486 : vector<1x128xf32> to vector<32x128xf32>
      %488 = arith.mulf %5, %487 : vector<32x128xf32>
      %cst_123 = arith.constant dense<0.000000e+00> : vector<32xf32>
      %489 = vector.multi_reduction <add>, %488, %cst_123 [1] : vector<32x128xf32> to vector<32xf32>
      %490 = vector.shape_cast %489 : vector<32xf32> to vector<32x1xf32>
      %cst_124 = arith.constant 1.000000e-16 : f32
      %491 = vector.broadcast %cst_124 : f32 to vector<32x1xf32>
      %492 = arith.addf %490, %491 : vector<32x1xf32>
      %493 = tpu.reciprocal %492 {approx = true} : vector<32x1xf32> -> vector<32x1xf32>
      %494 = arith.mulf %492, %493 : vector<32x1xf32>
      %cst_125 = arith.constant 2.000000e+00 : f32
      %495 = vector.broadcast %cst_125 : f32 to vector<32x1xf32>
      %496 = arith.subf %495, %494 : vector<32x1xf32>
      %497 = arith.mulf %493, %496 : vector<32x1xf32>
      %498 = vector.broadcast %cst_15 : f32 to vector<32x1xf32>
      %499 = arith.mulf %498, %497 : vector<32x1xf32>
      %500 = vector.broadcast %499 : vector<32x1xf32> to vector<32x128xf32>
      %501 = arith.mulf %500, %5 : vector<32x128xf32>
      %cst_126 = arith.constant dense<0.000000e+00> : vector<128xf32>
      %502 = vector.multi_reduction <add>, %501, %cst_126 [0] : vector<32x128xf32> to vector<128xf32>
      %503 = vector.shape_cast %502 : vector<128xf32> to vector<1x128xf32>
      %cst_127 = arith.constant 1.000000e-16 : f32
      %504 = vector.broadcast %cst_127 : f32 to vector<1x128xf32>
      %505 = arith.addf %503, %504 : vector<1x128xf32>
      %506 = tpu.reciprocal %505 {approx = true} : vector<1x128xf32> -> vector<1x128xf32>
      %507 = arith.mulf %505, %506 : vector<1x128xf32>
      %cst_128 = arith.constant 2.000000e+00 : f32
      %508 = vector.broadcast %cst_128 : f32 to vector<1x128xf32>
      %509 = arith.subf %508, %507 : vector<1x128xf32>
      %510 = arith.mulf %506, %509 : vector<1x128xf32>
      %511 = vector.broadcast %cst_14 : f32 to vector<1x128xf32>
      %512 = arith.mulf %511, %510 : vector<1x128xf32>
      %513 = vector.broadcast %512 : vector<1x128xf32> to vector<32x128xf32>
      %514 = arith.mulf %5, %513 : vector<32x128xf32>
      %cst_129 = arith.constant dense<0.000000e+00> : vector<32xf32>
      %515 = vector.multi_reduction <add>, %514, %cst_129 [1] : vector<32x128xf32> to vector<32xf32>
      %516 = vector.shape_cast %515 : vector<32xf32> to vector<32x1xf32>
      %cst_130 = arith.constant 1.000000e-16 : f32
      %517 = vector.broadcast %cst_130 : f32 to vector<32x1xf32>
      %518 = arith.addf %516, %517 : vector<32x1xf32>
      %519 = tpu.reciprocal %518 {approx = true} : vector<32x1xf32> -> vector<32x1xf32>
      %520 = arith.mulf %518, %519 : vector<32x1xf32>
      %cst_131 = arith.constant 2.000000e+00 : f32
      %521 = vector.broadcast %cst_131 : f32 to vector<32x1xf32>
      %522 = arith.subf %521, %520 : vector<32x1xf32>
      %523 = arith.mulf %519, %522 : vector<32x1xf32>
      %524 = vector.broadcast %cst_15 : f32 to vector<32x1xf32>
      %525 = arith.mulf %524, %523 : vector<32x1xf32>
      %526 = vector.broadcast %525 : vector<32x1xf32> to vector<32x128xf32>
      %527 = arith.mulf %526, %5 : vector<32x128xf32>
      %cst_132 = arith.constant dense<0.000000e+00> : vector<128xf32>
      %528 = vector.multi_reduction <add>, %527, %cst_132 [0] : vector<32x128xf32> to vector<128xf32>
      %529 = vector.shape_cast %528 : vector<128xf32> to vector<1x128xf32>
      %cst_133 = arith.constant 1.000000e-16 : f32
      %530 = vector.broadcast %cst_133 : f32 to vector<1x128xf32>
      %531 = arith.addf %529, %530 : vector<1x128xf32>
      %532 = tpu.reciprocal %531 {approx = true} : vector<1x128xf32> -> vector<1x128xf32>
      %533 = arith.mulf %531, %532 : vector<1x128xf32>
      %cst_134 = arith.constant 2.000000e+00 : f32
      %534 = vector.broadcast %cst_134 : f32 to vector<1x128xf32>
      %535 = arith.subf %534, %533 : vector<1x128xf32>
      %536 = arith.mulf %532, %535 : vector<1x128xf32>
      %537 = vector.broadcast %cst_14 : f32 to vector<1x128xf32>
      %538 = arith.mulf %537, %536 : vector<1x128xf32>
      %539 = vector.broadcast %538 : vector<1x128xf32> to vector<32x128xf32>
      %540 = arith.mulf %5, %539 : vector<32x128xf32>
      %cst_135 = arith.constant dense<0.000000e+00> : vector<32xf32>
      %541 = vector.multi_reduction <add>, %540, %cst_135 [1] : vector<32x128xf32> to vector<32xf32>
      %542 = vector.shape_cast %541 : vector<32xf32> to vector<32x1xf32>
      %cst_136 = arith.constant 1.000000e-16 : f32
      %543 = vector.broadcast %cst_136 : f32 to vector<32x1xf32>
      %544 = arith.addf %542, %543 : vector<32x1xf32>
      %545 = tpu.reciprocal %544 {approx = true} : vector<32x1xf32> -> vector<32x1xf32>
      %546 = arith.mulf %544, %545 : vector<32x1xf32>
      %cst_137 = arith.constant 2.000000e+00 : f32
      %547 = vector.broadcast %cst_137 : f32 to vector<32x1xf32>
      %548 = arith.subf %547, %546 : vector<32x1xf32>
      %549 = arith.mulf %545, %548 : vector<32x1xf32>
      %550 = vector.broadcast %cst_15 : f32 to vector<32x1xf32>
      %551 = arith.mulf %550, %549 : vector<32x1xf32>
      %552 = vector.broadcast %551 : vector<32x1xf32> to vector<32x128xf32>
      %553 = arith.mulf %552, %5 : vector<32x128xf32>
      %cst_138 = arith.constant dense<0.000000e+00> : vector<128xf32>
      %554 = vector.multi_reduction <add>, %553, %cst_138 [0] : vector<32x128xf32> to vector<128xf32>
      %555 = vector.shape_cast %554 : vector<128xf32> to vector<1x128xf32>
      %cst_139 = arith.constant 1.000000e-16 : f32
      %556 = vector.broadcast %cst_139 : f32 to vector<1x128xf32>
      %557 = arith.addf %555, %556 : vector<1x128xf32>
      %558 = tpu.reciprocal %557 {approx = true} : vector<1x128xf32> -> vector<1x128xf32>
      %559 = arith.mulf %557, %558 : vector<1x128xf32>
      %cst_140 = arith.constant 2.000000e+00 : f32
      %560 = vector.broadcast %cst_140 : f32 to vector<1x128xf32>
      %561 = arith.subf %560, %559 : vector<1x128xf32>
      %562 = arith.mulf %558, %561 : vector<1x128xf32>
      %563 = vector.broadcast %cst_14 : f32 to vector<1x128xf32>
      %564 = arith.mulf %563, %562 : vector<1x128xf32>
      %565 = vector.broadcast %564 : vector<1x128xf32> to vector<32x128xf32>
      %566 = arith.mulf %5, %565 : vector<32x128xf32>
      %cst_141 = arith.constant dense<0.000000e+00> : vector<32xf32>
      %567 = vector.multi_reduction <add>, %566, %cst_141 [1] : vector<32x128xf32> to vector<32xf32>
      %568 = vector.shape_cast %567 : vector<32xf32> to vector<32x1xf32>
      %cst_142 = arith.constant 1.000000e-16 : f32
      %569 = vector.broadcast %cst_142 : f32 to vector<32x1xf32>
      %570 = arith.addf %568, %569 : vector<32x1xf32>
      %571 = tpu.reciprocal %570 {approx = true} : vector<32x1xf32> -> vector<32x1xf32>
      %572 = arith.mulf %570, %571 : vector<32x1xf32>
      %cst_143 = arith.constant 2.000000e+00 : f32
      %573 = vector.broadcast %cst_143 : f32 to vector<32x1xf32>
      %574 = arith.subf %573, %572 : vector<32x1xf32>
      %575 = arith.mulf %571, %574 : vector<32x1xf32>
      %576 = vector.broadcast %cst_15 : f32 to vector<32x1xf32>
      %577 = arith.mulf %576, %575 : vector<32x1xf32>
      %578 = vector.broadcast %577 : vector<32x1xf32> to vector<32x128xf32>
      %579 = arith.mulf %578, %5 : vector<32x128xf32>
      %cst_144 = arith.constant dense<0.000000e+00> : vector<128xf32>
      %580 = vector.multi_reduction <add>, %579, %cst_144 [0] : vector<32x128xf32> to vector<128xf32>
      %581 = vector.shape_cast %580 : vector<128xf32> to vector<1x128xf32>
      %cst_145 = arith.constant 1.000000e-16 : f32
      %582 = vector.broadcast %cst_145 : f32 to vector<1x128xf32>
      %583 = arith.addf %581, %582 : vector<1x128xf32>
      %584 = tpu.reciprocal %583 {approx = true} : vector<1x128xf32> -> vector<1x128xf32>
      %585 = arith.mulf %583, %584 : vector<1x128xf32>
      %cst_146 = arith.constant 2.000000e+00 : f32
      %586 = vector.broadcast %cst_146 : f32 to vector<1x128xf32>
      %587 = arith.subf %586, %585 : vector<1x128xf32>
      %588 = arith.mulf %584, %587 : vector<1x128xf32>
      %589 = vector.broadcast %cst_14 : f32 to vector<1x128xf32>
      %590 = arith.mulf %589, %588 : vector<1x128xf32>
      %591 = vector.broadcast %590 : vector<1x128xf32> to vector<32x128xf32>
      %592 = arith.mulf %5, %591 : vector<32x128xf32>
      %cst_147 = arith.constant dense<0.000000e+00> : vector<32xf32>
      %593 = vector.multi_reduction <add>, %592, %cst_147 [1] : vector<32x128xf32> to vector<32xf32>
      %594 = vector.shape_cast %593 : vector<32xf32> to vector<32x1xf32>
      %cst_148 = arith.constant 1.000000e-16 : f32
      %595 = vector.broadcast %cst_148 : f32 to vector<32x1xf32>
      %596 = arith.addf %594, %595 : vector<32x1xf32>
      %597 = tpu.reciprocal %596 {approx = true} : vector<32x1xf32> -> vector<32x1xf32>
      %598 = arith.mulf %596, %597 : vector<32x1xf32>
      %cst_149 = arith.constant 2.000000e+00 : f32
      %599 = vector.broadcast %cst_149 : f32 to vector<32x1xf32>
      %600 = arith.subf %599, %598 : vector<32x1xf32>
      %601 = arith.mulf %597, %600 : vector<32x1xf32>
      %602 = vector.broadcast %cst_15 : f32 to vector<32x1xf32>
      %603 = arith.mulf %602, %601 : vector<32x1xf32>
      %604 = vector.broadcast %603 : vector<32x1xf32> to vector<32x128xf32>
      %605 = arith.mulf %604, %5 : vector<32x128xf32>
      %cst_150 = arith.constant dense<0.000000e+00> : vector<128xf32>
      %606 = vector.multi_reduction <add>, %605, %cst_150 [0] : vector<32x128xf32> to vector<128xf32>
      %607 = vector.shape_cast %606 : vector<128xf32> to vector<1x128xf32>
      %cst_151 = arith.constant 1.000000e-16 : f32
      %608 = vector.broadcast %cst_151 : f32 to vector<1x128xf32>
      %609 = arith.addf %607, %608 : vector<1x128xf32>
      %610 = tpu.reciprocal %609 {approx = true} : vector<1x128xf32> -> vector<1x128xf32>
      %611 = arith.mulf %609, %610 : vector<1x128xf32>
      %cst_152 = arith.constant 2.000000e+00 : f32
      %612 = vector.broadcast %cst_152 : f32 to vector<1x128xf32>
      %613 = arith.subf %612, %611 : vector<1x128xf32>
      %614 = arith.mulf %610, %613 : vector<1x128xf32>
      %615 = vector.broadcast %cst_14 : f32 to vector<1x128xf32>
      %616 = arith.mulf %615, %614 : vector<1x128xf32>
      %617 = vector.broadcast %616 : vector<1x128xf32> to vector<32x128xf32>
      %618 = arith.mulf %5, %617 : vector<32x128xf32>
      %cst_153 = arith.constant dense<0.000000e+00> : vector<32xf32>
      %619 = vector.multi_reduction <add>, %618, %cst_153 [1] : vector<32x128xf32> to vector<32xf32>
      %620 = vector.shape_cast %619 : vector<32xf32> to vector<32x1xf32>
      %cst_154 = arith.constant 1.000000e-16 : f32
      %621 = vector.broadcast %cst_154 : f32 to vector<32x1xf32>
      %622 = arith.addf %620, %621 : vector<32x1xf32>
      %623 = tpu.reciprocal %622 {approx = true} : vector<32x1xf32> -> vector<32x1xf32>
      %624 = arith.mulf %622, %623 : vector<32x1xf32>
      %cst_155 = arith.constant 2.000000e+00 : f32
      %625 = vector.broadcast %cst_155 : f32 to vector<32x1xf32>
      %626 = arith.subf %625, %624 : vector<32x1xf32>
      %627 = arith.mulf %623, %626 : vector<32x1xf32>
      %628 = vector.broadcast %cst_15 : f32 to vector<32x1xf32>
      %629 = arith.mulf %628, %627 : vector<32x1xf32>
      %630 = vector.broadcast %629 : vector<32x1xf32> to vector<32x128xf32>
      %631 = arith.mulf %630, %5 : vector<32x128xf32>
      %cst_156 = arith.constant dense<0.000000e+00> : vector<128xf32>
      %632 = vector.multi_reduction <add>, %631, %cst_156 [0] : vector<32x128xf32> to vector<128xf32>
      %633 = vector.shape_cast %632 : vector<128xf32> to vector<1x128xf32>
      %cst_157 = arith.constant 1.000000e-16 : f32
      %634 = vector.broadcast %cst_157 : f32 to vector<1x128xf32>
      %635 = arith.addf %633, %634 : vector<1x128xf32>
      %636 = tpu.reciprocal %635 {approx = true} : vector<1x128xf32> -> vector<1x128xf32>
      %637 = arith.mulf %635, %636 : vector<1x128xf32>
      %cst_158 = arith.constant 2.000000e+00 : f32
      %638 = vector.broadcast %cst_158 : f32 to vector<1x128xf32>
      %639 = arith.subf %638, %637 : vector<1x128xf32>
      %640 = arith.mulf %636, %639 : vector<1x128xf32>
      %641 = vector.broadcast %cst_14 : f32 to vector<1x128xf32>
      %642 = arith.mulf %641, %640 : vector<1x128xf32>
      %643 = vector.broadcast %642 : vector<1x128xf32> to vector<32x128xf32>
      %644 = arith.mulf %5, %643 : vector<32x128xf32>
      %cst_159 = arith.constant dense<0.000000e+00> : vector<32xf32>
      %645 = vector.multi_reduction <add>, %644, %cst_159 [1] : vector<32x128xf32> to vector<32xf32>
      %646 = vector.shape_cast %645 : vector<32xf32> to vector<32x1xf32>
      %cst_160 = arith.constant 1.000000e-16 : f32
      %647 = vector.broadcast %cst_160 : f32 to vector<32x1xf32>
      %648 = arith.addf %646, %647 : vector<32x1xf32>
      %649 = tpu.reciprocal %648 {approx = true} : vector<32x1xf32> -> vector<32x1xf32>
      %650 = arith.mulf %648, %649 : vector<32x1xf32>
      %cst_161 = arith.constant 2.000000e+00 : f32
      %651 = vector.broadcast %cst_161 : f32 to vector<32x1xf32>
      %652 = arith.subf %651, %650 : vector<32x1xf32>
      %653 = arith.mulf %649, %652 : vector<32x1xf32>
      %654 = vector.broadcast %cst_15 : f32 to vector<32x1xf32>
      %655 = arith.mulf %654, %653 : vector<32x1xf32>
      %656 = vector.broadcast %655 : vector<32x1xf32> to vector<32x128xf32>
      %657 = arith.mulf %656, %5 : vector<32x128xf32>
      %cst_162 = arith.constant dense<0.000000e+00> : vector<128xf32>
      %658 = vector.multi_reduction <add>, %657, %cst_162 [0] : vector<32x128xf32> to vector<128xf32>
      %659 = vector.shape_cast %658 : vector<128xf32> to vector<1x128xf32>
      %cst_163 = arith.constant 1.000000e-16 : f32
      %660 = vector.broadcast %cst_163 : f32 to vector<1x128xf32>
      %661 = arith.addf %659, %660 : vector<1x128xf32>
      %662 = tpu.reciprocal %661 {approx = true} : vector<1x128xf32> -> vector<1x128xf32>
      %663 = arith.mulf %661, %662 : vector<1x128xf32>
      %cst_164 = arith.constant 2.000000e+00 : f32
      %664 = vector.broadcast %cst_164 : f32 to vector<1x128xf32>
      %665 = arith.subf %664, %663 : vector<1x128xf32>
      %666 = arith.mulf %662, %665 : vector<1x128xf32>
      %667 = vector.broadcast %cst_14 : f32 to vector<1x128xf32>
      %668 = arith.mulf %667, %666 : vector<1x128xf32>
      %669 = vector.broadcast %668 : vector<1x128xf32> to vector<32x128xf32>
      %670 = arith.mulf %5, %669 : vector<32x128xf32>
      %cst_165 = arith.constant dense<0.000000e+00> : vector<32xf32>
      %671 = vector.multi_reduction <add>, %670, %cst_165 [1] : vector<32x128xf32> to vector<32xf32>
      %672 = vector.shape_cast %671 : vector<32xf32> to vector<32x1xf32>
      %cst_166 = arith.constant 1.000000e-16 : f32
      %673 = vector.broadcast %cst_166 : f32 to vector<32x1xf32>
      %674 = arith.addf %672, %673 : vector<32x1xf32>
      %675 = tpu.reciprocal %674 {approx = true} : vector<32x1xf32> -> vector<32x1xf32>
      %676 = arith.mulf %674, %675 : vector<32x1xf32>
      %cst_167 = arith.constant 2.000000e+00 : f32
      %677 = vector.broadcast %cst_167 : f32 to vector<32x1xf32>
      %678 = arith.subf %677, %676 : vector<32x1xf32>
      %679 = arith.mulf %675, %678 : vector<32x1xf32>
      %680 = vector.broadcast %cst_15 : f32 to vector<32x1xf32>
      %681 = arith.mulf %680, %679 : vector<32x1xf32>
      %682 = vector.broadcast %681 : vector<32x1xf32> to vector<32x128xf32>
      %683 = arith.mulf %682, %5 : vector<32x128xf32>
      %cst_168 = arith.constant dense<0.000000e+00> : vector<128xf32>
      %684 = vector.multi_reduction <add>, %683, %cst_168 [0] : vector<32x128xf32> to vector<128xf32>
      %685 = vector.shape_cast %684 : vector<128xf32> to vector<1x128xf32>
      %cst_169 = arith.constant 1.000000e-16 : f32
      %686 = vector.broadcast %cst_169 : f32 to vector<1x128xf32>
      %687 = arith.addf %685, %686 : vector<1x128xf32>
      %688 = tpu.reciprocal %687 {approx = true} : vector<1x128xf32> -> vector<1x128xf32>
      %689 = arith.mulf %687, %688 : vector<1x128xf32>
      %cst_170 = arith.constant 2.000000e+00 : f32
      %690 = vector.broadcast %cst_170 : f32 to vector<1x128xf32>
      %691 = arith.subf %690, %689 : vector<1x128xf32>
      %692 = arith.mulf %688, %691 : vector<1x128xf32>
      %693 = vector.broadcast %cst_14 : f32 to vector<1x128xf32>
      %694 = arith.mulf %693, %692 : vector<1x128xf32>
      %695 = vector.broadcast %694 : vector<1x128xf32> to vector<32x128xf32>
      %696 = arith.mulf %5, %695 : vector<32x128xf32>
      %cst_171 = arith.constant dense<0.000000e+00> : vector<32xf32>
      %697 = vector.multi_reduction <add>, %696, %cst_171 [1] : vector<32x128xf32> to vector<32xf32>
      %698 = vector.shape_cast %697 : vector<32xf32> to vector<32x1xf32>
      %cst_172 = arith.constant 1.000000e-16 : f32
      %699 = vector.broadcast %cst_172 : f32 to vector<32x1xf32>
      %700 = arith.addf %698, %699 : vector<32x1xf32>
      %701 = tpu.reciprocal %700 {approx = true} : vector<32x1xf32> -> vector<32x1xf32>
      %702 = arith.mulf %700, %701 : vector<32x1xf32>
      %cst_173 = arith.constant 2.000000e+00 : f32
      %703 = vector.broadcast %cst_173 : f32 to vector<32x1xf32>
      %704 = arith.subf %703, %702 : vector<32x1xf32>
      %705 = arith.mulf %701, %704 : vector<32x1xf32>
      %706 = vector.broadcast %cst_15 : f32 to vector<32x1xf32>
      %707 = arith.mulf %706, %705 : vector<32x1xf32>
      %708 = vector.broadcast %707 : vector<32x1xf32> to vector<32x128xf32>
      %709 = arith.mulf %708, %5 : vector<32x128xf32>
      %cst_174 = arith.constant dense<0.000000e+00> : vector<128xf32>
      %710 = vector.multi_reduction <add>, %709, %cst_174 [0] : vector<32x128xf32> to vector<128xf32>
      %711 = vector.shape_cast %710 : vector<128xf32> to vector<1x128xf32>
      %cst_175 = arith.constant 1.000000e-16 : f32
      %712 = vector.broadcast %cst_175 : f32 to vector<1x128xf32>
      %713 = arith.addf %711, %712 : vector<1x128xf32>
      %714 = tpu.reciprocal %713 {approx = true} : vector<1x128xf32> -> vector<1x128xf32>
      %715 = arith.mulf %713, %714 : vector<1x128xf32>
      %cst_176 = arith.constant 2.000000e+00 : f32
      %716 = vector.broadcast %cst_176 : f32 to vector<1x128xf32>
      %717 = arith.subf %716, %715 : vector<1x128xf32>
      %718 = arith.mulf %714, %717 : vector<1x128xf32>
      %719 = vector.broadcast %cst_14 : f32 to vector<1x128xf32>
      %720 = arith.mulf %719, %718 : vector<1x128xf32>
      %721 = vector.broadcast %720 : vector<1x128xf32> to vector<32x128xf32>
      %722 = arith.mulf %5, %721 : vector<32x128xf32>
      %cst_177 = arith.constant dense<0.000000e+00> : vector<32xf32>
      %723 = vector.multi_reduction <add>, %722, %cst_177 [1] : vector<32x128xf32> to vector<32xf32>
      %724 = vector.shape_cast %723 : vector<32xf32> to vector<32x1xf32>
      %cst_178 = arith.constant 1.000000e-16 : f32
      %725 = vector.broadcast %cst_178 : f32 to vector<32x1xf32>
      %726 = arith.addf %724, %725 : vector<32x1xf32>
      %727 = tpu.reciprocal %726 {approx = true} : vector<32x1xf32> -> vector<32x1xf32>
      %728 = arith.mulf %726, %727 : vector<32x1xf32>
      %cst_179 = arith.constant 2.000000e+00 : f32
      %729 = vector.broadcast %cst_179 : f32 to vector<32x1xf32>
      %730 = arith.subf %729, %728 : vector<32x1xf32>
      %731 = arith.mulf %727, %730 : vector<32x1xf32>
      %732 = vector.broadcast %cst_15 : f32 to vector<32x1xf32>
      %733 = arith.mulf %732, %731 : vector<32x1xf32>
      %734 = vector.broadcast %733 : vector<32x1xf32> to vector<32x128xf32>
      %735 = arith.mulf %734, %5 : vector<32x128xf32>
      %cst_180 = arith.constant dense<0.000000e+00> : vector<128xf32>
      %736 = vector.multi_reduction <add>, %735, %cst_180 [0] : vector<32x128xf32> to vector<128xf32>
      %737 = vector.shape_cast %736 : vector<128xf32> to vector<1x128xf32>
      %cst_181 = arith.constant 1.000000e-16 : f32
      %738 = vector.broadcast %cst_181 : f32 to vector<1x128xf32>
      %739 = arith.addf %737, %738 : vector<1x128xf32>
      %740 = tpu.reciprocal %739 {approx = true} : vector<1x128xf32> -> vector<1x128xf32>
      %741 = arith.mulf %739, %740 : vector<1x128xf32>
      %cst_182 = arith.constant 2.000000e+00 : f32
      %742 = vector.broadcast %cst_182 : f32 to vector<1x128xf32>
      %743 = arith.subf %742, %741 : vector<1x128xf32>
      %744 = arith.mulf %740, %743 : vector<1x128xf32>
      %745 = vector.broadcast %cst_14 : f32 to vector<1x128xf32>
      %746 = arith.mulf %745, %744 : vector<1x128xf32>
      %747 = vector.broadcast %746 : vector<1x128xf32> to vector<32x128xf32>
      %748 = arith.mulf %5, %747 : vector<32x128xf32>
      %cst_183 = arith.constant dense<0.000000e+00> : vector<32xf32>
      %749 = vector.multi_reduction <add>, %748, %cst_183 [1] : vector<32x128xf32> to vector<32xf32>
      %750 = vector.shape_cast %749 : vector<32xf32> to vector<32x1xf32>
      %cst_184 = arith.constant 1.000000e-16 : f32
      %751 = vector.broadcast %cst_184 : f32 to vector<32x1xf32>
      %752 = arith.addf %750, %751 : vector<32x1xf32>
      %753 = tpu.reciprocal %752 {approx = true} : vector<32x1xf32> -> vector<32x1xf32>
      %754 = arith.mulf %752, %753 : vector<32x1xf32>
      %cst_185 = arith.constant 2.000000e+00 : f32
      %755 = vector.broadcast %cst_185 : f32 to vector<32x1xf32>
      %756 = arith.subf %755, %754 : vector<32x1xf32>
      %757 = arith.mulf %753, %756 : vector<32x1xf32>
      %758 = vector.broadcast %cst_15 : f32 to vector<32x1xf32>
      %759 = arith.mulf %758, %757 : vector<32x1xf32>
      %760 = vector.broadcast %759 : vector<32x1xf32> to vector<32x128xf32>
      %761 = arith.mulf %760, %5 : vector<32x128xf32>
      %cst_186 = arith.constant dense<0.000000e+00> : vector<128xf32>
      %762 = vector.multi_reduction <add>, %761, %cst_186 [0] : vector<32x128xf32> to vector<128xf32>
      %763 = vector.shape_cast %762 : vector<128xf32> to vector<1x128xf32>
      %cst_187 = arith.constant 1.000000e-16 : f32
      %764 = vector.broadcast %cst_187 : f32 to vector<1x128xf32>
      %765 = arith.addf %763, %764 : vector<1x128xf32>
      %766 = tpu.reciprocal %765 {approx = true} : vector<1x128xf32> -> vector<1x128xf32>
      %767 = arith.mulf %765, %766 : vector<1x128xf32>
      %cst_188 = arith.constant 2.000000e+00 : f32
      %768 = vector.broadcast %cst_188 : f32 to vector<1x128xf32>
      %769 = arith.subf %768, %767 : vector<1x128xf32>
      %770 = arith.mulf %766, %769 : vector<1x128xf32>
      %771 = vector.broadcast %cst_14 : f32 to vector<1x128xf32>
      %772 = arith.mulf %771, %770 : vector<1x128xf32>
      %773 = vector.broadcast %772 : vector<1x128xf32> to vector<32x128xf32>
      %774 = arith.mulf %5, %773 : vector<32x128xf32>
      %cst_189 = arith.constant dense<0.000000e+00> : vector<32xf32>
      %775 = vector.multi_reduction <add>, %774, %cst_189 [1] : vector<32x128xf32> to vector<32xf32>
      %776 = vector.shape_cast %775 : vector<32xf32> to vector<32x1xf32>
      %cst_190 = arith.constant 1.000000e-16 : f32
      %777 = vector.broadcast %cst_190 : f32 to vector<32x1xf32>
      %778 = arith.addf %776, %777 : vector<32x1xf32>
      %779 = tpu.reciprocal %778 {approx = true} : vector<32x1xf32> -> vector<32x1xf32>
      %780 = arith.mulf %778, %779 : vector<32x1xf32>
      %cst_191 = arith.constant 2.000000e+00 : f32
      %781 = vector.broadcast %cst_191 : f32 to vector<32x1xf32>
      %782 = arith.subf %781, %780 : vector<32x1xf32>
      %783 = arith.mulf %779, %782 : vector<32x1xf32>
      %784 = vector.broadcast %cst_15 : f32 to vector<32x1xf32>
      %785 = arith.mulf %784, %783 : vector<32x1xf32>
      %786 = vector.broadcast %785 : vector<32x1xf32> to vector<32x128xf32>
      %787 = arith.mulf %786, %5 : vector<32x128xf32>
      %cst_192 = arith.constant dense<0.000000e+00> : vector<128xf32>
      %788 = vector.multi_reduction <add>, %787, %cst_192 [0] : vector<32x128xf32> to vector<128xf32>
      %789 = vector.shape_cast %788 : vector<128xf32> to vector<1x128xf32>
      %cst_193 = arith.constant 1.000000e-16 : f32
      %790 = vector.broadcast %cst_193 : f32 to vector<1x128xf32>
      %791 = arith.addf %789, %790 : vector<1x128xf32>
      %792 = tpu.reciprocal %791 {approx = true} : vector<1x128xf32> -> vector<1x128xf32>
      %793 = arith.mulf %791, %792 : vector<1x128xf32>
      %cst_194 = arith.constant 2.000000e+00 : f32
      %794 = vector.broadcast %cst_194 : f32 to vector<1x128xf32>
      %795 = arith.subf %794, %793 : vector<1x128xf32>
      %796 = arith.mulf %792, %795 : vector<1x128xf32>
      %797 = vector.broadcast %cst_14 : f32 to vector<1x128xf32>
      %798 = arith.mulf %797, %796 : vector<1x128xf32>
      %799 = vector.broadcast %798 : vector<1x128xf32> to vector<32x128xf32>
      %800 = arith.mulf %5, %799 : vector<32x128xf32>
      %cst_195 = arith.constant dense<0.000000e+00> : vector<32xf32>
      %801 = vector.multi_reduction <add>, %800, %cst_195 [1] : vector<32x128xf32> to vector<32xf32>
      %802 = vector.shape_cast %801 : vector<32xf32> to vector<32x1xf32>
      %cst_196 = arith.constant 1.000000e-16 : f32
      %803 = vector.broadcast %cst_196 : f32 to vector<32x1xf32>
      %804 = arith.addf %802, %803 : vector<32x1xf32>
      %805 = tpu.reciprocal %804 {approx = true} : vector<32x1xf32> -> vector<32x1xf32>
      %806 = arith.mulf %804, %805 : vector<32x1xf32>
      %cst_197 = arith.constant 2.000000e+00 : f32
      %807 = vector.broadcast %cst_197 : f32 to vector<32x1xf32>
      %808 = arith.subf %807, %806 : vector<32x1xf32>
      %809 = arith.mulf %805, %808 : vector<32x1xf32>
      %810 = vector.broadcast %cst_15 : f32 to vector<32x1xf32>
      %811 = arith.mulf %810, %809 : vector<32x1xf32>
      %812 = vector.broadcast %811 : vector<32x1xf32> to vector<32x128xf32>
      %813 = arith.mulf %812, %5 : vector<32x128xf32>
      %cst_198 = arith.constant dense<0.000000e+00> : vector<128xf32>
      %814 = vector.multi_reduction <add>, %813, %cst_198 [0] : vector<32x128xf32> to vector<128xf32>
      %815 = vector.shape_cast %814 : vector<128xf32> to vector<1x128xf32>
      %cst_199 = arith.constant 1.000000e-16 : f32
      %816 = vector.broadcast %cst_199 : f32 to vector<1x128xf32>
      %817 = arith.addf %815, %816 : vector<1x128xf32>
      %818 = tpu.reciprocal %817 {approx = true} : vector<1x128xf32> -> vector<1x128xf32>
      %819 = arith.mulf %817, %818 : vector<1x128xf32>
      %cst_200 = arith.constant 2.000000e+00 : f32
      %820 = vector.broadcast %cst_200 : f32 to vector<1x128xf32>
      %821 = arith.subf %820, %819 : vector<1x128xf32>
      %822 = arith.mulf %818, %821 : vector<1x128xf32>
      %823 = vector.broadcast %cst_14 : f32 to vector<1x128xf32>
      %824 = arith.mulf %823, %822 : vector<1x128xf32>
      %825 = vector.broadcast %824 : vector<1x128xf32> to vector<32x128xf32>
      %826 = arith.mulf %5, %825 : vector<32x128xf32>
      %cst_201 = arith.constant dense<0.000000e+00> : vector<32xf32>
      %827 = vector.multi_reduction <add>, %826, %cst_201 [1] : vector<32x128xf32> to vector<32xf32>
      %828 = vector.shape_cast %827 : vector<32xf32> to vector<32x1xf32>
      %cst_202 = arith.constant 1.000000e-16 : f32
      %829 = vector.broadcast %cst_202 : f32 to vector<32x1xf32>
      %830 = arith.addf %828, %829 : vector<32x1xf32>
      %831 = tpu.reciprocal %830 {approx = true} : vector<32x1xf32> -> vector<32x1xf32>
      %832 = arith.mulf %830, %831 : vector<32x1xf32>
      %cst_203 = arith.constant 2.000000e+00 : f32
      %833 = vector.broadcast %cst_203 : f32 to vector<32x1xf32>
      %834 = arith.subf %833, %832 : vector<32x1xf32>
      %835 = arith.mulf %831, %834 : vector<32x1xf32>
      %836 = vector.broadcast %cst_15 : f32 to vector<32x1xf32>
      %837 = arith.mulf %836, %835 : vector<32x1xf32>
      %838 = vector.broadcast %837 : vector<32x1xf32> to vector<32x128xf32>
      %839 = arith.mulf %838, %5 : vector<32x128xf32>
      %cst_204 = arith.constant dense<0.000000e+00> : vector<128xf32>
      %840 = vector.multi_reduction <add>, %839, %cst_204 [0] : vector<32x128xf32> to vector<128xf32>
      %841 = vector.shape_cast %840 : vector<128xf32> to vector<1x128xf32>
      %cst_205 = arith.constant 1.000000e-16 : f32
      %842 = vector.broadcast %cst_205 : f32 to vector<1x128xf32>
      %843 = arith.addf %841, %842 : vector<1x128xf32>
      %844 = tpu.reciprocal %843 {approx = true} : vector<1x128xf32> -> vector<1x128xf32>
      %845 = arith.mulf %843, %844 : vector<1x128xf32>
      %cst_206 = arith.constant 2.000000e+00 : f32
      %846 = vector.broadcast %cst_206 : f32 to vector<1x128xf32>
      %847 = arith.subf %846, %845 : vector<1x128xf32>
      %848 = arith.mulf %844, %847 : vector<1x128xf32>
      %849 = vector.broadcast %cst_14 : f32 to vector<1x128xf32>
      %850 = arith.mulf %849, %848 : vector<1x128xf32>
      %851 = vector.broadcast %850 : vector<1x128xf32> to vector<32x128xf32>
      %852 = arith.mulf %5, %851 : vector<32x128xf32>
      %cst_207 = arith.constant dense<0.000000e+00> : vector<32xf32>
      %853 = vector.multi_reduction <add>, %852, %cst_207 [1] : vector<32x128xf32> to vector<32xf32>
      %854 = vector.shape_cast %853 : vector<32xf32> to vector<32x1xf32>
      %cst_208 = arith.constant 1.000000e-16 : f32
      %855 = vector.broadcast %cst_208 : f32 to vector<32x1xf32>
      %856 = arith.addf %854, %855 : vector<32x1xf32>
      %857 = tpu.reciprocal %856 {approx = true} : vector<32x1xf32> -> vector<32x1xf32>
      %858 = arith.mulf %856, %857 : vector<32x1xf32>
      %cst_209 = arith.constant 2.000000e+00 : f32
      %859 = vector.broadcast %cst_209 : f32 to vector<32x1xf32>
      %860 = arith.subf %859, %858 : vector<32x1xf32>
      %861 = arith.mulf %857, %860 : vector<32x1xf32>
      %862 = vector.broadcast %cst_15 : f32 to vector<32x1xf32>
      %863 = arith.mulf %862, %861 : vector<32x1xf32>
      %864 = vector.broadcast %863 : vector<32x1xf32> to vector<32x128xf32>
      %865 = arith.mulf %864, %5 : vector<32x128xf32>
      %cst_210 = arith.constant dense<0.000000e+00> : vector<128xf32>
      %866 = vector.multi_reduction <add>, %865, %cst_210 [0] : vector<32x128xf32> to vector<128xf32>
      %867 = vector.shape_cast %866 : vector<128xf32> to vector<1x128xf32>
      %cst_211 = arith.constant 1.000000e-16 : f32
      %868 = vector.broadcast %cst_211 : f32 to vector<1x128xf32>
      %869 = arith.addf %867, %868 : vector<1x128xf32>
      %870 = tpu.reciprocal %869 {approx = true} : vector<1x128xf32> -> vector<1x128xf32>
      %871 = arith.mulf %869, %870 : vector<1x128xf32>
      %cst_212 = arith.constant 2.000000e+00 : f32
      %872 = vector.broadcast %cst_212 : f32 to vector<1x128xf32>
      %873 = arith.subf %872, %871 : vector<1x128xf32>
      %874 = arith.mulf %870, %873 : vector<1x128xf32>
      %875 = vector.broadcast %cst_14 : f32 to vector<1x128xf32>
      %876 = arith.mulf %875, %874 : vector<1x128xf32>
      %877 = vector.broadcast %876 : vector<1x128xf32> to vector<32x128xf32>
      %878 = arith.mulf %5, %877 : vector<32x128xf32>
      %cst_213 = arith.constant dense<0.000000e+00> : vector<32xf32>
      %879 = vector.multi_reduction <add>, %878, %cst_213 [1] : vector<32x128xf32> to vector<32xf32>
      %880 = vector.shape_cast %879 : vector<32xf32> to vector<32x1xf32>
      %cst_214 = arith.constant 1.000000e-16 : f32
      %881 = vector.broadcast %cst_214 : f32 to vector<32x1xf32>
      %882 = arith.addf %880, %881 : vector<32x1xf32>
      %883 = tpu.reciprocal %882 {approx = true} : vector<32x1xf32> -> vector<32x1xf32>
      %884 = arith.mulf %882, %883 : vector<32x1xf32>
      %cst_215 = arith.constant 2.000000e+00 : f32
      %885 = vector.broadcast %cst_215 : f32 to vector<32x1xf32>
      %886 = arith.subf %885, %884 : vector<32x1xf32>
      %887 = arith.mulf %883, %886 : vector<32x1xf32>
      %888 = vector.broadcast %cst_15 : f32 to vector<32x1xf32>
      %889 = arith.mulf %888, %887 : vector<32x1xf32>
      %890 = vector.broadcast %889 : vector<32x1xf32> to vector<32x128xf32>
      %891 = arith.mulf %890, %5 : vector<32x128xf32>
      %cst_216 = arith.constant dense<0.000000e+00> : vector<128xf32>
      %892 = vector.multi_reduction <add>, %891, %cst_216 [0] : vector<32x128xf32> to vector<128xf32>
      %893 = vector.shape_cast %892 : vector<128xf32> to vector<1x128xf32>
      %cst_217 = arith.constant 1.000000e-16 : f32
      %894 = vector.broadcast %cst_217 : f32 to vector<1x128xf32>
      %895 = arith.addf %893, %894 : vector<1x128xf32>
      %896 = tpu.reciprocal %895 {approx = true} : vector<1x128xf32> -> vector<1x128xf32>
      %897 = arith.mulf %895, %896 : vector<1x128xf32>
      %cst_218 = arith.constant 2.000000e+00 : f32
      %898 = vector.broadcast %cst_218 : f32 to vector<1x128xf32>
      %899 = arith.subf %898, %897 : vector<1x128xf32>
      %900 = arith.mulf %896, %899 : vector<1x128xf32>
      %901 = vector.broadcast %cst_14 : f32 to vector<1x128xf32>
      %902 = arith.mulf %901, %900 : vector<1x128xf32>
      %903 = vector.broadcast %902 : vector<1x128xf32> to vector<32x128xf32>
      %904 = arith.mulf %5, %903 : vector<32x128xf32>
      %cst_219 = arith.constant dense<0.000000e+00> : vector<32xf32>
      %905 = vector.multi_reduction <add>, %904, %cst_219 [1] : vector<32x128xf32> to vector<32xf32>
      %906 = vector.shape_cast %905 : vector<32xf32> to vector<32x1xf32>
      %cst_220 = arith.constant 1.000000e-16 : f32
      %907 = vector.broadcast %cst_220 : f32 to vector<32x1xf32>
      %908 = arith.addf %906, %907 : vector<32x1xf32>
      %909 = tpu.reciprocal %908 {approx = true} : vector<32x1xf32> -> vector<32x1xf32>
      %910 = arith.mulf %908, %909 : vector<32x1xf32>
      %cst_221 = arith.constant 2.000000e+00 : f32
      %911 = vector.broadcast %cst_221 : f32 to vector<32x1xf32>
      %912 = arith.subf %911, %910 : vector<32x1xf32>
      %913 = arith.mulf %909, %912 : vector<32x1xf32>
      %914 = vector.broadcast %cst_15 : f32 to vector<32x1xf32>
      %915 = arith.mulf %914, %913 : vector<32x1xf32>
      %916 = vector.broadcast %915 : vector<32x1xf32> to vector<32x128xf32>
      %917 = arith.mulf %916, %5 : vector<32x128xf32>
      %cst_222 = arith.constant dense<0.000000e+00> : vector<128xf32>
      %918 = vector.multi_reduction <add>, %917, %cst_222 [0] : vector<32x128xf32> to vector<128xf32>
      %919 = vector.shape_cast %918 : vector<128xf32> to vector<1x128xf32>
      %cst_223 = arith.constant 1.000000e-16 : f32
      %920 = vector.broadcast %cst_223 : f32 to vector<1x128xf32>
      %921 = arith.addf %919, %920 : vector<1x128xf32>
      %922 = tpu.reciprocal %921 {approx = true} : vector<1x128xf32> -> vector<1x128xf32>
      %923 = arith.mulf %921, %922 : vector<1x128xf32>
      %cst_224 = arith.constant 2.000000e+00 : f32
      %924 = vector.broadcast %cst_224 : f32 to vector<1x128xf32>
      %925 = arith.subf %924, %923 : vector<1x128xf32>
      %926 = arith.mulf %922, %925 : vector<1x128xf32>
      %927 = vector.broadcast %cst_14 : f32 to vector<1x128xf32>
      %928 = arith.mulf %927, %926 : vector<1x128xf32>
      %929 = vector.broadcast %928 : vector<1x128xf32> to vector<32x128xf32>
      %930 = arith.mulf %5, %929 : vector<32x128xf32>
      %cst_225 = arith.constant dense<0.000000e+00> : vector<32xf32>
      %931 = vector.multi_reduction <add>, %930, %cst_225 [1] : vector<32x128xf32> to vector<32xf32>
      %932 = vector.shape_cast %931 : vector<32xf32> to vector<32x1xf32>
      %cst_226 = arith.constant 1.000000e-16 : f32
      %933 = vector.broadcast %cst_226 : f32 to vector<32x1xf32>
      %934 = arith.addf %932, %933 : vector<32x1xf32>
      %935 = tpu.reciprocal %934 {approx = true} : vector<32x1xf32> -> vector<32x1xf32>
      %936 = arith.mulf %934, %935 : vector<32x1xf32>
      %cst_227 = arith.constant 2.000000e+00 : f32
      %937 = vector.broadcast %cst_227 : f32 to vector<32x1xf32>
      %938 = arith.subf %937, %936 : vector<32x1xf32>
      %939 = arith.mulf %935, %938 : vector<32x1xf32>
      %940 = vector.broadcast %cst_15 : f32 to vector<32x1xf32>
      %941 = arith.mulf %940, %939 : vector<32x1xf32>
      %942 = vector.broadcast %941 : vector<32x1xf32> to vector<32x128xf32>
      %943 = arith.mulf %942, %5 : vector<32x128xf32>
      %cst_228 = arith.constant dense<0.000000e+00> : vector<128xf32>
      %944 = vector.multi_reduction <add>, %943, %cst_228 [0] : vector<32x128xf32> to vector<128xf32>
      %945 = vector.shape_cast %944 : vector<128xf32> to vector<1x128xf32>
      %cst_229 = arith.constant 1.000000e-16 : f32
      %946 = vector.broadcast %cst_229 : f32 to vector<1x128xf32>
      %947 = arith.addf %945, %946 : vector<1x128xf32>
      %948 = tpu.reciprocal %947 {approx = true} : vector<1x128xf32> -> vector<1x128xf32>
      %949 = arith.mulf %947, %948 : vector<1x128xf32>
      %cst_230 = arith.constant 2.000000e+00 : f32
      %950 = vector.broadcast %cst_230 : f32 to vector<1x128xf32>
      %951 = arith.subf %950, %949 : vector<1x128xf32>
      %952 = arith.mulf %948, %951 : vector<1x128xf32>
      %953 = vector.broadcast %cst_14 : f32 to vector<1x128xf32>
      %954 = arith.mulf %953, %952 : vector<1x128xf32>
      %955 = vector.broadcast %954 : vector<1x128xf32> to vector<32x128xf32>
      %956 = arith.mulf %5, %955 : vector<32x128xf32>
      %cst_231 = arith.constant dense<0.000000e+00> : vector<32xf32>
      %957 = vector.multi_reduction <add>, %956, %cst_231 [1] : vector<32x128xf32> to vector<32xf32>
      %958 = vector.shape_cast %957 : vector<32xf32> to vector<32x1xf32>
      %cst_232 = arith.constant 1.000000e-16 : f32
      %959 = vector.broadcast %cst_232 : f32 to vector<32x1xf32>
      %960 = arith.addf %958, %959 : vector<32x1xf32>
      %961 = tpu.reciprocal %960 {approx = true} : vector<32x1xf32> -> vector<32x1xf32>
      %962 = arith.mulf %960, %961 : vector<32x1xf32>
      %cst_233 = arith.constant 2.000000e+00 : f32
      %963 = vector.broadcast %cst_233 : f32 to vector<32x1xf32>
      %964 = arith.subf %963, %962 : vector<32x1xf32>
      %965 = arith.mulf %961, %964 : vector<32x1xf32>
      %966 = vector.broadcast %cst_15 : f32 to vector<32x1xf32>
      %967 = arith.mulf %966, %965 : vector<32x1xf32>
      %968 = vector.broadcast %967 : vector<32x1xf32> to vector<32x128xf32>
      %969 = arith.mulf %968, %5 : vector<32x128xf32>
      %cst_234 = arith.constant dense<0.000000e+00> : vector<128xf32>
      %970 = vector.multi_reduction <add>, %969, %cst_234 [0] : vector<32x128xf32> to vector<128xf32>
      %971 = vector.shape_cast %970 : vector<128xf32> to vector<1x128xf32>
      %cst_235 = arith.constant 1.000000e-16 : f32
      %972 = vector.broadcast %cst_235 : f32 to vector<1x128xf32>
      %973 = arith.addf %971, %972 : vector<1x128xf32>
      %974 = tpu.reciprocal %973 {approx = true} : vector<1x128xf32> -> vector<1x128xf32>
      %975 = arith.mulf %973, %974 : vector<1x128xf32>
      %cst_236 = arith.constant 2.000000e+00 : f32
      %976 = vector.broadcast %cst_236 : f32 to vector<1x128xf32>
      %977 = arith.subf %976, %975 : vector<1x128xf32>
      %978 = arith.mulf %974, %977 : vector<1x128xf32>
      %979 = vector.broadcast %cst_14 : f32 to vector<1x128xf32>
      %980 = arith.mulf %979, %978 : vector<1x128xf32>
      %981 = vector.broadcast %980 : vector<1x128xf32> to vector<32x128xf32>
      %982 = arith.mulf %5, %981 : vector<32x128xf32>
      %cst_237 = arith.constant dense<0.000000e+00> : vector<32xf32>
      %983 = vector.multi_reduction <add>, %982, %cst_237 [1] : vector<32x128xf32> to vector<32xf32>
      %984 = vector.shape_cast %983 : vector<32xf32> to vector<32x1xf32>
      %cst_238 = arith.constant 1.000000e-16 : f32
      %985 = vector.broadcast %cst_238 : f32 to vector<32x1xf32>
      %986 = arith.addf %984, %985 : vector<32x1xf32>
      %987 = tpu.reciprocal %986 {approx = true} : vector<32x1xf32> -> vector<32x1xf32>
      %988 = arith.mulf %986, %987 : vector<32x1xf32>
      %cst_239 = arith.constant 2.000000e+00 : f32
      %989 = vector.broadcast %cst_239 : f32 to vector<32x1xf32>
      %990 = arith.subf %989, %988 : vector<32x1xf32>
      %991 = arith.mulf %987, %990 : vector<32x1xf32>
      %992 = vector.broadcast %cst_15 : f32 to vector<32x1xf32>
      %993 = arith.mulf %992, %991 : vector<32x1xf32>
      %994 = vector.broadcast %993 : vector<32x1xf32> to vector<32x128xf32>
      %995 = arith.mulf %994, %5 : vector<32x128xf32>
      %cst_240 = arith.constant dense<0.000000e+00> : vector<128xf32>
      %996 = vector.multi_reduction <add>, %995, %cst_240 [0] : vector<32x128xf32> to vector<128xf32>
      %997 = vector.shape_cast %996 : vector<128xf32> to vector<1x128xf32>
      %cst_241 = arith.constant 1.000000e-16 : f32
      %998 = vector.broadcast %cst_241 : f32 to vector<1x128xf32>
      %999 = arith.addf %997, %998 : vector<1x128xf32>
      %1000 = tpu.reciprocal %999 {approx = true} : vector<1x128xf32> -> vector<1x128xf32>
      %1001 = arith.mulf %999, %1000 : vector<1x128xf32>
      %cst_242 = arith.constant 2.000000e+00 : f32
      %1002 = vector.broadcast %cst_242 : f32 to vector<1x128xf32>
      %1003 = arith.subf %1002, %1001 : vector<1x128xf32>
      %1004 = arith.mulf %1000, %1003 : vector<1x128xf32>
      %1005 = vector.broadcast %cst_14 : f32 to vector<1x128xf32>
      %1006 = arith.mulf %1005, %1004 : vector<1x128xf32>
      %1007 = vector.broadcast %1006 : vector<1x128xf32> to vector<32x128xf32>
      %1008 = arith.mulf %5, %1007 : vector<32x128xf32>
      %cst_243 = arith.constant dense<0.000000e+00> : vector<32xf32>
      %1009 = vector.multi_reduction <add>, %1008, %cst_243 [1] : vector<32x128xf32> to vector<32xf32>
      %1010 = vector.shape_cast %1009 : vector<32xf32> to vector<32x1xf32>
      %cst_244 = arith.constant 1.000000e-16 : f32
      %1011 = vector.broadcast %cst_244 : f32 to vector<32x1xf32>
      %1012 = arith.addf %1010, %1011 : vector<32x1xf32>
      %1013 = tpu.reciprocal %1012 {approx = true} : vector<32x1xf32> -> vector<32x1xf32>
      %1014 = arith.mulf %1012, %1013 : vector<32x1xf32>
      %cst_245 = arith.constant 2.000000e+00 : f32
      %1015 = vector.broadcast %cst_245 : f32 to vector<32x1xf32>
      %1016 = arith.subf %1015, %1014 : vector<32x1xf32>
      %1017 = arith.mulf %1013, %1016 : vector<32x1xf32>
      %1018 = vector.broadcast %cst_15 : f32 to vector<32x1xf32>
      %1019 = arith.mulf %1018, %1017 : vector<32x1xf32>
      %1020 = vector.broadcast %1019 : vector<32x1xf32> to vector<32x128xf32>
      %1021 = arith.mulf %1020, %5 : vector<32x128xf32>
      %cst_246 = arith.constant dense<0.000000e+00> : vector<128xf32>
      %1022 = vector.multi_reduction <add>, %1021, %cst_246 [0] : vector<32x128xf32> to vector<128xf32>
      %1023 = vector.shape_cast %1022 : vector<128xf32> to vector<1x128xf32>
      %cst_247 = arith.constant 1.000000e-16 : f32
      %1024 = vector.broadcast %cst_247 : f32 to vector<1x128xf32>
      %1025 = arith.addf %1023, %1024 : vector<1x128xf32>
      %1026 = tpu.reciprocal %1025 {approx = true} : vector<1x128xf32> -> vector<1x128xf32>
      %1027 = arith.mulf %1025, %1026 : vector<1x128xf32>
      %cst_248 = arith.constant 2.000000e+00 : f32
      %1028 = vector.broadcast %cst_248 : f32 to vector<1x128xf32>
      %1029 = arith.subf %1028, %1027 : vector<1x128xf32>
      %1030 = arith.mulf %1026, %1029 : vector<1x128xf32>
      %1031 = vector.broadcast %cst_14 : f32 to vector<1x128xf32>
      %1032 = arith.mulf %1031, %1030 : vector<1x128xf32>
      %1033 = vector.broadcast %1032 : vector<1x128xf32> to vector<32x128xf32>
      %1034 = arith.mulf %5, %1033 : vector<32x128xf32>
      %cst_249 = arith.constant dense<0.000000e+00> : vector<32xf32>
      %1035 = vector.multi_reduction <add>, %1034, %cst_249 [1] : vector<32x128xf32> to vector<32xf32>
      %1036 = vector.shape_cast %1035 : vector<32xf32> to vector<32x1xf32>
      %cst_250 = arith.constant 1.000000e-16 : f32
      %1037 = vector.broadcast %cst_250 : f32 to vector<32x1xf32>
      %1038 = arith.addf %1036, %1037 : vector<32x1xf32>
      %1039 = tpu.reciprocal %1038 {approx = true} : vector<32x1xf32> -> vector<32x1xf32>
      %1040 = arith.mulf %1038, %1039 : vector<32x1xf32>
      %cst_251 = arith.constant 2.000000e+00 : f32
      %1041 = vector.broadcast %cst_251 : f32 to vector<32x1xf32>
      %1042 = arith.subf %1041, %1040 : vector<32x1xf32>
      %1043 = arith.mulf %1039, %1042 : vector<32x1xf32>
      %1044 = vector.broadcast %cst_15 : f32 to vector<32x1xf32>
      %1045 = arith.mulf %1044, %1043 : vector<32x1xf32>
      %1046 = vector.broadcast %1045 : vector<32x1xf32> to vector<32x128xf32>
      %1047 = arith.mulf %1046, %5 : vector<32x128xf32>
      %cst_252 = arith.constant dense<0.000000e+00> : vector<128xf32>
      %1048 = vector.multi_reduction <add>, %1047, %cst_252 [0] : vector<32x128xf32> to vector<128xf32>
      %1049 = vector.shape_cast %1048 : vector<128xf32> to vector<1x128xf32>
      %cst_253 = arith.constant 1.000000e-16 : f32
      %1050 = vector.broadcast %cst_253 : f32 to vector<1x128xf32>
      %1051 = arith.addf %1049, %1050 : vector<1x128xf32>
      %1052 = tpu.reciprocal %1051 {approx = true} : vector<1x128xf32> -> vector<1x128xf32>
      %1053 = arith.mulf %1051, %1052 : vector<1x128xf32>
      %cst_254 = arith.constant 2.000000e+00 : f32
      %1054 = vector.broadcast %cst_254 : f32 to vector<1x128xf32>
      %1055 = arith.subf %1054, %1053 : vector<1x128xf32>
      %1056 = arith.mulf %1052, %1055 : vector<1x128xf32>
      %1057 = vector.broadcast %cst_14 : f32 to vector<1x128xf32>
      %1058 = arith.mulf %1057, %1056 : vector<1x128xf32>
      %1059 = vector.broadcast %1058 : vector<1x128xf32> to vector<32x128xf32>
      %1060 = arith.mulf %5, %1059 : vector<32x128xf32>
      %cst_255 = arith.constant dense<0.000000e+00> : vector<32xf32>
      %1061 = vector.multi_reduction <add>, %1060, %cst_255 [1] : vector<32x128xf32> to vector<32xf32>
      %1062 = vector.shape_cast %1061 : vector<32xf32> to vector<32x1xf32>
      %cst_256 = arith.constant 1.000000e-16 : f32
      %1063 = vector.broadcast %cst_256 : f32 to vector<32x1xf32>
      %1064 = arith.addf %1062, %1063 : vector<32x1xf32>
      %1065 = tpu.reciprocal %1064 {approx = true} : vector<32x1xf32> -> vector<32x1xf32>
      %1066 = arith.mulf %1064, %1065 : vector<32x1xf32>
      %cst_257 = arith.constant 2.000000e+00 : f32
      %1067 = vector.broadcast %cst_257 : f32 to vector<32x1xf32>
      %1068 = arith.subf %1067, %1066 : vector<32x1xf32>
      %1069 = arith.mulf %1065, %1068 : vector<32x1xf32>
      %1070 = vector.broadcast %cst_15 : f32 to vector<32x1xf32>
      %1071 = arith.mulf %1070, %1069 : vector<32x1xf32>
      %1072 = vector.broadcast %1071 : vector<32x1xf32> to vector<32x128xf32>
      %1073 = arith.mulf %1072, %5 : vector<32x128xf32>
      %cst_258 = arith.constant dense<0.000000e+00> : vector<128xf32>
      %1074 = vector.multi_reduction <add>, %1073, %cst_258 [0] : vector<32x128xf32> to vector<128xf32>
      %1075 = vector.shape_cast %1074 : vector<128xf32> to vector<1x128xf32>
      %cst_259 = arith.constant 1.000000e-16 : f32
      %1076 = vector.broadcast %cst_259 : f32 to vector<1x128xf32>
      %1077 = arith.addf %1075, %1076 : vector<1x128xf32>
      %1078 = tpu.reciprocal %1077 {approx = true} : vector<1x128xf32> -> vector<1x128xf32>
      %1079 = arith.mulf %1077, %1078 : vector<1x128xf32>
      %cst_260 = arith.constant 2.000000e+00 : f32
      %1080 = vector.broadcast %cst_260 : f32 to vector<1x128xf32>
      %1081 = arith.subf %1080, %1079 : vector<1x128xf32>
      %1082 = arith.mulf %1078, %1081 : vector<1x128xf32>
      %1083 = vector.broadcast %cst_14 : f32 to vector<1x128xf32>
      %1084 = arith.mulf %1083, %1082 : vector<1x128xf32>
      %1085 = vector.broadcast %1084 : vector<1x128xf32> to vector<32x128xf32>
      %1086 = arith.mulf %5, %1085 : vector<32x128xf32>
      %cst_261 = arith.constant dense<0.000000e+00> : vector<32xf32>
      %1087 = vector.multi_reduction <add>, %1086, %cst_261 [1] : vector<32x128xf32> to vector<32xf32>
      %1088 = vector.shape_cast %1087 : vector<32xf32> to vector<32x1xf32>
      %cst_262 = arith.constant 1.000000e-16 : f32
      %1089 = vector.broadcast %cst_262 : f32 to vector<32x1xf32>
      %1090 = arith.addf %1088, %1089 : vector<32x1xf32>
      %1091 = tpu.reciprocal %1090 {approx = true} : vector<32x1xf32> -> vector<32x1xf32>
      %1092 = arith.mulf %1090, %1091 : vector<32x1xf32>
      %cst_263 = arith.constant 2.000000e+00 : f32
      %1093 = vector.broadcast %cst_263 : f32 to vector<32x1xf32>
      %1094 = arith.subf %1093, %1092 : vector<32x1xf32>
      %1095 = arith.mulf %1091, %1094 : vector<32x1xf32>
      %1096 = vector.broadcast %cst_15 : f32 to vector<32x1xf32>
      %1097 = arith.mulf %1096, %1095 : vector<32x1xf32>
      %1098 = vector.broadcast %1097 : vector<32x1xf32> to vector<32x128xf32>
      %1099 = arith.mulf %1098, %5 : vector<32x128xf32>
      %cst_264 = arith.constant dense<0.000000e+00> : vector<128xf32>
      %1100 = vector.multi_reduction <add>, %1099, %cst_264 [0] : vector<32x128xf32> to vector<128xf32>
      %1101 = vector.shape_cast %1100 : vector<128xf32> to vector<1x128xf32>
      %cst_265 = arith.constant 1.000000e-16 : f32
      %1102 = vector.broadcast %cst_265 : f32 to vector<1x128xf32>
      %1103 = arith.addf %1101, %1102 : vector<1x128xf32>
      %1104 = tpu.reciprocal %1103 {approx = true} : vector<1x128xf32> -> vector<1x128xf32>
      %1105 = arith.mulf %1103, %1104 : vector<1x128xf32>
      %cst_266 = arith.constant 2.000000e+00 : f32
      %1106 = vector.broadcast %cst_266 : f32 to vector<1x128xf32>
      %1107 = arith.subf %1106, %1105 : vector<1x128xf32>
      %1108 = arith.mulf %1104, %1107 : vector<1x128xf32>
      %1109 = vector.broadcast %cst_14 : f32 to vector<1x128xf32>
      %1110 = arith.mulf %1109, %1108 : vector<1x128xf32>
      %1111 = vector.broadcast %1110 : vector<1x128xf32> to vector<32x128xf32>
      %1112 = arith.mulf %5, %1111 : vector<32x128xf32>
      %cst_267 = arith.constant dense<0.000000e+00> : vector<32xf32>
      %1113 = vector.multi_reduction <add>, %1112, %cst_267 [1] : vector<32x128xf32> to vector<32xf32>
      %1114 = vector.shape_cast %1113 : vector<32xf32> to vector<32x1xf32>
      %cst_268 = arith.constant 1.000000e-16 : f32
      %1115 = vector.broadcast %cst_268 : f32 to vector<32x1xf32>
      %1116 = arith.addf %1114, %1115 : vector<32x1xf32>
      %1117 = tpu.reciprocal %1116 {approx = true} : vector<32x1xf32> -> vector<32x1xf32>
      %1118 = arith.mulf %1116, %1117 : vector<32x1xf32>
      %cst_269 = arith.constant 2.000000e+00 : f32
      %1119 = vector.broadcast %cst_269 : f32 to vector<32x1xf32>
      %1120 = arith.subf %1119, %1118 : vector<32x1xf32>
      %1121 = arith.mulf %1117, %1120 : vector<32x1xf32>
      %1122 = vector.broadcast %cst_15 : f32 to vector<32x1xf32>
      %1123 = arith.mulf %1122, %1121 : vector<32x1xf32>
      %1124 = vector.broadcast %1123 : vector<32x1xf32> to vector<32x128xf32>
      %1125 = arith.mulf %1124, %5 : vector<32x128xf32>
      %cst_270 = arith.constant dense<0.000000e+00> : vector<128xf32>
      %1126 = vector.multi_reduction <add>, %1125, %cst_270 [0] : vector<32x128xf32> to vector<128xf32>
      %1127 = vector.shape_cast %1126 : vector<128xf32> to vector<1x128xf32>
      %cst_271 = arith.constant 1.000000e-16 : f32
      %1128 = vector.broadcast %cst_271 : f32 to vector<1x128xf32>
      %1129 = arith.addf %1127, %1128 : vector<1x128xf32>
      %1130 = tpu.reciprocal %1129 {approx = true} : vector<1x128xf32> -> vector<1x128xf32>
      %1131 = arith.mulf %1129, %1130 : vector<1x128xf32>
      %cst_272 = arith.constant 2.000000e+00 : f32
      %1132 = vector.broadcast %cst_272 : f32 to vector<1x128xf32>
      %1133 = arith.subf %1132, %1131 : vector<1x128xf32>
      %1134 = arith.mulf %1130, %1133 : vector<1x128xf32>
      %1135 = vector.broadcast %cst_14 : f32 to vector<1x128xf32>
      %1136 = arith.mulf %1135, %1134 : vector<1x128xf32>
      %1137 = vector.broadcast %1136 : vector<1x128xf32> to vector<32x128xf32>
      %1138 = arith.mulf %5, %1137 : vector<32x128xf32>
      %cst_273 = arith.constant dense<0.000000e+00> : vector<32xf32>
      %1139 = vector.multi_reduction <add>, %1138, %cst_273 [1] : vector<32x128xf32> to vector<32xf32>
      %1140 = vector.shape_cast %1139 : vector<32xf32> to vector<32x1xf32>
      %cst_274 = arith.constant 1.000000e-16 : f32
      %1141 = vector.broadcast %cst_274 : f32 to vector<32x1xf32>
      %1142 = arith.addf %1140, %1141 : vector<32x1xf32>
      %1143 = tpu.reciprocal %1142 {approx = true} : vector<32x1xf32> -> vector<32x1xf32>
      %1144 = arith.mulf %1142, %1143 : vector<32x1xf32>
      %cst_275 = arith.constant 2.000000e+00 : f32
      %1145 = vector.broadcast %cst_275 : f32 to vector<32x1xf32>
      %1146 = arith.subf %1145, %1144 : vector<32x1xf32>
      %1147 = arith.mulf %1143, %1146 : vector<32x1xf32>
      %1148 = vector.broadcast %cst_15 : f32 to vector<32x1xf32>
      %1149 = arith.mulf %1148, %1147 : vector<32x1xf32>
      %1150 = vector.broadcast %1149 : vector<32x1xf32> to vector<32x128xf32>
      %1151 = arith.mulf %1150, %5 : vector<32x128xf32>
      %cst_276 = arith.constant dense<0.000000e+00> : vector<128xf32>
      %1152 = vector.multi_reduction <add>, %1151, %cst_276 [0] : vector<32x128xf32> to vector<128xf32>
      %1153 = vector.shape_cast %1152 : vector<128xf32> to vector<1x128xf32>
      %cst_277 = arith.constant 1.000000e-16 : f32
      %1154 = vector.broadcast %cst_277 : f32 to vector<1x128xf32>
      %1155 = arith.addf %1153, %1154 : vector<1x128xf32>
      %1156 = tpu.reciprocal %1155 {approx = true} : vector<1x128xf32> -> vector<1x128xf32>
      %1157 = arith.mulf %1155, %1156 : vector<1x128xf32>
      %cst_278 = arith.constant 2.000000e+00 : f32
      %1158 = vector.broadcast %cst_278 : f32 to vector<1x128xf32>
      %1159 = arith.subf %1158, %1157 : vector<1x128xf32>
      %1160 = arith.mulf %1156, %1159 : vector<1x128xf32>
      %1161 = vector.broadcast %cst_14 : f32 to vector<1x128xf32>
      %1162 = arith.mulf %1161, %1160 : vector<1x128xf32>
      %1163 = vector.broadcast %1162 : vector<1x128xf32> to vector<32x128xf32>
      %1164 = arith.mulf %5, %1163 : vector<32x128xf32>
      %cst_279 = arith.constant dense<0.000000e+00> : vector<32xf32>
      %1165 = vector.multi_reduction <add>, %1164, %cst_279 [1] : vector<32x128xf32> to vector<32xf32>
      %1166 = vector.shape_cast %1165 : vector<32xf32> to vector<32x1xf32>
      %cst_280 = arith.constant 1.000000e-16 : f32
      %1167 = vector.broadcast %cst_280 : f32 to vector<32x1xf32>
      %1168 = arith.addf %1166, %1167 : vector<32x1xf32>
      %1169 = tpu.reciprocal %1168 {approx = true} : vector<32x1xf32> -> vector<32x1xf32>
      %1170 = arith.mulf %1168, %1169 : vector<32x1xf32>
      %cst_281 = arith.constant 2.000000e+00 : f32
      %1171 = vector.broadcast %cst_281 : f32 to vector<32x1xf32>
      %1172 = arith.subf %1171, %1170 : vector<32x1xf32>
      %1173 = arith.mulf %1169, %1172 : vector<32x1xf32>
      %1174 = vector.broadcast %cst_15 : f32 to vector<32x1xf32>
      %1175 = arith.mulf %1174, %1173 : vector<32x1xf32>
      %1176 = vector.broadcast %1175 : vector<32x1xf32> to vector<32x128xf32>
      %1177 = arith.mulf %1176, %5 : vector<32x128xf32>
      %cst_282 = arith.constant dense<0.000000e+00> : vector<128xf32>
      %1178 = vector.multi_reduction <add>, %1177, %cst_282 [0] : vector<32x128xf32> to vector<128xf32>
      %1179 = vector.shape_cast %1178 : vector<128xf32> to vector<1x128xf32>
      %cst_283 = arith.constant 1.000000e-16 : f32
      %1180 = vector.broadcast %cst_283 : f32 to vector<1x128xf32>
      %1181 = arith.addf %1179, %1180 : vector<1x128xf32>
      %1182 = tpu.reciprocal %1181 {approx = true} : vector<1x128xf32> -> vector<1x128xf32>
      %1183 = arith.mulf %1181, %1182 : vector<1x128xf32>
      %cst_284 = arith.constant 2.000000e+00 : f32
      %1184 = vector.broadcast %cst_284 : f32 to vector<1x128xf32>
      %1185 = arith.subf %1184, %1183 : vector<1x128xf32>
      %1186 = arith.mulf %1182, %1185 : vector<1x128xf32>
      %1187 = vector.broadcast %cst_14 : f32 to vector<1x128xf32>
      %1188 = arith.mulf %1187, %1186 : vector<1x128xf32>
      %1189 = vector.broadcast %1188 : vector<1x128xf32> to vector<32x128xf32>
      %1190 = arith.mulf %5, %1189 : vector<32x128xf32>
      %cst_285 = arith.constant dense<0.000000e+00> : vector<32xf32>
      %1191 = vector.multi_reduction <add>, %1190, %cst_285 [1] : vector<32x128xf32> to vector<32xf32>
      %1192 = vector.shape_cast %1191 : vector<32xf32> to vector<32x1xf32>
      %cst_286 = arith.constant 1.000000e-16 : f32
      %1193 = vector.broadcast %cst_286 : f32 to vector<32x1xf32>
      %1194 = arith.addf %1192, %1193 : vector<32x1xf32>
      %1195 = tpu.reciprocal %1194 {approx = true} : vector<32x1xf32> -> vector<32x1xf32>
      %1196 = arith.mulf %1194, %1195 : vector<32x1xf32>
      %cst_287 = arith.constant 2.000000e+00 : f32
      %1197 = vector.broadcast %cst_287 : f32 to vector<32x1xf32>
      %1198 = arith.subf %1197, %1196 : vector<32x1xf32>
      %1199 = arith.mulf %1195, %1198 : vector<32x1xf32>
      %1200 = vector.broadcast %cst_15 : f32 to vector<32x1xf32>
      %1201 = arith.mulf %1200, %1199 : vector<32x1xf32>
      %1202 = vector.broadcast %1201 : vector<32x1xf32> to vector<32x128xf32>
      %1203 = arith.mulf %1202, %5 : vector<32x128xf32>
      %cst_288 = arith.constant dense<0.000000e+00> : vector<128xf32>
      %1204 = vector.multi_reduction <add>, %1203, %cst_288 [0] : vector<32x128xf32> to vector<128xf32>
      %1205 = vector.shape_cast %1204 : vector<128xf32> to vector<1x128xf32>
      %cst_289 = arith.constant 1.000000e-16 : f32
      %1206 = vector.broadcast %cst_289 : f32 to vector<1x128xf32>
      %1207 = arith.addf %1205, %1206 : vector<1x128xf32>
      %1208 = tpu.reciprocal %1207 {approx = true} : vector<1x128xf32> -> vector<1x128xf32>
      %1209 = arith.mulf %1207, %1208 : vector<1x128xf32>
      %cst_290 = arith.constant 2.000000e+00 : f32
      %1210 = vector.broadcast %cst_290 : f32 to vector<1x128xf32>
      %1211 = arith.subf %1210, %1209 : vector<1x128xf32>
      %1212 = arith.mulf %1208, %1211 : vector<1x128xf32>
      %1213 = vector.broadcast %cst_14 : f32 to vector<1x128xf32>
      %1214 = arith.mulf %1213, %1212 : vector<1x128xf32>
      %1215 = vector.broadcast %1214 : vector<1x128xf32> to vector<32x128xf32>
      %1216 = arith.mulf %5, %1215 : vector<32x128xf32>
      %cst_291 = arith.constant dense<0.000000e+00> : vector<32xf32>
      %1217 = vector.multi_reduction <add>, %1216, %cst_291 [1] : vector<32x128xf32> to vector<32xf32>
      %1218 = vector.shape_cast %1217 : vector<32xf32> to vector<32x1xf32>
      %cst_292 = arith.constant 1.000000e-16 : f32
      %1219 = vector.broadcast %cst_292 : f32 to vector<32x1xf32>
      %1220 = arith.addf %1218, %1219 : vector<32x1xf32>
      %1221 = tpu.reciprocal %1220 {approx = true} : vector<32x1xf32> -> vector<32x1xf32>
      %1222 = arith.mulf %1220, %1221 : vector<32x1xf32>
      %cst_293 = arith.constant 2.000000e+00 : f32
      %1223 = vector.broadcast %cst_293 : f32 to vector<32x1xf32>
      %1224 = arith.subf %1223, %1222 : vector<32x1xf32>
      %1225 = arith.mulf %1221, %1224 : vector<32x1xf32>
      %1226 = vector.broadcast %cst_15 : f32 to vector<32x1xf32>
      %1227 = arith.mulf %1226, %1225 : vector<32x1xf32>
      %1228 = vector.broadcast %1227 : vector<32x1xf32> to vector<32x128xf32>
      %1229 = arith.mulf %1228, %5 : vector<32x128xf32>
      %cst_294 = arith.constant dense<0.000000e+00> : vector<128xf32>
      %1230 = vector.multi_reduction <add>, %1229, %cst_294 [0] : vector<32x128xf32> to vector<128xf32>
      %1231 = vector.shape_cast %1230 : vector<128xf32> to vector<1x128xf32>
      %cst_295 = arith.constant 1.000000e-16 : f32
      %1232 = vector.broadcast %cst_295 : f32 to vector<1x128xf32>
      %1233 = arith.addf %1231, %1232 : vector<1x128xf32>
      %1234 = tpu.reciprocal %1233 {approx = true} : vector<1x128xf32> -> vector<1x128xf32>
      %1235 = arith.mulf %1233, %1234 : vector<1x128xf32>
      %cst_296 = arith.constant 2.000000e+00 : f32
      %1236 = vector.broadcast %cst_296 : f32 to vector<1x128xf32>
      %1237 = arith.subf %1236, %1235 : vector<1x128xf32>
      %1238 = arith.mulf %1234, %1237 : vector<1x128xf32>
      %1239 = vector.broadcast %cst_14 : f32 to vector<1x128xf32>
      %1240 = arith.mulf %1239, %1238 : vector<1x128xf32>
      %1241 = vector.broadcast %1240 : vector<1x128xf32> to vector<32x128xf32>
      %1242 = arith.mulf %5, %1241 : vector<32x128xf32>
      %cst_297 = arith.constant dense<0.000000e+00> : vector<32xf32>
      %1243 = vector.multi_reduction <add>, %1242, %cst_297 [1] : vector<32x128xf32> to vector<32xf32>
      %1244 = vector.shape_cast %1243 : vector<32xf32> to vector<32x1xf32>
      %cst_298 = arith.constant 1.000000e-16 : f32
      %1245 = vector.broadcast %cst_298 : f32 to vector<32x1xf32>
      %1246 = arith.addf %1244, %1245 : vector<32x1xf32>
      %1247 = tpu.reciprocal %1246 {approx = true} : vector<32x1xf32> -> vector<32x1xf32>
      %1248 = arith.mulf %1246, %1247 : vector<32x1xf32>
      %cst_299 = arith.constant 2.000000e+00 : f32
      %1249 = vector.broadcast %cst_299 : f32 to vector<32x1xf32>
      %1250 = arith.subf %1249, %1248 : vector<32x1xf32>
      %1251 = arith.mulf %1247, %1250 : vector<32x1xf32>
      %1252 = vector.broadcast %cst_15 : f32 to vector<32x1xf32>
      %1253 = arith.mulf %1252, %1251 : vector<32x1xf32>
      %1254 = vector.broadcast %1253 : vector<32x1xf32> to vector<32x128xf32>
      %1255 = arith.mulf %1254, %5 : vector<32x128xf32>
      %cst_300 = arith.constant dense<0.000000e+00> : vector<128xf32>
      %1256 = vector.multi_reduction <add>, %1255, %cst_300 [0] : vector<32x128xf32> to vector<128xf32>
      %1257 = vector.shape_cast %1256 : vector<128xf32> to vector<1x128xf32>
      %cst_301 = arith.constant 1.000000e-16 : f32
      %1258 = vector.broadcast %cst_301 : f32 to vector<1x128xf32>
      %1259 = arith.addf %1257, %1258 : vector<1x128xf32>
      %1260 = tpu.reciprocal %1259 {approx = true} : vector<1x128xf32> -> vector<1x128xf32>
      %1261 = arith.mulf %1259, %1260 : vector<1x128xf32>
      %cst_302 = arith.constant 2.000000e+00 : f32
      %1262 = vector.broadcast %cst_302 : f32 to vector<1x128xf32>
      %1263 = arith.subf %1262, %1261 : vector<1x128xf32>
      %1264 = arith.mulf %1260, %1263 : vector<1x128xf32>
      %1265 = vector.broadcast %cst_14 : f32 to vector<1x128xf32>
      %1266 = arith.mulf %1265, %1264 : vector<1x128xf32>
      %1267 = vector.broadcast %1266 : vector<1x128xf32> to vector<32x128xf32>
      %1268 = arith.mulf %5, %1267 : vector<32x128xf32>
      %cst_303 = arith.constant dense<0.000000e+00> : vector<32xf32>
      %1269 = vector.multi_reduction <add>, %1268, %cst_303 [1] : vector<32x128xf32> to vector<32xf32>
      %1270 = vector.shape_cast %1269 : vector<32xf32> to vector<32x1xf32>
      %cst_304 = arith.constant 1.000000e-16 : f32
      %1271 = vector.broadcast %cst_304 : f32 to vector<32x1xf32>
      %1272 = arith.addf %1270, %1271 : vector<32x1xf32>
      %1273 = tpu.reciprocal %1272 {approx = true} : vector<32x1xf32> -> vector<32x1xf32>
      %1274 = arith.mulf %1272, %1273 : vector<32x1xf32>
      %cst_305 = arith.constant 2.000000e+00 : f32
      %1275 = vector.broadcast %cst_305 : f32 to vector<32x1xf32>
      %1276 = arith.subf %1275, %1274 : vector<32x1xf32>
      %1277 = arith.mulf %1273, %1276 : vector<32x1xf32>
      %1278 = vector.broadcast %cst_15 : f32 to vector<32x1xf32>
      %1279 = arith.mulf %1278, %1277 : vector<32x1xf32>
      %1280 = vector.broadcast %1279 : vector<32x1xf32> to vector<32x128xf32>
      %1281 = arith.mulf %1280, %5 : vector<32x128xf32>
      %cst_306 = arith.constant dense<0.000000e+00> : vector<128xf32>
      %1282 = vector.multi_reduction <add>, %1281, %cst_306 [0] : vector<32x128xf32> to vector<128xf32>
      %1283 = vector.shape_cast %1282 : vector<128xf32> to vector<1x128xf32>
      %cst_307 = arith.constant 1.000000e-16 : f32
      %1284 = vector.broadcast %cst_307 : f32 to vector<1x128xf32>
      %1285 = arith.addf %1283, %1284 : vector<1x128xf32>
      %1286 = tpu.reciprocal %1285 {approx = true} : vector<1x128xf32> -> vector<1x128xf32>
      %1287 = arith.mulf %1285, %1286 : vector<1x128xf32>
      %cst_308 = arith.constant 2.000000e+00 : f32
      %1288 = vector.broadcast %cst_308 : f32 to vector<1x128xf32>
      %1289 = arith.subf %1288, %1287 : vector<1x128xf32>
      %1290 = arith.mulf %1286, %1289 : vector<1x128xf32>
      %1291 = vector.broadcast %cst_14 : f32 to vector<1x128xf32>
      %1292 = arith.mulf %1291, %1290 : vector<1x128xf32>
      %1293 = vector.broadcast %1292 : vector<1x128xf32> to vector<32x128xf32>
      %1294 = arith.mulf %5, %1293 : vector<32x128xf32>
      %cst_309 = arith.constant dense<0.000000e+00> : vector<32xf32>
      %1295 = vector.multi_reduction <add>, %1294, %cst_309 [1] : vector<32x128xf32> to vector<32xf32>
      %1296 = vector.shape_cast %1295 : vector<32xf32> to vector<32x1xf32>
      %cst_310 = arith.constant 1.000000e-16 : f32
      %1297 = vector.broadcast %cst_310 : f32 to vector<32x1xf32>
      %1298 = arith.addf %1296, %1297 : vector<32x1xf32>
      %1299 = tpu.reciprocal %1298 {approx = true} : vector<32x1xf32> -> vector<32x1xf32>
      %1300 = arith.mulf %1298, %1299 : vector<32x1xf32>
      %cst_311 = arith.constant 2.000000e+00 : f32
      %1301 = vector.broadcast %cst_311 : f32 to vector<32x1xf32>
      %1302 = arith.subf %1301, %1300 : vector<32x1xf32>
      %1303 = arith.mulf %1299, %1302 : vector<32x1xf32>
      %1304 = vector.broadcast %cst_15 : f32 to vector<32x1xf32>
      %1305 = arith.mulf %1304, %1303 : vector<32x1xf32>
      %1306 = vector.broadcast %1305 : vector<32x1xf32> to vector<32x128xf32>
      %1307 = arith.mulf %1306, %5 : vector<32x128xf32>
      %cst_312 = arith.constant dense<0.000000e+00> : vector<128xf32>
      %1308 = vector.multi_reduction <add>, %1307, %cst_312 [0] : vector<32x128xf32> to vector<128xf32>
      %1309 = vector.shape_cast %1308 : vector<128xf32> to vector<1x128xf32>
      %cst_313 = arith.constant 1.000000e-16 : f32
      %1310 = vector.broadcast %cst_313 : f32 to vector<1x128xf32>
      %1311 = arith.addf %1309, %1310 : vector<1x128xf32>
      %1312 = tpu.reciprocal %1311 {approx = true} : vector<1x128xf32> -> vector<1x128xf32>
      %1313 = arith.mulf %1311, %1312 : vector<1x128xf32>
      %cst_314 = arith.constant 2.000000e+00 : f32
      %1314 = vector.broadcast %cst_314 : f32 to vector<1x128xf32>
      %1315 = arith.subf %1314, %1313 : vector<1x128xf32>
      %1316 = arith.mulf %1312, %1315 : vector<1x128xf32>
      %1317 = vector.broadcast %cst_14 : f32 to vector<1x128xf32>
      %1318 = arith.mulf %1317, %1316 : vector<1x128xf32>
      %1319 = vector.broadcast %1318 : vector<1x128xf32> to vector<32x128xf32>
      %1320 = arith.mulf %5, %1319 : vector<32x128xf32>
      %cst_315 = arith.constant dense<0.000000e+00> : vector<32xf32>
      %1321 = vector.multi_reduction <add>, %1320, %cst_315 [1] : vector<32x128xf32> to vector<32xf32>
      %1322 = vector.shape_cast %1321 : vector<32xf32> to vector<32x1xf32>
      %cst_316 = arith.constant 1.000000e-16 : f32
      %1323 = vector.broadcast %cst_316 : f32 to vector<32x1xf32>
      %1324 = arith.addf %1322, %1323 : vector<32x1xf32>
      %1325 = tpu.reciprocal %1324 {approx = true} : vector<32x1xf32> -> vector<32x1xf32>
      %1326 = arith.mulf %1324, %1325 : vector<32x1xf32>
      %cst_317 = arith.constant 2.000000e+00 : f32
      %1327 = vector.broadcast %cst_317 : f32 to vector<32x1xf32>
      %1328 = arith.subf %1327, %1326 : vector<32x1xf32>
      %1329 = arith.mulf %1325, %1328 : vector<32x1xf32>
      %1330 = vector.broadcast %cst_15 : f32 to vector<32x1xf32>
      %1331 = arith.mulf %1330, %1329 : vector<32x1xf32>
      %1332 = vector.broadcast %1331 : vector<32x1xf32> to vector<32x128xf32>
      %1333 = arith.mulf %1332, %5 : vector<32x128xf32>
      %cst_318 = arith.constant dense<0.000000e+00> : vector<128xf32>
      %1334 = vector.multi_reduction <add>, %1333, %cst_318 [0] : vector<32x128xf32> to vector<128xf32>
      %1335 = vector.shape_cast %1334 : vector<128xf32> to vector<1x128xf32>
      %cst_319 = arith.constant 1.000000e-16 : f32
      %1336 = vector.broadcast %cst_319 : f32 to vector<1x128xf32>
      %1337 = arith.addf %1335, %1336 : vector<1x128xf32>
      %1338 = tpu.reciprocal %1337 {approx = true} : vector<1x128xf32> -> vector<1x128xf32>
      %1339 = arith.mulf %1337, %1338 : vector<1x128xf32>
      %cst_320 = arith.constant 2.000000e+00 : f32
      %1340 = vector.broadcast %cst_320 : f32 to vector<1x128xf32>
      %1341 = arith.subf %1340, %1339 : vector<1x128xf32>
      %1342 = arith.mulf %1338, %1341 : vector<1x128xf32>
      %1343 = vector.broadcast %cst_14 : f32 to vector<1x128xf32>
      %1344 = arith.mulf %1343, %1342 : vector<1x128xf32>
      %1345 = vector.broadcast %1344 : vector<1x128xf32> to vector<32x128xf32>
      %1346 = arith.mulf %5, %1345 : vector<32x128xf32>
      %cst_321 = arith.constant dense<0.000000e+00> : vector<32xf32>
      %1347 = vector.multi_reduction <add>, %1346, %cst_321 [1] : vector<32x128xf32> to vector<32xf32>
      %1348 = vector.shape_cast %1347 : vector<32xf32> to vector<32x1xf32>
      %cst_322 = arith.constant 1.000000e-16 : f32
      %1349 = vector.broadcast %cst_322 : f32 to vector<32x1xf32>
      %1350 = arith.addf %1348, %1349 : vector<32x1xf32>
      %1351 = tpu.reciprocal %1350 {approx = true} : vector<32x1xf32> -> vector<32x1xf32>
      %1352 = arith.mulf %1350, %1351 : vector<32x1xf32>
      %cst_323 = arith.constant 2.000000e+00 : f32
      %1353 = vector.broadcast %cst_323 : f32 to vector<32x1xf32>
      %1354 = arith.subf %1353, %1352 : vector<32x1xf32>
      %1355 = arith.mulf %1351, %1354 : vector<32x1xf32>
      %1356 = vector.broadcast %cst_15 : f32 to vector<32x1xf32>
      %1357 = arith.mulf %1356, %1355 : vector<32x1xf32>
      %1358 = vector.broadcast %1357 : vector<32x1xf32> to vector<32x128xf32>
      %1359 = arith.mulf %1358, %5 : vector<32x128xf32>
      %cst_324 = arith.constant dense<0.000000e+00> : vector<128xf32>
      %1360 = vector.multi_reduction <add>, %1359, %cst_324 [0] : vector<32x128xf32> to vector<128xf32>
      %1361 = vector.shape_cast %1360 : vector<128xf32> to vector<1x128xf32>
      %1362 = arith.mulf %1344, %1361 : vector<1x128xf32>
      %1363 = vector.broadcast %cst_14 : f32 to vector<1x128xf32>
      %1364 = arith.subf %1362, %1363 : vector<1x128xf32>
      %1365 = math.absf %1364 : vector<1x128xf32>
      %1366 = vector.shape_cast %1365 : vector<1x128xf32> to vector<1x1x128xf32>
      %cst_325 = arith.constant dense<0.000000e+00> : vector<1xf32>
      %1367 = vector.multi_reduction <add>, %1366, %cst_325 [1, 2] : vector<1x1x128xf32> to vector<1xf32>
      %1368 = vector.shape_cast %1367 : vector<1xf32> to vector<1x1x1xf32>
      %1369 = vector.extract %1368[0, 0, 0] : f32 from vector<1x1x1xf32>
      %c1_i32_326 = arith.constant 1 : i32
      %1370 = arith.addi %arg6, %c1_i32_326 : i32
      scf.yield %1357, %1344, %1361, %1369, %1370 : vector<32x1xf32>, vector<1x128xf32>, vector<1x128xf32>, f32, i32
    }
    %cst_16 = arith.constant 5.000000e-03 : f32
    %46 = arith.cmpf ogt, %45#3, %cst_16 : f32
    %c49_i32 = arith.constant 49 : i32
    %c0_i32_17 = arith.constant 0 : i32
    %47 = arith.select %46, %c49_i32, %c0_i32_17 : i32
    %cst_18 = arith.constant 7.812500e-03 : f32
    %cst_19 = arith.constant 3.125000e-02 : f32
    %c0_i32_20 = arith.constant 0 : i32
    %48 = arith.subi %47, %c0_i32_20 : i32
    %49 = arith.addi %c0_i32_20, %48 : i32
    %c1_i32 = arith.constant 1 : i32
    %50:3 = scf.for %arg2 = %c0_i32_20 to %49 step %c1_i32 iter_args(%arg3 = %45#0, %arg4 = %45#1, %arg5 = %45#2) -> (vector<32x1xf32>, vector<1x128xf32>, vector<1x128xf32>)  : i32 {
      %cst_25 = arith.constant 1.000000e-16 : f32
      %62 = vector.broadcast %cst_25 : f32 to vector<1x128xf32>
      %63 = arith.addf %arg5, %62 : vector<1x128xf32>
      %64 = tpu.reciprocal %63 {approx = true} : vector<1x128xf32> -> vector<1x128xf32>
      %65 = arith.mulf %63, %64 : vector<1x128xf32>
      %cst_26 = arith.constant 2.000000e+00 : f32
      %66 = vector.broadcast %cst_26 : f32 to vector<1x128xf32>
      %67 = arith.subf %66, %65 : vector<1x128xf32>
      %68 = arith.mulf %64, %67 : vector<1x128xf32>
      %69 = vector.broadcast %cst_18 : f32 to vector<1x128xf32>
      %70 = arith.mulf %69, %68 : vector<1x128xf32>
      %71 = vector.broadcast %70 : vector<1x128xf32> to vector<32x128xf32>
      %72 = arith.mulf %5, %71 : vector<32x128xf32>
      %cst_27 = arith.constant dense<0.000000e+00> : vector<32xf32>
      %73 = vector.multi_reduction <add>, %72, %cst_27 [1] : vector<32x128xf32> to vector<32xf32>
      %74 = vector.shape_cast %73 : vector<32xf32> to vector<32x1xf32>
      %cst_28 = arith.constant 1.000000e-16 : f32
      %75 = vector.broadcast %cst_28 : f32 to vector<32x1xf32>
      %76 = arith.addf %74, %75 : vector<32x1xf32>
      %77 = tpu.reciprocal %76 {approx = true} : vector<32x1xf32> -> vector<32x1xf32>
      %78 = arith.mulf %76, %77 : vector<32x1xf32>
      %cst_29 = arith.constant 2.000000e+00 : f32
      %79 = vector.broadcast %cst_29 : f32 to vector<32x1xf32>
      %80 = arith.subf %79, %78 : vector<32x1xf32>
      %81 = arith.mulf %77, %80 : vector<32x1xf32>
      %82 = vector.broadcast %cst_19 : f32 to vector<32x1xf32>
      %83 = arith.mulf %82, %81 : vector<32x1xf32>
      %84 = vector.broadcast %83 : vector<32x1xf32> to vector<32x128xf32>
      %85 = arith.mulf %84, %5 : vector<32x128xf32>
      %cst_30 = arith.constant dense<0.000000e+00> : vector<128xf32>
      %86 = vector.multi_reduction <add>, %85, %cst_30 [0] : vector<32x128xf32> to vector<128xf32>
      %87 = vector.shape_cast %86 : vector<128xf32> to vector<1x128xf32>
      scf.yield %83, %70, %87 : vector<32x1xf32>, vector<1x128xf32>, vector<1x128xf32>
    }
    %51 = vector.broadcast %50#0 : vector<32x1xf32> to vector<32x128xf32>
    %52 = arith.mulf %51, %5 : vector<32x128xf32>
    %53 = vector.broadcast %50#1 : vector<1x128xf32> to vector<32x128xf32>
    %54 = arith.mulf %53, %0 : vector<32x128xf32>
    %55 = arith.mulf %52, %54 : vector<32x128xf32>
    %56 = vector.shape_cast %55 : vector<32x128xf32> to vector<1x32x128xf32>
    %cst_21 = arith.constant dense<0.000000e+00> : vector<1xf32>
    %57 = vector.multi_reduction <add>, %56, %cst_21 [1, 2] : vector<1x32x128xf32> to vector<1xf32>
    %58 = vector.shape_cast %57 : vector<1xf32> to vector<1x1x1xf32>
    %59 = vector.extract %58[0, 0, 0] : f32 from vector<1x1x1xf32>
    %cst_22 = arith.constant 2.500000e+02 : f32
    %60 = arith.mulf %59, %cst_22 : f32
    %c0_23 = arith.constant 0 : index
    %c0_24 = arith.constant 0 : index
    %61 = memref.load %arg1[%c0_23, %c0_24] : memref<1x1xf32, #tpu.memory_space<smem>>
    memref.store %60, %arg1[%c0_23, %c0_24] : memref<1x1xf32, #tpu.memory_space<smem>>
    return
  }
}

</mosaic_0001>

<bundles_post_ra>
// kernel: ecr_loss.1
= control target key start
LH: loop header
LB: loop body
LE: loop exit
PB: predicated region body
PF: predicated region fallthrough
CT: control target
= control target key end

     0   :  { %6 = vsyncpa [#allocation3], 0  ;;  %s4493_s0 = inlined_call_operand.hbm [shape: f32[32,128], index: 0, kind: input, shape index: {}]   ;;  %s4494_s1 = inlined_call_operand.hbm [shape: f32[1,1], index: 1, kind: output, shape index: {}]  }
   0x1   :  { %7 = vsyncpa [#allocation4], 0  ;;  %s3899_s6 = smov [#allocation2]   ;;  %s3735_s10 = scalar_lea.hbm %s4493_s0, 512 }
   0x2   :  { %s13_s7 = sshll.u32 %s3899_s6, 4  ;;  %p3736_p0 = scmp.ne.s32.totalorder %s4493_s0, %s3735_s10  ;;  %s14_s7 = int_to_ptr.vmem [resolvable:$true] %s13_s7 }
   0x3   :  { %p3739_p1 = scmp.lt.u32.totalorder %s3735_s10, %s4493_s0 }
   0x5   :  { %p3741_p2 = pnand %p3739_p1, %p3736_p0 }
   0x7   :  { %3744 = shalt.err (!%p3741_p2)
}
   0x8   :  { %s3745_s15 = scalar_lea.vmem %s14_s7, 512  ;;  %p3750_p4 = scmp.lt.s32.totalorder %s14_s7, %s14_s7 }
   0x9   :  { %p3746_p3 = scmp.ne.s32.totalorder %s14_s7, %s3745_s15  ;;  %p3751_p5 = scmp.lt.s32.totalorder %s3745_s15, %s3745_s15 }
   0xb   :  { %p3752_p6 = por %p3751_p5, %p3750_p4 }
   0xd   :  { %p3753_p7 = pnand %p3752_p6, %p3746_p3 }
   0xf   :  { %3756 = shalt.err (!%p3753_p7)
}
  0x10   :  { %s3900_s16 = smov 128   ;;  %s3901_s17 = smov 8  }
  0x11   :  { %19 = dma.hbm_to_vmem [thread:$0]  %s4493_s0, 512, %s14_s7, [#allocation3], %s3900_s16, %s3900_s16, %s3901_s17  }
  0x12   :  { %3831 = dma.done.wait [#allocation3], 512  }
  0x13   :  { %3832 = vsyncadd [#allocation3], 4294966784  ;;  %v3925_v0 = vld [vmem:[#allocation2] sm:$0xff]  ;;  %v3927_v1 = vld [vmem:[#allocation2 + $0x8] sm:$0xff]  ;;  %vm114_vm0 = vcmask 1040384  }
  0x14   :  { %v3929_v2 = vld [vmem:[#allocation2 + $0x18] sm:$0xff]  ;;  %v27_v3 = vsub.f32 0.0, %v3925_v0  ;;  %v28_v4 = vsub.f32 0.0, %v3927_v1  ;;  %v3934_v6 = vld [vmem:[#allocation2 + $0x10] sm:$0xff] }
  0x15   :  { %v30_v5 = vsub.f32 0.0, %v3929_v2  ;;  %v29_v7 = vsub.f32 0.0, %v3934_v6 }
  0x16   :  { %v31_v8 = vmul.f32 20.0, %v27_v3  ;;  %v32_v9 = vmul.f32 20.0, %v28_v4 }
  0x17   :  { %v34_v10 = vmul.f32 20.0, %v30_v5  ;;  %v33_v11 = vmul.f32 20.0, %v29_v7 }
  0x18   :  { %v35_v12 = vmul.f32 1.442695, %v31_v8  ;;  %v37_v13 = vmul.f32 1.442695, %v32_v9 }
  0x19   :  { %v41_v14 = vmul.f32 1.442695, %v34_v10  ;;  %v39_v15 = vmul.f32 1.442695, %v33_v11 }
  0x1a   :  { %3207 = vpow2.f32 %v35_v12 }
  0x1b   :  { %3209 = vpow2.f32 %v37_v13 }
  0x1c   :  { %3211 = vpow2.f32 %v41_v14 }
  0x1d   :  { %3213 = vpow2.f32 %v39_v15 }
  0x24   :  { %v3937_v16 = vpop.eup %3207 }
  0x25   :  { %v3939_v17 = vpop.eup %3209  ;;  %v43_v18 = vmul.f32 0.03125, %v3937_v16 }
  0x26   :  { %v3942_v19 = vpop.eup %3211  ;;  %v44_v20 = vmul.f32 0.03125, %v3939_v17 }
  0x27   :  { %v3945_v21 = vpop.eup %3213  ;;  %v46_v23 = vmul.f32 0.03125, %v3942_v19 }
  0x28   :  { %v45_v22 = vmul.f32 0.03125, %v3945_v21  ;;  %v47_v24 = vadd.f32 %v44_v20, %v43_v18 }
  0x2a   :  { %v48_v25 = vadd.f32 %v47_v24, %v45_v22 }
  0x2c   :  { %v49_v26 = vadd.f32 %v48_v25, %v46_v23 }
  0x2e   :  { %v50_v27 = vrot.slane %v49_v26, 4 }
  0x30   :  { %v51_v28 = vadd.f32 %v50_v27, %v49_v26 }
  0x32   :  { %v52_v29 = vrot.slane %v51_v28, 2 }
  0x34   :  { %v53_v30 = vadd.f32 %v52_v29, %v51_v28 }
  0x36   :  { %v54_v31 = vrot.slane %v53_v30, 1 }
  0x38   :  { %v55_v32 = vadd.f32 %v54_v31, %v53_v30 }
  0x3a   :  { %v56_v33 = vadd.f32 1e-16, %v55_v32 }
  0x3c   :  { %3215 = vrcp.f32 %v56_v33 }
  0x46   :  { %v3216_v34 = vpop.eup %3215 }
  0x47   :  { %v58_v35 = vmul.f32 %v3216_v34, %v56_v33 }
  0x49   :  { %v59_v36 = vsub.f32 2.0, %v58_v35 }
  0x4b   :  { %v60_v37 = vmul.f32 %v3216_v34, %v59_v36 }
  0x4d   :  { %v3949_v38 = vmul.f32 0.0078125, %v60_v37  }
  0x4f   :  { %v64_v39 = vmul.f32 %v3945_v21, %v3949_v38  ;;  %v62_v40 = vmul.f32 %v3937_v16, %v3949_v38  ;;  %v65_v41 = vmul.f32 %v3942_v19, %v3949_v38  ;;  %v63_v42 = vmul.f32 %v3939_v17, %v3949_v38 }
  0x51   :  { %70 = vadd.xlane.f32.xlu1 %v64_v39  ;;  %66 = vadd.xlane.f32.xlu0 %v62_v40 }
  0x55   :  { %72 = vadd.xlane.f32.xlu1 %v65_v41  ;;  %68 = vadd.xlane.f32.xlu0 %v63_v42 }
  0xde   :  { %v71_v43 = vpop.xlane.xlu1 %70  ;;  %v67_v44 = vpop.xlane.xlu0 %66 }
  0xdf   :  { %v76_v45 = vadd.f32 1e-16, %v71_v43  ;;  %v74_v46 = vadd.f32 1e-16, %v67_v44 }
  0xe1   :  { %3217 = vrcp.f32 %v76_v45 }
  0xe2   :  { %3219 = vrcp.f32 %v74_v46  ;;  %v73_v47 = vpop.xlane.xlu1 %72  ;;  %v69_v48 = vpop.xlane.xlu0 %68 }
  0xe3   :  { %v77_v49 = vadd.f32 1e-16, %v73_v47  ;;  %v75_v50 = vadd.f32 1e-16, %v69_v48 }
  0xe5   :  { %3221 = vrcp.f32 %v77_v49 }
  0xe6   :  { %3223 = vrcp.f32 %v75_v50 }
  0xeb   :  { %v3218_v51 = vpop.eup %3217 }
  0xec   :  { %v3220_v52 = vpop.eup %3219  ;;  %v84_v53 = vmul.f32 %v3218_v51, %v76_v45 }
  0xed   :  { %v82_v54 = vmul.f32 %v3220_v52, %v74_v46 }
  0xee   :  { %v88_v56 = vsub.f32 2.0, %v84_v53 }
  0xef   :  { %v3222_v55 = vpop.eup %3221  ;;  %v86_v57 = vsub.f32 2.0, %v82_v54 }
  0xf0   :  { %v3224_v58 = vpop.eup %3223  ;;  %v85_v59 = vmul.f32 %v3222_v55, %v77_v49  ;;  %v92_v63 = vmul.f32 %v3218_v51, %v88_v56 }
  0xf1   :  { %v90_v60 = vmul.f32 %v3220_v52, %v86_v57  ;;  %v83_v61 = vmul.f32 %v3224_v58, %v75_v50 }
  0xf2   :  { %v89_v62 = vsub.f32 2.0, %v85_v59  ;;  %v96_v8 = vmul.f32 0.03125, %v92_v63  }
  0xf3   :  { %v87_v3 = vsub.f32 2.0, %v83_v61  ;;  %v94_v4 = vmul.f32 0.03125, %v90_v60  }
  0xf4   :  { %v93_v5 = vmul.f32 %v3222_v55, %v89_v62  ;;  %v100_v13 = vmul.f32 %v3945_v21, %v96_v8 }
  0xf5   :  { %v91_v7 = vmul.f32 %v3224_v58, %v87_v3  ;;  %v98_v10 = vmul.f32 %v3937_v16, %v94_v4 }
  0xf6   :  { %v97_v11 = vmul.f32 0.03125, %v93_v5  }
  0xf7   :  { %v95_v9 = vmul.f32 0.03125, %v91_v7  }
  0xf8   :  { %v101_v15 = vmul.f32 %v3942_v19, %v97_v11 }
  0xf9   :  { %v99_v12 = vmul.f32 %v3939_v17, %v95_v9 }
  0xfb   :  { %v102_v14 = vadd.f32 %v99_v12, %v98_v10 }
  0xfd   :  { %v103_v18 = vadd.f32 %v102_v14, %v100_v13 }
  0xff   :  { %v104_v20 = vadd.f32 %v103_v18, %v101_v15 }
 0x101   :  { %v105_v22 = vrot.slane %v104_v20, 4 }
 0x103   :  { %v106_v23 = vadd.f32 %v105_v22, %v104_v20 }
 0x105   :  { %v107_v24 = vrot.slane %v106_v23, 2 }
 0x107   :  { %v108_v25 = vadd.f32 %v107_v24, %v106_v23 }
 0x109   :  { %v109_v26 = vrot.slane %v108_v25, 1 }
 0x10b   :  { %v110_v27 = vadd.f32 %v109_v26, %v108_v25  }
 0x10d   :  { %v111_v28 = vmul.f32 %v110_v27, %v3949_v38  ;;  %v4495_v40 = vmov %v110_v27 }
 0x10f   :  { %v3065_v29 = vadd.f32 -0.0078125, %v111_v28 }
 0x111   :  { %v113_v30 = vand.u32 2147483647, %v3065_v29 }
 0x113   :  { %v115_v31 = vsel %vm114_vm0, %v113_v30, 0.0 }
 0x114   :  { %116 = vadd.xlane.f32.xlu0 %v115_v31 }
 0x1a1   :  { %v117_v32 = vpop.xlane.xlu0 %116 }
 0x1a2   :  { %v118_v33 = vrot.slane %v117_v32, 4 }
 0x1a4   :  { %v119_v34 = vadd.f32 %v118_v33, %v117_v32 }
 0x1a6   :  { %v120_v35 = vrot.slane %v119_v34, 2 }
 0x1a8   :  { %v121_v36 = vadd.f32 %v120_v35, %v119_v34 }
 0x1aa   :  { %v122_v37 = vrot.slane %v121_v36, 1 }
 0x1ac   :  { %v123_v39 = vadd.f32 %v122_v37, %v121_v36 }
 0x1ae   :  { %3069 = vpush %v123_v39 }
 0x1df   :  { %s3070_s0 = spop %3069  }
 0x1e0   :  { %p3022_p8 = scmp.gt.f32.partialorder %s3070_s0, 0.005 }
 0x1e1   :  { %s3980_s20 = smov (%p3022_p8), 0  }
 0x1e2   :  { %3025 = sbr.rel (!%p3022_p8) target bundleno = 11163 (0x2b9b), region = 37 }
 0x1e9 LB: > { %v140_v41 = vadd.f32 1e-16, %v3841_v27  ;;  %s2903_s20 = sadd.s32 1, %s3837_s20   ;;  %v3841_v27 = vphi %v110_v27, %v4496_v27   ;;  %s3837_s20 = sphi %s3980_s20, %s2903_s20  }
 0x1ea   : > { %p135_p10 = scmp.lt.s32.totalorder %s2903_s20, 99 }
 0x1eb   : > { %3225 = vrcp.f32 %v140_v41 }
 0x1f5   : > { %v3226_v42 = vpop.eup %3225 }
 0x1f6   : > { %v142_v43 = vmul.f32 %v3226_v42, %v140_v41 }
 0x1f8   : > { %v143_v44 = vsub.f32 2.0, %v142_v43 }
 0x1fa   : > { %v144_v45 = vmul.f32 %v3226_v42, %v143_v44 }
 0x1fc   : > { %v145_v46 = vmul.f32 0.0078125, %v144_v45 }
 0x1fe   : > { %v148_v47 = vmul.f32 %v3945_v21, %v145_v46  ;;  %v146_v38 = vmul.f32 %v3937_v16, %v145_v46  ;;  %v149_v48 = vmul.f32 %v3942_v19, %v145_v46  ;;  %v147_v49 = vmul.f32 %v3939_v17, %v145_v46 }
 0x200   : > { %154 = vadd.xlane.f32.xlu1 %v148_v47  ;;  %150 = vadd.xlane.f32.xlu0 %v146_v38 }
 0x204   : > { %156 = vadd.xlane.f32.xlu1 %v149_v48  ;;  %152 = vadd.xlane.f32.xlu0 %v147_v49 }
 0x28d   : > { %v155_v50 = vpop.xlane.xlu1 %154  ;;  %v151_v51 = vpop.xlane.xlu0 %150 }
 0x28e   : > { %v160_v52 = vadd.f32 1e-16, %v155_v50  ;;  %v158_v53 = vadd.f32 1e-16, %v151_v51 }
 0x290   : > { %3227 = vrcp.f32 %v160_v52 }
 0x291   : > { %3229 = vrcp.f32 %v158_v53  ;;  %v157_v54 = vpop.xlane.xlu1 %156  ;;  %v153_v55 = vpop.xlane.xlu0 %152 }
 0x292   : > { %v161_v56 = vadd.f32 1e-16, %v157_v54  ;;  %v159_v57 = vadd.f32 1e-16, %v153_v55 }
 0x294   : > { %3231 = vrcp.f32 %v161_v56 }
 0x295   : > { %3233 = vrcp.f32 %v159_v57 }
 0x29a   : > { %v3228_v58 = vpop.eup %3227 }
 0x29b   : > { %v3230_v59 = vpop.eup %3229  ;;  %v168_v60 = vmul.f32 %v3228_v58, %v160_v52 }
 0x29c   : > { %v166_v61 = vmul.f32 %v3230_v59, %v158_v53 }
 0x29d   : > { %v172_v63 = vsub.f32 2.0, %v168_v60 }
 0x29e   : > { %v3232_v62 = vpop.eup %3231  ;;  %v170_v3 = vsub.f32 2.0, %v166_v61 }
 0x29f   : > { %v3234_v4 = vpop.eup %3233  ;;  %v169_v5 = vmul.f32 %v3232_v62, %v161_v56  ;;  %v176_v10 = vmul.f32 %v3228_v58, %v172_v63 }
 0x2a0   : > { %v174_v7 = vmul.f32 %v3230_v59, %v170_v3  ;;  %v167_v8 = vmul.f32 %v3234_v4, %v159_v57 }
 0x2a1   : > { %v173_v9 = vsub.f32 2.0, %v169_v5  ;;  %v180_v15 = vmul.f32 0.03125, %v176_v10 }
 0x2a2   : > { %v171_v11 = vsub.f32 2.0, %v167_v8  ;;  %v178_v12 = vmul.f32 0.03125, %v174_v7 }
 0x2a3   : > { %v177_v13 = vmul.f32 %v3232_v62, %v173_v9  ;;  %v184_v24 = vmul.f32 %v3945_v21, %v180_v15 }
 0x2a4   : > { %v175_v14 = vmul.f32 %v3234_v4, %v171_v11  ;;  %v182_v20 = vmul.f32 %v3937_v16, %v178_v12 }
 0x2a5   : > { %v181_v22 = vmul.f32 0.03125, %v177_v13 }
 0x2a6   : > { %v179_v18 = vmul.f32 0.03125, %v175_v14 }
 0x2a7   : > { %v185_v26 = vmul.f32 %v3942_v19, %v181_v22 }
 0x2a8   : > { %v183_v23 = vmul.f32 %v3939_v17, %v179_v18 }
 0x2aa   : > { %v186_v25 = vadd.f32 %v183_v23, %v182_v20 }
 0x2ac   : > { %v187_v27 = vadd.f32 %v186_v25, %v184_v24 }
 0x2ae   : > { %v188_v28 = vadd.f32 %v187_v27, %v185_v26 }
 0x2b0   : > { %v189_v29 = vrot.slane %v188_v28, 4 }
 0x2b2   : > { %v190_v30 = vadd.f32 %v189_v29, %v188_v28 }
 0x2b4   : > { %v191_v31 = vrot.slane %v190_v30, 2 }
 0x2b6   : > { %v192_v32 = vadd.f32 %v191_v31, %v190_v30 }
 0x2b8   : > { %v193_v33 = vrot.slane %v192_v32, 1 }
 0x2ba   : > { %v194_v34 = vadd.f32 %v193_v33, %v192_v32 }
 0x2bc   : > { %v195_v35 = vadd.f32 1e-16, %v194_v34 }
 0x2be   : > { %3235 = vrcp.f32 %v195_v35 }
 0x2c8   : > { %v3236_v36 = vpop.eup %3235 }
 0x2c9   : > { %v197_v37 = vmul.f32 %v3236_v36, %v195_v35 }
 0x2cb   : > { %v198_v39 = vsub.f32 2.0, %v197_v37 }
 0x2cd   : > { %v199_v40 = vmul.f32 %v3236_v36, %v198_v39 }
 0x2cf   : > { %v200_v41 = vmul.f32 0.0078125, %v199_v40 }
 0x2d1   : > { %v202_v42 = vmul.f32 %v3939_v17, %v200_v41  ;;  %v201_v43 = vmul.f32 %v3937_v16, %v200_v41  ;;  %v204_v44 = vmul.f32 %v3942_v19, %v200_v41  ;;  %v203_v45 = vmul.f32 %v3945_v21, %v200_v41 }
 0x2d3   : > { %207 = vadd.xlane.f32.xlu1 %v202_v42  ;;  %205 = vadd.xlane.f32.xlu0 %v201_v43 }
 0x2d7   : > { %211 = vadd.xlane.f32.xlu1 %v204_v44  ;;  %209 = vadd.xlane.f32.xlu0 %v203_v45 }
 0x360   : > { %v208_v46 = vpop.xlane.xlu1 %207  ;;  %v206_v47 = vpop.xlane.xlu0 %205 }
 0x361   : > { %v214_v38 = vadd.f32 1e-16, %v208_v46  ;;  %v213_v48 = vadd.f32 1e-16, %v206_v47 }
 0x363   : > { %3237 = vrcp.f32 %v214_v38 }
 0x364   : > { %3239 = vrcp.f32 %v213_v48  ;;  %v212_v49 = vpop.xlane.xlu1 %211  ;;  %v210_v50 = vpop.xlane.xlu0 %209 }
 0x365   : > { %v216_v51 = vadd.f32 1e-16, %v212_v49  ;;  %v215_v52 = vadd.f32 1e-16, %v210_v50 }
 0x367   : > { %3241 = vrcp.f32 %v216_v51 }
 0x368   : > { %3243 = vrcp.f32 %v215_v52 }
 0x36d   : > { %v3238_v53 = vpop.eup %3237 }
 0x36e   : > { %v3240_v54 = vpop.eup %3239  ;;  %v222_v55 = vmul.f32 %v3238_v53, %v214_v38 }
 0x36f   : > { %v221_v56 = vmul.f32 %v3240_v54, %v213_v48 }
 0x370   : > { %v226_v57 = vsub.f32 2.0, %v222_v55 }
 0x371   : > { %v3242_v58 = vpop.eup %3241  ;;  %v225_v59 = vsub.f32 2.0, %v221_v56 }
 0x372   : > { %v3244_v60 = vpop.eup %3243  ;;  %v230_v61 = vmul.f32 %v3238_v53, %v226_v57  ;;  %v224_v62 = vmul.f32 %v3242_v58, %v216_v51 }
 0x373   : > { %v229_v63 = vmul.f32 %v3240_v54, %v225_v59  ;;  %v223_v3 = vmul.f32 %v3244_v60, %v215_v52 }
 0x374   : > { %v234_v4 = vmul.f32 0.03125, %v230_v61  ;;  %v228_v5 = vsub.f32 2.0, %v224_v62 }
 0x375   : > { %v233_v7 = vmul.f32 0.03125, %v229_v63  ;;  %v227_v8 = vsub.f32 2.0, %v223_v3 }
 0x376   : > { %v232_v9 = vmul.f32 %v3242_v58, %v228_v5  ;;  %v238_v10 = vmul.f32 %v3939_v17, %v234_v4 }
 0x377   : > { %v237_v11 = vmul.f32 %v3937_v16, %v233_v7  ;;  %v231_v12 = vmul.f32 %v3244_v60, %v227_v8 }
 0x378   : > { %v236_v13 = vmul.f32 0.03125, %v232_v9 }
 0x379   : > { %v235_v14 = vmul.f32 0.03125, %v231_v12  ;;  %v241_v15 = vadd.f32 %v238_v10, %v237_v11 }
 0x37a   : > { %v240_v20 = vmul.f32 %v3942_v19, %v236_v13 }
 0x37b   : > { %v239_v18 = vmul.f32 %v3945_v21, %v235_v14 }
 0x37d   : > { %v242_v22 = vadd.f32 %v241_v15, %v239_v18 }
 0x37f   : > { %v243_v23 = vadd.f32 %v242_v22, %v240_v20 }
 0x381   : > { %v244_v24 = vrot.slane %v243_v23, 4 }
 0x383   : > { %v245_v25 = vadd.f32 %v244_v24, %v243_v23 }
 0x385   : > { %v246_v26 = vrot.slane %v245_v25, 2 }
 0x387   : > { %v247_v27 = vadd.f32 %v246_v26, %v245_v25 }
 0x389   : > { %v248_v28 = vrot.slane %v247_v27, 1 }
 0x38b   : > { %v249_v29 = vadd.f32 %v248_v28, %v247_v27 }
 0x38d   : > { %v250_v30 = vadd.f32 1e-16, %v249_v29 }
 0x38f   : > { %3245 = vrcp.f32 %v250_v30 }
 0x399   : > { %v3246_v31 = vpop.eup %3245 }
 0x39a   : > { %v252_v32 = vmul.f32 %v3246_v31, %v250_v30 }
 0x39c   : > { %v253_v33 = vsub.f32 2.0, %v252_v32 }
 0x39e   : > { %v254_v34 = vmul.f32 %v3246_v31, %v253_v33 }
 0x3a0   : > { %v255_v35 = vmul.f32 0.0078125, %v254_v34 }
 0x3a2   : > { %v257_v36 = vmul.f32 %v3939_v17, %v255_v35  ;;  %v256_v37 = vmul.f32 %v3937_v16, %v255_v35  ;;  %v259_v39 = vmul.f32 %v3942_v19, %v255_v35  ;;  %v258_v40 = vmul.f32 %v3945_v21, %v255_v35 }
 0x3a4   : > { %262 = vadd.xlane.f32.xlu1 %v257_v36  ;;  %260 = vadd.xlane.f32.xlu0 %v256_v37 }
 0x3a8   : > { %266 = vadd.xlane.f32.xlu1 %v259_v39  ;;  %264 = vadd.xlane.f32.xlu0 %v258_v40 }
 0x431   : > { %v263_v41 = vpop.xlane.xlu1 %262  ;;  %v261_v42 = vpop.xlane.xlu0 %260 }
 0x432   : > { %v269_v43 = vadd.f32 1e-16, %v263_v41  ;;  %v268_v44 = vadd.f32 1e-16, %v261_v42 }
 0x434   : > { %3247 = vrcp.f32 %v269_v43 }
 0x435   : > { %3249 = vrcp.f32 %v268_v44  ;;  %v267_v45 = vpop.xlane.xlu1 %266  ;;  %v265_v46 = vpop.xlane.xlu0 %264 }
 0x436   : > { %v271_v47 = vadd.f32 1e-16, %v267_v45  ;;  %v270_v38 = vadd.f32 1e-16, %v265_v46 }
 0x438   : > { %3251 = vrcp.f32 %v271_v47 }
 0x439   : > { %3253 = vrcp.f32 %v270_v38 }
 0x43e   : > { %v3248_v48 = vpop.eup %3247 }
 0x43f   : > { %v3250_v49 = vpop.eup %3249  ;;  %v277_v50 = vmul.f32 %v3248_v48, %v269_v43 }
 0x440   : > { %v276_v51 = vmul.f32 %v3250_v49, %v268_v44 }
 0x441   : > { %v281_v52 = vsub.f32 2.0, %v277_v50 }
 0x442   : > { %v3252_v53 = vpop.eup %3251  ;;  %v280_v54 = vsub.f32 2.0, %v276_v51 }
 0x443   : > { %v3254_v55 = vpop.eup %3253  ;;  %v285_v56 = vmul.f32 %v3248_v48, %v281_v52  ;;  %v279_v57 = vmul.f32 %v3252_v53, %v271_v47 }
 0x444   : > { %v284_v58 = vmul.f32 %v3250_v49, %v280_v54  ;;  %v278_v59 = vmul.f32 %v3254_v55, %v270_v38 }
 0x445   : > { %v289_v60 = vmul.f32 0.03125, %v285_v56  ;;  %v283_v61 = vsub.f32 2.0, %v279_v57 }
 0x446   : > { %v288_v62 = vmul.f32 0.03125, %v284_v58  ;;  %v282_v63 = vsub.f32 2.0, %v278_v59 }
 0x447   : > { %v287_v3 = vmul.f32 %v3252_v53, %v283_v61  ;;  %v293_v4 = vmul.f32 %v3939_v17, %v289_v60 }
 0x448   : > { %v292_v5 = vmul.f32 %v3937_v16, %v288_v62  ;;  %v286_v7 = vmul.f32 %v3254_v55, %v282_v63 }
 0x449   : > { %v291_v8 = vmul.f32 0.03125, %v287_v3 }
 0x44a   : > { %v290_v9 = vmul.f32 0.03125, %v286_v7  ;;  %v296_v10 = vadd.f32 %v293_v4, %v292_v5 }
 0x44b   : > { %v295_v12 = vmul.f32 %v3942_v19, %v291_v8 }
 0x44c   : > { %v294_v11 = vmul.f32 %v3945_v21, %v290_v9 }
 0x44e   : > { %v297_v13 = vadd.f32 %v296_v10, %v294_v11 }
 0x450   : > { %v298_v14 = vadd.f32 %v297_v13, %v295_v12 }
 0x452   : > { %v299_v15 = vrot.slane %v298_v14, 4 }
 0x454   : > { %v300_v18 = vadd.f32 %v299_v15, %v298_v14 }
 0x456   : > { %v301_v20 = vrot.slane %v300_v18, 2 }
 0x458   : > { %v302_v22 = vadd.f32 %v301_v20, %v300_v18 }
 0x45a   : > { %v303_v23 = vrot.slane %v302_v22, 1 }
 0x45c   : > { %v304_v24 = vadd.f32 %v303_v23, %v302_v22 }
 0x45e   : > { %v305_v25 = vadd.f32 1e-16, %v304_v24 }
 0x460   : > { %3255 = vrcp.f32 %v305_v25 }
 0x46a   : > { %v3256_v26 = vpop.eup %3255 }
 0x46b   : > { %v307_v27 = vmul.f32 %v3256_v26, %v305_v25 }
 0x46d   : > { %v308_v28 = vsub.f32 2.0, %v307_v27 }
 0x46f   : > { %v309_v29 = vmul.f32 %v3256_v26, %v308_v28 }
 0x471   : > { %v310_v30 = vmul.f32 0.0078125, %v309_v29 }
 0x473   : > { %v312_v31 = vmul.f32 %v3939_v17, %v310_v30  ;;  %v311_v32 = vmul.f32 %v3937_v16, %v310_v30  ;;  %v314_v33 = vmul.f32 %v3942_v19, %v310_v30  ;;  %v313_v34 = vmul.f32 %v3945_v21, %v310_v30 }
 0x475   : > { %317 = vadd.xlane.f32.xlu1 %v312_v31  ;;  %315 = vadd.xlane.f32.xlu0 %v311_v32 }
 0x479   : > { %321 = vadd.xlane.f32.xlu1 %v314_v33  ;;  %319 = vadd.xlane.f32.xlu0 %v313_v34 }
 0x502   : > { %v318_v35 = vpop.xlane.xlu1 %317  ;;  %v316_v36 = vpop.xlane.xlu0 %315 }
 0x503   : > { %v324_v37 = vadd.f32 1e-16, %v318_v35  ;;  %v323_v39 = vadd.f32 1e-16, %v316_v36 }
 0x505   : > { %3257 = vrcp.f32 %v324_v37 }
 0x506   : > { %3259 = vrcp.f32 %v323_v39  ;;  %v322_v40 = vpop.xlane.xlu1 %321  ;;  %v320_v41 = vpop.xlane.xlu0 %319 }
 0x507   : > { %v326_v42 = vadd.f32 1e-16, %v322_v40  ;;  %v325_v43 = vadd.f32 1e-16, %v320_v41 }
 0x509   : > { %3261 = vrcp.f32 %v326_v42 }
 0x50a   : > { %3263 = vrcp.f32 %v325_v43 }
 0x50f   : > { %v3258_v44 = vpop.eup %3257 }
 0x510   : > { %v3260_v45 = vpop.eup %3259  ;;  %v332_v46 = vmul.f32 %v3258_v44, %v324_v37 }
 0x511   : > { %v331_v47 = vmul.f32 %v3260_v45, %v323_v39 }
 0x512   : > { %v336_v38 = vsub.f32 2.0, %v332_v46 }
 0x513   : > { %v3262_v48 = vpop.eup %3261  ;;  %v335_v49 = vsub.f32 2.0, %v331_v47 }
 0x514   : > { %v3264_v50 = vpop.eup %3263  ;;  %v340_v51 = vmul.f32 %v3258_v44, %v336_v38  ;;  %v334_v52 = vmul.f32 %v3262_v48, %v326_v42 }
 0x515   : > { %v339_v53 = vmul.f32 %v3260_v45, %v335_v49  ;;  %v333_v54 = vmul.f32 %v3264_v50, %v325_v43 }
 0x516   : > { %v344_v55 = vmul.f32 0.03125, %v340_v51  ;;  %v338_v56 = vsub.f32 2.0, %v334_v52 }
 0x517   : > { %v343_v57 = vmul.f32 0.03125, %v339_v53  ;;  %v337_v58 = vsub.f32 2.0, %v333_v54 }
 0x518   : > { %v342_v59 = vmul.f32 %v3262_v48, %v338_v56  ;;  %v348_v60 = vmul.f32 %v3939_v17, %v344_v55 }
 0x519   : > { %v347_v61 = vmul.f32 %v3937_v16, %v343_v57  ;;  %v341_v62 = vmul.f32 %v3264_v50, %v337_v58 }
 0x51a   : > { %v346_v63 = vmul.f32 0.03125, %v342_v59 }
 0x51b   : > { %v345_v3 = vmul.f32 0.03125, %v341_v62  ;;  %v351_v4 = vadd.f32 %v348_v60, %v347_v61 }
 0x51c   : > { %v350_v7 = vmul.f32 %v3942_v19, %v346_v63 }
 0x51d   : > { %v349_v5 = vmul.f32 %v3945_v21, %v345_v3 }
 0x51f   : > { %v352_v8 = vadd.f32 %v351_v4, %v349_v5 }
 0x521   : > { %v353_v9 = vadd.f32 %v352_v8, %v350_v7 }
 0x523   : > { %v354_v10 = vrot.slane %v353_v9, 4 }
 0x525   : > { %v355_v11 = vadd.f32 %v354_v10, %v353_v9 }
 0x527   : > { %v356_v12 = vrot.slane %v355_v11, 2 }
 0x529   : > { %v357_v13 = vadd.f32 %v356_v12, %v355_v11 }
 0x52b   : > { %v358_v14 = vrot.slane %v357_v13, 1 }
 0x52d   : > { %v359_v15 = vadd.f32 %v358_v14, %v357_v13 }
 0x52f   : > { %v360_v18 = vadd.f32 1e-16, %v359_v15 }
 0x531   : > { %3265 = vrcp.f32 %v360_v18 }
 0x53b   : > { %v3266_v20 = vpop.eup %3265 }
 0x53c   : > { %v362_v22 = vmul.f32 %v3266_v20, %v360_v18 }
 0x53e   : > { %v363_v23 = vsub.f32 2.0, %v362_v22 }
 0x540   : > { %v364_v24 = vmul.f32 %v3266_v20, %v363_v23 }
 0x542   : > { %v365_v25 = vmul.f32 0.0078125, %v364_v24 }
 0x544   : > { %v367_v26 = vmul.f32 %v3939_v17, %v365_v25  ;;  %v366_v27 = vmul.f32 %v3937_v16, %v365_v25  ;;  %v369_v28 = vmul.f32 %v3942_v19, %v365_v25  ;;  %v368_v29 = vmul.f32 %v3945_v21, %v365_v25 }
 0x546   : > { %372 = vadd.xlane.f32.xlu1 %v367_v26  ;;  %370 = vadd.xlane.f32.xlu0 %v366_v27 }
 0x54a   : > { %376 = vadd.xlane.f32.xlu1 %v369_v28  ;;  %374 = vadd.xlane.f32.xlu0 %v368_v29 }
 0x5d3   : > { %v373_v30 = vpop.xlane.xlu1 %372  ;;  %v371_v31 = vpop.xlane.xlu0 %370 }
 0x5d4   : > { %v379_v32 = vadd.f32 1e-16, %v373_v30  ;;  %v378_v33 = vadd.f32 1e-16, %v371_v31 }
 0x5d6   : > { %3267 = vrcp.f32 %v379_v32 }
 0x5d7   : > { %3269 = vrcp.f32 %v378_v33  ;;  %v377_v34 = vpop.xlane.xlu1 %376  ;;  %v375_v35 = vpop.xlane.xlu0 %374 }
 0x5d8   : > { %v381_v36 = vadd.f32 1e-16, %v377_v34  ;;  %v380_v37 = vadd.f32 1e-16, %v375_v35 }
 0x5da   : > { %3271 = vrcp.f32 %v381_v36 }
 0x5db   : > { %3273 = vrcp.f32 %v380_v37 }
 0x5e0   : > { %v3268_v39 = vpop.eup %3267 }
 0x5e1   : > { %v3270_v40 = vpop.eup %3269  ;;  %v387_v41 = vmul.f32 %v3268_v39, %v379_v32 }
 0x5e2   : > { %v386_v42 = vmul.f32 %v3270_v40, %v378_v33 }
 0x5e3   : > { %v391_v43 = vsub.f32 2.0, %v387_v41 }
 0x5e4   : > { %v3272_v44 = vpop.eup %3271  ;;  %v390_v45 = vsub.f32 2.0, %v386_v42 }
 0x5e5   : > { %v3274_v46 = vpop.eup %3273  ;;  %v395_v47 = vmul.f32 %v3268_v39, %v391_v43  ;;  %v389_v38 = vmul.f32 %v3272_v44, %v381_v36 }
 0x5e6   : > { %v394_v48 = vmul.f32 %v3270_v40, %v390_v45  ;;  %v388_v49 = vmul.f32 %v3274_v46, %v380_v37 }
 0x5e7   : > { %v399_v50 = vmul.f32 0.03125, %v395_v47  ;;  %v393_v51 = vsub.f32 2.0, %v389_v38 }
 0x5e8   : > { %v398_v52 = vmul.f32 0.03125, %v394_v48  ;;  %v392_v53 = vsub.f32 2.0, %v388_v49 }
 0x5e9   : > { %v397_v54 = vmul.f32 %v3272_v44, %v393_v51  ;;  %v403_v55 = vmul.f32 %v3939_v17, %v399_v50 }
 0x5ea   : > { %v402_v56 = vmul.f32 %v3937_v16, %v398_v52  ;;  %v396_v57 = vmul.f32 %v3274_v46, %v392_v53 }
 0x5eb   : > { %v401_v58 = vmul.f32 0.03125, %v397_v54 }
 0x5ec   : > { %v400_v59 = vmul.f32 0.03125, %v396_v57  ;;  %v406_v60 = vadd.f32 %v403_v55, %v402_v56 }
 0x5ed   : > { %v405_v62 = vmul.f32 %v3942_v19, %v401_v58 }
 0x5ee   : > { %v404_v61 = vmul.f32 %v3945_v21, %v400_v59 }
 0x5f0   : > { %v407_v63 = vadd.f32 %v406_v60, %v404_v61 }
 0x5f2   : > { %v408_v3 = vadd.f32 %v407_v63, %v405_v62 }
 0x5f4   : > { %v409_v4 = vrot.slane %v408_v3, 4 }
 0x5f6   : > { %v410_v5 = vadd.f32 %v409_v4, %v408_v3 }
 0x5f8   : > { %v411_v7 = vrot.slane %v410_v5, 2 }
 0x5fa   : > { %v412_v8 = vadd.f32 %v411_v7, %v410_v5 }
 0x5fc   : > { %v413_v9 = vrot.slane %v412_v8, 1 }
 0x5fe   : > { %v414_v10 = vadd.f32 %v413_v9, %v412_v8 }
 0x600   : > { %v415_v11 = vadd.f32 1e-16, %v414_v10 }
 0x602   : > { %3275 = vrcp.f32 %v415_v11 }
 0x60c   : > { %v3276_v12 = vpop.eup %3275 }
 0x60d   : > { %v417_v13 = vmul.f32 %v3276_v12, %v415_v11 }
 0x60f   : > { %v418_v14 = vsub.f32 2.0, %v417_v13 }
 0x611   : > { %v419_v15 = vmul.f32 %v3276_v12, %v418_v14 }
 0x613   : > { %v420_v18 = vmul.f32 0.0078125, %v419_v15 }
 0x615   : > { %v422_v20 = vmul.f32 %v3939_v17, %v420_v18  ;;  %v421_v22 = vmul.f32 %v3937_v16, %v420_v18  ;;  %v424_v23 = vmul.f32 %v3942_v19, %v420_v18  ;;  %v423_v24 = vmul.f32 %v3945_v21, %v420_v18 }
 0x617   : > { %427 = vadd.xlane.f32.xlu1 %v422_v20  ;;  %425 = vadd.xlane.f32.xlu0 %v421_v22 }
 0x61b   : > { %431 = vadd.xlane.f32.xlu1 %v424_v23  ;;  %429 = vadd.xlane.f32.xlu0 %v423_v24 }
 0x6a4   : > { %v428_v25 = vpop.xlane.xlu1 %427  ;;  %v426_v26 = vpop.xlane.xlu0 %425 }
 0x6a5   : > { %v434_v27 = vadd.f32 1e-16, %v428_v25  ;;  %v433_v28 = vadd.f32 1e-16, %v426_v26 }
 0x6a7   : > { %3277 = vrcp.f32 %v434_v27 }
 0x6a8   : > { %3279 = vrcp.f32 %v433_v28  ;;  %v432_v29 = vpop.xlane.xlu1 %431  ;;  %v430_v30 = vpop.xlane.xlu0 %429 }
 0x6a9   : > { %v436_v31 = vadd.f32 1e-16, %v432_v29  ;;  %v435_v32 = vadd.f32 1e-16, %v430_v30 }
 0x6ab   : > { %3281 = vrcp.f32 %v436_v31 }
 0x6ac   : > { %3283 = vrcp.f32 %v435_v32 }
 0x6b1   : > { %v3278_v33 = vpop.eup %3277 }
 0x6b2   : > { %v3280_v34 = vpop.eup %3279  ;;  %v442_v35 = vmul.f32 %v3278_v33, %v434_v27 }
 0x6b3   : > { %v441_v36 = vmul.f32 %v3280_v34, %v433_v28 }
 0x6b4   : > { %v446_v37 = vsub.f32 2.0, %v442_v35 }
 0x6b5   : > { %v3282_v39 = vpop.eup %3281  ;;  %v445_v40 = vsub.f32 2.0, %v441_v36 }
 0x6b6   : > { %v3284_v41 = vpop.eup %3283  ;;  %v450_v42 = vmul.f32 %v3278_v33, %v446_v37  ;;  %v444_v43 = vmul.f32 %v3282_v39, %v436_v31 }
 0x6b7   : > { %v449_v44 = vmul.f32 %v3280_v34, %v445_v40  ;;  %v443_v45 = vmul.f32 %v3284_v41, %v435_v32 }
 0x6b8   : > { %v454_v46 = vmul.f32 0.03125, %v450_v42  ;;  %v448_v47 = vsub.f32 2.0, %v444_v43 }
 0x6b9   : > { %v453_v38 = vmul.f32 0.03125, %v449_v44  ;;  %v447_v48 = vsub.f32 2.0, %v443_v45 }
 0x6ba   : > { %v452_v49 = vmul.f32 %v3282_v39, %v448_v47  ;;  %v458_v50 = vmul.f32 %v3939_v17, %v454_v46 }
 0x6bb   : > { %v457_v51 = vmul.f32 %v3937_v16, %v453_v38  ;;  %v451_v52 = vmul.f32 %v3284_v41, %v447_v48 }
 0x6bc   : > { %v456_v53 = vmul.f32 0.03125, %v452_v49 }
 0x6bd   : > { %v455_v54 = vmul.f32 0.03125, %v451_v52  ;;  %v461_v55 = vadd.f32 %v458_v50, %v457_v51 }
 0x6be   : > { %v460_v57 = vmul.f32 %v3942_v19, %v456_v53 }
 0x6bf   : > { %v459_v56 = vmul.f32 %v3945_v21, %v455_v54 }
 0x6c1   : > { %v462_v58 = vadd.f32 %v461_v55, %v459_v56 }
 0x6c3   : > { %v463_v59 = vadd.f32 %v462_v58, %v460_v57 }
 0x6c5   : > { %v464_v60 = vrot.slane %v463_v59, 4 }
 0x6c7   : > { %v465_v61 = vadd.f32 %v464_v60, %v463_v59 }
 0x6c9   : > { %v466_v62 = vrot.slane %v465_v61, 2 }
 0x6cb   : > { %v467_v63 = vadd.f32 %v466_v62, %v465_v61 }
 0x6cd   : > { %v468_v3 = vrot.slane %v467_v63, 1 }
 0x6cf   : > { %v469_v4 = vadd.f32 %v468_v3, %v467_v63 }
 0x6d1   : > { %v470_v5 = vadd.f32 1e-16, %v469_v4 }
 0x6d3   : > { %3285 = vrcp.f32 %v470_v5 }
 0x6dd   : > { %v3286_v7 = vpop.eup %3285 }
 0x6de   : > { %v472_v8 = vmul.f32 %v3286_v7, %v470_v5 }
 0x6e0   : > { %v473_v9 = vsub.f32 2.0, %v472_v8 }
 0x6e2   : > { %v474_v10 = vmul.f32 %v3286_v7, %v473_v9 }
 0x6e4   : > { %v475_v11 = vmul.f32 0.0078125, %v474_v10 }
 0x6e6   : > { %v477_v12 = vmul.f32 %v3939_v17, %v475_v11  ;;  %v476_v13 = vmul.f32 %v3937_v16, %v475_v11  ;;  %v479_v14 = vmul.f32 %v3942_v19, %v475_v11  ;;  %v478_v15 = vmul.f32 %v3945_v21, %v475_v11 }
 0x6e8   : > { %482 = vadd.xlane.f32.xlu1 %v477_v12  ;;  %480 = vadd.xlane.f32.xlu0 %v476_v13 }
 0x6ec   : > { %486 = vadd.xlane.f32.xlu1 %v479_v14  ;;  %484 = vadd.xlane.f32.xlu0 %v478_v15 }
 0x775   : > { %v483_v18 = vpop.xlane.xlu1 %482  ;;  %v481_v20 = vpop.xlane.xlu0 %480 }
 0x776   : > { %v489_v22 = vadd.f32 1e-16, %v483_v18  ;;  %v488_v23 = vadd.f32 1e-16, %v481_v20 }
 0x778   : > { %3287 = vrcp.f32 %v489_v22 }
 0x779   : > { %3289 = vrcp.f32 %v488_v23  ;;  %v487_v24 = vpop.xlane.xlu1 %486  ;;  %v485_v25 = vpop.xlane.xlu0 %484 }
 0x77a   : > { %v491_v26 = vadd.f32 1e-16, %v487_v24  ;;  %v490_v27 = vadd.f32 1e-16, %v485_v25 }
 0x77c   : > { %3291 = vrcp.f32 %v491_v26 }
 0x77d   : > { %3293 = vrcp.f32 %v490_v27 }
 0x782   : > { %v3288_v28 = vpop.eup %3287 }
 0x783   : > { %v3290_v29 = vpop.eup %3289  ;;  %v497_v30 = vmul.f32 %v3288_v28, %v489_v22 }
 0x784   : > { %v496_v31 = vmul.f32 %v3290_v29, %v488_v23 }
 0x785   : > { %v501_v32 = vsub.f32 2.0, %v497_v30 }
 0x786   : > { %v3292_v33 = vpop.eup %3291  ;;  %v500_v34 = vsub.f32 2.0, %v496_v31 }
 0x787   : > { %v3294_v35 = vpop.eup %3293  ;;  %v505_v36 = vmul.f32 %v3288_v28, %v501_v32  ;;  %v499_v37 = vmul.f32 %v3292_v33, %v491_v26 }
 0x788   : > { %v504_v39 = vmul.f32 %v3290_v29, %v500_v34  ;;  %v498_v40 = vmul.f32 %v3294_v35, %v490_v27 }
 0x789   : > { %v509_v41 = vmul.f32 0.03125, %v505_v36  ;;  %v503_v42 = vsub.f32 2.0, %v499_v37 }
 0x78a   : > { %v508_v43 = vmul.f32 0.03125, %v504_v39  ;;  %v502_v44 = vsub.f32 2.0, %v498_v40 }
 0x78b   : > { %v507_v45 = vmul.f32 %v3292_v33, %v503_v42  ;;  %v513_v46 = vmul.f32 %v3939_v17, %v509_v41 }
 0x78c   : > { %v512_v47 = vmul.f32 %v3937_v16, %v508_v43  ;;  %v506_v38 = vmul.f32 %v3294_v35, %v502_v44 }
 0x78d   : > { %v511_v48 = vmul.f32 0.03125, %v507_v45 }
 0x78e   : > { %v510_v49 = vmul.f32 0.03125, %v506_v38  ;;  %v516_v50 = vadd.f32 %v513_v46, %v512_v47 }
 0x78f   : > { %v515_v52 = vmul.f32 %v3942_v19, %v511_v48 }
 0x790   : > { %v514_v51 = vmul.f32 %v3945_v21, %v510_v49 }
 0x792   : > { %v517_v53 = vadd.f32 %v516_v50, %v514_v51 }
 0x794   : > { %v518_v54 = vadd.f32 %v517_v53, %v515_v52 }
 0x796   : > { %v519_v55 = vrot.slane %v518_v54, 4 }
 0x798   : > { %v520_v56 = vadd.f32 %v519_v55, %v518_v54 }
 0x79a   : > { %v521_v57 = vrot.slane %v520_v56, 2 }
 0x79c   : > { %v522_v58 = vadd.f32 %v521_v57, %v520_v56 }
 0x79e   : > { %v523_v59 = vrot.slane %v522_v58, 1 }
 0x7a0   : > { %v524_v60 = vadd.f32 %v523_v59, %v522_v58 }
 0x7a2   : > { %v525_v61 = vadd.f32 1e-16, %v524_v60 }
 0x7a4   : > { %3295 = vrcp.f32 %v525_v61 }
 0x7ae   : > { %v3296_v62 = vpop.eup %3295 }
 0x7af   : > { %v527_v63 = vmul.f32 %v3296_v62, %v525_v61 }
 0x7b1   : > { %v528_v3 = vsub.f32 2.0, %v527_v63 }
 0x7b3   : > { %v529_v4 = vmul.f32 %v3296_v62, %v528_v3 }
 0x7b5   : > { %v530_v5 = vmul.f32 0.0078125, %v529_v4 }
 0x7b7   : > { %v532_v7 = vmul.f32 %v3939_v17, %v530_v5  ;;  %v531_v8 = vmul.f32 %v3937_v16, %v530_v5  ;;  %v534_v9 = vmul.f32 %v3942_v19, %v530_v5  ;;  %v533_v10 = vmul.f32 %v3945_v21, %v530_v5 }
 0x7b9   : > { %537 = vadd.xlane.f32.xlu1 %v532_v7  ;;  %535 = vadd.xlane.f32.xlu0 %v531_v8 }
 0x7bd   : > { %541 = vadd.xlane.f32.xlu1 %v534_v9  ;;  %539 = vadd.xlane.f32.xlu0 %v533_v10 }
 0x846   : > { %v538_v11 = vpop.xlane.xlu1 %537  ;;  %v536_v12 = vpop.xlane.xlu0 %535 }
 0x847   : > { %v544_v13 = vadd.f32 1e-16, %v538_v11  ;;  %v543_v14 = vadd.f32 1e-16, %v536_v12 }
 0x849   : > { %3297 = vrcp.f32 %v544_v13 }
 0x84a   : > { %3299 = vrcp.f32 %v543_v14  ;;  %v542_v15 = vpop.xlane.xlu1 %541  ;;  %v540_v18 = vpop.xlane.xlu0 %539 }
 0x84b   : > { %v546_v20 = vadd.f32 1e-16, %v542_v15  ;;  %v545_v22 = vadd.f32 1e-16, %v540_v18 }
 0x84d   : > { %3301 = vrcp.f32 %v546_v20 }
 0x84e   : > { %3303 = vrcp.f32 %v545_v22 }
 0x853   : > { %v3298_v23 = vpop.eup %3297 }
 0x854   : > { %v3300_v24 = vpop.eup %3299  ;;  %v552_v25 = vmul.f32 %v3298_v23, %v544_v13 }
 0x855   : > { %v551_v26 = vmul.f32 %v3300_v24, %v543_v14 }
 0x856   : > { %v556_v27 = vsub.f32 2.0, %v552_v25 }
 0x857   : > { %v3302_v28 = vpop.eup %3301  ;;  %v555_v29 = vsub.f32 2.0, %v551_v26 }
 0x858   : > { %v3304_v30 = vpop.eup %3303  ;;  %v560_v31 = vmul.f32 %v3298_v23, %v556_v27  ;;  %v554_v32 = vmul.f32 %v3302_v28, %v546_v20 }
 0x859   : > { %v559_v33 = vmul.f32 %v3300_v24, %v555_v29  ;;  %v553_v34 = vmul.f32 %v3304_v30, %v545_v22 }
 0x85a   : > { %v564_v35 = vmul.f32 0.03125, %v560_v31  ;;  %v558_v36 = vsub.f32 2.0, %v554_v32 }
 0x85b   : > { %v563_v37 = vmul.f32 0.03125, %v559_v33  ;;  %v557_v39 = vsub.f32 2.0, %v553_v34 }
 0x85c   : > { %v562_v40 = vmul.f32 %v3302_v28, %v558_v36  ;;  %v568_v41 = vmul.f32 %v3939_v17, %v564_v35 }
 0x85d   : > { %v567_v42 = vmul.f32 %v3937_v16, %v563_v37  ;;  %v561_v43 = vmul.f32 %v3304_v30, %v557_v39 }
 0x85e   : > { %v566_v44 = vmul.f32 0.03125, %v562_v40 }
 0x85f   : > { %v565_v45 = vmul.f32 0.03125, %v561_v43  ;;  %v571_v46 = vadd.f32 %v568_v41, %v567_v42 }
 0x860   : > { %v570_v38 = vmul.f32 %v3942_v19, %v566_v44 }
 0x861   : > { %v569_v47 = vmul.f32 %v3945_v21, %v565_v45 }
 0x863   : > { %v572_v48 = vadd.f32 %v571_v46, %v569_v47 }
 0x865   : > { %v573_v49 = vadd.f32 %v572_v48, %v570_v38 }
 0x867   : > { %v574_v50 = vrot.slane %v573_v49, 4 }
 0x869   : > { %v575_v51 = vadd.f32 %v574_v50, %v573_v49 }
 0x86b   : > { %v576_v52 = vrot.slane %v575_v51, 2 }
 0x86d   : > { %v577_v53 = vadd.f32 %v576_v52, %v575_v51 }
 0x86f   : > { %v578_v54 = vrot.slane %v577_v53, 1 }
 0x871   : > { %v579_v55 = vadd.f32 %v578_v54, %v577_v53 }
 0x873   : > { %v580_v56 = vadd.f32 1e-16, %v579_v55 }
 0x875   : > { %3305 = vrcp.f32 %v580_v56 }
 0x87f   : > { %v3306_v57 = vpop.eup %3305 }
 0x880   : > { %v582_v58 = vmul.f32 %v3306_v57, %v580_v56 }
 0x882   : > { %v583_v59 = vsub.f32 2.0, %v582_v58 }
 0x884   : > { %v584_v60 = vmul.f32 %v3306_v57, %v583_v59 }
 0x886   : > { %v585_v61 = vmul.f32 0.0078125, %v584_v60 }
 0x888   : > { %v587_v62 = vmul.f32 %v3939_v17, %v585_v61  ;;  %v586_v63 = vmul.f32 %v3937_v16, %v585_v61  ;;  %v589_v3 = vmul.f32 %v3942_v19, %v585_v61  ;;  %v588_v4 = vmul.f32 %v3945_v21, %v585_v61 }
 0x88a   : > { %592 = vadd.xlane.f32.xlu1 %v587_v62  ;;  %590 = vadd.xlane.f32.xlu0 %v586_v63 }
 0x88e   : > { %596 = vadd.xlane.f32.xlu1 %v589_v3  ;;  %594 = vadd.xlane.f32.xlu0 %v588_v4 }
 0x917   : > { %v593_v5 = vpop.xlane.xlu1 %592  ;;  %v591_v7 = vpop.xlane.xlu0 %590 }
 0x918   : > { %v599_v8 = vadd.f32 1e-16, %v593_v5  ;;  %v598_v9 = vadd.f32 1e-16, %v591_v7 }
 0x91a   : > { %3307 = vrcp.f32 %v599_v8 }
 0x91b   : > { %3309 = vrcp.f32 %v598_v9  ;;  %v597_v10 = vpop.xlane.xlu1 %596  ;;  %v595_v11 = vpop.xlane.xlu0 %594 }
 0x91c   : > { %v601_v12 = vadd.f32 1e-16, %v597_v10  ;;  %v600_v13 = vadd.f32 1e-16, %v595_v11 }
 0x91e   : > { %3311 = vrcp.f32 %v601_v12 }
 0x91f   : > { %3313 = vrcp.f32 %v600_v13 }
 0x924   : > { %v3308_v14 = vpop.eup %3307 }
 0x925   : > { %v3310_v15 = vpop.eup %3309  ;;  %v607_v18 = vmul.f32 %v3308_v14, %v599_v8 }
 0x926   : > { %v606_v20 = vmul.f32 %v3310_v15, %v598_v9 }
 0x927   : > { %v611_v22 = vsub.f32 2.0, %v607_v18 }
 0x928   : > { %v3312_v23 = vpop.eup %3311  ;;  %v610_v24 = vsub.f32 2.0, %v606_v20 }
 0x929   : > { %v3314_v25 = vpop.eup %3313  ;;  %v615_v26 = vmul.f32 %v3308_v14, %v611_v22  ;;  %v609_v27 = vmul.f32 %v3312_v23, %v601_v12 }
 0x92a   : > { %v614_v28 = vmul.f32 %v3310_v15, %v610_v24  ;;  %v608_v29 = vmul.f32 %v3314_v25, %v600_v13 }
 0x92b   : > { %v619_v30 = vmul.f32 0.03125, %v615_v26  ;;  %v613_v31 = vsub.f32 2.0, %v609_v27 }
 0x92c   : > { %v618_v32 = vmul.f32 0.03125, %v614_v28  ;;  %v612_v33 = vsub.f32 2.0, %v608_v29 }
 0x92d   : > { %v617_v34 = vmul.f32 %v3312_v23, %v613_v31  ;;  %v623_v35 = vmul.f32 %v3939_v17, %v619_v30 }
 0x92e   : > { %v622_v36 = vmul.f32 %v3937_v16, %v618_v32  ;;  %v616_v37 = vmul.f32 %v3314_v25, %v612_v33 }
 0x92f   : > { %v621_v39 = vmul.f32 0.03125, %v617_v34 }
 0x930   : > { %v620_v40 = vmul.f32 0.03125, %v616_v37  ;;  %v626_v41 = vadd.f32 %v623_v35, %v622_v36 }
 0x931   : > { %v625_v43 = vmul.f32 %v3942_v19, %v621_v39 }
 0x932   : > { %v624_v42 = vmul.f32 %v3945_v21, %v620_v40 }
 0x934   : > { %v627_v44 = vadd.f32 %v626_v41, %v624_v42 }
 0x936   : > { %v628_v45 = vadd.f32 %v627_v44, %v625_v43 }
 0x938   : > { %v629_v46 = vrot.slane %v628_v45, 4 }
 0x93a   : > { %v630_v47 = vadd.f32 %v629_v46, %v628_v45 }
 0x93c   : > { %v631_v38 = vrot.slane %v630_v47, 2 }
 0x93e   : > { %v632_v48 = vadd.f32 %v631_v38, %v630_v47 }
 0x940   : > { %v633_v49 = vrot.slane %v632_v48, 1 }
 0x942   : > { %v634_v50 = vadd.f32 %v633_v49, %v632_v48 }
 0x944   : > { %v635_v51 = vadd.f32 1e-16, %v634_v50 }
 0x946   : > { %3315 = vrcp.f32 %v635_v51 }
 0x950   : > { %v3316_v52 = vpop.eup %3315 }
 0x951   : > { %v637_v53 = vmul.f32 %v3316_v52, %v635_v51 }
 0x953   : > { %v638_v54 = vsub.f32 2.0, %v637_v53 }
 0x955   : > { %v639_v55 = vmul.f32 %v3316_v52, %v638_v54 }
 0x957   : > { %v640_v56 = vmul.f32 0.0078125, %v639_v55 }
 0x959   : > { %v642_v57 = vmul.f32 %v3939_v17, %v640_v56  ;;  %v641_v58 = vmul.f32 %v3937_v16, %v640_v56  ;;  %v644_v59 = vmul.f32 %v3942_v19, %v640_v56  ;;  %v643_v60 = vmul.f32 %v3945_v21, %v640_v56 }
 0x95b   : > { %647 = vadd.xlane.f32.xlu1 %v642_v57  ;;  %645 = vadd.xlane.f32.xlu0 %v641_v58 }
 0x95f   : > { %651 = vadd.xlane.f32.xlu1 %v644_v59  ;;  %649 = vadd.xlane.f32.xlu0 %v643_v60 }
 0x9e8   : > { %v648_v61 = vpop.xlane.xlu1 %647  ;;  %v646_v62 = vpop.xlane.xlu0 %645 }
 0x9e9   : > { %v654_v63 = vadd.f32 1e-16, %v648_v61  ;;  %v653_v3 = vadd.f32 1e-16, %v646_v62 }
 0x9eb   : > { %3317 = vrcp.f32 %v654_v63 }
 0x9ec   : > { %3319 = vrcp.f32 %v653_v3  ;;  %v652_v4 = vpop.xlane.xlu1 %651  ;;  %v650_v5 = vpop.xlane.xlu0 %649 }
 0x9ed   : > { %v656_v7 = vadd.f32 1e-16, %v652_v4  ;;  %v655_v8 = vadd.f32 1e-16, %v650_v5 }
 0x9ef   : > { %3321 = vrcp.f32 %v656_v7 }
 0x9f0   : > { %3323 = vrcp.f32 %v655_v8 }
 0x9f5   : > { %v3318_v9 = vpop.eup %3317 }
 0x9f6   : > { %v3320_v10 = vpop.eup %3319  ;;  %v662_v11 = vmul.f32 %v3318_v9, %v654_v63 }
 0x9f7   : > { %v661_v12 = vmul.f32 %v3320_v10, %v653_v3 }
 0x9f8   : > { %v666_v13 = vsub.f32 2.0, %v662_v11 }
 0x9f9   : > { %v3322_v14 = vpop.eup %3321  ;;  %v665_v15 = vsub.f32 2.0, %v661_v12 }
 0x9fa   : > { %v3324_v18 = vpop.eup %3323  ;;  %v670_v20 = vmul.f32 %v3318_v9, %v666_v13  ;;  %v664_v22 = vmul.f32 %v3322_v14, %v656_v7 }
 0x9fb   : > { %v669_v23 = vmul.f32 %v3320_v10, %v665_v15  ;;  %v663_v24 = vmul.f32 %v3324_v18, %v655_v8 }
 0x9fc   : > { %v674_v25 = vmul.f32 0.03125, %v670_v20  ;;  %v668_v26 = vsub.f32 2.0, %v664_v22 }
 0x9fd   : > { %v673_v27 = vmul.f32 0.03125, %v669_v23  ;;  %v667_v28 = vsub.f32 2.0, %v663_v24 }
 0x9fe   : > { %v672_v29 = vmul.f32 %v3322_v14, %v668_v26  ;;  %v678_v30 = vmul.f32 %v3939_v17, %v674_v25 }
 0x9ff   : > { %v677_v31 = vmul.f32 %v3937_v16, %v673_v27  ;;  %v671_v32 = vmul.f32 %v3324_v18, %v667_v28 }
 0xa00   : > { %v676_v33 = vmul.f32 0.03125, %v672_v29 }
 0xa01   : > { %v675_v34 = vmul.f32 0.03125, %v671_v32  ;;  %v681_v35 = vadd.f32 %v678_v30, %v677_v31 }
 0xa02   : > { %v680_v37 = vmul.f32 %v3942_v19, %v676_v33 }
 0xa03   : > { %v679_v36 = vmul.f32 %v3945_v21, %v675_v34 }
 0xa05   : > { %v682_v39 = vadd.f32 %v681_v35, %v679_v36 }
 0xa07   : > { %v683_v40 = vadd.f32 %v682_v39, %v680_v37 }
 0xa09   : > { %v684_v41 = vrot.slane %v683_v40, 4 }
 0xa0b   : > { %v685_v42 = vadd.f32 %v684_v41, %v683_v40 }
 0xa0d   : > { %v686_v43 = vrot.slane %v685_v42, 2 }
 0xa0f   : > { %v687_v44 = vadd.f32 %v686_v43, %v685_v42 }
 0xa11   : > { %v688_v45 = vrot.slane %v687_v44, 1 }
 0xa13   : > { %v689_v46 = vadd.f32 %v688_v45, %v687_v44 }
 0xa15   : > { %v690_v47 = vadd.f32 1e-16, %v689_v46 }
 0xa17   : > { %3325 = vrcp.f32 %v690_v47 }
 0xa21   : > { %v3326_v38 = vpop.eup %3325 }
 0xa22   : > { %v692_v48 = vmul.f32 %v3326_v38, %v690_v47 }
 0xa24   : > { %v693_v49 = vsub.f32 2.0, %v692_v48 }
 0xa26   : > { %v694_v50 = vmul.f32 %v3326_v38, %v693_v49 }
 0xa28   : > { %v695_v51 = vmul.f32 0.0078125, %v694_v50 }
 0xa2a   : > { %v697_v52 = vmul.f32 %v3939_v17, %v695_v51  ;;  %v696_v53 = vmul.f32 %v3937_v16, %v695_v51  ;;  %v699_v54 = vmul.f32 %v3942_v19, %v695_v51  ;;  %v698_v55 = vmul.f32 %v3945_v21, %v695_v51 }
 0xa2c   : > { %702 = vadd.xlane.f32.xlu1 %v697_v52  ;;  %700 = vadd.xlane.f32.xlu0 %v696_v53 }
 0xa30   : > { %706 = vadd.xlane.f32.xlu1 %v699_v54  ;;  %704 = vadd.xlane.f32.xlu0 %v698_v55 }
 0xab9   : > { %v703_v56 = vpop.xlane.xlu1 %702  ;;  %v701_v57 = vpop.xlane.xlu0 %700 }
 0xaba   : > { %v709_v58 = vadd.f32 1e-16, %v703_v56  ;;  %v708_v59 = vadd.f32 1e-16, %v701_v57 }
 0xabc   : > { %3327 = vrcp.f32 %v709_v58 }
 0xabd   : > { %3329 = vrcp.f32 %v708_v59  ;;  %v707_v60 = vpop.xlane.xlu1 %706  ;;  %v705_v61 = vpop.xlane.xlu0 %704 }
 0xabe   : > { %v711_v62 = vadd.f32 1e-16, %v707_v60  ;;  %v710_v63 = vadd.f32 1e-16, %v705_v61 }
 0xac0   : > { %3331 = vrcp.f32 %v711_v62 }
 0xac1   : > { %3333 = vrcp.f32 %v710_v63 }
 0xac6   : > { %v3328_v3 = vpop.eup %3327 }
 0xac7   : > { %v3330_v4 = vpop.eup %3329  ;;  %v717_v5 = vmul.f32 %v3328_v3, %v709_v58 }
 0xac8   : > { %v716_v7 = vmul.f32 %v3330_v4, %v708_v59 }
 0xac9   : > { %v721_v8 = vsub.f32 2.0, %v717_v5 }
 0xaca   : > { %v3332_v9 = vpop.eup %3331  ;;  %v720_v10 = vsub.f32 2.0, %v716_v7 }
 0xacb   : > { %v3334_v11 = vpop.eup %3333  ;;  %v725_v12 = vmul.f32 %v3328_v3, %v721_v8  ;;  %v719_v13 = vmul.f32 %v3332_v9, %v711_v62 }
 0xacc   : > { %v724_v14 = vmul.f32 %v3330_v4, %v720_v10  ;;  %v718_v15 = vmul.f32 %v3334_v11, %v710_v63 }
 0xacd   : > { %v729_v18 = vmul.f32 0.03125, %v725_v12  ;;  %v723_v20 = vsub.f32 2.0, %v719_v13 }
 0xace   : > { %v728_v22 = vmul.f32 0.03125, %v724_v14  ;;  %v722_v23 = vsub.f32 2.0, %v718_v15 }
 0xacf   : > { %v727_v24 = vmul.f32 %v3332_v9, %v723_v20  ;;  %v733_v25 = vmul.f32 %v3939_v17, %v729_v18 }
 0xad0   : > { %v732_v26 = vmul.f32 %v3937_v16, %v728_v22  ;;  %v726_v27 = vmul.f32 %v3334_v11, %v722_v23 }
 0xad1   : > { %v731_v28 = vmul.f32 0.03125, %v727_v24 }
 0xad2   : > { %v730_v29 = vmul.f32 0.03125, %v726_v27  ;;  %v736_v30 = vadd.f32 %v733_v25, %v732_v26 }
 0xad3   : > { %v735_v32 = vmul.f32 %v3942_v19, %v731_v28 }
 0xad4   : > { %v734_v31 = vmul.f32 %v3945_v21, %v730_v29 }
 0xad6   : > { %v737_v33 = vadd.f32 %v736_v30, %v734_v31 }
 0xad8   : > { %v738_v34 = vadd.f32 %v737_v33, %v735_v32 }
 0xada   : > { %v739_v35 = vrot.slane %v738_v34, 4 }
 0xadc   : > { %v740_v36 = vadd.f32 %v739_v35, %v738_v34 }
 0xade   : > { %v741_v37 = vrot.slane %v740_v36, 2 }
 0xae0   : > { %v742_v39 = vadd.f32 %v741_v37, %v740_v36 }
 0xae2   : > { %v743_v40 = vrot.slane %v742_v39, 1 }
 0xae4   : > { %v744_v41 = vadd.f32 %v743_v40, %v742_v39 }
 0xae6   : > { %v745_v42 = vadd.f32 1e-16, %v744_v41 }
 0xae8   : > { %3335 = vrcp.f32 %v745_v42 }
 0xaf2   : > { %v3336_v43 = vpop.eup %3335 }
 0xaf3   : > { %v747_v44 = vmul.f32 %v3336_v43, %v745_v42 }
 0xaf5   : > { %v748_v45 = vsub.f32 2.0, %v747_v44 }
 0xaf7   : > { %v749_v46 = vmul.f32 %v3336_v43, %v748_v45 }
 0xaf9   : > { %v750_v47 = vmul.f32 0.0078125, %v749_v46 }
 0xafb   : > { %v752_v38 = vmul.f32 %v3939_v17, %v750_v47  ;;  %v751_v48 = vmul.f32 %v3937_v16, %v750_v47  ;;  %v754_v49 = vmul.f32 %v3942_v19, %v750_v47  ;;  %v753_v50 = vmul.f32 %v3945_v21, %v750_v47 }
 0xafd   : > { %757 = vadd.xlane.f32.xlu1 %v752_v38  ;;  %755 = vadd.xlane.f32.xlu0 %v751_v48 }
 0xb01   : > { %761 = vadd.xlane.f32.xlu1 %v754_v49  ;;  %759 = vadd.xlane.f32.xlu0 %v753_v50 }
 0xb8a   : > { %v758_v51 = vpop.xlane.xlu1 %757  ;;  %v756_v52 = vpop.xlane.xlu0 %755 }
 0xb8b   : > { %v764_v53 = vadd.f32 1e-16, %v758_v51  ;;  %v763_v54 = vadd.f32 1e-16, %v756_v52 }
 0xb8d   : > { %3337 = vrcp.f32 %v764_v53 }
 0xb8e   : > { %3339 = vrcp.f32 %v763_v54  ;;  %v762_v55 = vpop.xlane.xlu1 %761  ;;  %v760_v56 = vpop.xlane.xlu0 %759 }
 0xb8f   : > { %v766_v57 = vadd.f32 1e-16, %v762_v55  ;;  %v765_v58 = vadd.f32 1e-16, %v760_v56 }
 0xb91   : > { %3341 = vrcp.f32 %v766_v57 }
 0xb92   : > { %3343 = vrcp.f32 %v765_v58 }
 0xb97   : > { %v3338_v59 = vpop.eup %3337 }
 0xb98   : > { %v3340_v60 = vpop.eup %3339  ;;  %v772_v61 = vmul.f32 %v3338_v59, %v764_v53 }
 0xb99   : > { %v771_v62 = vmul.f32 %v3340_v60, %v763_v54 }
 0xb9a   : > { %v776_v63 = vsub.f32 2.0, %v772_v61 }
 0xb9b   : > { %v3342_v3 = vpop.eup %3341  ;;  %v775_v4 = vsub.f32 2.0, %v771_v62 }
 0xb9c   : > { %v3344_v5 = vpop.eup %3343  ;;  %v780_v7 = vmul.f32 %v3338_v59, %v776_v63  ;;  %v774_v8 = vmul.f32 %v3342_v3, %v766_v57 }
 0xb9d   : > { %v779_v9 = vmul.f32 %v3340_v60, %v775_v4  ;;  %v773_v10 = vmul.f32 %v3344_v5, %v765_v58 }
 0xb9e   : > { %v784_v11 = vmul.f32 0.03125, %v780_v7  ;;  %v778_v12 = vsub.f32 2.0, %v774_v8 }
 0xb9f   : > { %v783_v13 = vmul.f32 0.03125, %v779_v9  ;;  %v777_v14 = vsub.f32 2.0, %v773_v10 }
 0xba0   : > { %v782_v15 = vmul.f32 %v3342_v3, %v778_v12  ;;  %v788_v18 = vmul.f32 %v3939_v17, %v784_v11 }
 0xba1   : > { %v787_v20 = vmul.f32 %v3937_v16, %v783_v13  ;;  %v781_v22 = vmul.f32 %v3344_v5, %v777_v14 }
 0xba2   : > { %v786_v23 = vmul.f32 0.03125, %v782_v15 }
 0xba3   : > { %v785_v24 = vmul.f32 0.03125, %v781_v22  ;;  %v791_v25 = vadd.f32 %v788_v18, %v787_v20 }
 0xba4   : > { %v790_v27 = vmul.f32 %v3942_v19, %v786_v23 }
 0xba5   : > { %v789_v26 = vmul.f32 %v3945_v21, %v785_v24 }
 0xba7   : > { %v792_v28 = vadd.f32 %v791_v25, %v789_v26 }
 0xba9   : > { %v793_v29 = vadd.f32 %v792_v28, %v790_v27 }
 0xbab   : > { %v794_v30 = vrot.slane %v793_v29, 4 }
 0xbad   : > { %v795_v31 = vadd.f32 %v794_v30, %v793_v29 }
 0xbaf   : > { %v796_v32 = vrot.slane %v795_v31, 2 }
 0xbb1   : > { %v797_v33 = vadd.f32 %v796_v32, %v795_v31 }
 0xbb3   : > { %v798_v34 = vrot.slane %v797_v33, 1 }
 0xbb5   : > { %v799_v35 = vadd.f32 %v798_v34, %v797_v33 }
 0xbb7   : > { %v800_v36 = vadd.f32 1e-16, %v799_v35 }
 0xbb9   : > { %3345 = vrcp.f32 %v800_v36 }
 0xbc3   : > { %v3346_v37 = vpop.eup %3345 }
 0xbc4   : > { %v802_v39 = vmul.f32 %v3346_v37, %v800_v36 }
 0xbc6   : > { %v803_v40 = vsub.f32 2.0, %v802_v39 }
 0xbc8   : > { %v804_v41 = vmul.f32 %v3346_v37, %v803_v40 }
 0xbca   : > { %v805_v42 = vmul.f32 0.0078125, %v804_v41 }
 0xbcc   : > { %v807_v43 = vmul.f32 %v3939_v17, %v805_v42  ;;  %v806_v44 = vmul.f32 %v3937_v16, %v805_v42  ;;  %v809_v45 = vmul.f32 %v3942_v19, %v805_v42  ;;  %v808_v46 = vmul.f32 %v3945_v21, %v805_v42 }
 0xbce   : > { %812 = vadd.xlane.f32.xlu1 %v807_v43  ;;  %810 = vadd.xlane.f32.xlu0 %v806_v44 }
 0xbd2   : > { %816 = vadd.xlane.f32.xlu1 %v809_v45  ;;  %814 = vadd.xlane.f32.xlu0 %v808_v46 }
 0xc5b   : > { %v813_v47 = vpop.xlane.xlu1 %812  ;;  %v811_v38 = vpop.xlane.xlu0 %810 }
 0xc5c   : > { %v819_v48 = vadd.f32 1e-16, %v813_v47  ;;  %v818_v49 = vadd.f32 1e-16, %v811_v38 }
 0xc5e   : > { %3347 = vrcp.f32 %v819_v48 }
 0xc5f   : > { %3349 = vrcp.f32 %v818_v49  ;;  %v817_v50 = vpop.xlane.xlu1 %816  ;;  %v815_v51 = vpop.xlane.xlu0 %814 }
 0xc60   : > { %v821_v52 = vadd.f32 1e-16, %v817_v50  ;;  %v820_v53 = vadd.f32 1e-16, %v815_v51 }
 0xc62   : > { %3351 = vrcp.f32 %v821_v52 }
 0xc63   : > { %3353 = vrcp.f32 %v820_v53 }
 0xc68   : > { %v3348_v54 = vpop.eup %3347 }
 0xc69   : > { %v3350_v55 = vpop.eup %3349  ;;  %v827_v56 = vmul.f32 %v3348_v54, %v819_v48 }
 0xc6a   : > { %v826_v57 = vmul.f32 %v3350_v55, %v818_v49 }
 0xc6b   : > { %v831_v58 = vsub.f32 2.0, %v827_v56 }
 0xc6c   : > { %v3352_v59 = vpop.eup %3351  ;;  %v830_v60 = vsub.f32 2.0, %v826_v57 }
 0xc6d   : > { %v3354_v61 = vpop.eup %3353  ;;  %v835_v62 = vmul.f32 %v3348_v54, %v831_v58  ;;  %v829_v63 = vmul.f32 %v3352_v59, %v821_v52 }
 0xc6e   : > { %v834_v3 = vmul.f32 %v3350_v55, %v830_v60  ;;  %v828_v4 = vmul.f32 %v3354_v61, %v820_v53 }
 0xc6f   : > { %v839_v5 = vmul.f32 0.03125, %v835_v62  ;;  %v833_v7 = vsub.f32 2.0, %v829_v63 }
 0xc70   : > { %v838_v8 = vmul.f32 0.03125, %v834_v3  ;;  %v832_v9 = vsub.f32 2.0, %v828_v4 }
 0xc71   : > { %v837_v10 = vmul.f32 %v3352_v59, %v833_v7  ;;  %v843_v11 = vmul.f32 %v3939_v17, %v839_v5 }
 0xc72   : > { %v842_v12 = vmul.f32 %v3937_v16, %v838_v8  ;;  %v836_v13 = vmul.f32 %v3354_v61, %v832_v9 }
 0xc73   : > { %v841_v14 = vmul.f32 0.03125, %v837_v10 }
 0xc74   : > { %v840_v15 = vmul.f32 0.03125, %v836_v13  ;;  %v846_v18 = vadd.f32 %v843_v11, %v842_v12 }
 0xc75   : > { %v845_v22 = vmul.f32 %v3942_v19, %v841_v14 }
 0xc76   : > { %v844_v20 = vmul.f32 %v3945_v21, %v840_v15 }
 0xc78   : > { %v847_v23 = vadd.f32 %v846_v18, %v844_v20 }
 0xc7a   : > { %v848_v24 = vadd.f32 %v847_v23, %v845_v22 }
 0xc7c   : > { %v849_v25 = vrot.slane %v848_v24, 4 }
 0xc7e   : > { %v850_v26 = vadd.f32 %v849_v25, %v848_v24 }
 0xc80   : > { %v851_v27 = vrot.slane %v850_v26, 2 }
 0xc82   : > { %v852_v28 = vadd.f32 %v851_v27, %v850_v26 }
 0xc84   : > { %v853_v29 = vrot.slane %v852_v28, 1 }
 0xc86   : > { %v854_v30 = vadd.f32 %v853_v29, %v852_v28 }
 0xc88   : > { %v855_v31 = vadd.f32 1e-16, %v854_v30 }
 0xc8a   : > { %3355 = vrcp.f32 %v855_v31 }
 0xc94   : > { %v3356_v32 = vpop.eup %3355 }
 0xc95   : > { %v857_v33 = vmul.f32 %v3356_v32, %v855_v31 }
 0xc97   : > { %v858_v34 = vsub.f32 2.0, %v857_v33 }
 0xc99   : > { %v859_v35 = vmul.f32 %v3356_v32, %v858_v34 }
 0xc9b   : > { %v860_v36 = vmul.f32 0.0078125, %v859_v35 }
 0xc9d   : > { %v862_v37 = vmul.f32 %v3939_v17, %v860_v36  ;;  %v861_v39 = vmul.f32 %v3937_v16, %v860_v36  ;;  %v864_v40 = vmul.f32 %v3942_v19, %v860_v36  ;;  %v863_v41 = vmul.f32 %v3945_v21, %v860_v36 }
 0xc9f   : > { %867 = vadd.xlane.f32.xlu1 %v862_v37  ;;  %865 = vadd.xlane.f32.xlu0 %v861_v39 }
 0xca3   : > { %871 = vadd.xlane.f32.xlu1 %v864_v40  ;;  %869 = vadd.xlane.f32.xlu0 %v863_v41 }
 0xd2c   : > { %v868_v42 = vpop.xlane.xlu1 %867  ;;  %v866_v43 = vpop.xlane.xlu0 %865 }
 0xd2d   : > { %v874_v44 = vadd.f32 1e-16, %v868_v42  ;;  %v873_v45 = vadd.f32 1e-16, %v866_v43 }
 0xd2f   : > { %3357 = vrcp.f32 %v874_v44 }
 0xd30   : > { %3359 = vrcp.f32 %v873_v45  ;;  %v872_v46 = vpop.xlane.xlu1 %871  ;;  %v870_v47 = vpop.xlane.xlu0 %869 }
 0xd31   : > { %v876_v38 = vadd.f32 1e-16, %v872_v46  ;;  %v875_v48 = vadd.f32 1e-16, %v870_v47 }
 0xd33   : > { %3361 = vrcp.f32 %v876_v38 }
 0xd34   : > { %3363 = vrcp.f32 %v875_v48 }
 0xd39   : > { %v3358_v49 = vpop.eup %3357 }
 0xd3a   : > { %v3360_v50 = vpop.eup %3359  ;;  %v882_v51 = vmul.f32 %v3358_v49, %v874_v44 }
 0xd3b   : > { %v881_v52 = vmul.f32 %v3360_v50, %v873_v45 }
 0xd3c   : > { %v886_v53 = vsub.f32 2.0, %v882_v51 }
 0xd3d   : > { %v3362_v54 = vpop.eup %3361  ;;  %v885_v55 = vsub.f32 2.0, %v881_v52 }
 0xd3e   : > { %v3364_v56 = vpop.eup %3363  ;;  %v890_v57 = vmul.f32 %v3358_v49, %v886_v53  ;;  %v884_v58 = vmul.f32 %v3362_v54, %v876_v38 }
 0xd3f   : > { %v889_v59 = vmul.f32 %v3360_v50, %v885_v55  ;;  %v883_v60 = vmul.f32 %v3364_v56, %v875_v48 }
 0xd40   : > { %v894_v61 = vmul.f32 0.03125, %v890_v57  ;;  %v888_v62 = vsub.f32 2.0, %v884_v58 }
 0xd41   : > { %v893_v63 = vmul.f32 0.03125, %v889_v59  ;;  %v887_v3 = vsub.f32 2.0, %v883_v60 }
 0xd42   : > { %v892_v4 = vmul.f32 %v3362_v54, %v888_v62  ;;  %v898_v5 = vmul.f32 %v3939_v17, %v894_v61 }
 0xd43   : > { %v897_v7 = vmul.f32 %v3937_v16, %v893_v63  ;;  %v891_v8 = vmul.f32 %v3364_v56, %v887_v3 }
 0xd44   : > { %v896_v9 = vmul.f32 0.03125, %v892_v4 }
 0xd45   : > { %v895_v10 = vmul.f32 0.03125, %v891_v8  ;;  %v901_v11 = vadd.f32 %v898_v5, %v897_v7 }
 0xd46   : > { %v900_v13 = vmul.f32 %v3942_v19, %v896_v9 }
 0xd47   : > { %v899_v12 = vmul.f32 %v3945_v21, %v895_v10 }
 0xd49   : > { %v902_v14 = vadd.f32 %v901_v11, %v899_v12 }
 0xd4b   : > { %v903_v15 = vadd.f32 %v902_v14, %v900_v13 }
 0xd4d   : > { %v904_v18 = vrot.slane %v903_v15, 4 }
 0xd4f   : > { %v905_v20 = vadd.f32 %v904_v18, %v903_v15 }
 0xd51   : > { %v906_v22 = vrot.slane %v905_v20, 2 }
 0xd53   : > { %v907_v23 = vadd.f32 %v906_v22, %v905_v20 }
 0xd55   : > { %v908_v24 = vrot.slane %v907_v23, 1 }
 0xd57   : > { %v909_v25 = vadd.f32 %v908_v24, %v907_v23 }
 0xd59   : > { %v910_v26 = vadd.f32 1e-16, %v909_v25 }
 0xd5b   : > { %3365 = vrcp.f32 %v910_v26 }
 0xd65   : > { %v3366_v27 = vpop.eup %3365 }
 0xd66   : > { %v912_v28 = vmul.f32 %v3366_v27, %v910_v26 }
 0xd68   : > { %v913_v29 = vsub.f32 2.0, %v912_v28 }
 0xd6a   : > { %v914_v30 = vmul.f32 %v3366_v27, %v913_v29 }
 0xd6c   : > { %v915_v31 = vmul.f32 0.0078125, %v914_v30 }
 0xd6e   : > { %v917_v32 = vmul.f32 %v3939_v17, %v915_v31  ;;  %v916_v33 = vmul.f32 %v3937_v16, %v915_v31  ;;  %v919_v34 = vmul.f32 %v3942_v19, %v915_v31  ;;  %v918_v35 = vmul.f32 %v3945_v21, %v915_v31 }
 0xd70   : > { %922 = vadd.xlane.f32.xlu1 %v917_v32  ;;  %920 = vadd.xlane.f32.xlu0 %v916_v33 }
 0xd74   : > { %926 = vadd.xlane.f32.xlu1 %v919_v34  ;;  %924 = vadd.xlane.f32.xlu0 %v918_v35 }
 0xdfd   : > { %v923_v36 = vpop.xlane.xlu1 %922  ;;  %v921_v37 = vpop.xlane.xlu0 %920 }
 0xdfe   : > { %v929_v39 = vadd.f32 1e-16, %v923_v36  ;;  %v928_v40 = vadd.f32 1e-16, %v921_v37 }
 0xe00   : > { %3367 = vrcp.f32 %v929_v39 }
 0xe01   : > { %3369 = vrcp.f32 %v928_v40  ;;  %v927_v41 = vpop.xlane.xlu1 %926  ;;  %v925_v42 = vpop.xlane.xlu0 %924 }
 0xe02   : > { %v931_v43 = vadd.f32 1e-16, %v927_v41  ;;  %v930_v44 = vadd.f32 1e-16, %v925_v42 }
 0xe04   : > { %3371 = vrcp.f32 %v931_v43 }
 0xe05   : > { %3373 = vrcp.f32 %v930_v44 }
 0xe0a   : > { %v3368_v45 = vpop.eup %3367 }
 0xe0b   : > { %v3370_v46 = vpop.eup %3369  ;;  %v937_v47 = vmul.f32 %v3368_v45, %v929_v39 }
 0xe0c   : > { %v936_v38 = vmul.f32 %v3370_v46, %v928_v40 }
 0xe0d   : > { %v941_v48 = vsub.f32 2.0, %v937_v47 }
 0xe0e   : > { %v3372_v49 = vpop.eup %3371  ;;  %v940_v50 = vsub.f32 2.0, %v936_v38 }
 0xe0f   : > { %v3374_v51 = vpop.eup %3373  ;;  %v945_v52 = vmul.f32 %v3368_v45, %v941_v48  ;;  %v939_v53 = vmul.f32 %v3372_v49, %v931_v43 }
 0xe10   : > { %v944_v54 = vmul.f32 %v3370_v46, %v940_v50  ;;  %v938_v55 = vmul.f32 %v3374_v51, %v930_v44 }
 0xe11   : > { %v949_v56 = vmul.f32 0.03125, %v945_v52  ;;  %v943_v57 = vsub.f32 2.0, %v939_v53 }
 0xe12   : > { %v948_v58 = vmul.f32 0.03125, %v944_v54  ;;  %v942_v59 = vsub.f32 2.0, %v938_v55 }
 0xe13   : > { %v947_v60 = vmul.f32 %v3372_v49, %v943_v57  ;;  %v953_v61 = vmul.f32 %v3939_v17, %v949_v56 }
 0xe14   : > { %v952_v62 = vmul.f32 %v3937_v16, %v948_v58  ;;  %v946_v63 = vmul.f32 %v3374_v51, %v942_v59 }
 0xe15   : > { %v951_v3 = vmul.f32 0.03125, %v947_v60 }
 0xe16   : > { %v950_v4 = vmul.f32 0.03125, %v946_v63  ;;  %v956_v5 = vadd.f32 %v953_v61, %v952_v62 }
 0xe17   : > { %v955_v8 = vmul.f32 %v3942_v19, %v951_v3 }
 0xe18   : > { %v954_v7 = vmul.f32 %v3945_v21, %v950_v4 }
 0xe1a   : > { %v957_v9 = vadd.f32 %v956_v5, %v954_v7 }
 0xe1c   : > { %v958_v10 = vadd.f32 %v957_v9, %v955_v8 }
 0xe1e   : > { %v959_v11 = vrot.slane %v958_v10, 4 }
 0xe20   : > { %v960_v12 = vadd.f32 %v959_v11, %v958_v10 }
 0xe22   : > { %v961_v13 = vrot.slane %v960_v12, 2 }
 0xe24   : > { %v962_v14 = vadd.f32 %v961_v13, %v960_v12 }
 0xe26   : > { %v963_v15 = vrot.slane %v962_v14, 1 }
 0xe28   : > { %v964_v18 = vadd.f32 %v963_v15, %v962_v14 }
 0xe2a   : > { %v965_v20 = vadd.f32 1e-16, %v964_v18 }
 0xe2c   : > { %3375 = vrcp.f32 %v965_v20 }
 0xe36   : > { %v3376_v22 = vpop.eup %3375 }
 0xe37   : > { %v967_v23 = vmul.f32 %v3376_v22, %v965_v20 }
 0xe39   : > { %v968_v24 = vsub.f32 2.0, %v967_v23 }
 0xe3b   : > { %v969_v25 = vmul.f32 %v3376_v22, %v968_v24 }
 0xe3d   : > { %v970_v26 = vmul.f32 0.0078125, %v969_v25 }
 0xe3f   : > { %v972_v27 = vmul.f32 %v3939_v17, %v970_v26  ;;  %v971_v28 = vmul.f32 %v3937_v16, %v970_v26  ;;  %v974_v29 = vmul.f32 %v3942_v19, %v970_v26  ;;  %v973_v30 = vmul.f32 %v3945_v21, %v970_v26 }
 0xe41   : > { %977 = vadd.xlane.f32.xlu1 %v972_v27  ;;  %975 = vadd.xlane.f32.xlu0 %v971_v28 }
 0xe45   : > { %981 = vadd.xlane.f32.xlu1 %v974_v29  ;;  %979 = vadd.xlane.f32.xlu0 %v973_v30 }
 0xece   : > { %v978_v31 = vpop.xlane.xlu1 %977  ;;  %v976_v32 = vpop.xlane.xlu0 %975 }
 0xecf   : > { %v984_v33 = vadd.f32 1e-16, %v978_v31  ;;  %v983_v34 = vadd.f32 1e-16, %v976_v32 }
 0xed1   : > { %3377 = vrcp.f32 %v984_v33 }
 0xed2   : > { %3379 = vrcp.f32 %v983_v34  ;;  %v982_v35 = vpop.xlane.xlu1 %981  ;;  %v980_v36 = vpop.xlane.xlu0 %979 }
 0xed3   : > { %v986_v37 = vadd.f32 1e-16, %v982_v35  ;;  %v985_v39 = vadd.f32 1e-16, %v980_v36 }
 0xed5   : > { %3381 = vrcp.f32 %v986_v37 }
 0xed6   : > { %3383 = vrcp.f32 %v985_v39 }
 0xedb   : > { %v3378_v40 = vpop.eup %3377 }
 0xedc   : > { %v3380_v41 = vpop.eup %3379  ;;  %v992_v42 = vmul.f32 %v3378_v40, %v984_v33 }
 0xedd   : > { %v991_v43 = vmul.f32 %v3380_v41, %v983_v34 }
 0xede   : > { %v996_v44 = vsub.f32 2.0, %v992_v42 }
 0xedf   : > { %v3382_v45 = vpop.eup %3381  ;;  %v995_v46 = vsub.f32 2.0, %v991_v43 }
 0xee0   : > { %v3384_v47 = vpop.eup %3383  ;;  %v1000_v38 = vmul.f32 %v3378_v40, %v996_v44  ;;  %v994_v48 = vmul.f32 %v3382_v45, %v986_v37 }
 0xee1   : > { %v999_v49 = vmul.f32 %v3380_v41, %v995_v46  ;;  %v993_v50 = vmul.f32 %v3384_v47, %v985_v39 }
 0xee2   : > { %v1004_v51 = vmul.f32 0.03125, %v1000_v38  ;;  %v998_v52 = vsub.f32 2.0, %v994_v48 }
 0xee3   : > { %v1003_v53 = vmul.f32 0.03125, %v999_v49  ;;  %v997_v54 = vsub.f32 2.0, %v993_v50 }
 0xee4   : > { %v1002_v55 = vmul.f32 %v3382_v45, %v998_v52  ;;  %v1008_v56 = vmul.f32 %v3939_v17, %v1004_v51 }
 0xee5   : > { %v1007_v57 = vmul.f32 %v3937_v16, %v1003_v53  ;;  %v1001_v58 = vmul.f32 %v3384_v47, %v997_v54 }
 0xee6   : > { %v1006_v59 = vmul.f32 0.03125, %v1002_v55 }
 0xee7   : > { %v1005_v60 = vmul.f32 0.03125, %v1001_v58  ;;  %v1011_v61 = vadd.f32 %v1008_v56, %v1007_v57 }
 0xee8   : > { %v1010_v63 = vmul.f32 %v3942_v19, %v1006_v59 }
 0xee9   : > { %v1009_v62 = vmul.f32 %v3945_v21, %v1005_v60 }
 0xeeb   : > { %v1012_v3 = vadd.f32 %v1011_v61, %v1009_v62 }
 0xeed   : > { %v1013_v4 = vadd.f32 %v1012_v3, %v1010_v63 }
 0xeef   : > { %v1014_v5 = vrot.slane %v1013_v4, 4 }
 0xef1   : > { %v1015_v7 = vadd.f32 %v1014_v5, %v1013_v4 }
 0xef3   : > { %v1016_v8 = vrot.slane %v1015_v7, 2 }
 0xef5   : > { %v1017_v9 = vadd.f32 %v1016_v8, %v1015_v7 }
 0xef7   : > { %v1018_v10 = vrot.slane %v1017_v9, 1 }
 0xef9   : > { %v1019_v11 = vadd.f32 %v1018_v10, %v1017_v9 }
 0xefb   : > { %v1020_v12 = vadd.f32 1e-16, %v1019_v11 }
 0xefd   : > { %3385 = vrcp.f32 %v1020_v12 }
 0xf07   : > { %v3386_v13 = vpop.eup %3385 }
 0xf08   : > { %v1022_v14 = vmul.f32 %v3386_v13, %v1020_v12 }
 0xf0a   : > { %v1023_v15 = vsub.f32 2.0, %v1022_v14 }
 0xf0c   : > { %v1024_v18 = vmul.f32 %v3386_v13, %v1023_v15 }
 0xf0e   : > { %v1025_v20 = vmul.f32 0.0078125, %v1024_v18 }
 0xf10   : > { %v1027_v22 = vmul.f32 %v3939_v17, %v1025_v20  ;;  %v1026_v23 = vmul.f32 %v3937_v16, %v1025_v20  ;;  %v1029_v24 = vmul.f32 %v3942_v19, %v1025_v20  ;;  %v1028_v25 = vmul.f32 %v3945_v21, %v1025_v20 }
 0xf12   : > { %1032 = vadd.xlane.f32.xlu1 %v1027_v22  ;;  %1030 = vadd.xlane.f32.xlu0 %v1026_v23 }
 0xf16   : > { %1036 = vadd.xlane.f32.xlu1 %v1029_v24  ;;  %1034 = vadd.xlane.f32.xlu0 %v1028_v25 }
 0xf9f   : > { %v1033_v26 = vpop.xlane.xlu1 %1032  ;;  %v1031_v27 = vpop.xlane.xlu0 %1030 }
 0xfa0   : > { %v1039_v28 = vadd.f32 1e-16, %v1033_v26  ;;  %v1038_v29 = vadd.f32 1e-16, %v1031_v27 }
 0xfa2   : > { %3387 = vrcp.f32 %v1039_v28 }
 0xfa3   : > { %3389 = vrcp.f32 %v1038_v29  ;;  %v1037_v30 = vpop.xlane.xlu1 %1036  ;;  %v1035_v31 = vpop.xlane.xlu0 %1034 }
 0xfa4   : > { %v1041_v32 = vadd.f32 1e-16, %v1037_v30  ;;  %v1040_v33 = vadd.f32 1e-16, %v1035_v31 }
 0xfa6   : > { %3391 = vrcp.f32 %v1041_v32 }
 0xfa7   : > { %3393 = vrcp.f32 %v1040_v33 }
 0xfac   : > { %v3388_v34 = vpop.eup %3387 }
 0xfad   : > { %v3390_v35 = vpop.eup %3389  ;;  %v1047_v36 = vmul.f32 %v3388_v34, %v1039_v28 }
 0xfae   : > { %v1046_v37 = vmul.f32 %v3390_v35, %v1038_v29 }
 0xfaf   : > { %v1051_v39 = vsub.f32 2.0, %v1047_v36 }
 0xfb0   : > { %v3392_v40 = vpop.eup %3391  ;;  %v1050_v41 = vsub.f32 2.0, %v1046_v37 }
 0xfb1   : > { %v3394_v42 = vpop.eup %3393  ;;  %v1055_v43 = vmul.f32 %v3388_v34, %v1051_v39  ;;  %v1049_v44 = vmul.f32 %v3392_v40, %v1041_v32 }
 0xfb2   : > { %v1054_v45 = vmul.f32 %v3390_v35, %v1050_v41  ;;  %v1048_v46 = vmul.f32 %v3394_v42, %v1040_v33 }
 0xfb3   : > { %v1059_v47 = vmul.f32 0.03125, %v1055_v43  ;;  %v1053_v38 = vsub.f32 2.0, %v1049_v44 }
 0xfb4   : > { %v1058_v48 = vmul.f32 0.03125, %v1054_v45  ;;  %v1052_v49 = vsub.f32 2.0, %v1048_v46 }
 0xfb5   : > { %v1057_v50 = vmul.f32 %v3392_v40, %v1053_v38  ;;  %v1063_v51 = vmul.f32 %v3939_v17, %v1059_v47 }
 0xfb6   : > { %v1062_v52 = vmul.f32 %v3937_v16, %v1058_v48  ;;  %v1056_v53 = vmul.f32 %v3394_v42, %v1052_v49 }
 0xfb7   : > { %v1061_v54 = vmul.f32 0.03125, %v1057_v50 }
 0xfb8   : > { %v1060_v55 = vmul.f32 0.03125, %v1056_v53  ;;  %v1066_v56 = vadd.f32 %v1063_v51, %v1062_v52 }
 0xfb9   : > { %v1065_v58 = vmul.f32 %v3942_v19, %v1061_v54 }
 0xfba   : > { %v1064_v57 = vmul.f32 %v3945_v21, %v1060_v55 }
 0xfbc   : > { %v1067_v59 = vadd.f32 %v1066_v56, %v1064_v57 }
 0xfbe   : > { %v1068_v60 = vadd.f32 %v1067_v59, %v1065_v58 }
 0xfc0   : > { %v1069_v61 = vrot.slane %v1068_v60, 4 }
 0xfc2   : > { %v1070_v62 = vadd.f32 %v1069_v61, %v1068_v60 }
 0xfc4   : > { %v1071_v63 = vrot.slane %v1070_v62, 2 }
 0xfc6   : > { %v1072_v3 = vadd.f32 %v1071_v63, %v1070_v62 }
 0xfc8   : > { %v1073_v4 = vrot.slane %v1072_v3, 1 }
 0xfca   : > { %v1074_v5 = vadd.f32 %v1073_v4, %v1072_v3 }
 0xfcc   : > { %v1075_v7 = vadd.f32 1e-16, %v1074_v5 }
 0xfce   : > { %3395 = vrcp.f32 %v1075_v7 }
 0xfd8   : > { %v3396_v8 = vpop.eup %3395 }
 0xfd9   : > { %v1077_v9 = vmul.f32 %v3396_v8, %v1075_v7 }
 0xfdb   : > { %v1078_v10 = vsub.f32 2.0, %v1077_v9 }
 0xfdd   : > { %v1079_v11 = vmul.f32 %v3396_v8, %v1078_v10 }
 0xfdf   : > { %v1080_v12 = vmul.f32 0.0078125, %v1079_v11 }
 0xfe1   : > { %v1082_v13 = vmul.f32 %v3939_v17, %v1080_v12  ;;  %v1081_v14 = vmul.f32 %v3937_v16, %v1080_v12  ;;  %v1084_v15 = vmul.f32 %v3942_v19, %v1080_v12  ;;  %v1083_v18 = vmul.f32 %v3945_v21, %v1080_v12 }
 0xfe3   : > { %1087 = vadd.xlane.f32.xlu1 %v1082_v13  ;;  %1085 = vadd.xlane.f32.xlu0 %v1081_v14 }
 0xfe7   : > { %1091 = vadd.xlane.f32.xlu1 %v1084_v15  ;;  %1089 = vadd.xlane.f32.xlu0 %v1083_v18 }
0x1070   : > { %v1088_v20 = vpop.xlane.xlu1 %1087  ;;  %v1086_v22 = vpop.xlane.xlu0 %1085 }
0x1071   : > { %v1094_v23 = vadd.f32 1e-16, %v1088_v20  ;;  %v1093_v24 = vadd.f32 1e-16, %v1086_v22 }
0x1073   : > { %3397 = vrcp.f32 %v1094_v23 }
0x1074   : > { %3399 = vrcp.f32 %v1093_v24  ;;  %v1092_v25 = vpop.xlane.xlu1 %1091  ;;  %v1090_v26 = vpop.xlane.xlu0 %1089 }
0x1075   : > { %v1096_v27 = vadd.f32 1e-16, %v1092_v25  ;;  %v1095_v28 = vadd.f32 1e-16, %v1090_v26 }
0x1077   : > { %3401 = vrcp.f32 %v1096_v27 }
0x1078   : > { %3403 = vrcp.f32 %v1095_v28 }
0x107d   : > { %v3398_v29 = vpop.eup %3397 }
0x107e   : > { %v3400_v30 = vpop.eup %3399  ;;  %v1102_v31 = vmul.f32 %v3398_v29, %v1094_v23 }
0x107f   : > { %v1101_v32 = vmul.f32 %v3400_v30, %v1093_v24 }
0x1080   : > { %v1106_v33 = vsub.f32 2.0, %v1102_v31 }
0x1081   : > { %v3402_v34 = vpop.eup %3401  ;;  %v1105_v35 = vsub.f32 2.0, %v1101_v32 }
0x1082   : > { %v3404_v36 = vpop.eup %3403  ;;  %v1110_v37 = vmul.f32 %v3398_v29, %v1106_v33  ;;  %v1104_v39 = vmul.f32 %v3402_v34, %v1096_v27 }
0x1083   : > { %v1109_v40 = vmul.f32 %v3400_v30, %v1105_v35  ;;  %v1103_v41 = vmul.f32 %v3404_v36, %v1095_v28 }
0x1084   : > { %v1114_v42 = vmul.f32 0.03125, %v1110_v37  ;;  %v1108_v43 = vsub.f32 2.0, %v1104_v39 }
0x1085   : > { %v1113_v44 = vmul.f32 0.03125, %v1109_v40  ;;  %v1107_v45 = vsub.f32 2.0, %v1103_v41 }
0x1086   : > { %v1112_v46 = vmul.f32 %v3402_v34, %v1108_v43  ;;  %v1118_v47 = vmul.f32 %v3939_v17, %v1114_v42 }
0x1087   : > { %v1117_v38 = vmul.f32 %v3937_v16, %v1113_v44  ;;  %v1111_v48 = vmul.f32 %v3404_v36, %v1107_v45 }
0x1088   : > { %v1116_v49 = vmul.f32 0.03125, %v1112_v46 }
0x1089   : > { %v1115_v50 = vmul.f32 0.03125, %v1111_v48  ;;  %v1121_v51 = vadd.f32 %v1118_v47, %v1117_v38 }
0x108a   : > { %v1120_v53 = vmul.f32 %v3942_v19, %v1116_v49 }
0x108b   : > { %v1119_v52 = vmul.f32 %v3945_v21, %v1115_v50 }
0x108d   : > { %v1122_v54 = vadd.f32 %v1121_v51, %v1119_v52 }
0x108f   : > { %v1123_v55 = vadd.f32 %v1122_v54, %v1120_v53 }
0x1091   : > { %v1124_v56 = vrot.slane %v1123_v55, 4 }
0x1093   : > { %v1125_v57 = vadd.f32 %v1124_v56, %v1123_v55 }
0x1095   : > { %v1126_v58 = vrot.slane %v1125_v57, 2 }
0x1097   : > { %v1127_v59 = vadd.f32 %v1126_v58, %v1125_v57 }
0x1099   : > { %v1128_v60 = vrot.slane %v1127_v59, 1 }
0x109b   : > { %v1129_v61 = vadd.f32 %v1128_v60, %v1127_v59 }
0x109d   : > { %v1130_v62 = vadd.f32 1e-16, %v1129_v61 }
0x109f   : > { %3405 = vrcp.f32 %v1130_v62 }
0x10a9   : > { %v3406_v63 = vpop.eup %3405 }
0x10aa   : > { %v1132_v3 = vmul.f32 %v3406_v63, %v1130_v62 }
0x10ac   : > { %v1133_v4 = vsub.f32 2.0, %v1132_v3 }
0x10ae   : > { %v1134_v5 = vmul.f32 %v3406_v63, %v1133_v4 }
0x10b0   : > { %v1135_v7 = vmul.f32 0.0078125, %v1134_v5 }
0x10b2   : > { %v1137_v8 = vmul.f32 %v3939_v17, %v1135_v7  ;;  %v1136_v9 = vmul.f32 %v3937_v16, %v1135_v7  ;;  %v1139_v10 = vmul.f32 %v3942_v19, %v1135_v7  ;;  %v1138_v11 = vmul.f32 %v3945_v21, %v1135_v7 }
0x10b4   : > { %1142 = vadd.xlane.f32.xlu1 %v1137_v8  ;;  %1140 = vadd.xlane.f32.xlu0 %v1136_v9 }
0x10b8   : > { %1146 = vadd.xlane.f32.xlu1 %v1139_v10  ;;  %1144 = vadd.xlane.f32.xlu0 %v1138_v11 }
0x1141   : > { %v1143_v12 = vpop.xlane.xlu1 %1142  ;;  %v1141_v13 = vpop.xlane.xlu0 %1140 }
0x1142   : > { %v1149_v14 = vadd.f32 1e-16, %v1143_v12  ;;  %v1148_v15 = vadd.f32 1e-16, %v1141_v13 }
0x1144   : > { %3407 = vrcp.f32 %v1149_v14 }
0x1145   : > { %3409 = vrcp.f32 %v1148_v15  ;;  %v1147_v18 = vpop.xlane.xlu1 %1146  ;;  %v1145_v20 = vpop.xlane.xlu0 %1144 }
0x1146   : > { %v1151_v22 = vadd.f32 1e-16, %v1147_v18  ;;  %v1150_v23 = vadd.f32 1e-16, %v1145_v20 }
0x1148   : > { %3411 = vrcp.f32 %v1151_v22 }
0x1149   : > { %3413 = vrcp.f32 %v1150_v23 }
0x114e   : > { %v3408_v24 = vpop.eup %3407 }
0x114f   : > { %v3410_v25 = vpop.eup %3409  ;;  %v1157_v26 = vmul.f32 %v3408_v24, %v1149_v14 }
0x1150   : > { %v1156_v27 = vmul.f32 %v3410_v25, %v1148_v15 }
0x1151   : > { %v1161_v28 = vsub.f32 2.0, %v1157_v26 }
0x1152   : > { %v3412_v29 = vpop.eup %3411  ;;  %v1160_v30 = vsub.f32 2.0, %v1156_v27 }
0x1153   : > { %v3414_v31 = vpop.eup %3413  ;;  %v1165_v32 = vmul.f32 %v3408_v24, %v1161_v28  ;;  %v1159_v33 = vmul.f32 %v3412_v29, %v1151_v22 }
0x1154   : > { %v1164_v34 = vmul.f32 %v3410_v25, %v1160_v30  ;;  %v1158_v35 = vmul.f32 %v3414_v31, %v1150_v23 }
0x1155   : > { %v1169_v36 = vmul.f32 0.03125, %v1165_v32  ;;  %v1163_v37 = vsub.f32 2.0, %v1159_v33 }
0x1156   : > { %v1168_v39 = vmul.f32 0.03125, %v1164_v34  ;;  %v1162_v40 = vsub.f32 2.0, %v1158_v35 }
0x1157   : > { %v1167_v41 = vmul.f32 %v3412_v29, %v1163_v37  ;;  %v1173_v42 = vmul.f32 %v3939_v17, %v1169_v36 }
0x1158   : > { %v1172_v43 = vmul.f32 %v3937_v16, %v1168_v39  ;;  %v1166_v44 = vmul.f32 %v3414_v31, %v1162_v40 }
0x1159   : > { %v1171_v45 = vmul.f32 0.03125, %v1167_v41 }
0x115a   : > { %v1170_v46 = vmul.f32 0.03125, %v1166_v44  ;;  %v1176_v47 = vadd.f32 %v1173_v42, %v1172_v43 }
0x115b   : > { %v1175_v48 = vmul.f32 %v3942_v19, %v1171_v45 }
0x115c   : > { %v1174_v38 = vmul.f32 %v3945_v21, %v1170_v46 }
0x115e   : > { %v1177_v49 = vadd.f32 %v1176_v47, %v1174_v38 }
0x1160   : > { %v1178_v50 = vadd.f32 %v1177_v49, %v1175_v48 }
0x1162   : > { %v1179_v51 = vrot.slane %v1178_v50, 4 }
0x1164   : > { %v1180_v52 = vadd.f32 %v1179_v51, %v1178_v50 }
0x1166   : > { %v1181_v53 = vrot.slane %v1180_v52, 2 }
0x1168   : > { %v1182_v54 = vadd.f32 %v1181_v53, %v1180_v52 }
0x116a   : > { %v1183_v55 = vrot.slane %v1182_v54, 1 }
0x116c   : > { %v1184_v56 = vadd.f32 %v1183_v55, %v1182_v54 }
0x116e   : > { %v1185_v57 = vadd.f32 1e-16, %v1184_v56 }
0x1170   : > { %3415 = vrcp.f32 %v1185_v57 }
0x117a   : > { %v3416_v58 = vpop.eup %3415 }
0x117b   : > { %v1187_v59 = vmul.f32 %v3416_v58, %v1185_v57 }
0x117d   : > { %v1188_v60 = vsub.f32 2.0, %v1187_v59 }
0x117f   : > { %v1189_v61 = vmul.f32 %v3416_v58, %v1188_v60 }
0x1181   : > { %v1190_v62 = vmul.f32 0.0078125, %v1189_v61 }
0x1183   : > { %v1192_v63 = vmul.f32 %v3939_v17, %v1190_v62  ;;  %v1191_v3 = vmul.f32 %v3937_v16, %v1190_v62  ;;  %v1194_v4 = vmul.f32 %v3942_v19, %v1190_v62  ;;  %v1193_v5 = vmul.f32 %v3945_v21, %v1190_v62 }
0x1185   : > { %1197 = vadd.xlane.f32.xlu1 %v1192_v63  ;;  %1195 = vadd.xlane.f32.xlu0 %v1191_v3 }
0x1189   : > { %1201 = vadd.xlane.f32.xlu1 %v1194_v4  ;;  %1199 = vadd.xlane.f32.xlu0 %v1193_v5 }
0x1212   : > { %v1198_v7 = vpop.xlane.xlu1 %1197  ;;  %v1196_v8 = vpop.xlane.xlu0 %1195 }
0x1213   : > { %v1204_v9 = vadd.f32 1e-16, %v1198_v7  ;;  %v1203_v10 = vadd.f32 1e-16, %v1196_v8 }
0x1215   : > { %3417 = vrcp.f32 %v1204_v9 }
0x1216   : > { %3419 = vrcp.f32 %v1203_v10  ;;  %v1202_v11 = vpop.xlane.xlu1 %1201  ;;  %v1200_v12 = vpop.xlane.xlu0 %1199 }
0x1217   : > { %v1206_v13 = vadd.f32 1e-16, %v1202_v11  ;;  %v1205_v14 = vadd.f32 1e-16, %v1200_v12 }
0x1219   : > { %3421 = vrcp.f32 %v1206_v13 }
0x121a   : > { %3423 = vrcp.f32 %v1205_v14 }
0x121f   : > { %v3418_v15 = vpop.eup %3417 }
0x1220   : > { %v3420_v18 = vpop.eup %3419  ;;  %v1212_v20 = vmul.f32 %v3418_v15, %v1204_v9 }
0x1221   : > { %v1211_v22 = vmul.f32 %v3420_v18, %v1203_v10 }
0x1222   : > { %v1216_v23 = vsub.f32 2.0, %v1212_v20 }
0x1223   : > { %v3422_v24 = vpop.eup %3421  ;;  %v1215_v25 = vsub.f32 2.0, %v1211_v22 }
0x1224   : > { %v3424_v26 = vpop.eup %3423  ;;  %v1220_v27 = vmul.f32 %v3418_v15, %v1216_v23  ;;  %v1214_v28 = vmul.f32 %v3422_v24, %v1206_v13 }
0x1225   : > { %v1219_v29 = vmul.f32 %v3420_v18, %v1215_v25  ;;  %v1213_v30 = vmul.f32 %v3424_v26, %v1205_v14 }
0x1226   : > { %v1224_v31 = vmul.f32 0.03125, %v1220_v27  ;;  %v1218_v32 = vsub.f32 2.0, %v1214_v28 }
0x1227   : > { %v1223_v33 = vmul.f32 0.03125, %v1219_v29  ;;  %v1217_v34 = vsub.f32 2.0, %v1213_v30 }
0x1228   : > { %v1222_v35 = vmul.f32 %v3422_v24, %v1218_v32  ;;  %v1228_v36 = vmul.f32 %v3939_v17, %v1224_v31 }
0x1229   : > { %v1227_v37 = vmul.f32 %v3937_v16, %v1223_v33  ;;  %v1221_v39 = vmul.f32 %v3424_v26, %v1217_v34 }
0x122a   : > { %v1226_v40 = vmul.f32 0.03125, %v1222_v35 }
0x122b   : > { %v1225_v41 = vmul.f32 0.03125, %v1221_v39  ;;  %v1231_v42 = vadd.f32 %v1228_v36, %v1227_v37 }
0x122c   : > { %v1230_v44 = vmul.f32 %v3942_v19, %v1226_v40 }
0x122d   : > { %v1229_v43 = vmul.f32 %v3945_v21, %v1225_v41 }
0x122f   : > { %v1232_v45 = vadd.f32 %v1231_v42, %v1229_v43 }
0x1231   : > { %v1233_v46 = vadd.f32 %v1232_v45, %v1230_v44 }
0x1233   : > { %v1234_v47 = vrot.slane %v1233_v46, 4 }
0x1235   : > { %v1235_v38 = vadd.f32 %v1234_v47, %v1233_v46 }
0x1237   : > { %v1236_v48 = vrot.slane %v1235_v38, 2 }
0x1239   : > { %v1237_v49 = vadd.f32 %v1236_v48, %v1235_v38 }
0x123b   : > { %v1238_v50 = vrot.slane %v1237_v49, 1 }
0x123d   : > { %v1239_v51 = vadd.f32 %v1238_v50, %v1237_v49 }
0x123f   : > { %v1240_v52 = vadd.f32 1e-16, %v1239_v51 }
0x1241   : > { %3425 = vrcp.f32 %v1240_v52 }
0x124b   : > { %v3426_v53 = vpop.eup %3425 }
0x124c   : > { %v1242_v54 = vmul.f32 %v3426_v53, %v1240_v52 }
0x124e   : > { %v1243_v55 = vsub.f32 2.0, %v1242_v54 }
0x1250   : > { %v1244_v56 = vmul.f32 %v3426_v53, %v1243_v55 }
0x1252   : > { %v1245_v57 = vmul.f32 0.0078125, %v1244_v56 }
0x1254   : > { %v1247_v58 = vmul.f32 %v3939_v17, %v1245_v57  ;;  %v1246_v59 = vmul.f32 %v3937_v16, %v1245_v57  ;;  %v1249_v60 = vmul.f32 %v3942_v19, %v1245_v57  ;;  %v1248_v61 = vmul.f32 %v3945_v21, %v1245_v57 }
0x1256   : > { %1252 = vadd.xlane.f32.xlu1 %v1247_v58  ;;  %1250 = vadd.xlane.f32.xlu0 %v1246_v59 }
0x125a   : > { %1256 = vadd.xlane.f32.xlu1 %v1249_v60  ;;  %1254 = vadd.xlane.f32.xlu0 %v1248_v61 }
0x12e3   : > { %v1253_v62 = vpop.xlane.xlu1 %1252  ;;  %v1251_v63 = vpop.xlane.xlu0 %1250 }
0x12e4   : > { %v1259_v3 = vadd.f32 1e-16, %v1253_v62  ;;  %v1258_v4 = vadd.f32 1e-16, %v1251_v63 }
0x12e6   : > { %3427 = vrcp.f32 %v1259_v3 }
0x12e7   : > { %3429 = vrcp.f32 %v1258_v4  ;;  %v1257_v5 = vpop.xlane.xlu1 %1256  ;;  %v1255_v7 = vpop.xlane.xlu0 %1254 }
0x12e8   : > { %v1261_v8 = vadd.f32 1e-16, %v1257_v5  ;;  %v1260_v9 = vadd.f32 1e-16, %v1255_v7 }
0x12ea   : > { %3431 = vrcp.f32 %v1261_v8 }
0x12eb   : > { %3433 = vrcp.f32 %v1260_v9 }
0x12f0   : > { %v3428_v10 = vpop.eup %3427 }
0x12f1   : > { %v3430_v11 = vpop.eup %3429  ;;  %v1267_v12 = vmul.f32 %v3428_v10, %v1259_v3 }
0x12f2   : > { %v1266_v13 = vmul.f32 %v3430_v11, %v1258_v4 }
0x12f3   : > { %v1271_v14 = vsub.f32 2.0, %v1267_v12 }
0x12f4   : > { %v3432_v15 = vpop.eup %3431  ;;  %v1270_v18 = vsub.f32 2.0, %v1266_v13 }
0x12f5   : > { %v3434_v20 = vpop.eup %3433  ;;  %v1275_v22 = vmul.f32 %v3428_v10, %v1271_v14  ;;  %v1269_v23 = vmul.f32 %v3432_v15, %v1261_v8 }
0x12f6   : > { %v1274_v24 = vmul.f32 %v3430_v11, %v1270_v18  ;;  %v1268_v25 = vmul.f32 %v3434_v20, %v1260_v9 }
0x12f7   : > { %v1279_v26 = vmul.f32 0.03125, %v1275_v22  ;;  %v1273_v27 = vsub.f32 2.0, %v1269_v23 }
0x12f8   : > { %v1278_v28 = vmul.f32 0.03125, %v1274_v24  ;;  %v1272_v29 = vsub.f32 2.0, %v1268_v25 }
0x12f9   : > { %v1277_v30 = vmul.f32 %v3432_v15, %v1273_v27  ;;  %v1283_v31 = vmul.f32 %v3939_v17, %v1279_v26 }
0x12fa   : > { %v1282_v32 = vmul.f32 %v3937_v16, %v1278_v28  ;;  %v1276_v33 = vmul.f32 %v3434_v20, %v1272_v29 }
0x12fb   : > { %v1281_v34 = vmul.f32 0.03125, %v1277_v30 }
0x12fc   : > { %v1280_v35 = vmul.f32 0.03125, %v1276_v33  ;;  %v1286_v36 = vadd.f32 %v1283_v31, %v1282_v32 }
0x12fd   : > { %v1285_v39 = vmul.f32 %v3942_v19, %v1281_v34 }
0x12fe   : > { %v1284_v37 = vmul.f32 %v3945_v21, %v1280_v35 }
0x1300   : > { %v1287_v40 = vadd.f32 %v1286_v36, %v1284_v37 }
0x1302   : > { %v1288_v41 = vadd.f32 %v1287_v40, %v1285_v39 }
0x1304   : > { %v1289_v42 = vrot.slane %v1288_v41, 4 }
0x1306   : > { %v1290_v43 = vadd.f32 %v1289_v42, %v1288_v41 }
0x1308   : > { %v1291_v44 = vrot.slane %v1290_v43, 2 }
0x130a   : > { %v1292_v45 = vadd.f32 %v1291_v44, %v1290_v43 }
0x130c   : > { %v1293_v46 = vrot.slane %v1292_v45, 1 }
0x130e   : > { %v1294_v47 = vadd.f32 %v1293_v46, %v1292_v45 }
0x1310   : > { %v1295_v38 = vadd.f32 1e-16, %v1294_v47 }
0x1312   : > { %3435 = vrcp.f32 %v1295_v38 }
0x131c   : > { %v3436_v48 = vpop.eup %3435 }
0x131d   : > { %v1297_v49 = vmul.f32 %v3436_v48, %v1295_v38 }
0x131f   : > { %v1298_v50 = vsub.f32 2.0, %v1297_v49 }
0x1321   : > { %v1299_v51 = vmul.f32 %v3436_v48, %v1298_v50 }
0x1323   : > { %v1300_v52 = vmul.f32 0.0078125, %v1299_v51 }
0x1325   : > { %v1302_v53 = vmul.f32 %v3939_v17, %v1300_v52  ;;  %v1301_v54 = vmul.f32 %v3937_v16, %v1300_v52  ;;  %v1304_v55 = vmul.f32 %v3942_v19, %v1300_v52  ;;  %v1303_v56 = vmul.f32 %v3945_v21, %v1300_v52 }
0x1327   : > { %1307 = vadd.xlane.f32.xlu1 %v1302_v53  ;;  %1305 = vadd.xlane.f32.xlu0 %v1301_v54 }
0x132b   : > { %1311 = vadd.xlane.f32.xlu1 %v1304_v55  ;;  %1309 = vadd.xlane.f32.xlu0 %v1303_v56 }
0x13b4   : > { %v1308_v57 = vpop.xlane.xlu1 %1307  ;;  %v1306_v58 = vpop.xlane.xlu0 %1305 }
0x13b5   : > { %v1314_v59 = vadd.f32 1e-16, %v1308_v57  ;;  %v1313_v60 = vadd.f32 1e-16, %v1306_v58 }
0x13b7   : > { %3437 = vrcp.f32 %v1314_v59 }
0x13b8   : > { %3439 = vrcp.f32 %v1313_v60  ;;  %v1312_v61 = vpop.xlane.xlu1 %1311  ;;  %v1310_v62 = vpop.xlane.xlu0 %1309 }
0x13b9   : > { %v1316_v63 = vadd.f32 1e-16, %v1312_v61  ;;  %v1315_v3 = vadd.f32 1e-16, %v1310_v62 }
0x13bb   : > { %3441 = vrcp.f32 %v1316_v63 }
0x13bc   : > { %3443 = vrcp.f32 %v1315_v3 }
0x13c1   : > { %v3438_v4 = vpop.eup %3437 }
0x13c2   : > { %v3440_v5 = vpop.eup %3439  ;;  %v1322_v7 = vmul.f32 %v3438_v4, %v1314_v59 }
0x13c3   : > { %v1321_v8 = vmul.f32 %v3440_v5, %v1313_v60 }
0x13c4   : > { %v1326_v9 = vsub.f32 2.0, %v1322_v7 }
0x13c5   : > { %v3442_v10 = vpop.eup %3441  ;;  %v1325_v11 = vsub.f32 2.0, %v1321_v8 }
0x13c6   : > { %v3444_v12 = vpop.eup %3443  ;;  %v1330_v13 = vmul.f32 %v3438_v4, %v1326_v9  ;;  %v1324_v14 = vmul.f32 %v3442_v10, %v1316_v63 }
0x13c7   : > { %v1329_v15 = vmul.f32 %v3440_v5, %v1325_v11  ;;  %v1323_v18 = vmul.f32 %v3444_v12, %v1315_v3 }
0x13c8   : > { %v1334_v20 = vmul.f32 0.03125, %v1330_v13  ;;  %v1328_v22 = vsub.f32 2.0, %v1324_v14 }
0x13c9   : > { %v1333_v23 = vmul.f32 0.03125, %v1329_v15  ;;  %v1327_v24 = vsub.f32 2.0, %v1323_v18 }
0x13ca   : > { %v1332_v25 = vmul.f32 %v3442_v10, %v1328_v22  ;;  %v1338_v26 = vmul.f32 %v3939_v17, %v1334_v20 }
0x13cb   : > { %v1337_v27 = vmul.f32 %v3937_v16, %v1333_v23  ;;  %v1331_v28 = vmul.f32 %v3444_v12, %v1327_v24 }
0x13cc   : > { %v1336_v29 = vmul.f32 0.03125, %v1332_v25 }
0x13cd   : > { %v1335_v30 = vmul.f32 0.03125, %v1331_v28  ;;  %v1341_v31 = vadd.f32 %v1338_v26, %v1337_v27 }
0x13ce   : > { %v1340_v33 = vmul.f32 %v3942_v19, %v1336_v29 }
0x13cf   : > { %v1339_v32 = vmul.f32 %v3945_v21, %v1335_v30 }
0x13d1   : > { %v1342_v34 = vadd.f32 %v1341_v31, %v1339_v32 }
0x13d3   : > { %v1343_v35 = vadd.f32 %v1342_v34, %v1340_v33 }
0x13d5   : > { %v1344_v36 = vrot.slane %v1343_v35, 4 }
0x13d7   : > { %v1345_v37 = vadd.f32 %v1344_v36, %v1343_v35 }
0x13d9   : > { %v1346_v39 = vrot.slane %v1345_v37, 2 }
0x13db   : > { %v1347_v40 = vadd.f32 %v1346_v39, %v1345_v37 }
0x13dd   : > { %v1348_v41 = vrot.slane %v1347_v40, 1 }
0x13df   : > { %v1349_v42 = vadd.f32 %v1348_v41, %v1347_v40 }
0x13e1   : > { %v1350_v43 = vadd.f32 1e-16, %v1349_v42 }
0x13e3   : > { %3445 = vrcp.f32 %v1350_v43 }
0x13ed   : > { %v3446_v44 = vpop.eup %3445 }
0x13ee   : > { %v1352_v45 = vmul.f32 %v3446_v44, %v1350_v43 }
0x13f0   : > { %v1353_v46 = vsub.f32 2.0, %v1352_v45 }
0x13f2   : > { %v1354_v47 = vmul.f32 %v3446_v44, %v1353_v46 }
0x13f4   : > { %v1355_v38 = vmul.f32 0.0078125, %v1354_v47 }
0x13f6   : > { %v1357_v48 = vmul.f32 %v3939_v17, %v1355_v38  ;;  %v1356_v49 = vmul.f32 %v3937_v16, %v1355_v38  ;;  %v1359_v50 = vmul.f32 %v3942_v19, %v1355_v38  ;;  %v1358_v51 = vmul.f32 %v3945_v21, %v1355_v38 }
0x13f8   : > { %1362 = vadd.xlane.f32.xlu1 %v1357_v48  ;;  %1360 = vadd.xlane.f32.xlu0 %v1356_v49 }
0x13fc   : > { %1366 = vadd.xlane.f32.xlu1 %v1359_v50  ;;  %1364 = vadd.xlane.f32.xlu0 %v1358_v51 }
0x1485   : > { %v1363_v52 = vpop.xlane.xlu1 %1362  ;;  %v1361_v53 = vpop.xlane.xlu0 %1360 }
0x1486   : > { %v1369_v54 = vadd.f32 1e-16, %v1363_v52  ;;  %v1368_v55 = vadd.f32 1e-16, %v1361_v53 }
0x1488   : > { %3447 = vrcp.f32 %v1369_v54 }
0x1489   : > { %3449 = vrcp.f32 %v1368_v55  ;;  %v1367_v56 = vpop.xlane.xlu1 %1366  ;;  %v1365_v57 = vpop.xlane.xlu0 %1364 }
0x148a   : > { %v1371_v58 = vadd.f32 1e-16, %v1367_v56  ;;  %v1370_v59 = vadd.f32 1e-16, %v1365_v57 }
0x148c   : > { %3451 = vrcp.f32 %v1371_v58 }
0x148d   : > { %3453 = vrcp.f32 %v1370_v59 }
0x1492   : > { %v3448_v60 = vpop.eup %3447 }
0x1493   : > { %v3450_v61 = vpop.eup %3449  ;;  %v1377_v62 = vmul.f32 %v3448_v60, %v1369_v54 }
0x1494   : > { %v1376_v63 = vmul.f32 %v3450_v61, %v1368_v55 }
0x1495   : > { %v1381_v3 = vsub.f32 2.0, %v1377_v62 }
0x1496   : > { %v3452_v4 = vpop.eup %3451  ;;  %v1380_v5 = vsub.f32 2.0, %v1376_v63 }
0x1497   : > { %v3454_v7 = vpop.eup %3453  ;;  %v1385_v8 = vmul.f32 %v3448_v60, %v1381_v3  ;;  %v1379_v9 = vmul.f32 %v3452_v4, %v1371_v58 }
0x1498   : > { %v1384_v10 = vmul.f32 %v3450_v61, %v1380_v5  ;;  %v1378_v11 = vmul.f32 %v3454_v7, %v1370_v59 }
0x1499   : > { %v1389_v12 = vmul.f32 0.03125, %v1385_v8  ;;  %v1383_v13 = vsub.f32 2.0, %v1379_v9 }
0x149a   : > { %v1388_v14 = vmul.f32 0.03125, %v1384_v10  ;;  %v1382_v15 = vsub.f32 2.0, %v1378_v11 }
0x149b   : > { %v1387_v18 = vmul.f32 %v3452_v4, %v1383_v13  ;;  %v1393_v20 = vmul.f32 %v3939_v17, %v1389_v12 }
0x149c   : > { %v1392_v22 = vmul.f32 %v3937_v16, %v1388_v14  ;;  %v1386_v23 = vmul.f32 %v3454_v7, %v1382_v15 }
0x149d   : > { %v1391_v24 = vmul.f32 0.03125, %v1387_v18 }
0x149e   : > { %v1390_v25 = vmul.f32 0.03125, %v1386_v23  ;;  %v1396_v26 = vadd.f32 %v1393_v20, %v1392_v22 }
0x149f   : > { %v1395_v28 = vmul.f32 %v3942_v19, %v1391_v24 }
0x14a0   : > { %v1394_v27 = vmul.f32 %v3945_v21, %v1390_v25 }
0x14a2   : > { %v1397_v29 = vadd.f32 %v1396_v26, %v1394_v27 }
0x14a4   : > { %v1398_v30 = vadd.f32 %v1397_v29, %v1395_v28 }
0x14a6   : > { %v1399_v31 = vrot.slane %v1398_v30, 4 }
0x14a8   : > { %v1400_v32 = vadd.f32 %v1399_v31, %v1398_v30 }
0x14aa   : > { %v1401_v33 = vrot.slane %v1400_v32, 2 }
0x14ac   : > { %v1402_v34 = vadd.f32 %v1401_v33, %v1400_v32 }
0x14ae   : > { %v1403_v35 = vrot.slane %v1402_v34, 1 }
0x14b0   : > { %v1404_v36 = vadd.f32 %v1403_v35, %v1402_v34 }
0x14b2   : > { %v1405_v37 = vadd.f32 1e-16, %v1404_v36 }
0x14b4   : > { %3455 = vrcp.f32 %v1405_v37 }
0x14be   : > { %v3456_v39 = vpop.eup %3455 }
0x14bf   : > { %v1407_v40 = vmul.f32 %v3456_v39, %v1405_v37 }
0x14c1   : > { %v1408_v41 = vsub.f32 2.0, %v1407_v40 }
0x14c3   : > { %v1409_v42 = vmul.f32 %v3456_v39, %v1408_v41 }
0x14c5   : > { %v1410_v43 = vmul.f32 0.0078125, %v1409_v42 }
0x14c7   : > { %v1412_v44 = vmul.f32 %v3939_v17, %v1410_v43  ;;  %v1411_v45 = vmul.f32 %v3937_v16, %v1410_v43  ;;  %v1414_v46 = vmul.f32 %v3942_v19, %v1410_v43  ;;  %v1413_v47 = vmul.f32 %v3945_v21, %v1410_v43 }
0x14c9   : > { %1417 = vadd.xlane.f32.xlu1 %v1412_v44  ;;  %1415 = vadd.xlane.f32.xlu0 %v1411_v45 }
0x14cd   : > { %1421 = vadd.xlane.f32.xlu1 %v1414_v46  ;;  %1419 = vadd.xlane.f32.xlu0 %v1413_v47 }
0x1556   : > { %v1418_v38 = vpop.xlane.xlu1 %1417  ;;  %v1416_v48 = vpop.xlane.xlu0 %1415 }
0x1557   : > { %v1424_v49 = vadd.f32 1e-16, %v1418_v38  ;;  %v1423_v50 = vadd.f32 1e-16, %v1416_v48 }
0x1559   : > { %3457 = vrcp.f32 %v1424_v49 }
0x155a   : > { %3459 = vrcp.f32 %v1423_v50  ;;  %v1422_v51 = vpop.xlane.xlu1 %1421  ;;  %v1420_v52 = vpop.xlane.xlu0 %1419 }
0x155b   : > { %v1426_v53 = vadd.f32 1e-16, %v1422_v51  ;;  %v1425_v54 = vadd.f32 1e-16, %v1420_v52 }
0x155d   : > { %3461 = vrcp.f32 %v1426_v53 }
0x155e   : > { %3463 = vrcp.f32 %v1425_v54 }
0x1563   : > { %v3458_v55 = vpop.eup %3457 }
0x1564   : > { %v3460_v56 = vpop.eup %3459  ;;  %v1432_v57 = vmul.f32 %v3458_v55, %v1424_v49 }
0x1565   : > { %v1431_v58 = vmul.f32 %v3460_v56, %v1423_v50 }
0x1566   : > { %v1436_v59 = vsub.f32 2.0, %v1432_v57 }
0x1567   : > { %v3462_v60 = vpop.eup %3461  ;;  %v1435_v61 = vsub.f32 2.0, %v1431_v58 }
0x1568   : > { %v3464_v62 = vpop.eup %3463  ;;  %v1440_v63 = vmul.f32 %v3458_v55, %v1436_v59  ;;  %v1434_v3 = vmul.f32 %v3462_v60, %v1426_v53 }
0x1569   : > { %v1439_v4 = vmul.f32 %v3460_v56, %v1435_v61  ;;  %v1433_v5 = vmul.f32 %v3464_v62, %v1425_v54 }
0x156a   : > { %v1444_v7 = vmul.f32 0.03125, %v1440_v63  ;;  %v1438_v8 = vsub.f32 2.0, %v1434_v3 }
0x156b   : > { %v1443_v9 = vmul.f32 0.03125, %v1439_v4  ;;  %v1437_v10 = vsub.f32 2.0, %v1433_v5 }
0x156c   : > { %v1442_v11 = vmul.f32 %v3462_v60, %v1438_v8  ;;  %v1448_v12 = vmul.f32 %v3939_v17, %v1444_v7 }
0x156d   : > { %v1447_v13 = vmul.f32 %v3937_v16, %v1443_v9  ;;  %v1441_v14 = vmul.f32 %v3464_v62, %v1437_v10 }
0x156e   : > { %v1446_v15 = vmul.f32 0.03125, %v1442_v11 }
0x156f   : > { %v1445_v18 = vmul.f32 0.03125, %v1441_v14  ;;  %v1451_v20 = vadd.f32 %v1448_v12, %v1447_v13 }
0x1570   : > { %v1450_v23 = vmul.f32 %v3942_v19, %v1446_v15 }
0x1571   : > { %v1449_v22 = vmul.f32 %v3945_v21, %v1445_v18 }
0x1573   : > { %v1452_v24 = vadd.f32 %v1451_v20, %v1449_v22 }
0x1575   : > { %v1453_v25 = vadd.f32 %v1452_v24, %v1450_v23 }
0x1577   : > { %v1454_v26 = vrot.slane %v1453_v25, 4 }
0x1579   : > { %v1455_v27 = vadd.f32 %v1454_v26, %v1453_v25 }
0x157b   : > { %v1456_v28 = vrot.slane %v1455_v27, 2 }
0x157d   : > { %v1457_v29 = vadd.f32 %v1456_v28, %v1455_v27 }
0x157f   : > { %v1458_v30 = vrot.slane %v1457_v29, 1 }
0x1581   : > { %v1459_v31 = vadd.f32 %v1458_v30, %v1457_v29 }
0x1583   : > { %v1460_v32 = vadd.f32 1e-16, %v1459_v31 }
0x1585   : > { %3465 = vrcp.f32 %v1460_v32 }
0x158f   : > { %v3466_v33 = vpop.eup %3465 }
0x1590   : > { %v1462_v34 = vmul.f32 %v3466_v33, %v1460_v32 }
0x1592   : > { %v1463_v35 = vsub.f32 2.0, %v1462_v34 }
0x1594   : > { %v1464_v36 = vmul.f32 %v3466_v33, %v1463_v35 }
0x1596   : > { %v1465_v37 = vmul.f32 0.0078125, %v1464_v36 }
0x1598   : > { %v1467_v39 = vmul.f32 %v3939_v17, %v1465_v37  ;;  %v1466_v40 = vmul.f32 %v3937_v16, %v1465_v37  ;;  %v1469_v41 = vmul.f32 %v3942_v19, %v1465_v37  ;;  %v1468_v42 = vmul.f32 %v3945_v21, %v1465_v37 }
0x159a   : > { %1472 = vadd.xlane.f32.xlu1 %v1467_v39  ;;  %1470 = vadd.xlane.f32.xlu0 %v1466_v40 }
0x159e   : > { %1476 = vadd.xlane.f32.xlu1 %v1469_v41  ;;  %1474 = vadd.xlane.f32.xlu0 %v1468_v42 }
0x1627   : > { %v1473_v43 = vpop.xlane.xlu1 %1472  ;;  %v1471_v44 = vpop.xlane.xlu0 %1470 }
0x1628   : > { %v1479_v45 = vadd.f32 1e-16, %v1473_v43  ;;  %v1478_v46 = vadd.f32 1e-16, %v1471_v44 }
0x162a   : > { %3467 = vrcp.f32 %v1479_v45 }
0x162b   : > { %3469 = vrcp.f32 %v1478_v46  ;;  %v1477_v47 = vpop.xlane.xlu1 %1476  ;;  %v1475_v38 = vpop.xlane.xlu0 %1474 }
0x162c   : > { %v1481_v48 = vadd.f32 1e-16, %v1477_v47  ;;  %v1480_v49 = vadd.f32 1e-16, %v1475_v38 }
0x162e   : > { %3471 = vrcp.f32 %v1481_v48 }
0x162f   : > { %3473 = vrcp.f32 %v1480_v49 }
0x1634   : > { %v3468_v50 = vpop.eup %3467 }
0x1635   : > { %v3470_v51 = vpop.eup %3469  ;;  %v1487_v52 = vmul.f32 %v3468_v50, %v1479_v45 }
0x1636   : > { %v1486_v53 = vmul.f32 %v3470_v51, %v1478_v46 }
0x1637   : > { %v1491_v54 = vsub.f32 2.0, %v1487_v52 }
0x1638   : > { %v3472_v55 = vpop.eup %3471  ;;  %v1490_v56 = vsub.f32 2.0, %v1486_v53 }
0x1639   : > { %v3474_v57 = vpop.eup %3473  ;;  %v1495_v58 = vmul.f32 %v3468_v50, %v1491_v54  ;;  %v1489_v59 = vmul.f32 %v3472_v55, %v1481_v48 }
0x163a   : > { %v1494_v60 = vmul.f32 %v3470_v51, %v1490_v56  ;;  %v1488_v61 = vmul.f32 %v3474_v57, %v1480_v49 }
0x163b   : > { %v1499_v62 = vmul.f32 0.03125, %v1495_v58  ;;  %v1493_v63 = vsub.f32 2.0, %v1489_v59 }
0x163c   : > { %v1498_v3 = vmul.f32 0.03125, %v1494_v60  ;;  %v1492_v4 = vsub.f32 2.0, %v1488_v61 }
0x163d   : > { %v1497_v5 = vmul.f32 %v3472_v55, %v1493_v63  ;;  %v1503_v7 = vmul.f32 %v3939_v17, %v1499_v62 }
0x163e   : > { %v1502_v8 = vmul.f32 %v3937_v16, %v1498_v3  ;;  %v1496_v9 = vmul.f32 %v3474_v57, %v1492_v4 }
0x163f   : > { %v1501_v10 = vmul.f32 0.03125, %v1497_v5 }
0x1640   : > { %v1500_v11 = vmul.f32 0.03125, %v1496_v9  ;;  %v1506_v12 = vadd.f32 %v1503_v7, %v1502_v8 }
0x1641   : > { %v1505_v14 = vmul.f32 %v3942_v19, %v1501_v10 }
0x1642   : > { %v1504_v13 = vmul.f32 %v3945_v21, %v1500_v11 }
0x1644   : > { %v1507_v15 = vadd.f32 %v1506_v12, %v1504_v13 }
0x1646   : > { %v1508_v18 = vadd.f32 %v1507_v15, %v1505_v14 }
0x1648   : > { %v1509_v20 = vrot.slane %v1508_v18, 4 }
0x164a   : > { %v1510_v22 = vadd.f32 %v1509_v20, %v1508_v18 }
0x164c   : > { %v1511_v23 = vrot.slane %v1510_v22, 2 }
0x164e   : > { %v1512_v24 = vadd.f32 %v1511_v23, %v1510_v22 }
0x1650   : > { %v1513_v25 = vrot.slane %v1512_v24, 1 }
0x1652   : > { %v1514_v26 = vadd.f32 %v1513_v25, %v1512_v24 }
0x1654   : > { %v1515_v27 = vadd.f32 1e-16, %v1514_v26 }
0x1656   : > { %3475 = vrcp.f32 %v1515_v27 }
0x1660   : > { %v3476_v28 = vpop.eup %3475 }
0x1661   : > { %v1517_v29 = vmul.f32 %v3476_v28, %v1515_v27 }
0x1663   : > { %v1518_v30 = vsub.f32 2.0, %v1517_v29 }
0x1665   : > { %v1519_v31 = vmul.f32 %v3476_v28, %v1518_v30 }
0x1667   : > { %v1520_v32 = vmul.f32 0.0078125, %v1519_v31 }
0x1669   : > { %v1522_v33 = vmul.f32 %v3939_v17, %v1520_v32  ;;  %v1521_v34 = vmul.f32 %v3937_v16, %v1520_v32  ;;  %v1524_v35 = vmul.f32 %v3942_v19, %v1520_v32  ;;  %v1523_v36 = vmul.f32 %v3945_v21, %v1520_v32 }
0x166b   : > { %1527 = vadd.xlane.f32.xlu1 %v1522_v33  ;;  %1525 = vadd.xlane.f32.xlu0 %v1521_v34 }
0x166f   : > { %1531 = vadd.xlane.f32.xlu1 %v1524_v35  ;;  %1529 = vadd.xlane.f32.xlu0 %v1523_v36 }
0x16f8   : > { %v1528_v37 = vpop.xlane.xlu1 %1527  ;;  %v1526_v39 = vpop.xlane.xlu0 %1525 }
0x16f9   : > { %v1534_v40 = vadd.f32 1e-16, %v1528_v37  ;;  %v1533_v41 = vadd.f32 1e-16, %v1526_v39 }
0x16fb   : > { %3477 = vrcp.f32 %v1534_v40 }
0x16fc   : > { %3479 = vrcp.f32 %v1533_v41  ;;  %v1532_v42 = vpop.xlane.xlu1 %1531  ;;  %v1530_v43 = vpop.xlane.xlu0 %1529 }
0x16fd   : > { %v1536_v44 = vadd.f32 1e-16, %v1532_v42  ;;  %v1535_v45 = vadd.f32 1e-16, %v1530_v43 }
0x16ff   : > { %3481 = vrcp.f32 %v1536_v44 }
0x1700   : > { %3483 = vrcp.f32 %v1535_v45 }
0x1705   : > { %v3478_v46 = vpop.eup %3477 }
0x1706   : > { %v3480_v47 = vpop.eup %3479  ;;  %v1542_v38 = vmul.f32 %v3478_v46, %v1534_v40 }
0x1707   : > { %v1541_v48 = vmul.f32 %v3480_v47, %v1533_v41 }
0x1708   : > { %v1546_v49 = vsub.f32 2.0, %v1542_v38 }
0x1709   : > { %v3482_v50 = vpop.eup %3481  ;;  %v1545_v51 = vsub.f32 2.0, %v1541_v48 }
0x170a   : > { %v3484_v52 = vpop.eup %3483  ;;  %v1550_v53 = vmul.f32 %v3478_v46, %v1546_v49  ;;  %v1544_v54 = vmul.f32 %v3482_v50, %v1536_v44 }
0x170b   : > { %v1549_v55 = vmul.f32 %v3480_v47, %v1545_v51  ;;  %v1543_v56 = vmul.f32 %v3484_v52, %v1535_v45 }
0x170c   : > { %v1554_v57 = vmul.f32 0.03125, %v1550_v53  ;;  %v1548_v58 = vsub.f32 2.0, %v1544_v54 }
0x170d   : > { %v1553_v59 = vmul.f32 0.03125, %v1549_v55  ;;  %v1547_v60 = vsub.f32 2.0, %v1543_v56 }
0x170e   : > { %v1552_v61 = vmul.f32 %v3482_v50, %v1548_v58  ;;  %v1558_v62 = vmul.f32 %v3939_v17, %v1554_v57 }
0x170f   : > { %v1557_v63 = vmul.f32 %v3937_v16, %v1553_v59  ;;  %v1551_v3 = vmul.f32 %v3484_v52, %v1547_v60 }
0x1710   : > { %v1556_v4 = vmul.f32 0.03125, %v1552_v61 }
0x1711   : > { %v1555_v5 = vmul.f32 0.03125, %v1551_v3  ;;  %v1561_v7 = vadd.f32 %v1558_v62, %v1557_v63 }
0x1712   : > { %v1560_v9 = vmul.f32 %v3942_v19, %v1556_v4 }
0x1713   : > { %v1559_v8 = vmul.f32 %v3945_v21, %v1555_v5 }
0x1715   : > { %v1562_v10 = vadd.f32 %v1561_v7, %v1559_v8 }
0x1717   : > { %v1563_v11 = vadd.f32 %v1562_v10, %v1560_v9 }
0x1719   : > { %v1564_v12 = vrot.slane %v1563_v11, 4 }
0x171b   : > { %v1565_v13 = vadd.f32 %v1564_v12, %v1563_v11 }
0x171d   : > { %v1566_v14 = vrot.slane %v1565_v13, 2 }
0x171f   : > { %v1567_v15 = vadd.f32 %v1566_v14, %v1565_v13 }
0x1721   : > { %v1568_v18 = vrot.slane %v1567_v15, 1 }
0x1723   : > { %v1569_v20 = vadd.f32 %v1568_v18, %v1567_v15 }
0x1725   : > { %v1570_v22 = vadd.f32 1e-16, %v1569_v20 }
0x1727   : > { %3485 = vrcp.f32 %v1570_v22 }
0x1731   : > { %v3486_v23 = vpop.eup %3485 }
0x1732   : > { %v1572_v24 = vmul.f32 %v3486_v23, %v1570_v22 }
0x1734   : > { %v1573_v25 = vsub.f32 2.0, %v1572_v24 }
0x1736   : > { %v1574_v26 = vmul.f32 %v3486_v23, %v1573_v25 }
0x1738   : > { %v1575_v27 = vmul.f32 0.0078125, %v1574_v26 }
0x173a   : > { %v1577_v28 = vmul.f32 %v3939_v17, %v1575_v27  ;;  %v1576_v29 = vmul.f32 %v3937_v16, %v1575_v27  ;;  %v1579_v30 = vmul.f32 %v3942_v19, %v1575_v27  ;;  %v1578_v31 = vmul.f32 %v3945_v21, %v1575_v27 }
0x173c   : > { %1582 = vadd.xlane.f32.xlu1 %v1577_v28  ;;  %1580 = vadd.xlane.f32.xlu0 %v1576_v29 }
0x1740   : > { %1586 = vadd.xlane.f32.xlu1 %v1579_v30  ;;  %1584 = vadd.xlane.f32.xlu0 %v1578_v31 }
0x17c9   : > { %v1583_v32 = vpop.xlane.xlu1 %1582  ;;  %v1581_v33 = vpop.xlane.xlu0 %1580 }
0x17ca   : > { %v1589_v34 = vadd.f32 1e-16, %v1583_v32  ;;  %v1588_v35 = vadd.f32 1e-16, %v1581_v33 }
0x17cc   : > { %3487 = vrcp.f32 %v1589_v34 }
0x17cd   : > { %3489 = vrcp.f32 %v1588_v35  ;;  %v1587_v36 = vpop.xlane.xlu1 %1586  ;;  %v1585_v37 = vpop.xlane.xlu0 %1584 }
0x17ce   : > { %v1591_v39 = vadd.f32 1e-16, %v1587_v36  ;;  %v1590_v40 = vadd.f32 1e-16, %v1585_v37 }
0x17d0   : > { %3491 = vrcp.f32 %v1591_v39 }
0x17d1   : > { %3493 = vrcp.f32 %v1590_v40 }
0x17d6   : > { %v3488_v41 = vpop.eup %3487 }
0x17d7   : > { %v3490_v42 = vpop.eup %3489  ;;  %v1597_v43 = vmul.f32 %v3488_v41, %v1589_v34 }
0x17d8   : > { %v1596_v44 = vmul.f32 %v3490_v42, %v1588_v35 }
0x17d9   : > { %v1601_v45 = vsub.f32 2.0, %v1597_v43 }
0x17da   : > { %v3492_v46 = vpop.eup %3491  ;;  %v1600_v47 = vsub.f32 2.0, %v1596_v44 }
0x17db   : > { %v3494_v38 = vpop.eup %3493  ;;  %v1605_v48 = vmul.f32 %v3488_v41, %v1601_v45  ;;  %v1599_v49 = vmul.f32 %v3492_v46, %v1591_v39 }
0x17dc   : > { %v1604_v50 = vmul.f32 %v3490_v42, %v1600_v47  ;;  %v1598_v51 = vmul.f32 %v3494_v38, %v1590_v40 }
0x17dd   : > { %v1609_v52 = vmul.f32 0.03125, %v1605_v48  ;;  %v1603_v53 = vsub.f32 2.0, %v1599_v49 }
0x17de   : > { %v1608_v54 = vmul.f32 0.03125, %v1604_v50  ;;  %v1602_v55 = vsub.f32 2.0, %v1598_v51 }
0x17df   : > { %v1607_v56 = vmul.f32 %v3492_v46, %v1603_v53  ;;  %v1613_v57 = vmul.f32 %v3939_v17, %v1609_v52 }
0x17e0   : > { %v1612_v58 = vmul.f32 %v3937_v16, %v1608_v54  ;;  %v1606_v59 = vmul.f32 %v3494_v38, %v1602_v55 }
0x17e1   : > { %v1611_v60 = vmul.f32 0.03125, %v1607_v56 }
0x17e2   : > { %v1610_v61 = vmul.f32 0.03125, %v1606_v59  ;;  %v1616_v62 = vadd.f32 %v1613_v57, %v1612_v58 }
0x17e3   : > { %v1615_v3 = vmul.f32 %v3942_v19, %v1611_v60 }
0x17e4   : > { %v1614_v63 = vmul.f32 %v3945_v21, %v1610_v61 }
0x17e6   : > { %v1617_v4 = vadd.f32 %v1616_v62, %v1614_v63 }
0x17e8   : > { %v1618_v5 = vadd.f32 %v1617_v4, %v1615_v3 }
0x17ea   : > { %v1619_v7 = vrot.slane %v1618_v5, 4 }
0x17ec   : > { %v1620_v8 = vadd.f32 %v1619_v7, %v1618_v5 }
0x17ee   : > { %v1621_v9 = vrot.slane %v1620_v8, 2 }
0x17f0   : > { %v1622_v10 = vadd.f32 %v1621_v9, %v1620_v8 }
0x17f2   : > { %v1623_v11 = vrot.slane %v1622_v10, 1 }
0x17f4   : > { %v1624_v12 = vadd.f32 %v1623_v11, %v1622_v10 }
0x17f6   : > { %v1625_v13 = vadd.f32 1e-16, %v1624_v12 }
0x17f8   : > { %3495 = vrcp.f32 %v1625_v13 }
0x1802   : > { %v3496_v14 = vpop.eup %3495 }
0x1803   : > { %v1627_v15 = vmul.f32 %v3496_v14, %v1625_v13 }
0x1805   : > { %v1628_v18 = vsub.f32 2.0, %v1627_v15 }
0x1807   : > { %v1629_v20 = vmul.f32 %v3496_v14, %v1628_v18 }
0x1809   : > { %v1630_v22 = vmul.f32 0.0078125, %v1629_v20 }
0x180b   : > { %v1632_v23 = vmul.f32 %v3939_v17, %v1630_v22  ;;  %v1631_v24 = vmul.f32 %v3937_v16, %v1630_v22  ;;  %v1634_v25 = vmul.f32 %v3942_v19, %v1630_v22  ;;  %v1633_v26 = vmul.f32 %v3945_v21, %v1630_v22 }
0x180d   : > { %1637 = vadd.xlane.f32.xlu1 %v1632_v23  ;;  %1635 = vadd.xlane.f32.xlu0 %v1631_v24 }
0x1811   : > { %1641 = vadd.xlane.f32.xlu1 %v1634_v25  ;;  %1639 = vadd.xlane.f32.xlu0 %v1633_v26 }
0x189a   : > { %v1638_v27 = vpop.xlane.xlu1 %1637  ;;  %v1636_v28 = vpop.xlane.xlu0 %1635 }
0x189b   : > { %v1644_v29 = vadd.f32 1e-16, %v1638_v27  ;;  %v1643_v30 = vadd.f32 1e-16, %v1636_v28 }
0x189d   : > { %3497 = vrcp.f32 %v1644_v29 }
0x189e   : > { %3499 = vrcp.f32 %v1643_v30  ;;  %v1642_v31 = vpop.xlane.xlu1 %1641  ;;  %v1640_v32 = vpop.xlane.xlu0 %1639 }
0x189f   : > { %v1646_v33 = vadd.f32 1e-16, %v1642_v31  ;;  %v1645_v34 = vadd.f32 1e-16, %v1640_v32 }
0x18a1   : > { %3501 = vrcp.f32 %v1646_v33 }
0x18a2   : > { %3503 = vrcp.f32 %v1645_v34 }
0x18a7   : > { %v3498_v35 = vpop.eup %3497 }
0x18a8   : > { %v3500_v36 = vpop.eup %3499  ;;  %v1652_v37 = vmul.f32 %v3498_v35, %v1644_v29 }
0x18a9   : > { %v1651_v39 = vmul.f32 %v3500_v36, %v1643_v30 }
0x18aa   : > { %v1656_v40 = vsub.f32 2.0, %v1652_v37 }
0x18ab   : > { %v3502_v41 = vpop.eup %3501  ;;  %v1655_v42 = vsub.f32 2.0, %v1651_v39 }
0x18ac   : > { %v3504_v43 = vpop.eup %3503  ;;  %v1660_v44 = vmul.f32 %v3498_v35, %v1656_v40  ;;  %v1654_v45 = vmul.f32 %v3502_v41, %v1646_v33 }
0x18ad   : > { %v1659_v46 = vmul.f32 %v3500_v36, %v1655_v42  ;;  %v1653_v47 = vmul.f32 %v3504_v43, %v1645_v34 }
0x18ae   : > { %v1664_v38 = vmul.f32 0.03125, %v1660_v44  ;;  %v1658_v48 = vsub.f32 2.0, %v1654_v45 }
0x18af   : > { %v1663_v49 = vmul.f32 0.03125, %v1659_v46  ;;  %v1657_v50 = vsub.f32 2.0, %v1653_v47 }
0x18b0   : > { %v1662_v51 = vmul.f32 %v3502_v41, %v1658_v48  ;;  %v1668_v52 = vmul.f32 %v3939_v17, %v1664_v38 }
0x18b1   : > { %v1667_v53 = vmul.f32 %v3937_v16, %v1663_v49  ;;  %v1661_v54 = vmul.f32 %v3504_v43, %v1657_v50 }
0x18b2   : > { %v1666_v55 = vmul.f32 0.03125, %v1662_v51 }
0x18b3   : > { %v1665_v56 = vmul.f32 0.03125, %v1661_v54  ;;  %v1671_v57 = vadd.f32 %v1668_v52, %v1667_v53 }
0x18b4   : > { %v1670_v59 = vmul.f32 %v3942_v19, %v1666_v55 }
0x18b5   : > { %v1669_v58 = vmul.f32 %v3945_v21, %v1665_v56 }
0x18b7   : > { %v1672_v60 = vadd.f32 %v1671_v57, %v1669_v58 }
0x18b9   : > { %v1673_v61 = vadd.f32 %v1672_v60, %v1670_v59 }
0x18bb   : > { %v1674_v62 = vrot.slane %v1673_v61, 4 }
0x18bd   : > { %v1675_v63 = vadd.f32 %v1674_v62, %v1673_v61 }
0x18bf   : > { %v1676_v3 = vrot.slane %v1675_v63, 2 }
0x18c1   : > { %v1677_v4 = vadd.f32 %v1676_v3, %v1675_v63 }
0x18c3   : > { %v1678_v5 = vrot.slane %v1677_v4, 1 }
0x18c5   : > { %v1679_v7 = vadd.f32 %v1678_v5, %v1677_v4 }
0x18c7   : > { %v1680_v8 = vadd.f32 1e-16, %v1679_v7 }
0x18c9   : > { %3505 = vrcp.f32 %v1680_v8 }
0x18d3   : > { %v3506_v9 = vpop.eup %3505 }
0x18d4   : > { %v1682_v10 = vmul.f32 %v3506_v9, %v1680_v8 }
0x18d6   : > { %v1683_v11 = vsub.f32 2.0, %v1682_v10 }
0x18d8   : > { %v1684_v12 = vmul.f32 %v3506_v9, %v1683_v11 }
0x18da   : > { %v1685_v13 = vmul.f32 0.0078125, %v1684_v12 }
0x18dc   : > { %v1687_v14 = vmul.f32 %v3939_v17, %v1685_v13  ;;  %v1686_v15 = vmul.f32 %v3937_v16, %v1685_v13  ;;  %v1689_v18 = vmul.f32 %v3942_v19, %v1685_v13  ;;  %v1688_v20 = vmul.f32 %v3945_v21, %v1685_v13 }
0x18de   : > { %1692 = vadd.xlane.f32.xlu1 %v1687_v14  ;;  %1690 = vadd.xlane.f32.xlu0 %v1686_v15 }
0x18e2   : > { %1696 = vadd.xlane.f32.xlu1 %v1689_v18  ;;  %1694 = vadd.xlane.f32.xlu0 %v1688_v20 }
0x196b   : > { %v1693_v22 = vpop.xlane.xlu1 %1692  ;;  %v1691_v23 = vpop.xlane.xlu0 %1690 }
0x196c   : > { %v1699_v24 = vadd.f32 1e-16, %v1693_v22  ;;  %v1698_v25 = vadd.f32 1e-16, %v1691_v23 }
0x196e   : > { %3507 = vrcp.f32 %v1699_v24 }
0x196f   : > { %3509 = vrcp.f32 %v1698_v25  ;;  %v1697_v26 = vpop.xlane.xlu1 %1696  ;;  %v1695_v27 = vpop.xlane.xlu0 %1694 }
0x1970   : > { %v1701_v28 = vadd.f32 1e-16, %v1697_v26  ;;  %v1700_v29 = vadd.f32 1e-16, %v1695_v27 }
0x1972   : > { %3511 = vrcp.f32 %v1701_v28 }
0x1973   : > { %3513 = vrcp.f32 %v1700_v29 }
0x1978   : > { %v3508_v30 = vpop.eup %3507 }
0x1979   : > { %v3510_v31 = vpop.eup %3509  ;;  %v1707_v32 = vmul.f32 %v3508_v30, %v1699_v24 }
0x197a   : > { %v1706_v33 = vmul.f32 %v3510_v31, %v1698_v25 }
0x197b   : > { %v1711_v34 = vsub.f32 2.0, %v1707_v32 }
0x197c   : > { %v3512_v35 = vpop.eup %3511  ;;  %v1710_v36 = vsub.f32 2.0, %v1706_v33 }
0x197d   : > { %v3514_v37 = vpop.eup %3513  ;;  %v1715_v39 = vmul.f32 %v3508_v30, %v1711_v34  ;;  %v1709_v40 = vmul.f32 %v3512_v35, %v1701_v28 }
0x197e   : > { %v1714_v41 = vmul.f32 %v3510_v31, %v1710_v36  ;;  %v1708_v42 = vmul.f32 %v3514_v37, %v1700_v29 }
0x197f   : > { %v1719_v43 = vmul.f32 0.03125, %v1715_v39  ;;  %v1713_v44 = vsub.f32 2.0, %v1709_v40 }
0x1980   : > { %v1718_v45 = vmul.f32 0.03125, %v1714_v41  ;;  %v1712_v46 = vsub.f32 2.0, %v1708_v42 }
0x1981   : > { %v1717_v47 = vmul.f32 %v3512_v35, %v1713_v44  ;;  %v1723_v38 = vmul.f32 %v3939_v17, %v1719_v43 }
0x1982   : > { %v1722_v48 = vmul.f32 %v3937_v16, %v1718_v45  ;;  %v1716_v49 = vmul.f32 %v3514_v37, %v1712_v46 }
0x1983   : > { %v1721_v50 = vmul.f32 0.03125, %v1717_v47 }
0x1984   : > { %v1720_v51 = vmul.f32 0.03125, %v1716_v49  ;;  %v1726_v52 = vadd.f32 %v1723_v38, %v1722_v48 }
0x1985   : > { %v1725_v54 = vmul.f32 %v3942_v19, %v1721_v50 }
0x1986   : > { %v1724_v53 = vmul.f32 %v3945_v21, %v1720_v51 }
0x1988   : > { %v1727_v55 = vadd.f32 %v1726_v52, %v1724_v53 }
0x198a   : > { %v1728_v56 = vadd.f32 %v1727_v55, %v1725_v54 }
0x198c   : > { %v1729_v57 = vrot.slane %v1728_v56, 4 }
0x198e   : > { %v1730_v58 = vadd.f32 %v1729_v57, %v1728_v56 }
0x1990   : > { %v1731_v59 = vrot.slane %v1730_v58, 2 }
0x1992   : > { %v1732_v60 = vadd.f32 %v1731_v59, %v1730_v58 }
0x1994   : > { %v1733_v61 = vrot.slane %v1732_v60, 1 }
0x1996   : > { %v1734_v62 = vadd.f32 %v1733_v61, %v1732_v60 }
0x1998   : > { %v1735_v63 = vadd.f32 1e-16, %v1734_v62 }
0x199a   : > { %3515 = vrcp.f32 %v1735_v63 }
0x19a4   : > { %v3516_v3 = vpop.eup %3515 }
0x19a5   : > { %v1737_v4 = vmul.f32 %v3516_v3, %v1735_v63 }
0x19a7   : > { %v1738_v5 = vsub.f32 2.0, %v1737_v4 }
0x19a9   : > { %v1739_v7 = vmul.f32 %v3516_v3, %v1738_v5 }
0x19ab   : > { %v1740_v8 = vmul.f32 0.0078125, %v1739_v7 }
0x19ad   : > { %v1742_v9 = vmul.f32 %v3939_v17, %v1740_v8  ;;  %v1741_v10 = vmul.f32 %v3937_v16, %v1740_v8  ;;  %v1744_v11 = vmul.f32 %v3942_v19, %v1740_v8  ;;  %v1743_v12 = vmul.f32 %v3945_v21, %v1740_v8 }
0x19af   : > { %1747 = vadd.xlane.f32.xlu1 %v1742_v9  ;;  %1745 = vadd.xlane.f32.xlu0 %v1741_v10 }
0x19b3   : > { %1751 = vadd.xlane.f32.xlu1 %v1744_v11  ;;  %1749 = vadd.xlane.f32.xlu0 %v1743_v12 }
0x1a3c   : > { %v1748_v13 = vpop.xlane.xlu1 %1747  ;;  %v1746_v14 = vpop.xlane.xlu0 %1745 }
0x1a3d   : > { %v1754_v15 = vadd.f32 1e-16, %v1748_v13  ;;  %v1753_v18 = vadd.f32 1e-16, %v1746_v14 }
0x1a3f   : > { %3517 = vrcp.f32 %v1754_v15 }
0x1a40   : > { %3519 = vrcp.f32 %v1753_v18  ;;  %v1752_v20 = vpop.xlane.xlu1 %1751  ;;  %v1750_v22 = vpop.xlane.xlu0 %1749 }
0x1a41   : > { %v1756_v23 = vadd.f32 1e-16, %v1752_v20  ;;  %v1755_v24 = vadd.f32 1e-16, %v1750_v22 }
0x1a43   : > { %3521 = vrcp.f32 %v1756_v23 }
0x1a44   : > { %3523 = vrcp.f32 %v1755_v24 }
0x1a49   : > { %v3518_v25 = vpop.eup %3517 }
0x1a4a   : > { %v3520_v26 = vpop.eup %3519  ;;  %v1762_v27 = vmul.f32 %v3518_v25, %v1754_v15 }
0x1a4b   : > { %v1761_v28 = vmul.f32 %v3520_v26, %v1753_v18 }
0x1a4c   : > { %v1766_v29 = vsub.f32 2.0, %v1762_v27 }
0x1a4d   : > { %v3522_v30 = vpop.eup %3521  ;;  %v1765_v31 = vsub.f32 2.0, %v1761_v28 }
0x1a4e   : > { %v3524_v32 = vpop.eup %3523  ;;  %v1770_v33 = vmul.f32 %v3518_v25, %v1766_v29  ;;  %v1764_v34 = vmul.f32 %v3522_v30, %v1756_v23 }
0x1a4f   : > { %v1769_v35 = vmul.f32 %v3520_v26, %v1765_v31  ;;  %v1763_v36 = vmul.f32 %v3524_v32, %v1755_v24 }
0x1a50   : > { %v1774_v37 = vmul.f32 0.03125, %v1770_v33  ;;  %v1768_v39 = vsub.f32 2.0, %v1764_v34 }
0x1a51   : > { %v1773_v40 = vmul.f32 0.03125, %v1769_v35  ;;  %v1767_v41 = vsub.f32 2.0, %v1763_v36 }
0x1a52   : > { %v1772_v42 = vmul.f32 %v3522_v30, %v1768_v39  ;;  %v1778_v43 = vmul.f32 %v3939_v17, %v1774_v37 }
0x1a53   : > { %v1777_v44 = vmul.f32 %v3937_v16, %v1773_v40  ;;  %v1771_v45 = vmul.f32 %v3524_v32, %v1767_v41 }
0x1a54   : > { %v1776_v46 = vmul.f32 0.03125, %v1772_v42 }
0x1a55   : > { %v1775_v47 = vmul.f32 0.03125, %v1771_v45  ;;  %v1781_v38 = vadd.f32 %v1778_v43, %v1777_v44 }
0x1a56   : > { %v1780_v49 = vmul.f32 %v3942_v19, %v1776_v46 }
0x1a57   : > { %v1779_v48 = vmul.f32 %v3945_v21, %v1775_v47 }
0x1a59   : > { %v1782_v50 = vadd.f32 %v1781_v38, %v1779_v48 }
0x1a5b   : > { %v1783_v51 = vadd.f32 %v1782_v50, %v1780_v49 }
0x1a5d   : > { %v1784_v52 = vrot.slane %v1783_v51, 4 }
0x1a5f   : > { %v1785_v53 = vadd.f32 %v1784_v52, %v1783_v51 }
0x1a61   : > { %v1786_v54 = vrot.slane %v1785_v53, 2 }
0x1a63   : > { %v1787_v55 = vadd.f32 %v1786_v54, %v1785_v53 }
0x1a65   : > { %v1788_v56 = vrot.slane %v1787_v55, 1 }
0x1a67   : > { %v1789_v57 = vadd.f32 %v1788_v56, %v1787_v55 }
0x1a69   : > { %v1790_v58 = vadd.f32 1e-16, %v1789_v57 }
0x1a6b   : > { %3525 = vrcp.f32 %v1790_v58 }
0x1a75   : > { %v3526_v59 = vpop.eup %3525 }
0x1a76   : > { %v1792_v60 = vmul.f32 %v3526_v59, %v1790_v58 }
0x1a78   : > { %v1793_v61 = vsub.f32 2.0, %v1792_v60 }
0x1a7a   : > { %v1794_v62 = vmul.f32 %v3526_v59, %v1793_v61 }
0x1a7c   : > { %v1795_v63 = vmul.f32 0.0078125, %v1794_v62 }
0x1a7e   : > { %v1797_v3 = vmul.f32 %v3939_v17, %v1795_v63  ;;  %v1796_v4 = vmul.f32 %v3937_v16, %v1795_v63  ;;  %v1799_v5 = vmul.f32 %v3942_v19, %v1795_v63  ;;  %v1798_v7 = vmul.f32 %v3945_v21, %v1795_v63 }
0x1a80   : > { %1802 = vadd.xlane.f32.xlu1 %v1797_v3  ;;  %1800 = vadd.xlane.f32.xlu0 %v1796_v4 }
0x1a84   : > { %1806 = vadd.xlane.f32.xlu1 %v1799_v5  ;;  %1804 = vadd.xlane.f32.xlu0 %v1798_v7 }
0x1b0d   : > { %v1803_v8 = vpop.xlane.xlu1 %1802  ;;  %v1801_v9 = vpop.xlane.xlu0 %1800 }
0x1b0e   : > { %v1809_v10 = vadd.f32 1e-16, %v1803_v8  ;;  %v1808_v11 = vadd.f32 1e-16, %v1801_v9 }
0x1b10   : > { %3527 = vrcp.f32 %v1809_v10 }
0x1b11   : > { %3529 = vrcp.f32 %v1808_v11  ;;  %v1807_v12 = vpop.xlane.xlu1 %1806  ;;  %v1805_v13 = vpop.xlane.xlu0 %1804 }
0x1b12   : > { %v1811_v14 = vadd.f32 1e-16, %v1807_v12  ;;  %v1810_v15 = vadd.f32 1e-16, %v1805_v13 }
0x1b14   : > { %3531 = vrcp.f32 %v1811_v14 }
0x1b15   : > { %3533 = vrcp.f32 %v1810_v15 }
0x1b1a   : > { %v3528_v18 = vpop.eup %3527 }
0x1b1b   : > { %v3530_v20 = vpop.eup %3529  ;;  %v1817_v22 = vmul.f32 %v3528_v18, %v1809_v10 }
0x1b1c   : > { %v1816_v23 = vmul.f32 %v3530_v20, %v1808_v11 }
0x1b1d   : > { %v1821_v24 = vsub.f32 2.0, %v1817_v22 }
0x1b1e   : > { %v3532_v25 = vpop.eup %3531  ;;  %v1820_v26 = vsub.f32 2.0, %v1816_v23 }
0x1b1f   : > { %v3534_v27 = vpop.eup %3533  ;;  %v1825_v28 = vmul.f32 %v3528_v18, %v1821_v24  ;;  %v1819_v29 = vmul.f32 %v3532_v25, %v1811_v14 }
0x1b20   : > { %v1824_v30 = vmul.f32 %v3530_v20, %v1820_v26  ;;  %v1818_v31 = vmul.f32 %v3534_v27, %v1810_v15 }
0x1b21   : > { %v1829_v32 = vmul.f32 0.03125, %v1825_v28  ;;  %v1823_v33 = vsub.f32 2.0, %v1819_v29 }
0x1b22   : > { %v1828_v34 = vmul.f32 0.03125, %v1824_v30  ;;  %v1822_v35 = vsub.f32 2.0, %v1818_v31 }
0x1b23   : > { %v1827_v36 = vmul.f32 %v3532_v25, %v1823_v33  ;;  %v1833_v37 = vmul.f32 %v3939_v17, %v1829_v32 }
0x1b24   : > { %v1832_v39 = vmul.f32 %v3937_v16, %v1828_v34  ;;  %v1826_v40 = vmul.f32 %v3534_v27, %v1822_v35 }
0x1b25   : > { %v1831_v41 = vmul.f32 0.03125, %v1827_v36 }
0x1b26   : > { %v1830_v42 = vmul.f32 0.03125, %v1826_v40  ;;  %v1836_v43 = vadd.f32 %v1833_v37, %v1832_v39 }
0x1b27   : > { %v1835_v45 = vmul.f32 %v3942_v19, %v1831_v41 }
0x1b28   : > { %v1834_v44 = vmul.f32 %v3945_v21, %v1830_v42 }
0x1b2a   : > { %v1837_v46 = vadd.f32 %v1836_v43, %v1834_v44 }
0x1b2c   : > { %v1838_v47 = vadd.f32 %v1837_v46, %v1835_v45 }
0x1b2e   : > { %v1839_v38 = vrot.slane %v1838_v47, 4 }
0x1b30   : > { %v1840_v48 = vadd.f32 %v1839_v38, %v1838_v47 }
0x1b32   : > { %v1841_v49 = vrot.slane %v1840_v48, 2 }
0x1b34   : > { %v1842_v50 = vadd.f32 %v1841_v49, %v1840_v48 }
0x1b36   : > { %v1843_v51 = vrot.slane %v1842_v50, 1 }
0x1b38   : > { %v1844_v52 = vadd.f32 %v1843_v51, %v1842_v50 }
0x1b3a   : > { %v1845_v53 = vadd.f32 1e-16, %v1844_v52 }
0x1b3c   : > { %3535 = vrcp.f32 %v1845_v53 }
0x1b46   : > { %v3536_v54 = vpop.eup %3535 }
0x1b47   : > { %v1847_v55 = vmul.f32 %v3536_v54, %v1845_v53 }
0x1b49   : > { %v1848_v56 = vsub.f32 2.0, %v1847_v55 }
0x1b4b   : > { %v1849_v57 = vmul.f32 %v3536_v54, %v1848_v56 }
0x1b4d   : > { %v1850_v58 = vmul.f32 0.0078125, %v1849_v57 }
0x1b4f   : > { %v1852_v59 = vmul.f32 %v3939_v17, %v1850_v58  ;;  %v1851_v60 = vmul.f32 %v3937_v16, %v1850_v58  ;;  %v1854_v61 = vmul.f32 %v3942_v19, %v1850_v58  ;;  %v1853_v62 = vmul.f32 %v3945_v21, %v1850_v58 }
0x1b51   : > { %1857 = vadd.xlane.f32.xlu1 %v1852_v59  ;;  %1855 = vadd.xlane.f32.xlu0 %v1851_v60 }
0x1b55   : > { %1861 = vadd.xlane.f32.xlu1 %v1854_v61  ;;  %1859 = vadd.xlane.f32.xlu0 %v1853_v62 }
0x1bde   : > { %v1858_v63 = vpop.xlane.xlu1 %1857  ;;  %v1856_v3 = vpop.xlane.xlu0 %1855 }
0x1bdf   : > { %v1864_v4 = vadd.f32 1e-16, %v1858_v63  ;;  %v1863_v5 = vadd.f32 1e-16, %v1856_v3 }
0x1be1   : > { %3537 = vrcp.f32 %v1864_v4 }
0x1be2   : > { %3539 = vrcp.f32 %v1863_v5  ;;  %v1862_v7 = vpop.xlane.xlu1 %1861  ;;  %v1860_v8 = vpop.xlane.xlu0 %1859 }
0x1be3   : > { %v1866_v9 = vadd.f32 1e-16, %v1862_v7  ;;  %v1865_v10 = vadd.f32 1e-16, %v1860_v8 }
0x1be5   : > { %3541 = vrcp.f32 %v1866_v9 }
0x1be6   : > { %3543 = vrcp.f32 %v1865_v10 }
0x1beb   : > { %v3538_v11 = vpop.eup %3537 }
0x1bec   : > { %v3540_v12 = vpop.eup %3539  ;;  %v1872_v13 = vmul.f32 %v3538_v11, %v1864_v4 }
0x1bed   : > { %v1871_v14 = vmul.f32 %v3540_v12, %v1863_v5 }
0x1bee   : > { %v1876_v15 = vsub.f32 2.0, %v1872_v13 }
0x1bef   : > { %v3542_v18 = vpop.eup %3541  ;;  %v1875_v20 = vsub.f32 2.0, %v1871_v14 }
0x1bf0   : > { %v3544_v22 = vpop.eup %3543  ;;  %v1880_v23 = vmul.f32 %v3538_v11, %v1876_v15  ;;  %v1874_v24 = vmul.f32 %v3542_v18, %v1866_v9 }
0x1bf1   : > { %v1879_v25 = vmul.f32 %v3540_v12, %v1875_v20  ;;  %v1873_v26 = vmul.f32 %v3544_v22, %v1865_v10 }
0x1bf2   : > { %v1884_v27 = vmul.f32 0.03125, %v1880_v23  ;;  %v1878_v28 = vsub.f32 2.0, %v1874_v24 }
0x1bf3   : > { %v1883_v29 = vmul.f32 0.03125, %v1879_v25  ;;  %v1877_v30 = vsub.f32 2.0, %v1873_v26 }
0x1bf4   : > { %v1882_v31 = vmul.f32 %v3542_v18, %v1878_v28  ;;  %v1888_v32 = vmul.f32 %v3939_v17, %v1884_v27 }
0x1bf5   : > { %v1887_v33 = vmul.f32 %v3937_v16, %v1883_v29  ;;  %v1881_v34 = vmul.f32 %v3544_v22, %v1877_v30 }
0x1bf6   : > { %v1886_v35 = vmul.f32 0.03125, %v1882_v31 }
0x1bf7   : > { %v1885_v36 = vmul.f32 0.03125, %v1881_v34  ;;  %v1891_v37 = vadd.f32 %v1888_v32, %v1887_v33 }
0x1bf8   : > { %v1890_v40 = vmul.f32 %v3942_v19, %v1886_v35 }
0x1bf9   : > { %v1889_v39 = vmul.f32 %v3945_v21, %v1885_v36 }
0x1bfb   : > { %v1892_v41 = vadd.f32 %v1891_v37, %v1889_v39 }
0x1bfd   : > { %v1893_v42 = vadd.f32 %v1892_v41, %v1890_v40 }
0x1bff   : > { %v1894_v43 = vrot.slane %v1893_v42, 4 }
0x1c01   : > { %v1895_v44 = vadd.f32 %v1894_v43, %v1893_v42 }
0x1c03   : > { %v1896_v45 = vrot.slane %v1895_v44, 2 }
0x1c05   : > { %v1897_v46 = vadd.f32 %v1896_v45, %v1895_v44 }
0x1c07   : > { %v1898_v47 = vrot.slane %v1897_v46, 1 }
0x1c09   : > { %v1899_v38 = vadd.f32 %v1898_v47, %v1897_v46 }
0x1c0b   : > { %v1900_v48 = vadd.f32 1e-16, %v1899_v38 }
0x1c0d   : > { %3545 = vrcp.f32 %v1900_v48 }
0x1c17   : > { %v3546_v49 = vpop.eup %3545 }
0x1c18   : > { %v1902_v50 = vmul.f32 %v3546_v49, %v1900_v48 }
0x1c1a   : > { %v1903_v51 = vsub.f32 2.0, %v1902_v50 }
0x1c1c   : > { %v1904_v52 = vmul.f32 %v3546_v49, %v1903_v51 }
0x1c1e   : > { %v1905_v53 = vmul.f32 0.0078125, %v1904_v52 }
0x1c20   : > { %v1907_v54 = vmul.f32 %v3939_v17, %v1905_v53  ;;  %v1906_v55 = vmul.f32 %v3937_v16, %v1905_v53  ;;  %v1909_v56 = vmul.f32 %v3942_v19, %v1905_v53  ;;  %v1908_v57 = vmul.f32 %v3945_v21, %v1905_v53 }
0x1c22   : > { %1912 = vadd.xlane.f32.xlu1 %v1907_v54  ;;  %1910 = vadd.xlane.f32.xlu0 %v1906_v55 }
0x1c26   : > { %1916 = vadd.xlane.f32.xlu1 %v1909_v56  ;;  %1914 = vadd.xlane.f32.xlu0 %v1908_v57 }
0x1caf   : > { %v1913_v58 = vpop.xlane.xlu1 %1912  ;;  %v1911_v59 = vpop.xlane.xlu0 %1910 }
0x1cb0   : > { %v1919_v60 = vadd.f32 1e-16, %v1913_v58  ;;  %v1918_v61 = vadd.f32 1e-16, %v1911_v59 }
0x1cb2   : > { %3547 = vrcp.f32 %v1919_v60 }
0x1cb3   : > { %3549 = vrcp.f32 %v1918_v61  ;;  %v1917_v62 = vpop.xlane.xlu1 %1916  ;;  %v1915_v63 = vpop.xlane.xlu0 %1914 }
0x1cb4   : > { %v1921_v3 = vadd.f32 1e-16, %v1917_v62  ;;  %v1920_v4 = vadd.f32 1e-16, %v1915_v63 }
0x1cb6   : > { %3551 = vrcp.f32 %v1921_v3 }
0x1cb7   : > { %3553 = vrcp.f32 %v1920_v4 }
0x1cbc   : > { %v3548_v5 = vpop.eup %3547 }
0x1cbd   : > { %v3550_v7 = vpop.eup %3549  ;;  %v1927_v8 = vmul.f32 %v3548_v5, %v1919_v60 }
0x1cbe   : > { %v1926_v9 = vmul.f32 %v3550_v7, %v1918_v61 }
0x1cbf   : > { %v1931_v10 = vsub.f32 2.0, %v1927_v8 }
0x1cc0   : > { %v3552_v11 = vpop.eup %3551  ;;  %v1930_v12 = vsub.f32 2.0, %v1926_v9 }
0x1cc1   : > { %v3554_v13 = vpop.eup %3553  ;;  %v1935_v14 = vmul.f32 %v3548_v5, %v1931_v10  ;;  %v1929_v15 = vmul.f32 %v3552_v11, %v1921_v3 }
0x1cc2   : > { %v1934_v18 = vmul.f32 %v3550_v7, %v1930_v12  ;;  %v1928_v20 = vmul.f32 %v3554_v13, %v1920_v4 }
0x1cc3   : > { %v1939_v22 = vmul.f32 0.03125, %v1935_v14  ;;  %v1933_v23 = vsub.f32 2.0, %v1929_v15 }
0x1cc4   : > { %v1938_v24 = vmul.f32 0.03125, %v1934_v18  ;;  %v1932_v25 = vsub.f32 2.0, %v1928_v20 }
0x1cc5   : > { %v1937_v26 = vmul.f32 %v3552_v11, %v1933_v23  ;;  %v1943_v27 = vmul.f32 %v3939_v17, %v1939_v22 }
0x1cc6   : > { %v1942_v28 = vmul.f32 %v3937_v16, %v1938_v24  ;;  %v1936_v29 = vmul.f32 %v3554_v13, %v1932_v25 }
0x1cc7   : > { %v1941_v30 = vmul.f32 0.03125, %v1937_v26 }
0x1cc8   : > { %v1940_v31 = vmul.f32 0.03125, %v1936_v29  ;;  %v1946_v32 = vadd.f32 %v1943_v27, %v1942_v28 }
0x1cc9   : > { %v1945_v34 = vmul.f32 %v3942_v19, %v1941_v30 }
0x1cca   : > { %v1944_v33 = vmul.f32 %v3945_v21, %v1940_v31 }
0x1ccc   : > { %v1947_v35 = vadd.f32 %v1946_v32, %v1944_v33 }
0x1cce   : > { %v1948_v36 = vadd.f32 %v1947_v35, %v1945_v34 }
0x1cd0   : > { %v1949_v37 = vrot.slane %v1948_v36, 4 }
0x1cd2   : > { %v1950_v39 = vadd.f32 %v1949_v37, %v1948_v36 }
0x1cd4   : > { %v1951_v40 = vrot.slane %v1950_v39, 2 }
0x1cd6   : > { %v1952_v41 = vadd.f32 %v1951_v40, %v1950_v39 }
0x1cd8   : > { %v1953_v42 = vrot.slane %v1952_v41, 1 }
0x1cda   : > { %v1954_v43 = vadd.f32 %v1953_v42, %v1952_v41 }
0x1cdc   : > { %v1955_v44 = vadd.f32 1e-16, %v1954_v43 }
0x1cde   : > { %3555 = vrcp.f32 %v1955_v44 }
0x1ce8   : > { %v3556_v45 = vpop.eup %3555 }
0x1ce9   : > { %v1957_v46 = vmul.f32 %v3556_v45, %v1955_v44 }
0x1ceb   : > { %v1958_v47 = vsub.f32 2.0, %v1957_v46 }
0x1ced   : > { %v1959_v38 = vmul.f32 %v3556_v45, %v1958_v47 }
0x1cef   : > { %v1960_v48 = vmul.f32 0.0078125, %v1959_v38 }
0x1cf1   : > { %v1962_v49 = vmul.f32 %v3939_v17, %v1960_v48  ;;  %v1961_v50 = vmul.f32 %v3937_v16, %v1960_v48  ;;  %v1964_v51 = vmul.f32 %v3942_v19, %v1960_v48  ;;  %v1963_v52 = vmul.f32 %v3945_v21, %v1960_v48 }
0x1cf3   : > { %1967 = vadd.xlane.f32.xlu1 %v1962_v49  ;;  %1965 = vadd.xlane.f32.xlu0 %v1961_v50 }
0x1cf7   : > { %1971 = vadd.xlane.f32.xlu1 %v1964_v51  ;;  %1969 = vadd.xlane.f32.xlu0 %v1963_v52 }
0x1d80   : > { %v1968_v53 = vpop.xlane.xlu1 %1967  ;;  %v1966_v54 = vpop.xlane.xlu0 %1965 }
0x1d81   : > { %v1974_v55 = vadd.f32 1e-16, %v1968_v53  ;;  %v1973_v56 = vadd.f32 1e-16, %v1966_v54 }
0x1d83   : > { %3557 = vrcp.f32 %v1974_v55 }
0x1d84   : > { %3559 = vrcp.f32 %v1973_v56  ;;  %v1972_v57 = vpop.xlane.xlu1 %1971  ;;  %v1970_v58 = vpop.xlane.xlu0 %1969 }
0x1d85   : > { %v1976_v59 = vadd.f32 1e-16, %v1972_v57  ;;  %v1975_v60 = vadd.f32 1e-16, %v1970_v58 }
0x1d87   : > { %3561 = vrcp.f32 %v1976_v59 }
0x1d88   : > { %3563 = vrcp.f32 %v1975_v60 }
0x1d8d   : > { %v3558_v61 = vpop.eup %3557 }
0x1d8e   : > { %v3560_v62 = vpop.eup %3559  ;;  %v1982_v63 = vmul.f32 %v3558_v61, %v1974_v55 }
0x1d8f   : > { %v1981_v3 = vmul.f32 %v3560_v62, %v1973_v56 }
0x1d90   : > { %v1986_v4 = vsub.f32 2.0, %v1982_v63 }
0x1d91   : > { %v3562_v5 = vpop.eup %3561  ;;  %v1985_v7 = vsub.f32 2.0, %v1981_v3 }
0x1d92   : > { %v3564_v8 = vpop.eup %3563  ;;  %v1990_v9 = vmul.f32 %v3558_v61, %v1986_v4  ;;  %v1984_v10 = vmul.f32 %v3562_v5, %v1976_v59 }
0x1d93   : > { %v1989_v11 = vmul.f32 %v3560_v62, %v1985_v7  ;;  %v1983_v12 = vmul.f32 %v3564_v8, %v1975_v60 }
0x1d94   : > { %v1994_v13 = vmul.f32 0.03125, %v1990_v9  ;;  %v1988_v14 = vsub.f32 2.0, %v1984_v10 }
0x1d95   : > { %v1993_v15 = vmul.f32 0.03125, %v1989_v11  ;;  %v1987_v18 = vsub.f32 2.0, %v1983_v12 }
0x1d96   : > { %v1992_v20 = vmul.f32 %v3562_v5, %v1988_v14  ;;  %v1998_v22 = vmul.f32 %v3939_v17, %v1994_v13 }
0x1d97   : > { %v1997_v23 = vmul.f32 %v3937_v16, %v1993_v15  ;;  %v1991_v24 = vmul.f32 %v3564_v8, %v1987_v18 }
0x1d98   : > { %v1996_v25 = vmul.f32 0.03125, %v1992_v20 }
0x1d99   : > { %v1995_v26 = vmul.f32 0.03125, %v1991_v24  ;;  %v2001_v27 = vadd.f32 %v1998_v22, %v1997_v23 }
0x1d9a   : > { %v2000_v29 = vmul.f32 %v3942_v19, %v1996_v25 }
0x1d9b   : > { %v1999_v28 = vmul.f32 %v3945_v21, %v1995_v26 }
0x1d9d   : > { %v2002_v30 = vadd.f32 %v2001_v27, %v1999_v28 }
0x1d9f   : > { %v2003_v31 = vadd.f32 %v2002_v30, %v2000_v29 }
0x1da1   : > { %v2004_v32 = vrot.slane %v2003_v31, 4 }
0x1da3   : > { %v2005_v33 = vadd.f32 %v2004_v32, %v2003_v31 }
0x1da5   : > { %v2006_v34 = vrot.slane %v2005_v33, 2 }
0x1da7   : > { %v2007_v35 = vadd.f32 %v2006_v34, %v2005_v33 }
0x1da9   : > { %v2008_v36 = vrot.slane %v2007_v35, 1 }
0x1dab   : > { %v2009_v37 = vadd.f32 %v2008_v36, %v2007_v35 }
0x1dad   : > { %v2010_v39 = vadd.f32 1e-16, %v2009_v37 }
0x1daf   : > { %3565 = vrcp.f32 %v2010_v39 }
0x1db9   : > { %v3566_v40 = vpop.eup %3565 }
0x1dba   : > { %v2012_v41 = vmul.f32 %v3566_v40, %v2010_v39 }
0x1dbc   : > { %v2013_v42 = vsub.f32 2.0, %v2012_v41 }
0x1dbe   : > { %v2014_v43 = vmul.f32 %v3566_v40, %v2013_v42 }
0x1dc0   : > { %v2015_v44 = vmul.f32 0.0078125, %v2014_v43 }
0x1dc2   : > { %v2017_v45 = vmul.f32 %v3939_v17, %v2015_v44  ;;  %v2016_v46 = vmul.f32 %v3937_v16, %v2015_v44  ;;  %v2019_v47 = vmul.f32 %v3942_v19, %v2015_v44  ;;  %v2018_v38 = vmul.f32 %v3945_v21, %v2015_v44 }
0x1dc4   : > { %2022 = vadd.xlane.f32.xlu1 %v2017_v45  ;;  %2020 = vadd.xlane.f32.xlu0 %v2016_v46 }
0x1dc8   : > { %2026 = vadd.xlane.f32.xlu1 %v2019_v47  ;;  %2024 = vadd.xlane.f32.xlu0 %v2018_v38 }
0x1e51   : > { %v2023_v48 = vpop.xlane.xlu1 %2022  ;;  %v2021_v49 = vpop.xlane.xlu0 %2020 }
0x1e52   : > { %v2029_v50 = vadd.f32 1e-16, %v2023_v48  ;;  %v2028_v51 = vadd.f32 1e-16, %v2021_v49 }
0x1e54   : > { %3567 = vrcp.f32 %v2029_v50 }
0x1e55   : > { %3569 = vrcp.f32 %v2028_v51  ;;  %v2027_v52 = vpop.xlane.xlu1 %2026  ;;  %v2025_v53 = vpop.xlane.xlu0 %2024 }
0x1e56   : > { %v2031_v54 = vadd.f32 1e-16, %v2027_v52  ;;  %v2030_v55 = vadd.f32 1e-16, %v2025_v53 }
0x1e58   : > { %3571 = vrcp.f32 %v2031_v54 }
0x1e59   : > { %3573 = vrcp.f32 %v2030_v55 }
0x1e5e   : > { %v3568_v56 = vpop.eup %3567 }
0x1e5f   : > { %v3570_v57 = vpop.eup %3569  ;;  %v2037_v58 = vmul.f32 %v3568_v56, %v2029_v50 }
0x1e60   : > { %v2036_v59 = vmul.f32 %v3570_v57, %v2028_v51 }
0x1e61   : > { %v2041_v60 = vsub.f32 2.0, %v2037_v58 }
0x1e62   : > { %v3572_v61 = vpop.eup %3571  ;;  %v2040_v62 = vsub.f32 2.0, %v2036_v59 }
0x1e63   : > { %v3574_v63 = vpop.eup %3573  ;;  %v2045_v3 = vmul.f32 %v3568_v56, %v2041_v60  ;;  %v2039_v4 = vmul.f32 %v3572_v61, %v2031_v54 }
0x1e64   : > { %v2044_v5 = vmul.f32 %v3570_v57, %v2040_v62  ;;  %v2038_v7 = vmul.f32 %v3574_v63, %v2030_v55 }
0x1e65   : > { %v2049_v8 = vmul.f32 0.03125, %v2045_v3  ;;  %v2043_v9 = vsub.f32 2.0, %v2039_v4 }
0x1e66   : > { %v2048_v10 = vmul.f32 0.03125, %v2044_v5  ;;  %v2042_v11 = vsub.f32 2.0, %v2038_v7 }
0x1e67   : > { %v2047_v12 = vmul.f32 %v3572_v61, %v2043_v9  ;;  %v2053_v13 = vmul.f32 %v3939_v17, %v2049_v8 }
0x1e68   : > { %v2052_v14 = vmul.f32 %v3937_v16, %v2048_v10  ;;  %v2046_v15 = vmul.f32 %v3574_v63, %v2042_v11 }
0x1e69   : > { %v2051_v18 = vmul.f32 0.03125, %v2047_v12 }
0x1e6a   : > { %v2050_v20 = vmul.f32 0.03125, %v2046_v15  ;;  %v2056_v22 = vadd.f32 %v2053_v13, %v2052_v14 }
0x1e6b   : > { %v2055_v24 = vmul.f32 %v3942_v19, %v2051_v18 }
0x1e6c   : > { %v2054_v23 = vmul.f32 %v3945_v21, %v2050_v20 }
0x1e6e   : > { %v2057_v25 = vadd.f32 %v2056_v22, %v2054_v23 }
0x1e70   : > { %v2058_v26 = vadd.f32 %v2057_v25, %v2055_v24 }
0x1e72   : > { %v2059_v27 = vrot.slane %v2058_v26, 4 }
0x1e74   : > { %v2060_v28 = vadd.f32 %v2059_v27, %v2058_v26 }
0x1e76   : > { %v2061_v29 = vrot.slane %v2060_v28, 2 }
0x1e78   : > { %v2062_v30 = vadd.f32 %v2061_v29, %v2060_v28 }
0x1e7a   : > { %v2063_v31 = vrot.slane %v2062_v30, 1 }
0x1e7c   : > { %v2064_v32 = vadd.f32 %v2063_v31, %v2062_v30 }
0x1e7e   : > { %v2065_v33 = vadd.f32 1e-16, %v2064_v32 }
0x1e80   : > { %3575 = vrcp.f32 %v2065_v33 }
0x1e8a   : > { %v3576_v34 = vpop.eup %3575 }
0x1e8b   : > { %v2067_v35 = vmul.f32 %v3576_v34, %v2065_v33 }
0x1e8d   : > { %v2068_v36 = vsub.f32 2.0, %v2067_v35 }
0x1e8f   : > { %v2069_v37 = vmul.f32 %v3576_v34, %v2068_v36 }
0x1e91   : > { %v2070_v39 = vmul.f32 0.0078125, %v2069_v37 }
0x1e93   : > { %v2072_v40 = vmul.f32 %v3939_v17, %v2070_v39  ;;  %v2071_v41 = vmul.f32 %v3937_v16, %v2070_v39  ;;  %v2074_v42 = vmul.f32 %v3942_v19, %v2070_v39  ;;  %v2073_v43 = vmul.f32 %v3945_v21, %v2070_v39 }
0x1e95   : > { %2077 = vadd.xlane.f32.xlu1 %v2072_v40  ;;  %2075 = vadd.xlane.f32.xlu0 %v2071_v41 }
0x1e99   : > { %2081 = vadd.xlane.f32.xlu1 %v2074_v42  ;;  %2079 = vadd.xlane.f32.xlu0 %v2073_v43 }
0x1f22   : > { %v2078_v44 = vpop.xlane.xlu1 %2077  ;;  %v2076_v45 = vpop.xlane.xlu0 %2075 }
0x1f23   : > { %v2084_v46 = vadd.f32 1e-16, %v2078_v44  ;;  %v2083_v47 = vadd.f32 1e-16, %v2076_v45 }
0x1f25   : > { %3577 = vrcp.f32 %v2084_v46 }
0x1f26   : > { %3579 = vrcp.f32 %v2083_v47  ;;  %v2082_v38 = vpop.xlane.xlu1 %2081  ;;  %v2080_v48 = vpop.xlane.xlu0 %2079 }
0x1f27   : > { %v2086_v49 = vadd.f32 1e-16, %v2082_v38  ;;  %v2085_v50 = vadd.f32 1e-16, %v2080_v48 }
0x1f29   : > { %3581 = vrcp.f32 %v2086_v49 }
0x1f2a   : > { %3583 = vrcp.f32 %v2085_v50 }
0x1f2f   : > { %v3578_v51 = vpop.eup %3577 }
0x1f30   : > { %v3580_v52 = vpop.eup %3579  ;;  %v2092_v53 = vmul.f32 %v3578_v51, %v2084_v46 }
0x1f31   : > { %v2091_v54 = vmul.f32 %v3580_v52, %v2083_v47 }
0x1f32   : > { %v2096_v55 = vsub.f32 2.0, %v2092_v53 }
0x1f33   : > { %v3582_v56 = vpop.eup %3581  ;;  %v2095_v57 = vsub.f32 2.0, %v2091_v54 }
0x1f34   : > { %v3584_v58 = vpop.eup %3583  ;;  %v2100_v59 = vmul.f32 %v3578_v51, %v2096_v55  ;;  %v2094_v60 = vmul.f32 %v3582_v56, %v2086_v49 }
0x1f35   : > { %v2099_v61 = vmul.f32 %v3580_v52, %v2095_v57  ;;  %v2093_v62 = vmul.f32 %v3584_v58, %v2085_v50 }
0x1f36   : > { %v2104_v63 = vmul.f32 0.03125, %v2100_v59  ;;  %v2098_v3 = vsub.f32 2.0, %v2094_v60 }
0x1f37   : > { %v2103_v4 = vmul.f32 0.03125, %v2099_v61  ;;  %v2097_v5 = vsub.f32 2.0, %v2093_v62 }
0x1f38   : > { %v2102_v7 = vmul.f32 %v3582_v56, %v2098_v3  ;;  %v2108_v8 = vmul.f32 %v3939_v17, %v2104_v63 }
0x1f39   : > { %v2107_v9 = vmul.f32 %v3937_v16, %v2103_v4  ;;  %v2101_v10 = vmul.f32 %v3584_v58, %v2097_v5 }
0x1f3a   : > { %v2106_v11 = vmul.f32 0.03125, %v2102_v7 }
0x1f3b   : > { %v2105_v12 = vmul.f32 0.03125, %v2101_v10  ;;  %v2111_v13 = vadd.f32 %v2108_v8, %v2107_v9 }
0x1f3c   : > { %v2110_v15 = vmul.f32 %v3942_v19, %v2106_v11 }
0x1f3d   : > { %v2109_v14 = vmul.f32 %v3945_v21, %v2105_v12 }
0x1f3f   : > { %v2112_v18 = vadd.f32 %v2111_v13, %v2109_v14 }
0x1f41   : > { %v2113_v20 = vadd.f32 %v2112_v18, %v2110_v15 }
0x1f43   : > { %v2114_v22 = vrot.slane %v2113_v20, 4 }
0x1f45   : > { %v2115_v23 = vadd.f32 %v2114_v22, %v2113_v20 }
0x1f47   : > { %v2116_v24 = vrot.slane %v2115_v23, 2 }
0x1f49   : > { %v2117_v25 = vadd.f32 %v2116_v24, %v2115_v23 }
0x1f4b   : > { %v2118_v26 = vrot.slane %v2117_v25, 1 }
0x1f4d   : > { %v2119_v27 = vadd.f32 %v2118_v26, %v2117_v25 }
0x1f4f   : > { %v2120_v28 = vadd.f32 1e-16, %v2119_v27 }
0x1f51   : > { %3585 = vrcp.f32 %v2120_v28 }
0x1f5b   : > { %v3586_v29 = vpop.eup %3585 }
0x1f5c   : > { %v2122_v30 = vmul.f32 %v3586_v29, %v2120_v28 }
0x1f5e   : > { %v2123_v31 = vsub.f32 2.0, %v2122_v30 }
0x1f60   : > { %v2124_v32 = vmul.f32 %v3586_v29, %v2123_v31 }
0x1f62   : > { %v2125_v33 = vmul.f32 0.0078125, %v2124_v32 }
0x1f64   : > { %v2127_v34 = vmul.f32 %v3939_v17, %v2125_v33  ;;  %v2126_v35 = vmul.f32 %v3937_v16, %v2125_v33  ;;  %v2129_v36 = vmul.f32 %v3942_v19, %v2125_v33  ;;  %v2128_v37 = vmul.f32 %v3945_v21, %v2125_v33 }
0x1f66   : > { %2132 = vadd.xlane.f32.xlu1 %v2127_v34  ;;  %2130 = vadd.xlane.f32.xlu0 %v2126_v35 }
0x1f6a   : > { %2136 = vadd.xlane.f32.xlu1 %v2129_v36  ;;  %2134 = vadd.xlane.f32.xlu0 %v2128_v37 }
0x1ff3   : > { %v2133_v39 = vpop.xlane.xlu1 %2132  ;;  %v2131_v40 = vpop.xlane.xlu0 %2130 }
0x1ff4   : > { %v2139_v41 = vadd.f32 1e-16, %v2133_v39  ;;  %v2138_v42 = vadd.f32 1e-16, %v2131_v40 }
0x1ff6   : > { %3587 = vrcp.f32 %v2139_v41 }
0x1ff7   : > { %3589 = vrcp.f32 %v2138_v42  ;;  %v2137_v43 = vpop.xlane.xlu1 %2136  ;;  %v2135_v44 = vpop.xlane.xlu0 %2134 }
0x1ff8   : > { %v2141_v45 = vadd.f32 1e-16, %v2137_v43  ;;  %v2140_v46 = vadd.f32 1e-16, %v2135_v44 }
0x1ffa   : > { %3591 = vrcp.f32 %v2141_v45 }
0x1ffb   : > { %3593 = vrcp.f32 %v2140_v46 }
0x2000   : > { %v3588_v47 = vpop.eup %3587 }
0x2001   : > { %v3590_v38 = vpop.eup %3589  ;;  %v2147_v48 = vmul.f32 %v3588_v47, %v2139_v41 }
0x2002   : > { %v2146_v49 = vmul.f32 %v3590_v38, %v2138_v42 }
0x2003   : > { %v2151_v50 = vsub.f32 2.0, %v2147_v48 }
0x2004   : > { %v3592_v51 = vpop.eup %3591  ;;  %v2150_v52 = vsub.f32 2.0, %v2146_v49 }
0x2005   : > { %v3594_v53 = vpop.eup %3593  ;;  %v2155_v54 = vmul.f32 %v3588_v47, %v2151_v50  ;;  %v2149_v55 = vmul.f32 %v3592_v51, %v2141_v45 }
0x2006   : > { %v2154_v56 = vmul.f32 %v3590_v38, %v2150_v52  ;;  %v2148_v57 = vmul.f32 %v3594_v53, %v2140_v46 }
0x2007   : > { %v2159_v58 = vmul.f32 0.03125, %v2155_v54  ;;  %v2153_v59 = vsub.f32 2.0, %v2149_v55 }
0x2008   : > { %v2158_v60 = vmul.f32 0.03125, %v2154_v56  ;;  %v2152_v61 = vsub.f32 2.0, %v2148_v57 }
0x2009   : > { %v2157_v62 = vmul.f32 %v3592_v51, %v2153_v59  ;;  %v2163_v63 = vmul.f32 %v3939_v17, %v2159_v58 }
0x200a   : > { %v2162_v3 = vmul.f32 %v3937_v16, %v2158_v60  ;;  %v2156_v4 = vmul.f32 %v3594_v53, %v2152_v61 }
0x200b   : > { %v2161_v5 = vmul.f32 0.03125, %v2157_v62 }
0x200c   : > { %v2160_v7 = vmul.f32 0.03125, %v2156_v4  ;;  %v2166_v8 = vadd.f32 %v2163_v63, %v2162_v3 }
0x200d   : > { %v2165_v10 = vmul.f32 %v3942_v19, %v2161_v5 }
0x200e   : > { %v2164_v9 = vmul.f32 %v3945_v21, %v2160_v7 }
0x2010   : > { %v2167_v11 = vadd.f32 %v2166_v8, %v2164_v9 }
0x2012   : > { %v2168_v12 = vadd.f32 %v2167_v11, %v2165_v10 }
0x2014   : > { %v2169_v13 = vrot.slane %v2168_v12, 4 }
0x2016   : > { %v2170_v14 = vadd.f32 %v2169_v13, %v2168_v12 }
0x2018   : > { %v2171_v15 = vrot.slane %v2170_v14, 2 }
0x201a   : > { %v2172_v18 = vadd.f32 %v2171_v15, %v2170_v14 }
0x201c   : > { %v2173_v20 = vrot.slane %v2172_v18, 1 }
0x201e   : > { %v2174_v22 = vadd.f32 %v2173_v20, %v2172_v18 }
0x2020   : > { %v2175_v23 = vadd.f32 1e-16, %v2174_v22 }
0x2022   : > { %3595 = vrcp.f32 %v2175_v23 }
0x202c   : > { %v3596_v24 = vpop.eup %3595 }
0x202d   : > { %v2177_v25 = vmul.f32 %v3596_v24, %v2175_v23 }
0x202f   : > { %v2178_v26 = vsub.f32 2.0, %v2177_v25 }
0x2031   : > { %v2179_v27 = vmul.f32 %v3596_v24, %v2178_v26 }
0x2033   : > { %v2180_v28 = vmul.f32 0.0078125, %v2179_v27 }
0x2035   : > { %v2182_v29 = vmul.f32 %v3939_v17, %v2180_v28  ;;  %v2181_v30 = vmul.f32 %v3937_v16, %v2180_v28  ;;  %v2184_v31 = vmul.f32 %v3942_v19, %v2180_v28  ;;  %v2183_v32 = vmul.f32 %v3945_v21, %v2180_v28 }
0x2037   : > { %2187 = vadd.xlane.f32.xlu1 %v2182_v29  ;;  %2185 = vadd.xlane.f32.xlu0 %v2181_v30 }
0x203b   : > { %2191 = vadd.xlane.f32.xlu1 %v2184_v31  ;;  %2189 = vadd.xlane.f32.xlu0 %v2183_v32 }
0x20c4   : > { %v2188_v33 = vpop.xlane.xlu1 %2187  ;;  %v2186_v34 = vpop.xlane.xlu0 %2185 }
0x20c5   : > { %v2194_v35 = vadd.f32 1e-16, %v2188_v33  ;;  %v2193_v36 = vadd.f32 1e-16, %v2186_v34 }
0x20c7   : > { %3597 = vrcp.f32 %v2194_v35 }
0x20c8   : > { %3599 = vrcp.f32 %v2193_v36  ;;  %v2192_v37 = vpop.xlane.xlu1 %2191  ;;  %v2190_v39 = vpop.xlane.xlu0 %2189 }
0x20c9   : > { %v2196_v40 = vadd.f32 1e-16, %v2192_v37  ;;  %v2195_v41 = vadd.f32 1e-16, %v2190_v39 }
0x20cb   : > { %3601 = vrcp.f32 %v2196_v40 }
0x20cc   : > { %3603 = vrcp.f32 %v2195_v41 }
0x20d1   : > { %v3598_v42 = vpop.eup %3597 }
0x20d2   : > { %v3600_v43 = vpop.eup %3599  ;;  %v2202_v44 = vmul.f32 %v3598_v42, %v2194_v35 }
0x20d3   : > { %v2201_v45 = vmul.f32 %v3600_v43, %v2193_v36 }
0x20d4   : > { %v2206_v46 = vsub.f32 2.0, %v2202_v44 }
0x20d5   : > { %v3602_v47 = vpop.eup %3601  ;;  %v2205_v38 = vsub.f32 2.0, %v2201_v45 }
0x20d6   : > { %v3604_v48 = vpop.eup %3603  ;;  %v2210_v49 = vmul.f32 %v3598_v42, %v2206_v46  ;;  %v2204_v50 = vmul.f32 %v3602_v47, %v2196_v40 }
0x20d7   : > { %v2209_v51 = vmul.f32 %v3600_v43, %v2205_v38  ;;  %v2203_v52 = vmul.f32 %v3604_v48, %v2195_v41 }
0x20d8   : > { %v2214_v53 = vmul.f32 0.03125, %v2210_v49  ;;  %v2208_v54 = vsub.f32 2.0, %v2204_v50 }
0x20d9   : > { %v2213_v55 = vmul.f32 0.03125, %v2209_v51  ;;  %v2207_v56 = vsub.f32 2.0, %v2203_v52 }
0x20da   : > { %v2212_v57 = vmul.f32 %v3602_v47, %v2208_v54  ;;  %v2218_v58 = vmul.f32 %v3939_v17, %v2214_v53 }
0x20db   : > { %v2217_v59 = vmul.f32 %v3937_v16, %v2213_v55  ;;  %v2211_v60 = vmul.f32 %v3604_v48, %v2207_v56 }
0x20dc   : > { %v2216_v61 = vmul.f32 0.03125, %v2212_v57 }
0x20dd   : > { %v2215_v62 = vmul.f32 0.03125, %v2211_v60  ;;  %v2221_v63 = vadd.f32 %v2218_v58, %v2217_v59 }
0x20de   : > { %v2220_v4 = vmul.f32 %v3942_v19, %v2216_v61 }
0x20df   : > { %v2219_v3 = vmul.f32 %v3945_v21, %v2215_v62 }
0x20e1   : > { %v2222_v5 = vadd.f32 %v2221_v63, %v2219_v3 }
0x20e3   : > { %v2223_v7 = vadd.f32 %v2222_v5, %v2220_v4 }
0x20e5   : > { %v2224_v8 = vrot.slane %v2223_v7, 4 }
0x20e7   : > { %v2225_v9 = vadd.f32 %v2224_v8, %v2223_v7 }
0x20e9   : > { %v2226_v10 = vrot.slane %v2225_v9, 2 }
0x20eb   : > { %v2227_v11 = vadd.f32 %v2226_v10, %v2225_v9 }
0x20ed   : > { %v2228_v12 = vrot.slane %v2227_v11, 1 }
0x20ef   : > { %v2229_v13 = vadd.f32 %v2228_v12, %v2227_v11 }
0x20f1   : > { %v2230_v14 = vadd.f32 1e-16, %v2229_v13 }
0x20f3   : > { %3605 = vrcp.f32 %v2230_v14 }
0x20fd   : > { %v3606_v15 = vpop.eup %3605 }
0x20fe   : > { %v2232_v18 = vmul.f32 %v3606_v15, %v2230_v14 }
0x2100   : > { %v2233_v20 = vsub.f32 2.0, %v2232_v18 }
0x2102   : > { %v2234_v22 = vmul.f32 %v3606_v15, %v2233_v20 }
0x2104   : > { %v2235_v23 = vmul.f32 0.0078125, %v2234_v22 }
0x2106   : > { %v2237_v24 = vmul.f32 %v3939_v17, %v2235_v23  ;;  %v2236_v25 = vmul.f32 %v3937_v16, %v2235_v23  ;;  %v2239_v26 = vmul.f32 %v3942_v19, %v2235_v23  ;;  %v2238_v27 = vmul.f32 %v3945_v21, %v2235_v23 }
0x2108   : > { %2242 = vadd.xlane.f32.xlu1 %v2237_v24  ;;  %2240 = vadd.xlane.f32.xlu0 %v2236_v25 }
0x210c   : > { %2246 = vadd.xlane.f32.xlu1 %v2239_v26  ;;  %2244 = vadd.xlane.f32.xlu0 %v2238_v27 }
0x2195   : > { %v2243_v28 = vpop.xlane.xlu1 %2242  ;;  %v2241_v29 = vpop.xlane.xlu0 %2240 }
0x2196   : > { %v2249_v30 = vadd.f32 1e-16, %v2243_v28  ;;  %v2248_v31 = vadd.f32 1e-16, %v2241_v29 }
0x2198   : > { %3607 = vrcp.f32 %v2249_v30 }
0x2199   : > { %3609 = vrcp.f32 %v2248_v31  ;;  %v2247_v32 = vpop.xlane.xlu1 %2246  ;;  %v2245_v33 = vpop.xlane.xlu0 %2244 }
0x219a   : > { %v2251_v34 = vadd.f32 1e-16, %v2247_v32  ;;  %v2250_v35 = vadd.f32 1e-16, %v2245_v33 }
0x219c   : > { %3611 = vrcp.f32 %v2251_v34 }
0x219d   : > { %3613 = vrcp.f32 %v2250_v35 }
0x21a2   : > { %v3608_v36 = vpop.eup %3607 }
0x21a3   : > { %v3610_v37 = vpop.eup %3609  ;;  %v2257_v39 = vmul.f32 %v3608_v36, %v2249_v30 }
0x21a4   : > { %v2256_v40 = vmul.f32 %v3610_v37, %v2248_v31 }
0x21a5   : > { %v2261_v41 = vsub.f32 2.0, %v2257_v39 }
0x21a6   : > { %v3612_v42 = vpop.eup %3611  ;;  %v2260_v43 = vsub.f32 2.0, %v2256_v40 }
0x21a7   : > { %v3614_v44 = vpop.eup %3613  ;;  %v2265_v45 = vmul.f32 %v3608_v36, %v2261_v41  ;;  %v2259_v46 = vmul.f32 %v3612_v42, %v2251_v34 }
0x21a8   : > { %v2264_v47 = vmul.f32 %v3610_v37, %v2260_v43  ;;  %v2258_v38 = vmul.f32 %v3614_v44, %v2250_v35 }
0x21a9   : > { %v2269_v48 = vmul.f32 0.03125, %v2265_v45  ;;  %v2263_v49 = vsub.f32 2.0, %v2259_v46 }
0x21aa   : > { %v2268_v50 = vmul.f32 0.03125, %v2264_v47  ;;  %v2262_v51 = vsub.f32 2.0, %v2258_v38 }
0x21ab   : > { %v2267_v52 = vmul.f32 %v3612_v42, %v2263_v49  ;;  %v2273_v53 = vmul.f32 %v3939_v17, %v2269_v48 }
0x21ac   : > { %v2272_v54 = vmul.f32 %v3937_v16, %v2268_v50  ;;  %v2266_v55 = vmul.f32 %v3614_v44, %v2262_v51 }
0x21ad   : > { %v2271_v56 = vmul.f32 0.03125, %v2267_v52 }
0x21ae   : > { %v2270_v57 = vmul.f32 0.03125, %v2266_v55  ;;  %v2276_v58 = vadd.f32 %v2273_v53, %v2272_v54 }
0x21af   : > { %v2275_v60 = vmul.f32 %v3942_v19, %v2271_v56 }
0x21b0   : > { %v2274_v59 = vmul.f32 %v3945_v21, %v2270_v57 }
0x21b2   : > { %v2277_v61 = vadd.f32 %v2276_v58, %v2274_v59 }
0x21b4   : > { %v2278_v62 = vadd.f32 %v2277_v61, %v2275_v60 }
0x21b6   : > { %v2279_v63 = vrot.slane %v2278_v62, 4 }
0x21b8   : > { %v2280_v3 = vadd.f32 %v2279_v63, %v2278_v62 }
0x21ba   : > { %v2281_v4 = vrot.slane %v2280_v3, 2 }
0x21bc   : > { %v2282_v5 = vadd.f32 %v2281_v4, %v2280_v3 }
0x21be   : > { %v2283_v7 = vrot.slane %v2282_v5, 1 }
0x21c0   : > { %v2284_v8 = vadd.f32 %v2283_v7, %v2282_v5 }
0x21c2   : > { %v2285_v9 = vadd.f32 1e-16, %v2284_v8 }
0x21c4   : > { %3615 = vrcp.f32 %v2285_v9 }
0x21ce   : > { %v3616_v10 = vpop.eup %3615 }
0x21cf   : > { %v2287_v11 = vmul.f32 %v3616_v10, %v2285_v9 }
0x21d1   : > { %v2288_v12 = vsub.f32 2.0, %v2287_v11 }
0x21d3   : > { %v2289_v13 = vmul.f32 %v3616_v10, %v2288_v12 }
0x21d5   : > { %v2290_v14 = vmul.f32 0.0078125, %v2289_v13 }
0x21d7   : > { %v2292_v15 = vmul.f32 %v3939_v17, %v2290_v14  ;;  %v2291_v18 = vmul.f32 %v3937_v16, %v2290_v14  ;;  %v2294_v20 = vmul.f32 %v3942_v19, %v2290_v14  ;;  %v2293_v22 = vmul.f32 %v3945_v21, %v2290_v14 }
0x21d9   : > { %2297 = vadd.xlane.f32.xlu1 %v2292_v15  ;;  %2295 = vadd.xlane.f32.xlu0 %v2291_v18 }
0x21dd   : > { %2301 = vadd.xlane.f32.xlu1 %v2294_v20  ;;  %2299 = vadd.xlane.f32.xlu0 %v2293_v22 }
0x2266   : > { %v2298_v23 = vpop.xlane.xlu1 %2297  ;;  %v2296_v24 = vpop.xlane.xlu0 %2295 }
0x2267   : > { %v2304_v25 = vadd.f32 1e-16, %v2298_v23  ;;  %v2303_v26 = vadd.f32 1e-16, %v2296_v24 }
0x2269   : > { %3617 = vrcp.f32 %v2304_v25 }
0x226a   : > { %3619 = vrcp.f32 %v2303_v26  ;;  %v2302_v27 = vpop.xlane.xlu1 %2301  ;;  %v2300_v28 = vpop.xlane.xlu0 %2299 }
0x226b   : > { %v2306_v29 = vadd.f32 1e-16, %v2302_v27  ;;  %v2305_v30 = vadd.f32 1e-16, %v2300_v28 }
0x226d   : > { %3621 = vrcp.f32 %v2306_v29 }
0x226e   : > { %3623 = vrcp.f32 %v2305_v30 }
0x2273   : > { %v3618_v31 = vpop.eup %3617 }
0x2274   : > { %v3620_v32 = vpop.eup %3619  ;;  %v2312_v33 = vmul.f32 %v3618_v31, %v2304_v25 }
0x2275   : > { %v2311_v34 = vmul.f32 %v3620_v32, %v2303_v26 }
0x2276   : > { %v2316_v35 = vsub.f32 2.0, %v2312_v33 }
0x2277   : > { %v3622_v36 = vpop.eup %3621  ;;  %v2315_v37 = vsub.f32 2.0, %v2311_v34 }
0x2278   : > { %v3624_v39 = vpop.eup %3623  ;;  %v2320_v40 = vmul.f32 %v3618_v31, %v2316_v35  ;;  %v2314_v41 = vmul.f32 %v3622_v36, %v2306_v29 }
0x2279   : > { %v2319_v42 = vmul.f32 %v3620_v32, %v2315_v37  ;;  %v2313_v43 = vmul.f32 %v3624_v39, %v2305_v30 }
0x227a   : > { %v2324_v44 = vmul.f32 0.03125, %v2320_v40  ;;  %v2318_v45 = vsub.f32 2.0, %v2314_v41 }
0x227b   : > { %v2323_v46 = vmul.f32 0.03125, %v2319_v42  ;;  %v2317_v47 = vsub.f32 2.0, %v2313_v43 }
0x227c   : > { %v2322_v38 = vmul.f32 %v3622_v36, %v2318_v45  ;;  %v2328_v48 = vmul.f32 %v3939_v17, %v2324_v44 }
0x227d   : > { %v2327_v49 = vmul.f32 %v3937_v16, %v2323_v46  ;;  %v2321_v50 = vmul.f32 %v3624_v39, %v2317_v47 }
0x227e   : > { %v2326_v51 = vmul.f32 0.03125, %v2322_v38 }
0x227f   : > { %v2325_v52 = vmul.f32 0.03125, %v2321_v50  ;;  %v2331_v53 = vadd.f32 %v2328_v48, %v2327_v49 }
0x2280   : > { %v2330_v55 = vmul.f32 %v3942_v19, %v2326_v51 }
0x2281   : > { %v2329_v54 = vmul.f32 %v3945_v21, %v2325_v52 }
0x2283   : > { %v2332_v56 = vadd.f32 %v2331_v53, %v2329_v54 }
0x2285   : > { %v2333_v57 = vadd.f32 %v2332_v56, %v2330_v55 }
0x2287   : > { %v2334_v58 = vrot.slane %v2333_v57, 4 }
0x2289   : > { %v2335_v59 = vadd.f32 %v2334_v58, %v2333_v57 }
0x228b   : > { %v2336_v60 = vrot.slane %v2335_v59, 2 }
0x228d   : > { %v2337_v61 = vadd.f32 %v2336_v60, %v2335_v59 }
0x228f   : > { %v2338_v62 = vrot.slane %v2337_v61, 1 }
0x2291   : > { %v2339_v63 = vadd.f32 %v2338_v62, %v2337_v61 }
0x2293   : > { %v2340_v3 = vadd.f32 1e-16, %v2339_v63 }
0x2295   : > { %3625 = vrcp.f32 %v2340_v3 }
0x229f   : > { %v3626_v4 = vpop.eup %3625 }
0x22a0   : > { %v2342_v5 = vmul.f32 %v3626_v4, %v2340_v3 }
0x22a2   : > { %v2343_v7 = vsub.f32 2.0, %v2342_v5 }
0x22a4   : > { %v2344_v8 = vmul.f32 %v3626_v4, %v2343_v7 }
0x22a6   : > { %v2345_v9 = vmul.f32 0.0078125, %v2344_v8 }
0x22a8   : > { %v2347_v10 = vmul.f32 %v3939_v17, %v2345_v9  ;;  %v2346_v11 = vmul.f32 %v3937_v16, %v2345_v9  ;;  %v2349_v12 = vmul.f32 %v3942_v19, %v2345_v9  ;;  %v2348_v13 = vmul.f32 %v3945_v21, %v2345_v9 }
0x22aa   : > { %2352 = vadd.xlane.f32.xlu1 %v2347_v10  ;;  %2350 = vadd.xlane.f32.xlu0 %v2346_v11 }
0x22ae   : > { %2356 = vadd.xlane.f32.xlu1 %v2349_v12  ;;  %2354 = vadd.xlane.f32.xlu0 %v2348_v13 }
0x2337   : > { %v2353_v14 = vpop.xlane.xlu1 %2352  ;;  %v2351_v15 = vpop.xlane.xlu0 %2350 }
0x2338   : > { %v2359_v18 = vadd.f32 1e-16, %v2353_v14  ;;  %v2358_v20 = vadd.f32 1e-16, %v2351_v15 }
0x233a   : > { %3627 = vrcp.f32 %v2359_v18 }
0x233b   : > { %3629 = vrcp.f32 %v2358_v20  ;;  %v2357_v22 = vpop.xlane.xlu1 %2356  ;;  %v2355_v23 = vpop.xlane.xlu0 %2354 }
0x233c   : > { %v2361_v24 = vadd.f32 1e-16, %v2357_v22  ;;  %v2360_v25 = vadd.f32 1e-16, %v2355_v23 }
0x233e   : > { %3631 = vrcp.f32 %v2361_v24 }
0x233f   : > { %3633 = vrcp.f32 %v2360_v25 }
0x2344   : > { %v3628_v26 = vpop.eup %3627 }
0x2345   : > { %v3630_v27 = vpop.eup %3629  ;;  %v2367_v28 = vmul.f32 %v3628_v26, %v2359_v18 }
0x2346   : > { %v2366_v29 = vmul.f32 %v3630_v27, %v2358_v20 }
0x2347   : > { %v2371_v30 = vsub.f32 2.0, %v2367_v28 }
0x2348   : > { %v3632_v31 = vpop.eup %3631  ;;  %v2370_v32 = vsub.f32 2.0, %v2366_v29 }
0x2349   : > { %v3634_v33 = vpop.eup %3633  ;;  %v2375_v34 = vmul.f32 %v3628_v26, %v2371_v30  ;;  %v2369_v35 = vmul.f32 %v3632_v31, %v2361_v24 }
0x234a   : > { %v2374_v36 = vmul.f32 %v3630_v27, %v2370_v32  ;;  %v2368_v37 = vmul.f32 %v3634_v33, %v2360_v25 }
0x234b   : > { %v2379_v39 = vmul.f32 0.03125, %v2375_v34  ;;  %v2373_v40 = vsub.f32 2.0, %v2369_v35 }
0x234c   : > { %v2378_v41 = vmul.f32 0.03125, %v2374_v36  ;;  %v2372_v42 = vsub.f32 2.0, %v2368_v37 }
0x234d   : > { %v2377_v43 = vmul.f32 %v3632_v31, %v2373_v40  ;;  %v2383_v44 = vmul.f32 %v3939_v17, %v2379_v39 }
0x234e   : > { %v2382_v45 = vmul.f32 %v3937_v16, %v2378_v41  ;;  %v2376_v46 = vmul.f32 %v3634_v33, %v2372_v42 }
0x234f   : > { %v2381_v47 = vmul.f32 0.03125, %v2377_v43 }
0x2350   : > { %v2380_v38 = vmul.f32 0.03125, %v2376_v46  ;;  %v2386_v48 = vadd.f32 %v2383_v44, %v2382_v45 }
0x2351   : > { %v2385_v50 = vmul.f32 %v3942_v19, %v2381_v47 }
0x2352   : > { %v2384_v49 = vmul.f32 %v3945_v21, %v2380_v38 }
0x2354   : > { %v2387_v51 = vadd.f32 %v2386_v48, %v2384_v49 }
0x2356   : > { %v2388_v52 = vadd.f32 %v2387_v51, %v2385_v50 }
0x2358   : > { %v2389_v53 = vrot.slane %v2388_v52, 4 }
0x235a   : > { %v2390_v54 = vadd.f32 %v2389_v53, %v2388_v52 }
0x235c   : > { %v2391_v55 = vrot.slane %v2390_v54, 2 }
0x235e   : > { %v2392_v56 = vadd.f32 %v2391_v55, %v2390_v54 }
0x2360   : > { %v2393_v57 = vrot.slane %v2392_v56, 1 }
0x2362   : > { %v2394_v58 = vadd.f32 %v2393_v57, %v2392_v56 }
0x2364   : > { %v2395_v59 = vadd.f32 1e-16, %v2394_v58 }
0x2366   : > { %3635 = vrcp.f32 %v2395_v59 }
0x2370   : > { %v3636_v60 = vpop.eup %3635 }
0x2371   : > { %v2397_v61 = vmul.f32 %v3636_v60, %v2395_v59 }
0x2373   : > { %v2398_v62 = vsub.f32 2.0, %v2397_v61 }
0x2375   : > { %v2399_v63 = vmul.f32 %v3636_v60, %v2398_v62 }
0x2377   : > { %v2400_v3 = vmul.f32 0.0078125, %v2399_v63 }
0x2379   : > { %v2402_v4 = vmul.f32 %v3939_v17, %v2400_v3  ;;  %v2401_v5 = vmul.f32 %v3937_v16, %v2400_v3  ;;  %v2404_v7 = vmul.f32 %v3942_v19, %v2400_v3  ;;  %v2403_v8 = vmul.f32 %v3945_v21, %v2400_v3 }
0x237b   : > { %2407 = vadd.xlane.f32.xlu1 %v2402_v4  ;;  %2405 = vadd.xlane.f32.xlu0 %v2401_v5 }
0x237f   : > { %2411 = vadd.xlane.f32.xlu1 %v2404_v7  ;;  %2409 = vadd.xlane.f32.xlu0 %v2403_v8 }
0x2408   : > { %v2408_v9 = vpop.xlane.xlu1 %2407  ;;  %v2406_v10 = vpop.xlane.xlu0 %2405 }
0x2409   : > { %v2414_v11 = vadd.f32 1e-16, %v2408_v9  ;;  %v2413_v12 = vadd.f32 1e-16, %v2406_v10 }
0x240b   : > { %3637 = vrcp.f32 %v2414_v11 }
0x240c   : > { %3639 = vrcp.f32 %v2413_v12  ;;  %v2412_v13 = vpop.xlane.xlu1 %2411  ;;  %v2410_v14 = vpop.xlane.xlu0 %2409 }
0x240d   : > { %v2416_v15 = vadd.f32 1e-16, %v2412_v13  ;;  %v2415_v18 = vadd.f32 1e-16, %v2410_v14 }
0x240f   : > { %3641 = vrcp.f32 %v2416_v15 }
0x2410   : > { %3643 = vrcp.f32 %v2415_v18 }
0x2415   : > { %v3638_v20 = vpop.eup %3637 }
0x2416   : > { %v3640_v22 = vpop.eup %3639  ;;  %v2422_v23 = vmul.f32 %v3638_v20, %v2414_v11 }
0x2417   : > { %v2421_v24 = vmul.f32 %v3640_v22, %v2413_v12 }
0x2418   : > { %v2426_v25 = vsub.f32 2.0, %v2422_v23 }
0x2419   : > { %v3642_v26 = vpop.eup %3641  ;;  %v2425_v27 = vsub.f32 2.0, %v2421_v24 }
0x241a   : > { %v3644_v28 = vpop.eup %3643  ;;  %v2430_v29 = vmul.f32 %v3638_v20, %v2426_v25  ;;  %v2424_v30 = vmul.f32 %v3642_v26, %v2416_v15 }
0x241b   : > { %v2429_v31 = vmul.f32 %v3640_v22, %v2425_v27  ;;  %v2423_v32 = vmul.f32 %v3644_v28, %v2415_v18 }
0x241c   : > { %v2434_v33 = vmul.f32 0.03125, %v2430_v29  ;;  %v2428_v34 = vsub.f32 2.0, %v2424_v30 }
0x241d   : > { %v2433_v35 = vmul.f32 0.03125, %v2429_v31  ;;  %v2427_v36 = vsub.f32 2.0, %v2423_v32 }
0x241e   : > { %v2432_v37 = vmul.f32 %v3642_v26, %v2428_v34  ;;  %v2438_v39 = vmul.f32 %v3939_v17, %v2434_v33 }
0x241f   : > { %v2437_v40 = vmul.f32 %v3937_v16, %v2433_v35  ;;  %v2431_v41 = vmul.f32 %v3644_v28, %v2427_v36 }
0x2420   : > { %v2436_v42 = vmul.f32 0.03125, %v2432_v37 }
0x2421   : > { %v2435_v43 = vmul.f32 0.03125, %v2431_v41  ;;  %v2441_v44 = vadd.f32 %v2438_v39, %v2437_v40 }
0x2422   : > { %v2440_v46 = vmul.f32 %v3942_v19, %v2436_v42 }
0x2423   : > { %v2439_v45 = vmul.f32 %v3945_v21, %v2435_v43 }
0x2425   : > { %v2442_v47 = vadd.f32 %v2441_v44, %v2439_v45 }
0x2427   : > { %v2443_v38 = vadd.f32 %v2442_v47, %v2440_v46 }
0x2429   : > { %v2444_v48 = vrot.slane %v2443_v38, 4 }
0x242b   : > { %v2445_v49 = vadd.f32 %v2444_v48, %v2443_v38 }
0x242d   : > { %v2446_v50 = vrot.slane %v2445_v49, 2 }
0x242f   : > { %v2447_v51 = vadd.f32 %v2446_v50, %v2445_v49 }
0x2431   : > { %v2448_v52 = vrot.slane %v2447_v51, 1 }
0x2433   : > { %v2449_v53 = vadd.f32 %v2448_v52, %v2447_v51 }
0x2435   : > { %v2450_v54 = vadd.f32 1e-16, %v2449_v53 }
0x2437   : > { %3645 = vrcp.f32 %v2450_v54 }
0x2441   : > { %v3646_v55 = vpop.eup %3645 }
0x2442   : > { %v2452_v56 = vmul.f32 %v3646_v55, %v2450_v54 }
0x2444   : > { %v2453_v57 = vsub.f32 2.0, %v2452_v56 }
0x2446   : > { %v2454_v58 = vmul.f32 %v3646_v55, %v2453_v57 }
0x2448   : > { %v2455_v59 = vmul.f32 0.0078125, %v2454_v58 }
0x244a   : > { %v2457_v60 = vmul.f32 %v3939_v17, %v2455_v59  ;;  %v2456_v61 = vmul.f32 %v3937_v16, %v2455_v59  ;;  %v2459_v62 = vmul.f32 %v3942_v19, %v2455_v59  ;;  %v2458_v63 = vmul.f32 %v3945_v21, %v2455_v59 }
0x244c   : > { %2462 = vadd.xlane.f32.xlu1 %v2457_v60  ;;  %2460 = vadd.xlane.f32.xlu0 %v2456_v61 }
0x2450   : > { %2466 = vadd.xlane.f32.xlu1 %v2459_v62  ;;  %2464 = vadd.xlane.f32.xlu0 %v2458_v63 }
0x24d9   : > { %v2463_v3 = vpop.xlane.xlu1 %2462  ;;  %v2461_v4 = vpop.xlane.xlu0 %2460 }
0x24da   : > { %v2469_v5 = vadd.f32 1e-16, %v2463_v3  ;;  %v2468_v7 = vadd.f32 1e-16, %v2461_v4 }
0x24dc   : > { %3647 = vrcp.f32 %v2469_v5 }
0x24dd   : > { %3649 = vrcp.f32 %v2468_v7  ;;  %v2467_v8 = vpop.xlane.xlu1 %2466  ;;  %v2465_v9 = vpop.xlane.xlu0 %2464 }
0x24de   : > { %v2471_v10 = vadd.f32 1e-16, %v2467_v8  ;;  %v2470_v11 = vadd.f32 1e-16, %v2465_v9 }
0x24e0   : > { %3651 = vrcp.f32 %v2471_v10 }
0x24e1   : > { %3653 = vrcp.f32 %v2470_v11 }
0x24e6   : > { %v3648_v12 = vpop.eup %3647 }
0x24e7   : > { %v3650_v13 = vpop.eup %3649  ;;  %v2477_v14 = vmul.f32 %v3648_v12, %v2469_v5 }
0x24e8   : > { %v2476_v15 = vmul.f32 %v3650_v13, %v2468_v7 }
0x24e9   : > { %v2481_v18 = vsub.f32 2.0, %v2477_v14 }
0x24ea   : > { %v3652_v20 = vpop.eup %3651  ;;  %v2480_v22 = vsub.f32 2.0, %v2476_v15 }
0x24eb   : > { %v3654_v23 = vpop.eup %3653  ;;  %v2485_v24 = vmul.f32 %v3648_v12, %v2481_v18  ;;  %v2479_v25 = vmul.f32 %v3652_v20, %v2471_v10 }
0x24ec   : > { %v2484_v26 = vmul.f32 %v3650_v13, %v2480_v22  ;;  %v2478_v27 = vmul.f32 %v3654_v23, %v2470_v11 }
0x24ed   : > { %v2489_v28 = vmul.f32 0.03125, %v2485_v24  ;;  %v2483_v29 = vsub.f32 2.0, %v2479_v25 }
0x24ee   : > { %v2488_v30 = vmul.f32 0.03125, %v2484_v26  ;;  %v2482_v31 = vsub.f32 2.0, %v2478_v27 }
0x24ef   : > { %v2487_v32 = vmul.f32 %v3652_v20, %v2483_v29  ;;  %v2493_v33 = vmul.f32 %v3939_v17, %v2489_v28 }
0x24f0   : > { %v2492_v34 = vmul.f32 %v3937_v16, %v2488_v30  ;;  %v2486_v35 = vmul.f32 %v3654_v23, %v2482_v31 }
0x24f1   : > { %v2491_v36 = vmul.f32 0.03125, %v2487_v32 }
0x24f2   : > { %v2490_v37 = vmul.f32 0.03125, %v2486_v35  ;;  %v2496_v39 = vadd.f32 %v2493_v33, %v2492_v34 }
0x24f3   : > { %v2495_v41 = vmul.f32 %v3942_v19, %v2491_v36 }
0x24f4   : > { %v2494_v40 = vmul.f32 %v3945_v21, %v2490_v37 }
0x24f6   : > { %v2497_v42 = vadd.f32 %v2496_v39, %v2494_v40 }
0x24f8   : > { %v2498_v43 = vadd.f32 %v2497_v42, %v2495_v41 }
0x24fa   : > { %v2499_v44 = vrot.slane %v2498_v43, 4 }
0x24fc   : > { %v2500_v45 = vadd.f32 %v2499_v44, %v2498_v43 }
0x24fe   : > { %v2501_v46 = vrot.slane %v2500_v45, 2 }
0x2500   : > { %v2502_v47 = vadd.f32 %v2501_v46, %v2500_v45 }
0x2502   : > { %v2503_v38 = vrot.slane %v2502_v47, 1 }
0x2504   : > { %v2504_v48 = vadd.f32 %v2503_v38, %v2502_v47 }
0x2506   : > { %v2505_v49 = vadd.f32 1e-16, %v2504_v48 }
0x2508   : > { %3655 = vrcp.f32 %v2505_v49 }
0x2512   : > { %v3656_v50 = vpop.eup %3655 }
0x2513   : > { %v2507_v51 = vmul.f32 %v3656_v50, %v2505_v49 }
0x2515   : > { %v2508_v52 = vsub.f32 2.0, %v2507_v51 }
0x2517   : > { %v2509_v53 = vmul.f32 %v3656_v50, %v2508_v52 }
0x2519   : > { %v2510_v54 = vmul.f32 0.0078125, %v2509_v53 }
0x251b   : > { %v2512_v55 = vmul.f32 %v3939_v17, %v2510_v54  ;;  %v2511_v56 = vmul.f32 %v3937_v16, %v2510_v54  ;;  %v2514_v57 = vmul.f32 %v3942_v19, %v2510_v54  ;;  %v2513_v58 = vmul.f32 %v3945_v21, %v2510_v54 }
0x251d   : > { %2517 = vadd.xlane.f32.xlu1 %v2512_v55  ;;  %2515 = vadd.xlane.f32.xlu0 %v2511_v56 }
0x2521   : > { %2521 = vadd.xlane.f32.xlu1 %v2514_v57  ;;  %2519 = vadd.xlane.f32.xlu0 %v2513_v58 }
0x25aa   : > { %v2518_v59 = vpop.xlane.xlu1 %2517  ;;  %v2516_v60 = vpop.xlane.xlu0 %2515 }
0x25ab   : > { %v2524_v61 = vadd.f32 1e-16, %v2518_v59  ;;  %v2523_v62 = vadd.f32 1e-16, %v2516_v60 }
0x25ad   : > { %3657 = vrcp.f32 %v2524_v61 }
0x25ae   : > { %3659 = vrcp.f32 %v2523_v62  ;;  %v2522_v63 = vpop.xlane.xlu1 %2521  ;;  %v2520_v3 = vpop.xlane.xlu0 %2519 }
0x25af   : > { %v2526_v4 = vadd.f32 1e-16, %v2522_v63  ;;  %v2525_v5 = vadd.f32 1e-16, %v2520_v3 }
0x25b1   : > { %3661 = vrcp.f32 %v2526_v4 }
0x25b2   : > { %3663 = vrcp.f32 %v2525_v5 }
0x25b7   : > { %v3658_v7 = vpop.eup %3657 }
0x25b8   : > { %v3660_v8 = vpop.eup %3659  ;;  %v2532_v9 = vmul.f32 %v3658_v7, %v2524_v61 }
0x25b9   : > { %v2531_v10 = vmul.f32 %v3660_v8, %v2523_v62 }
0x25ba   : > { %v2536_v11 = vsub.f32 2.0, %v2532_v9 }
0x25bb   : > { %v3662_v12 = vpop.eup %3661  ;;  %v2535_v13 = vsub.f32 2.0, %v2531_v10 }
0x25bc   : > { %v3664_v14 = vpop.eup %3663  ;;  %v2540_v15 = vmul.f32 %v3658_v7, %v2536_v11  ;;  %v2534_v18 = vmul.f32 %v3662_v12, %v2526_v4 }
0x25bd   : > { %v2539_v20 = vmul.f32 %v3660_v8, %v2535_v13  ;;  %v2533_v22 = vmul.f32 %v3664_v14, %v2525_v5 }
0x25be   : > { %v2544_v23 = vmul.f32 0.03125, %v2540_v15  ;;  %v2538_v24 = vsub.f32 2.0, %v2534_v18 }
0x25bf   : > { %v2543_v25 = vmul.f32 0.03125, %v2539_v20  ;;  %v2537_v26 = vsub.f32 2.0, %v2533_v22 }
0x25c0   : > { %v2542_v27 = vmul.f32 %v3662_v12, %v2538_v24  ;;  %v2548_v28 = vmul.f32 %v3939_v17, %v2544_v23 }
0x25c1   : > { %v2547_v29 = vmul.f32 %v3937_v16, %v2543_v25  ;;  %v2541_v30 = vmul.f32 %v3664_v14, %v2537_v26 }
0x25c2   : > { %v2546_v31 = vmul.f32 0.03125, %v2542_v27 }
0x25c3   : > { %v2545_v32 = vmul.f32 0.03125, %v2541_v30  ;;  %v2551_v33 = vadd.f32 %v2548_v28, %v2547_v29 }
0x25c4   : > { %v2550_v35 = vmul.f32 %v3942_v19, %v2546_v31 }
0x25c5   : > { %v2549_v34 = vmul.f32 %v3945_v21, %v2545_v32 }
0x25c7   : > { %v2552_v36 = vadd.f32 %v2551_v33, %v2549_v34 }
0x25c9   : > { %v2553_v37 = vadd.f32 %v2552_v36, %v2550_v35 }
0x25cb   : > { %v2554_v39 = vrot.slane %v2553_v37, 4 }
0x25cd   : > { %v2555_v40 = vadd.f32 %v2554_v39, %v2553_v37 }
0x25cf   : > { %v2556_v41 = vrot.slane %v2555_v40, 2 }
0x25d1   : > { %v2557_v42 = vadd.f32 %v2556_v41, %v2555_v40 }
0x25d3   : > { %v2558_v43 = vrot.slane %v2557_v42, 1 }
0x25d5   : > { %v2559_v44 = vadd.f32 %v2558_v43, %v2557_v42 }
0x25d7   : > { %v2560_v45 = vadd.f32 1e-16, %v2559_v44 }
0x25d9   : > { %3665 = vrcp.f32 %v2560_v45 }
0x25e3   : > { %v3666_v46 = vpop.eup %3665 }
0x25e4   : > { %v2562_v47 = vmul.f32 %v3666_v46, %v2560_v45 }
0x25e6   : > { %v2563_v38 = vsub.f32 2.0, %v2562_v47 }
0x25e8   : > { %v2564_v48 = vmul.f32 %v3666_v46, %v2563_v38 }
0x25ea   : > { %v2565_v49 = vmul.f32 0.0078125, %v2564_v48 }
0x25ec   : > { %v2567_v50 = vmul.f32 %v3939_v17, %v2565_v49  ;;  %v2566_v51 = vmul.f32 %v3937_v16, %v2565_v49  ;;  %v2569_v52 = vmul.f32 %v3942_v19, %v2565_v49  ;;  %v2568_v53 = vmul.f32 %v3945_v21, %v2565_v49 }
0x25ee   : > { %2572 = vadd.xlane.f32.xlu1 %v2567_v50  ;;  %2570 = vadd.xlane.f32.xlu0 %v2566_v51 }
0x25f2   : > { %2576 = vadd.xlane.f32.xlu1 %v2569_v52  ;;  %2574 = vadd.xlane.f32.xlu0 %v2568_v53 }
0x267b   : > { %v2573_v54 = vpop.xlane.xlu1 %2572  ;;  %v2571_v55 = vpop.xlane.xlu0 %2570 }
0x267c   : > { %v2579_v56 = vadd.f32 1e-16, %v2573_v54  ;;  %v2578_v57 = vadd.f32 1e-16, %v2571_v55 }
0x267e   : > { %3667 = vrcp.f32 %v2579_v56 }
0x267f   : > { %3669 = vrcp.f32 %v2578_v57  ;;  %v2577_v58 = vpop.xlane.xlu1 %2576  ;;  %v2575_v59 = vpop.xlane.xlu0 %2574 }
0x2680   : > { %v2581_v60 = vadd.f32 1e-16, %v2577_v58  ;;  %v2580_v61 = vadd.f32 1e-16, %v2575_v59 }
0x2682   : > { %3671 = vrcp.f32 %v2581_v60 }
0x2683   : > { %3673 = vrcp.f32 %v2580_v61 }
0x2688   : > { %v3668_v62 = vpop.eup %3667 }
0x2689   : > { %v3670_v63 = vpop.eup %3669  ;;  %v2587_v3 = vmul.f32 %v3668_v62, %v2579_v56 }
0x268a   : > { %v2586_v4 = vmul.f32 %v3670_v63, %v2578_v57 }
0x268b   : > { %v2591_v5 = vsub.f32 2.0, %v2587_v3 }
0x268c   : > { %v3672_v7 = vpop.eup %3671  ;;  %v2590_v8 = vsub.f32 2.0, %v2586_v4 }
0x268d   : > { %v3674_v9 = vpop.eup %3673  ;;  %v2595_v10 = vmul.f32 %v3668_v62, %v2591_v5  ;;  %v2589_v11 = vmul.f32 %v3672_v7, %v2581_v60 }
0x268e   : > { %v2594_v12 = vmul.f32 %v3670_v63, %v2590_v8  ;;  %v2588_v13 = vmul.f32 %v3674_v9, %v2580_v61 }
0x268f   : > { %v2599_v14 = vmul.f32 0.03125, %v2595_v10  ;;  %v2593_v15 = vsub.f32 2.0, %v2589_v11 }
0x2690   : > { %v2598_v18 = vmul.f32 0.03125, %v2594_v12  ;;  %v2592_v20 = vsub.f32 2.0, %v2588_v13 }
0x2691   : > { %v2597_v22 = vmul.f32 %v3672_v7, %v2593_v15  ;;  %v2603_v23 = vmul.f32 %v3939_v17, %v2599_v14 }
0x2692   : > { %v2602_v24 = vmul.f32 %v3937_v16, %v2598_v18  ;;  %v2596_v25 = vmul.f32 %v3674_v9, %v2592_v20 }
0x2693   : > { %v2601_v26 = vmul.f32 0.03125, %v2597_v22 }
0x2694   : > { %v2600_v27 = vmul.f32 0.03125, %v2596_v25  ;;  %v2606_v28 = vadd.f32 %v2603_v23, %v2602_v24 }
0x2695   : > { %v2605_v30 = vmul.f32 %v3942_v19, %v2601_v26 }
0x2696   : > { %v2604_v29 = vmul.f32 %v3945_v21, %v2600_v27 }
0x2698   : > { %v2607_v31 = vadd.f32 %v2606_v28, %v2604_v29 }
0x269a   : > { %v2608_v32 = vadd.f32 %v2607_v31, %v2605_v30 }
0x269c   : > { %v2609_v33 = vrot.slane %v2608_v32, 4 }
0x269e   : > { %v2610_v34 = vadd.f32 %v2609_v33, %v2608_v32 }
0x26a0   : > { %v2611_v35 = vrot.slane %v2610_v34, 2 }
0x26a2   : > { %v2612_v36 = vadd.f32 %v2611_v35, %v2610_v34 }
0x26a4   : > { %v2613_v37 = vrot.slane %v2612_v36, 1 }
0x26a6   : > { %v2614_v39 = vadd.f32 %v2613_v37, %v2612_v36 }
0x26a8   : > { %v2615_v40 = vadd.f32 1e-16, %v2614_v39 }
0x26aa   : > { %3675 = vrcp.f32 %v2615_v40 }
0x26b4   : > { %v3676_v41 = vpop.eup %3675 }
0x26b5   : > { %v2617_v42 = vmul.f32 %v3676_v41, %v2615_v40 }
0x26b7   : > { %v2618_v43 = vsub.f32 2.0, %v2617_v42 }
0x26b9   : > { %v2619_v44 = vmul.f32 %v3676_v41, %v2618_v43 }
0x26bb   : > { %v2620_v45 = vmul.f32 0.0078125, %v2619_v44 }
0x26bd   : > { %v2622_v46 = vmul.f32 %v3939_v17, %v2620_v45  ;;  %v2621_v47 = vmul.f32 %v3937_v16, %v2620_v45  ;;  %v2624_v38 = vmul.f32 %v3942_v19, %v2620_v45  ;;  %v2623_v48 = vmul.f32 %v3945_v21, %v2620_v45 }
0x26bf   : > { %2627 = vadd.xlane.f32.xlu1 %v2622_v46  ;;  %2625 = vadd.xlane.f32.xlu0 %v2621_v47 }
0x26c3   : > { %2631 = vadd.xlane.f32.xlu1 %v2624_v38  ;;  %2629 = vadd.xlane.f32.xlu0 %v2623_v48 }
0x274c   : > { %v2628_v49 = vpop.xlane.xlu1 %2627  ;;  %v2626_v50 = vpop.xlane.xlu0 %2625 }
0x274d   : > { %v2634_v51 = vadd.f32 1e-16, %v2628_v49  ;;  %v2633_v52 = vadd.f32 1e-16, %v2626_v50 }
0x274f   : > { %3677 = vrcp.f32 %v2634_v51 }
0x2750   : > { %3679 = vrcp.f32 %v2633_v52  ;;  %v2632_v53 = vpop.xlane.xlu1 %2631  ;;  %v2630_v54 = vpop.xlane.xlu0 %2629 }
0x2751   : > { %v2636_v55 = vadd.f32 1e-16, %v2632_v53  ;;  %v2635_v56 = vadd.f32 1e-16, %v2630_v54 }
0x2753   : > { %3681 = vrcp.f32 %v2636_v55 }
0x2754   : > { %3683 = vrcp.f32 %v2635_v56 }
0x2759   : > { %v3678_v57 = vpop.eup %3677 }
0x275a   : > { %v3680_v58 = vpop.eup %3679  ;;  %v2642_v59 = vmul.f32 %v3678_v57, %v2634_v51 }
0x275b   : > { %v2641_v60 = vmul.f32 %v3680_v58, %v2633_v52 }
0x275c   : > { %v2646_v61 = vsub.f32 2.0, %v2642_v59 }
0x275d   : > { %v3682_v62 = vpop.eup %3681  ;;  %v2645_v63 = vsub.f32 2.0, %v2641_v60 }
0x275e   : > { %v3684_v3 = vpop.eup %3683  ;;  %v2650_v4 = vmul.f32 %v3678_v57, %v2646_v61  ;;  %v2644_v5 = vmul.f32 %v3682_v62, %v2636_v55 }
0x275f   : > { %v2649_v7 = vmul.f32 %v3680_v58, %v2645_v63  ;;  %v2643_v8 = vmul.f32 %v3684_v3, %v2635_v56 }
0x2760   : > { %v2654_v9 = vmul.f32 0.03125, %v2650_v4  ;;  %v2648_v10 = vsub.f32 2.0, %v2644_v5 }
0x2761   : > { %v2653_v11 = vmul.f32 0.03125, %v2649_v7  ;;  %v2647_v12 = vsub.f32 2.0, %v2643_v8 }
0x2762   : > { %v2652_v13 = vmul.f32 %v3682_v62, %v2648_v10  ;;  %v2658_v14 = vmul.f32 %v3939_v17, %v2654_v9 }
0x2763   : > { %v2657_v15 = vmul.f32 %v3937_v16, %v2653_v11  ;;  %v2651_v18 = vmul.f32 %v3684_v3, %v2647_v12 }
0x2764   : > { %v2656_v20 = vmul.f32 0.03125, %v2652_v13 }
0x2765   : > { %v2655_v22 = vmul.f32 0.03125, %v2651_v18  ;;  %v2661_v23 = vadd.f32 %v2658_v14, %v2657_v15 }
0x2766   : > { %v2660_v25 = vmul.f32 %v3942_v19, %v2656_v20 }
0x2767   : > { %v2659_v24 = vmul.f32 %v3945_v21, %v2655_v22 }
0x2769   : > { %v2662_v26 = vadd.f32 %v2661_v23, %v2659_v24 }
0x276b   : > { %v2663_v27 = vadd.f32 %v2662_v26, %v2660_v25 }
0x276d   : > { %v2664_v28 = vrot.slane %v2663_v27, 4 }
0x276f   : > { %v2665_v29 = vadd.f32 %v2664_v28, %v2663_v27 }
0x2771   : > { %v2666_v30 = vrot.slane %v2665_v29, 2 }
0x2773   : > { %v2667_v31 = vadd.f32 %v2666_v30, %v2665_v29 }
0x2775   : > { %v2668_v32 = vrot.slane %v2667_v31, 1 }
0x2777   : > { %v2669_v33 = vadd.f32 %v2668_v32, %v2667_v31 }
0x2779   : > { %v2670_v34 = vadd.f32 1e-16, %v2669_v33 }
0x277b   : > { %3685 = vrcp.f32 %v2670_v34 }
0x2785   : > { %v3686_v35 = vpop.eup %3685 }
0x2786   : > { %v2672_v36 = vmul.f32 %v3686_v35, %v2670_v34 }
0x2788   : > { %v2673_v37 = vsub.f32 2.0, %v2672_v36 }
0x278a   : > { %v2674_v39 = vmul.f32 %v3686_v35, %v2673_v37 }
0x278c   : > { %v2675_v40 = vmul.f32 0.0078125, %v2674_v39 }
0x278e   : > { %v2677_v41 = vmul.f32 %v3939_v17, %v2675_v40  ;;  %v2676_v42 = vmul.f32 %v3937_v16, %v2675_v40  ;;  %v2679_v43 = vmul.f32 %v3942_v19, %v2675_v40  ;;  %v2678_v44 = vmul.f32 %v3945_v21, %v2675_v40 }
0x2790   : > { %2682 = vadd.xlane.f32.xlu1 %v2677_v41  ;;  %2680 = vadd.xlane.f32.xlu0 %v2676_v42 }
0x2794   : > { %2686 = vadd.xlane.f32.xlu1 %v2679_v43  ;;  %2684 = vadd.xlane.f32.xlu0 %v2678_v44 }
0x281d   : > { %v2683_v45 = vpop.xlane.xlu1 %2682  ;;  %v2681_v46 = vpop.xlane.xlu0 %2680 }
0x281e   : > { %v2689_v47 = vadd.f32 1e-16, %v2683_v45  ;;  %v2688_v38 = vadd.f32 1e-16, %v2681_v46 }
0x2820   : > { %3687 = vrcp.f32 %v2689_v47 }
0x2821   : > { %3689 = vrcp.f32 %v2688_v38  ;;  %v2687_v48 = vpop.xlane.xlu1 %2686  ;;  %v2685_v49 = vpop.xlane.xlu0 %2684 }
0x2822   : > { %v2691_v50 = vadd.f32 1e-16, %v2687_v48  ;;  %v2690_v51 = vadd.f32 1e-16, %v2685_v49 }
0x2824   : > { %3691 = vrcp.f32 %v2691_v50 }
0x2825   : > { %3693 = vrcp.f32 %v2690_v51 }
0x282a   : > { %v3688_v52 = vpop.eup %3687 }
0x282b   : > { %v3690_v53 = vpop.eup %3689  ;;  %v2697_v54 = vmul.f32 %v3688_v52, %v2689_v47 }
0x282c   : > { %v2696_v55 = vmul.f32 %v3690_v53, %v2688_v38 }
0x282d   : > { %v2701_v56 = vsub.f32 2.0, %v2697_v54 }
0x282e   : > { %v3692_v57 = vpop.eup %3691  ;;  %v2700_v58 = vsub.f32 2.0, %v2696_v55 }
0x282f   : > { %v3694_v59 = vpop.eup %3693  ;;  %v2705_v60 = vmul.f32 %v3688_v52, %v2701_v56  ;;  %v2699_v61 = vmul.f32 %v3692_v57, %v2691_v50 }
0x2830   : > { %v2704_v62 = vmul.f32 %v3690_v53, %v2700_v58  ;;  %v2698_v63 = vmul.f32 %v3694_v59, %v2690_v51 }
0x2831   : > { %v2709_v3 = vmul.f32 0.03125, %v2705_v60  ;;  %v2703_v4 = vsub.f32 2.0, %v2699_v61 }
0x2832   : > { %v2708_v5 = vmul.f32 0.03125, %v2704_v62  ;;  %v2702_v7 = vsub.f32 2.0, %v2698_v63 }
0x2833   : > { %v2707_v8 = vmul.f32 %v3692_v57, %v2703_v4  ;;  %v2713_v9 = vmul.f32 %v3939_v17, %v2709_v3 }
0x2834   : > { %v2712_v10 = vmul.f32 %v3937_v16, %v2708_v5  ;;  %v2706_v11 = vmul.f32 %v3694_v59, %v2702_v7 }
0x2835   : > { %v2711_v12 = vmul.f32 0.03125, %v2707_v8 }
0x2836   : > { %v2710_v13 = vmul.f32 0.03125, %v2706_v11  ;;  %v2716_v14 = vadd.f32 %v2713_v9, %v2712_v10 }
0x2837   : > { %v2715_v18 = vmul.f32 %v3942_v19, %v2711_v12 }
0x2838   : > { %v2714_v15 = vmul.f32 %v3945_v21, %v2710_v13 }
0x283a   : > { %v2717_v20 = vadd.f32 %v2716_v14, %v2714_v15 }
0x283c   : > { %v2718_v22 = vadd.f32 %v2717_v20, %v2715_v18 }
0x283e   : > { %v2719_v23 = vrot.slane %v2718_v22, 4 }
0x2840   : > { %v2720_v24 = vadd.f32 %v2719_v23, %v2718_v22 }
0x2842   : > { %v2721_v25 = vrot.slane %v2720_v24, 2 }
0x2844   : > { %v2722_v26 = vadd.f32 %v2721_v25, %v2720_v24 }
0x2846   : > { %v2723_v27 = vrot.slane %v2722_v26, 1 }
0x2848   : > { %v2724_v28 = vadd.f32 %v2723_v27, %v2722_v26 }
0x284a   : > { %v2725_v29 = vadd.f32 1e-16, %v2724_v28 }
0x284c   : > { %3695 = vrcp.f32 %v2725_v29 }
0x2856   : > { %v3696_v30 = vpop.eup %3695 }
0x2857   : > { %v2727_v31 = vmul.f32 %v3696_v30, %v2725_v29 }
0x2859   : > { %v2728_v32 = vsub.f32 2.0, %v2727_v31 }
0x285b   : > { %v2729_v33 = vmul.f32 %v3696_v30, %v2728_v32 }
0x285d   : > { %v2730_v34 = vmul.f32 0.0078125, %v2729_v33 }
0x285f   : > { %v2732_v35 = vmul.f32 %v3939_v17, %v2730_v34  ;;  %v2731_v36 = vmul.f32 %v3937_v16, %v2730_v34  ;;  %v2734_v37 = vmul.f32 %v3942_v19, %v2730_v34  ;;  %v2733_v39 = vmul.f32 %v3945_v21, %v2730_v34 }
0x2861   : > { %2737 = vadd.xlane.f32.xlu1 %v2732_v35  ;;  %2735 = vadd.xlane.f32.xlu0 %v2731_v36 }
0x2865   : > { %2741 = vadd.xlane.f32.xlu1 %v2734_v37  ;;  %2739 = vadd.xlane.f32.xlu0 %v2733_v39 }
0x28ee   : > { %v2738_v40 = vpop.xlane.xlu1 %2737  ;;  %v2736_v41 = vpop.xlane.xlu0 %2735 }
0x28ef   : > { %v2744_v42 = vadd.f32 1e-16, %v2738_v40  ;;  %v2743_v43 = vadd.f32 1e-16, %v2736_v41 }
0x28f1   : > { %3697 = vrcp.f32 %v2744_v42 }
0x28f2   : > { %3699 = vrcp.f32 %v2743_v43  ;;  %v2742_v44 = vpop.xlane.xlu1 %2741  ;;  %v2740_v45 = vpop.xlane.xlu0 %2739 }
0x28f3   : > { %v2746_v46 = vadd.f32 1e-16, %v2742_v44  ;;  %v2745_v47 = vadd.f32 1e-16, %v2740_v45 }
0x28f5   : > { %3701 = vrcp.f32 %v2746_v46 }
0x28f6   : > { %3703 = vrcp.f32 %v2745_v47 }
0x28fb   : > { %v3698_v38 = vpop.eup %3697 }
0x28fc   : > { %v3700_v48 = vpop.eup %3699  ;;  %v2752_v49 = vmul.f32 %v3698_v38, %v2744_v42 }
0x28fd   : > { %v2751_v50 = vmul.f32 %v3700_v48, %v2743_v43 }
0x28fe   : > { %v2756_v51 = vsub.f32 2.0, %v2752_v49 }
0x28ff   : > { %v3702_v52 = vpop.eup %3701  ;;  %v2755_v53 = vsub.f32 2.0, %v2751_v50 }
0x2900   : > { %v3704_v54 = vpop.eup %3703  ;;  %v2760_v55 = vmul.f32 %v3698_v38, %v2756_v51  ;;  %v2754_v56 = vmul.f32 %v3702_v52, %v2746_v46 }
0x2901   : > { %v2759_v57 = vmul.f32 %v3700_v48, %v2755_v53  ;;  %v2753_v58 = vmul.f32 %v3704_v54, %v2745_v47 }
0x2902   : > { %v2764_v59 = vmul.f32 0.03125, %v2760_v55  ;;  %v2758_v60 = vsub.f32 2.0, %v2754_v56 }
0x2903   : > { %v2763_v61 = vmul.f32 0.03125, %v2759_v57  ;;  %v2757_v62 = vsub.f32 2.0, %v2753_v58 }
0x2904   : > { %v2762_v63 = vmul.f32 %v3702_v52, %v2758_v60  ;;  %v2768_v3 = vmul.f32 %v3939_v17, %v2764_v59 }
0x2905   : > { %v2767_v4 = vmul.f32 %v3937_v16, %v2763_v61  ;;  %v2761_v5 = vmul.f32 %v3704_v54, %v2757_v62 }
0x2906   : > { %v2766_v7 = vmul.f32 0.03125, %v2762_v63 }
0x2907   : > { %v2765_v8 = vmul.f32 0.03125, %v2761_v5  ;;  %v2771_v9 = vadd.f32 %v2768_v3, %v2767_v4 }
0x2908   : > { %v2770_v11 = vmul.f32 %v3942_v19, %v2766_v7 }
0x2909   : > { %v2769_v10 = vmul.f32 %v3945_v21, %v2765_v8 }
0x290b   : > { %v2772_v12 = vadd.f32 %v2771_v9, %v2769_v10 }
0x290d   : > { %v2773_v13 = vadd.f32 %v2772_v12, %v2770_v11 }
0x290f   : > { %v2774_v14 = vrot.slane %v2773_v13, 4 }
0x2911   : > { %v2775_v15 = vadd.f32 %v2774_v14, %v2773_v13 }
0x2913   : > { %v2776_v18 = vrot.slane %v2775_v15, 2 }
0x2915   : > { %v2777_v20 = vadd.f32 %v2776_v18, %v2775_v15 }
0x2917   : > { %v2778_v22 = vrot.slane %v2777_v20, 1 }
0x2919   : > { %v2779_v23 = vadd.f32 %v2778_v22, %v2777_v20 }
0x291b   : > { %v2780_v24 = vadd.f32 1e-16, %v2779_v23 }
0x291d   : > { %3705 = vrcp.f32 %v2780_v24 }
0x2927   : > { %v3706_v25 = vpop.eup %3705 }
0x2928   : > { %v2782_v26 = vmul.f32 %v3706_v25, %v2780_v24 }
0x292a   : > { %v2783_v27 = vsub.f32 2.0, %v2782_v26 }
0x292c   : > { %v2784_v28 = vmul.f32 %v3706_v25, %v2783_v27 }
0x292e   : > { %v2785_v29 = vmul.f32 0.0078125, %v2784_v28 }
0x2930   : > { %v2787_v30 = vmul.f32 %v3939_v17, %v2785_v29  ;;  %v2786_v31 = vmul.f32 %v3937_v16, %v2785_v29  ;;  %v2789_v32 = vmul.f32 %v3942_v19, %v2785_v29  ;;  %v2788_v33 = vmul.f32 %v3945_v21, %v2785_v29 }
0x2932   : > { %2792 = vadd.xlane.f32.xlu1 %v2787_v30  ;;  %2790 = vadd.xlane.f32.xlu0 %v2786_v31 }
0x2936   : > { %2796 = vadd.xlane.f32.xlu1 %v2789_v32  ;;  %2794 = vadd.xlane.f32.xlu0 %v2788_v33 }
0x29bf   : > { %v2793_v34 = vpop.xlane.xlu1 %2792  ;;  %v2791_v35 = vpop.xlane.xlu0 %2790 }
0x29c0   : > { %v2799_v36 = vadd.f32 1e-16, %v2793_v34  ;;  %v2798_v37 = vadd.f32 1e-16, %v2791_v35 }
0x29c2   : > { %3707 = vrcp.f32 %v2799_v36 }
0x29c3   : > { %3709 = vrcp.f32 %v2798_v37  ;;  %v2797_v39 = vpop.xlane.xlu1 %2796  ;;  %v2795_v40 = vpop.xlane.xlu0 %2794 }
0x29c4   : > { %v2801_v41 = vadd.f32 1e-16, %v2797_v39  ;;  %v2800_v42 = vadd.f32 1e-16, %v2795_v40 }
0x29c6   : > { %3711 = vrcp.f32 %v2801_v41 }
0x29c7   : > { %3713 = vrcp.f32 %v2800_v42 }
0x29cc   : > { %v3708_v43 = vpop.eup %3707 }
0x29cd   : > { %v3710_v44 = vpop.eup %3709  ;;  %v2807_v45 = vmul.f32 %v3708_v43, %v2799_v36 }
0x29ce   : > { %v2806_v46 = vmul.f32 %v3710_v44, %v2798_v37 }
0x29cf   : > { %v2811_v47 = vsub.f32 2.0, %v2807_v45 }
0x29d0   : > { %v3712_v38 = vpop.eup %3711  ;;  %v2810_v48 = vsub.f32 2.0, %v2806_v46 }
0x29d1   : > { %v3714_v49 = vpop.eup %3713  ;;  %v2815_v50 = vmul.f32 %v3708_v43, %v2811_v47  ;;  %v2809_v51 = vmul.f32 %v3712_v38, %v2801_v41 }
0x29d2   : > { %v2814_v52 = vmul.f32 %v3710_v44, %v2810_v48  ;;  %v2808_v53 = vmul.f32 %v3714_v49, %v2800_v42 }
0x29d3   : > { %v2819_v54 = vmul.f32 0.03125, %v2815_v50  ;;  %v2813_v55 = vsub.f32 2.0, %v2809_v51 }
0x29d4   : > { %v2818_v56 = vmul.f32 0.03125, %v2814_v52  ;;  %v2812_v57 = vsub.f32 2.0, %v2808_v53 }
0x29d5   : > { %v2817_v58 = vmul.f32 %v3712_v38, %v2813_v55  ;;  %v2823_v59 = vmul.f32 %v3939_v17, %v2819_v54 }
0x29d6   : > { %v2822_v60 = vmul.f32 %v3937_v16, %v2818_v56  ;;  %v2816_v61 = vmul.f32 %v3714_v49, %v2812_v57 }
0x29d7   : > { %v2821_v62 = vmul.f32 0.03125, %v2817_v58 }
0x29d8   : > { %v2820_v63 = vmul.f32 0.03125, %v2816_v61  ;;  %v2826_v3 = vadd.f32 %v2823_v59, %v2822_v60 }
0x29d9   : > { %v2825_v5 = vmul.f32 %v3942_v19, %v2821_v62 }
0x29da   : > { %v2824_v4 = vmul.f32 %v3945_v21, %v2820_v63 }
0x29dc   : > { %v2827_v7 = vadd.f32 %v2826_v3, %v2824_v4 }
0x29de   : > { %v2828_v8 = vadd.f32 %v2827_v7, %v2825_v5 }
0x29e0   : > { %v2829_v9 = vrot.slane %v2828_v8, 4 }
0x29e2   : > { %v2830_v10 = vadd.f32 %v2829_v9, %v2828_v8 }
0x29e4   : > { %v2831_v11 = vrot.slane %v2830_v10, 2 }
0x29e6   : > { %v2832_v12 = vadd.f32 %v2831_v11, %v2830_v10 }
0x29e8   : > { %v2833_v13 = vrot.slane %v2832_v12, 1 }
0x29ea   : > { %v2834_v14 = vadd.f32 %v2833_v13, %v2832_v12 }
0x29ec   : > { %v2835_v15 = vadd.f32 1e-16, %v2834_v14 }
0x29ee   : > { %3715 = vrcp.f32 %v2835_v15 }
0x29f8   : > { %v3716_v18 = vpop.eup %3715 }
0x29f9   : > { %v2837_v20 = vmul.f32 %v3716_v18, %v2835_v15 }
0x29fb   : > { %v2838_v22 = vsub.f32 2.0, %v2837_v20 }
0x29fd   : > { %v2839_v23 = vmul.f32 %v3716_v18, %v2838_v22 }
0x29ff   : > { %v4380_v38 = vmul.f32 0.0078125, %v2839_v23  }
0x2a01   : > { %v2842_v24 = vmul.f32 %v3939_v17, %v4380_v38  ;;  %v2841_v25 = vmul.f32 %v3937_v16, %v4380_v38  ;;  %v2844_v26 = vmul.f32 %v3942_v19, %v4380_v38  ;;  %v2843_v27 = vmul.f32 %v3945_v21, %v4380_v38 }
0x2a03   : > { %2847 = vadd.xlane.f32.xlu1 %v2842_v24  ;;  %2845 = vadd.xlane.f32.xlu0 %v2841_v25 }
0x2a07   : > { %2851 = vadd.xlane.f32.xlu1 %v2844_v26  ;;  %2849 = vadd.xlane.f32.xlu0 %v2843_v27 }
0x2a90   : > { %v2848_v28 = vpop.xlane.xlu1 %2847  ;;  %v2846_v29 = vpop.xlane.xlu0 %2845 }
0x2a91   : > { %v2854_v30 = vadd.f32 1e-16, %v2848_v28  ;;  %v2853_v31 = vadd.f32 1e-16, %v2846_v29 }
0x2a93   : > { %3717 = vrcp.f32 %v2854_v30 }
0x2a94   : > { %3719 = vrcp.f32 %v2853_v31  ;;  %v2852_v32 = vpop.xlane.xlu1 %2851  ;;  %v2850_v33 = vpop.xlane.xlu0 %2849 }
0x2a95   : > { %v2856_v34 = vadd.f32 1e-16, %v2852_v32  ;;  %v2855_v35 = vadd.f32 1e-16, %v2850_v33 }
0x2a97   : > { %3721 = vrcp.f32 %v2856_v34 }
0x2a98   : > { %3723 = vrcp.f32 %v2855_v35 }
0x2a9d   : > { %v3718_v36 = vpop.eup %3717 }
0x2a9e   : > { %v3720_v37 = vpop.eup %3719  ;;  %v2862_v39 = vmul.f32 %v3718_v36, %v2854_v30 }
0x2a9f   : > { %v2861_v40 = vmul.f32 %v3720_v37, %v2853_v31 }
0x2aa0   : > { %v2866_v41 = vsub.f32 2.0, %v2862_v39 }
0x2aa1   : > { %v3722_v42 = vpop.eup %3721  ;;  %v2865_v43 = vsub.f32 2.0, %v2861_v40 }
0x2aa2   : > { %v3724_v44 = vpop.eup %3723  ;;  %v2870_v45 = vmul.f32 %v3718_v36, %v2866_v41  ;;  %v2864_v46 = vmul.f32 %v3722_v42, %v2856_v34 }
0x2aa3   : > { %v2869_v47 = vmul.f32 %v3720_v37, %v2865_v43  ;;  %v2863_v48 = vmul.f32 %v3724_v44, %v2855_v35 }
0x2aa4   : > { %v2874_v9 = vmul.f32 0.03125, %v2870_v45   ;;  %v2868_v49 = vsub.f32 2.0, %v2864_v46 }
0x2aa5   : > { %v2873_v4 = vmul.f32 0.03125, %v2869_v47   ;;  %v2867_v50 = vsub.f32 2.0, %v2863_v48 }
0x2aa6   : > { %v2872_v51 = vmul.f32 %v3722_v42, %v2868_v49  ;;  %v2878_v52 = vmul.f32 %v3939_v17, %v2874_v9 }
0x2aa7   : > { %v2877_v53 = vmul.f32 %v3937_v16, %v2873_v4  ;;  %v2871_v54 = vmul.f32 %v3724_v44, %v2867_v50 }
0x2aa8   : > { %v2876_v11 = vmul.f32 0.03125, %v2872_v51  }
0x2aa9   : > { %v2875_v8 = vmul.f32 0.03125, %v2871_v54   ;;  %v2881_v55 = vadd.f32 %v2878_v52, %v2877_v53 }
0x2aaa   : > { %v2880_v57 = vmul.f32 %v3942_v19, %v2876_v11 }
0x2aab   : > { %v2879_v56 = vmul.f32 %v3945_v21, %v2875_v8 }
0x2aad   : > { %v2882_v58 = vadd.f32 %v2881_v55, %v2879_v56 }
0x2aaf   : > { %v2883_v59 = vadd.f32 %v2882_v58, %v2880_v57 }
0x2ab1   : > { %v2884_v60 = vrot.slane %v2883_v59, 4 }
0x2ab3   : > { %v2885_v61 = vadd.f32 %v2884_v60, %v2883_v59 }
0x2ab5   : > { %v2886_v62 = vrot.slane %v2885_v61, 2 }
0x2ab7   : > { %v2887_v63 = vadd.f32 %v2886_v62, %v2885_v61 }
0x2ab9   : > { %v2888_v3 = vrot.slane %v2887_v63, 1 }
0x2abb   : > { %v2889_v5 = vadd.f32 %v2888_v3, %v2887_v63  }
0x2abd   : > { %v2890_v7 = vmul.f32 %v2889_v5, %v4380_v38  ;;  %v4496_v27 = vmov %v2889_v5 }
0x2abf   : > { %v3067_v10 = vadd.f32 -0.0078125, %v2890_v7 }
0x2ac1   : > { %v2892_v12 = vand.u32 2147483647, %v3067_v10 }
0x2ac3   : > { %v2893_v13 = vsel %vm114_vm0, %v2892_v12, 0.0 }
0x2ac4   : > { %2894 = vadd.xlane.f32.xlu0 %v2893_v13 }
0x2b51   : > { %v2895_v14 = vpop.xlane.xlu0 %2894 }
0x2b52   : > { %v2896_v15 = vrot.slane %v2895_v14, 4 }
0x2b54   : > { %v2897_v18 = vadd.f32 %v2896_v15, %v2895_v14 }
0x2b56   : > { %v2898_v20 = vrot.slane %v2897_v18, 2 }
0x2b58   : > { %v2899_v22 = vadd.f32 %v2898_v20, %v2897_v18 }
0x2b5a   : > { %v2900_v23 = vrot.slane %v2899_v22, 1 }
0x2b5c   : > { %v2901_v24 = vadd.f32 %v2900_v23, %v2899_v22 }
0x2b5e   : > { %3071 = vpush %v2901_v24 }
0x2b8f   : > { %s3072_s0 = spop %3071  }
0x2b90   : > { %p134_p9 = scmp.gt.f32.partialorder %s3072_s0, 0.005 }
0x2b92   : > { %p136_p11 = pnand %p135_p10, %p134_p9 }
0x2b93   :  { %v4497_v40 = vmov (%p136_p11), %v2889_v5 }
0x2b94   :  { %139 = sbr.rel (!%p136_p11) target bundleno = 489 (0x1e9), region = 43 }
0x2b9b PF:  { %p2904_p12 = scmp.gt.f32.partialorder %s3845_s0, 0.005  ;;  %v3869_v4 = vphi %v94_v4, %v2873_v4   ;;  %v3865_v9 = vphi %v95_v9, %v2874_v9   ;;  %v3861_v8 = vphi %v96_v8, %v2875_v8   ;;  %v3857_v11 = vphi %v97_v11, %v2876_v11   ;;  %v3853_v38 = vphi %v3949_v38, %v4380_v38   ;;  %v3849_v40 = vphi %v4495_v40, %v4497_v40   ;;  %s3845_s0 = sphi %s3070_s0, %s3072_s0  }
0x2b9d   :  { %s4423_s21 = scalar_select %p2904_p12, 49, 0 }
0x2b9f   :  { %p3068_p13 = scmp.le.s32.totalorder %s4423_s21, 0 }
0x2ba0   :  { %s4438_s22 = smov (!%p3068_p13), 0  }
0x2ba1   :  { %3050 = sbr.rel (%p3068_p13) target bundleno = 11386 (0x2c7a), region = 48 }
0x2ba8 LB: > { %v2918_v25 = vadd.f32 1e-16, %v3873_v40  ;;  %s2909_s22 = sadd.s32 1, %s3877_s22   ;;  %s3877_s22 = sphi %s4438_s22, %s2909_s22   ;;  %v3873_v40 = vphi %v3849_v40, %v2972_v40  }
0x2ba9   : > { %p2908_p0 = scmp.ge.s32.totalorder %s2909_s22, %s4423_s21 }
0x2baa   : > { %3725 = vrcp.f32 %v2918_v25 }
0x2bb4   : > { %v3726_v26 = vpop.eup %3725 }
0x2bb5   : > { %v2920_v27 = vmul.f32 %v3726_v26, %v2918_v25 }
0x2bb7   : > { %v2921_v28 = vsub.f32 2.0, %v2920_v27 }
0x2bb9   : > { %v2922_v29 = vmul.f32 %v3726_v26, %v2921_v28 }
0x2bbb   : > { %v2923_v38 = vmul.f32 0.0078125, %v2922_v29  }
0x2bbd   : > { %v2926_v30 = vmul.f32 %v3945_v21, %v2923_v38  ;;  %v2924_v4 = vmul.f32 %v3937_v16, %v2923_v38  ;;  %v2927_v8 = vmul.f32 %v3942_v19, %v2923_v38  ;;  %v2925_v9 = vmul.f32 %v3939_v17, %v2923_v38 }
0x2bbf   : > { %2932 = vadd.xlane.f32.xlu1 %v2926_v30  ;;  %2928 = vadd.xlane.f32.xlu0 %v2924_v4 }
0x2bc3   : > { %2934 = vadd.xlane.f32.xlu1 %v2927_v8  ;;  %2930 = vadd.xlane.f32.xlu0 %v2925_v9 }
0x2c4c   : > { %v2933_v11 = vpop.xlane.xlu1 %2932  ;;  %v2929_v31 = vpop.xlane.xlu0 %2928 }
0x2c4d   : > { %v2938_v32 = vadd.f32 1e-16, %v2933_v11  ;;  %v2936_v33 = vadd.f32 1e-16, %v2929_v31 }
0x2c4f   : > { %3727 = vrcp.f32 %v2938_v32 }
0x2c50   : > { %3729 = vrcp.f32 %v2936_v33  ;;  %v2935_v34 = vpop.xlane.xlu1 %2934  ;;  %v2931_v35 = vpop.xlane.xlu0 %2930 }
0x2c51   : > { %v2939_v36 = vadd.f32 1e-16, %v2935_v34  ;;  %v2937_v37 = vadd.f32 1e-16, %v2931_v35 }
0x2c53   : > { %3731 = vrcp.f32 %v2939_v36 }
0x2c54   : > { %3733 = vrcp.f32 %v2937_v37 }
0x2c59   : > { %v3728_v39 = vpop.eup %3727 }
0x2c5a   : > { %v3730_v40 = vpop.eup %3729  ;;  %v2946_v41 = vmul.f32 %v3728_v39, %v2938_v32 }
0x2c5b   : > { %v2944_v42 = vmul.f32 %v3730_v40, %v2936_v33 }
0x2c5c   : > { %v2950_v44 = vsub.f32 2.0, %v2946_v41 }
0x2c5d   : > { %v3732_v43 = vpop.eup %3731  ;;  %v2948_v45 = vsub.f32 2.0, %v2944_v42 }
0x2c5e   : > { %v3734_v46 = vpop.eup %3733  ;;  %v2947_v47 = vmul.f32 %v3732_v43, %v2939_v36  ;;  %v2954_v51 = vmul.f32 %v3728_v39, %v2950_v44 }
0x2c5f   : > { %v2952_v48 = vmul.f32 %v3730_v40, %v2948_v45  ;;  %v2945_v49 = vmul.f32 %v3734_v46, %v2937_v37 }
0x2c60   : > { %v2951_v50 = vsub.f32 2.0, %v2947_v47  ;;  %v2958_v8 = vmul.f32 0.03125, %v2954_v51  }
0x2c61   : > { %v2949_v52 = vsub.f32 2.0, %v2945_v49  ;;  %v2956_v4 = vmul.f32 0.03125, %v2952_v48  }
0x2c62   : > { %v2955_v53 = vmul.f32 %v3732_v43, %v2951_v50  ;;  %v2962_v57 = vmul.f32 %v3945_v21, %v2958_v8 }
0x2c63   : > { %v2953_v54 = vmul.f32 %v3734_v46, %v2949_v52  ;;  %v2960_v55 = vmul.f32 %v3937_v16, %v2956_v4 }
0x2c64   : > { %v2959_v11 = vmul.f32 0.03125, %v2955_v53  }
0x2c65   : > { %v2957_v9 = vmul.f32 0.03125, %v2953_v54  }
0x2c66   : > { %v2963_v59 = vmul.f32 %v3942_v19, %v2959_v11 }
0x2c67   : > { %v2961_v56 = vmul.f32 %v3939_v17, %v2957_v9 }
0x2c69   : > { %v2964_v58 = vadd.f32 %v2961_v56, %v2960_v55 }
0x2c6b   : > { %v2965_v60 = vadd.f32 %v2964_v58, %v2962_v57 }
0x2c6d   : > { %v2966_v61 = vadd.f32 %v2965_v60, %v2963_v59 }
0x2c6f   : > { %v2967_v62 = vrot.slane %v2966_v61, 4 }
0x2c71   : > { %v2968_v63 = vadd.f32 %v2967_v62, %v2966_v61 }
0x2c73   : > { %v2969_v3 = vrot.slane %v2968_v63, 2  ;;  %2911 = sbr.rel (!%p2908_p0) target bundleno = 11176 (0x2ba8), region = 54 }
0x2c75   : > { %v2970_v5 = vadd.f32 %v2969_v3, %v2968_v63 }
0x2c77   : > { %v2971_v7 = vrot.slane %v2970_v5, 1 }
0x2c79   : > { %v2972_v40 = vadd.f32 %v2971_v7, %v2970_v5  }
0x2c7a PF:  { %v2973_v10 = vmul.f32 %v3897_v4, %v3937_v16  ;;  %v2974_v12 = vmul.f32 %v3893_v9, %v3939_v17  ;;  %v2975_v13 = vmul.f32 %v3889_v8, %v3945_v21  ;;  %v2976_v14 = vmul.f32 %v3885_v11, %v3942_v19  ;;  %s3757_s27 = scalar_lea.hbm %s4494_s1, 16  ;;  %v3897_v4 = vphi %v3869_v4, %v2956_v4   ;;  %v3893_v9 = vphi %v3865_v9, %v2957_v9   ;;  %v3889_v8 = vphi %v3861_v8, %v2958_v8   ;;  %v3885_v11 = vphi %v3857_v11, %v2959_v11   ;;  %v3881_v38 = vphi %v3853_v38, %v2923_v38  }
0x2c7b   :  { %v2977_v15 = vmul.f32 %v3881_v38, %v3925_v0  ;;  %v2978_v18 = vmul.f32 %v3881_v38, %v3927_v1  ;;  %v2979_v20 = vmul.f32 %v3881_v38, %v3934_v6  ;;  %v2980_v22 = vmul.f32 %v3881_v38, %v3929_v2  ;;  %p3758_p1 = scmp.ne.s32.totalorder %s4494_s1, %s3757_s27  ;;  %p3761_p2 = scmp.lt.u32.totalorder %s3757_s27, %s4494_s1 }
0x2c7d   :  { %v2981_v23 = vmul.f32 %v2977_v15, %v2973_v10  ;;  %v2982_v24 = vmul.f32 %v2978_v18, %v2974_v12  ;;  %v2983_v25 = vmul.f32 %v2979_v20, %v2975_v13  ;;  %v2984_v26 = vmul.f32 %v2980_v22, %v2976_v14  ;;  %p3763_p3 = pnand %p3761_p2, %p3758_p1 }
0x2c7f   :  { %v2985_v27 = vadd.f32 %v2982_v24, %v2981_v23 }
0x2c81   :  { %v2986_v16 = vadd.f32 %v2985_v27, %v2983_v25 }
0x2c83   :  { %v2987_v28 = vadd.f32 %v2986_v16, %v2984_v26 }
0x2c85   :  { %2988 = vadd.xlane.f32.xlu0 %v2987_v28 }
0x2d12   :  { %v2989_v17 = vpop.xlane.xlu0 %2988 }
0x2d13   :  { %v2990_v21 = vrot.slane %v2989_v17, 4 }
0x2d15   :  { %v2991_v29 = vadd.f32 %v2990_v21, %v2989_v17 }
0x2d17   :  { %v2992_v19 = vrot.slane %v2991_v29, 2 }
0x2d19   :  { %v2993_v30 = vadd.f32 %v2992_v19, %v2991_v29 }
0x2d1b   :  { %v2994_v0 = vrot.slane %v2993_v30, 1 }
0x2d1d   :  { %v2995_v4 = vadd.f32 %v2994_v0, %v2993_v30 }
0x2d1f   :  { %3073 = vpush %v2995_v4 }
0x2d50   :  { %s3074_s23 = spop %3073 }
0x2d51   :  { %s2997_s24 = smul.f32 250.0, %s3074_s23 }
0x2d53   :  { %2999 = sst [smem:[#allocation5]] %s2997_s24 }
0x2d54   :  { %3766 = shalt.err (!%p3763_p3)
}
0x2d55   :  { %s3902_s3 = smov [#allocation5]  }
0x2d56   :  { %3007 = dma.smem_to_hbm %s3902_s3, 16, %s4494_s1, [#allocation4]  }
0x2d57   :  { %3833 = dma.done.wait [#allocation4], 16  }
0x2d58   :  { %3834 = vsyncadd [#allocation4], 4294967280 }
0x2d59   :  { %3011 = sfence }
0x2d5a   :  { %3012 = vsyncpa [#allocation3], 1 }
0x2d5b   :  { %3013 = vsyncpa [#allocation4], 1 }

</bundles_post_ra>
